<compile_context>
chip_gen: v5e
topology: v5e:2x2
jax: 0.10.0
libtpu: 0.0.40
codegen_flags: <defaults>
</compile_context>

<pallas_src>
import jax
import jax.numpy as jnp
from jax.experimental import pallas as pl
from jax.experimental.pallas import tpu as pltpu

LN_EPS = 1e-5  # PyTorch nn.LayerNorm default


# --------------------------------------------------------------------------- tiling helpers
def _pad_to(n, m):
    return ((n + m - 1) // m) * m


def _vmem_estimate(ti, W, C, itemsize=4):
    """Approx. VMEM bytes used by one grid step's pipelined blocks (2x buffered)."""
    tm = ti * W
    x_blk = _pad_to(tm, 8) * _pad_to(C, 128) * itemsize                # (tm, C)
    o_blk = ti * 2 * _pad_to(W, 8) * _pad_to(2 * C, 128) * itemsize    # (ti, 2, W, 2C)
    w_blk = 4 * _pad_to(C, 8) * _pad_to(C, 128) * itemsize             # (4, C, C)
    b_blk = 4 * 8 * _pad_to(C, 128) * itemsize                         # (4, 1, C)
    gb_blk = 2 * 8 * _pad_to(C, 128) * itemsize                        # gamma + beta
    return 2 * (x_blk + o_blk + w_blk + b_blk + gb_blk)


def _pick_row_tile(BH, W, C, max_rows=512, vmem_budget=40 << 20, itemsize=4):
    """Pick ti = rows of the (B*H, ...) view per grid step (tm = ti*W input pixels).

    Memory-bound kernel -> use the largest tile <= max_rows input pixels that fits
    the VMEM budget (amortizes the ~0.35us/step overhead).  Tiles are kept
    sublane-aligned (tm % 8 == 0) unless one tile covers the whole array.  When
    the single-tile choice leaves the grid at 1, prefer a >=2-step grid if the
    tile stays >= 256 pixel rows (megacore / pipelining).
    """
    divisors = [d for d in range(1, BH + 1) if BH % d == 0]

    def shape_ok(d):
        return d == BH or (d * W) % 8 == 0

    feas = [d for d in divisors
            if shape_ok(d) and d * W <= max_rows
            and _vmem_estimate(d, W, C, itemsize) <= vmem_budget]
    if not feas:
        legal = [d for d in divisors if shape_ok(d)]
        return legal[0] if legal else BH
    best = feas[-1]
    if BH // best == 1:
        for d in reversed(feas):
            if BH // d >= 2 and d * W >= 256:
                best = d
                break
    return best


# --------------------------------------------------------------------------- kernel
def _patch_split_kernel(x_ref, w_ref, b_ref, g_ref, beta_ref, o_ref):
    """One row tile.

    x_ref    : (tm, C)          input pixels, tm = ti*W, rows ordered (b*H + i, j)
    w_ref    : (4, C, C)        chunk-major Linear weight
    b_ref    : (4, 1, C)        chunk-major Linear bias
    g_ref    : (1, C)           LayerNorm gamma
    beta_ref : (1, C)           LayerNorm beta
    o_ref    : (ti, 2, W, 2C)   interleaved tile:
                                o[t, di, j, dj*C + c] == out[b, 2i+di, 2j+dj, c]
    """
    ti, _, W, _ = o_ref.shape
    tm, C = x_ref.shape

    x = x_ref[...]
    # Hoist the (1, C) -> (tm, C) broadcasts out of the unrolled chunk loop
    # (JAX does not CSE broadcast_in_dim).
    gamma = jnp.broadcast_to(g_ref[...].astype(jnp.float32), (tm, C))
    beta = jnp.broadcast_to(beta_ref[...].astype(jnp.float32), (tm, C))

    # Chunk k of the Linear output lands at pixel offset (di, dj) = (k % 2, k // 2).
    # LayerNorm is per output pixel over C, so normalizing each chunk before the
    # interleave is exact.  Rows for a fixed di are assembled in registers and
    # written with ONE full-width (2C) store -> no masked partial lane stores.
    for di in range(2):                       # static unroll
        halves = []
        for dj in range(2):                   # static unroll
            k = dj * 2 + di
            y = jnp.dot(x, w_ref[k], preferred_element_type=jnp.float32)
            y = y + b_ref[k].astype(jnp.float32)
            mean = jnp.mean(y, axis=-1, keepdims=True)
            var = jnp.mean(jnp.square(y - mean), axis=-1, keepdims=True)
            n = (y - mean) * jax.lax.rsqrt(var + LN_EPS)
            halves.append(n * gamma + beta)
        row = jnp.concatenate(halves, axis=-1)                 # (tm, 2C)
        o_ref[:, di:di + 1, :, :] = (
            row.reshape(ti, 1, W, 2 * C).astype(o_ref.dtype))  # leading-dim split only


def _build_call(BH, W, C, ti, out_dtype, vmem_limit_bytes):
    tm = ti * W
    grid_spec = pltpu.PrefetchScalarGridSpec(
        num_scalar_prefetch=0,
        grid=(BH // ti,),
        in_specs=[
            pl.BlockSpec((tm, C), lambda i: (i, 0)),            # activations
            pl.BlockSpec((4, C, C), lambda i: (0, 0, 0)),       # weight (resident)
            pl.BlockSpec((4, 1, C), lambda i: (0, 0, 0)),       # bias
            pl.BlockSpec((1, C), lambda i: (0, 0)),             # LN gamma
            pl.BlockSpec((1, C), lambda i: (0, 0)),             # LN beta
        ],
        out_specs=pl.BlockSpec((ti, 2, W, 2 * C), lambda i: (i, 0, 0, 0)),
    )
    return pl.pallas_call(
        _patch_split_kernel,
        out_shape=jax.ShapeDtypeStruct((BH, 2, W, 2 * C), out_dtype),
        grid_spec=grid_spec,
        compiler_params=pltpu.CompilerParams(
            dimension_semantics=("parallel",),
            vmem_limit_bytes=vmem_limit_bytes,
        ),
    )


# --------------------------------------------------------------------------- wrappers
def patch_splitting(x, w, b, gamma, beta, *, out_dtype=None, max_rows=512):
    """x: (B, H, W, C) -> (B, 2H, 2W, C).  Fused Linear(C->4C) + interleave + LayerNorm(C).

    `w` is the (in, out) = (C, 4C) matrix, i.e. PyTorch's `linear.weight.T`.
    Pass bf16 x/w/b/gamma/beta and out_dtype=jnp.bfloat16 to halve HBM traffic;
    the matmul accumulates in f32 and LayerNorm math stays f32.
    """
    B, H, W, C = x.shape
    assert w.shape == (C, 4 * C) and b.shape == (4 * C,)
    assert gamma.shape == (C,) and beta.shape == (C,)
    out_dtype = jnp.dtype(out_dtype) if out_dtype is not None else jnp.dtype(x.dtype)
    itemsize = jnp.dtype(x.dtype).itemsize

    BH = B * H
    x2 = x.reshape(BH * W, C)                           # free view, rows ordered (b, i, j)
    w4 = jnp.transpose(w.reshape(C, 4, C), (1, 0, 2))   # (4, C, C) chunk-major (tiny, one-time)
    b4 = b.reshape(4, 1, C)
    g2 = gamma.reshape(1, C)
    bt2 = beta.reshape(1, C)

    ti = _pick_row_tile(BH, W, C, max_rows=max_rows, itemsize=itemsize)
    est = _vmem_estimate(ti, W, C, itemsize)
    # Explicit scoped-VMEM budget: at least the 32 MiB default, but stay well
    # inside v7x's 64 MiB physical VMEM.
    vmem_limit_bytes = int(min(48 << 20, max(32 << 20, 2 * est)))

    out5 = _build_call(BH, W, C, ti, out_dtype, vmem_limit_bytes)(x2, w4, b4, g2, bt2)

    # (BH, 2, W, 2C) -> (B, 2H, 2W, C) is a contiguous (free) reshape:
    #   out5[b*H + i, di, j, dj*C + c] == out[b, 2i + di, 2j + dj, c]
    return out5.reshape(B, 2 * H, 2 * W, C)


def swin_decoder_block(x_nchw, w, b, gamma, beta):
    """SwinDecoderBlock.forward minus the SwinTransformerBlock stack.

    Matches: x.permute(0,2,3,1) -> [transform] -> PatchSplitting -> permute(0,3,1,2)
    """
    # TODO(synk): the SwinTransformerBlock stack (`self.transform`) is not defined in the
    # provided spec; only the PatchSplitting (`self.enlarge`) stage is implemented in Pallas.
    x = jnp.transpose(x_nchw, (0, 2, 3, 1))        # NCHW -> NHWC
    y = patch_splitting(x, w, b, gamma, beta)      # (B, 2H, 2W, C)
    return jnp.transpose(y, (0, 3, 1, 2))          # NHWC -> NCHW


# --------------------------------------------------------------------------- reference
def _reference_nhwc(x, w, b, gamma, beta):
    B, H, W, C = x.shape
    y = x @ w + b
    chunks = [y[..., k * C:(k + 1) * C] for k in range(4)]
    out = jnp.zeros((B, 2 * H, 2 * W, C), jnp.float32)
    out = out.at[:, 0::2, 0::2, :].set(chunks[0])
    out = out.at[:, 1::2, 0::2, :].set(chunks[1])
    out = out.at[:, 0::2, 1::2, :].set(chunks[2])
    out = out.at[:, 1::2, 1::2, :].set(chunks[3])
    mean = jnp.mean(out, axis=-1, keepdims=True)
    var = jnp.mean((out - mean) ** 2, axis=-1, keepdims=True)
    return (out - mean) * jax.lax.rsqrt(var + LN_EPS) * gamma + beta


def _reference_decoder(x_nchw, w, b, gamma, beta):
    x = jnp.transpose(x_nchw, (0, 2, 3, 1))
    y = _reference_nhwc(x, w, b, gamma, beta)
    return jnp.transpose(y, (0, 3, 1, 2))


if __name__ == "__main__":
    key = jax.random.PRNGKey(0)
    B, C, H, W = 2, 32, 16, 16        # dim = 32, NCHW like SwinDecoderBlock input

    k_x, k_w, k_b, k_g, k_bt = jax.random.split(key, 5)
    x = jax.random.normal(k_x, (B, C, H, W), jnp.float32)
    # Deterministic synthetic parameters (not a checkpoint load).
    w = jax.random.normal(k_w, (C, 4 * C), jnp.float32) * (1.0 / jnp.sqrt(C))
    b = jax.random.normal(k_b, (4 * C,), jnp.float32) * 0.01
    gamma = 1.0 + 0.1 * jax.random.normal(k_g, (C,), jnp.float32)
    beta = 0.01 * jax.random.normal(k_bt, (C,), jnp.float32)

    out = jax.block_until_ready(swin_decoder_block(x, w, b, gamma, beta))
    ref = jax.block_until_ready(_reference_decoder(x, w, b, gamma, beta))

    assert out.shape == (B, C, 2 * H, 2 * W), out.shape
    max_err = float(jnp.max(jnp.abs(out - ref)))
    assert jnp.allclose(out, ref, atol=2e-4, rtol=2e-4), f"mismatch vs reference: {max_err}"
    print("KERNEL_OK")
</pallas_src>

<mosaic_0001>
module attributes {stable_mosaic.version = 11 : i64} {
  func.func @_patch_split_kernel(%arg0: i32, %arg1: memref<256x32xf32, #tpu.memory_space<vmem>>, %arg2: memref<4x32x32xf32, #tpu.memory_space<vmem>>, %arg3: memref<4x1x32xf32, #tpu.memory_space<vmem>>, %arg4: memref<1x32xf32, #tpu.memory_space<vmem>>, %arg5: memref<1x32xf32, #tpu.memory_space<vmem>>, %arg6: memref<16x2x16x64xf32, #tpu.memory_space<vmem>>) attributes {dimension_semantics = [#tpu.dimension_semantics<parallel>], iteration_bounds = array<i64: 2>, scalar_prefetch = 0 : i64, scratch_operands = 0 : i64, tpu.core_type = #tpu.core_type<tc>, window_params = [{transform_indices = @transform_0, window_bounds = array<i64: 256, 32>}, {pipeline_mode = #tpu.pipeline_mode<synchronous>, transform_indices = @transform_1, window_bounds = array<i64: 4, 32, 32>}, {pipeline_mode = #tpu.pipeline_mode<synchronous>, transform_indices = @transform_2, window_bounds = array<i64: 4, 1, 32>}, {pipeline_mode = #tpu.pipeline_mode<synchronous>, transform_indices = @transform_3, window_bounds = array<i64: 1, 32>}, {pipeline_mode = #tpu.pipeline_mode<synchronous>, transform_indices = @transform_4, window_bounds = array<i64: 1, 32>}, {transform_indices = @transform_5, window_bounds = array<i64: 16, 2, 16, 64>}]} {
    %c0 = arith.constant 0 : index
    %c0_0 = arith.constant 0 : index
    %0 = vector.load %arg1[%c0, %c0_0] : memref<256x32xf32, #tpu.memory_space<vmem>>, vector<256x32xf32>
    %c0_1 = arith.constant 0 : index
    %c0_2 = arith.constant 0 : index
    %1 = vector.load %arg4[%c0_1, %c0_2] : memref<1x32xf32, #tpu.memory_space<vmem>>, vector<1x32xf32>
    %2 = vector.shape_cast %1 : vector<1x32xf32> to vector<1x32xf32>
    %3 = vector.broadcast %2 : vector<1x32xf32> to vector<256x32xf32>
    %c0_3 = arith.constant 0 : index
    %c0_4 = arith.constant 0 : index
    %4 = vector.load %arg5[%c0_3, %c0_4] : memref<1x32xf32, #tpu.memory_space<vmem>>, vector<1x32xf32>
    %5 = vector.shape_cast %4 : vector<1x32xf32> to vector<1x32xf32>
    %6 = vector.broadcast %5 : vector<1x32xf32> to vector<256x32xf32>
    %c0_5 = arith.constant 0 : index
    %c0_6 = arith.constant 0 : index
    %c0_7 = arith.constant 0 : index
    %7 = vector.load %arg2[%c0_5, %c0_6, %c0_7] : memref<4x32x32xf32, #tpu.memory_space<vmem>>, vector<1x32x32xf32>
    %8 = vector.shape_cast %7 : vector<1x32x32xf32> to vector<32x32xf32>
    %cst = arith.constant dense<0.000000e+00> : vector<256x32xf32>
    %9 = tpu.matmul %0, %8, %cst {dimension_numbers = #tpu.dot_dimension_numbers<[1], [0], [0], [1], [0, 0, 1, 1], [], []>} : vector<256x32xf32>, vector<32x32xf32>, vector<256x32xf32> -> vector<256x32xf32>
    %c0_8 = arith.constant 0 : index
    %c0_9 = arith.constant 0 : index
    %c0_10 = arith.constant 0 : index
    %10 = vector.load %arg3[%c0_8, %c0_9, %c0_10] : memref<4x1x32xf32, #tpu.memory_space<vmem>>, vector<1x1x32xf32>
    %11 = vector.shape_cast %10 : vector<1x1x32xf32> to vector<1x32xf32>
    %12 = vector.broadcast %11 : vector<1x32xf32> to vector<256x32xf32>
    %13 = arith.addf %9, %12 : vector<256x32xf32>
    %cst_11 = arith.constant dense<0.000000e+00> : vector<256xf32>
    %14 = vector.multi_reduction <add>, %13, %cst_11 [1] : vector<256x32xf32> to vector<256xf32>
    %15 = vector.shape_cast %14 : vector<256xf32> to vector<256x1xf32>
    %cst_12 = arith.constant 3.200000e+01 : f32
    %16 = vector.broadcast %cst_12 : f32 to vector<256x1xf32>
    %17 = arith.divf %15, %16 : vector<256x1xf32>
    %18 = vector.broadcast %17 : vector<256x1xf32> to vector<256x32xf32>
    %19 = arith.subf %13, %18 : vector<256x32xf32>
    %20 = arith.mulf %19, %19 : vector<256x32xf32>
    %cst_13 = arith.constant dense<0.000000e+00> : vector<256xf32>
    %21 = vector.multi_reduction <add>, %20, %cst_13 [1] : vector<256x32xf32> to vector<256xf32>
    %22 = vector.shape_cast %21 : vector<256xf32> to vector<256x1xf32>
    %cst_14 = arith.constant 3.200000e+01 : f32
    %23 = vector.broadcast %cst_14 : f32 to vector<256x1xf32>
    %24 = arith.divf %22, %23 : vector<256x1xf32>
    %25 = vector.broadcast %17 : vector<256x1xf32> to vector<256x32xf32>
    %26 = arith.subf %13, %25 : vector<256x32xf32>
    %cst_15 = arith.constant 9.99999974E-6 : f32
    %27 = vector.broadcast %cst_15 : f32 to vector<256x1xf32>
    %28 = arith.addf %24, %27 : vector<256x1xf32>
    %29 = math.rsqrt %28 : vector<256x1xf32>
    %30 = vector.broadcast %29 : vector<256x1xf32> to vector<256x32xf32>
    %31 = arith.mulf %26, %30 : vector<256x32xf32>
    %32 = arith.mulf %31, %3 : vector<256x32xf32>
    %33 = arith.addf %32, %6 : vector<256x32xf32>
    %c2 = arith.constant 2 : index
    %c0_16 = arith.constant 0 : index
    %c0_17 = arith.constant 0 : index
    %34 = vector.load %arg2[%c2, %c0_16, %c0_17] : memref<4x32x32xf32, #tpu.memory_space<vmem>>, vector<1x32x32xf32>
    %35 = vector.shape_cast %34 : vector<1x32x32xf32> to vector<32x32xf32>
    %cst_18 = arith.constant dense<0.000000e+00> : vector<256x32xf32>
    %36 = tpu.matmul %0, %35, %cst_18 {dimension_numbers = #tpu.dot_dimension_numbers<[1], [0], [0], [1], [0, 0, 1, 1], [], []>} : vector<256x32xf32>, vector<32x32xf32>, vector<256x32xf32> -> vector<256x32xf32>
    %c2_19 = arith.constant 2 : index
    %c0_20 = arith.constant 0 : index
    %c0_21 = arith.constant 0 : index
    %37 = vector.load %arg3[%c2_19, %c0_20, %c0_21] : memref<4x1x32xf32, #tpu.memory_space<vmem>>, vector<1x1x32xf32>
    %38 = vector.shape_cast %37 : vector<1x1x32xf32> to vector<1x32xf32>
    %39 = vector.broadcast %38 : vector<1x32xf32> to vector<256x32xf32>
    %40 = arith.addf %36, %39 : vector<256x32xf32>
    %cst_22 = arith.constant dense<0.000000e+00> : vector<256xf32>
    %41 = vector.multi_reduction <add>, %40, %cst_22 [1] : vector<256x32xf32> to vector<256xf32>
    %42 = vector.shape_cast %41 : vector<256xf32> to vector<256x1xf32>
    %cst_23 = arith.constant 3.200000e+01 : f32
    %43 = vector.broadcast %cst_23 : f32 to vector<256x1xf32>
    %44 = arith.divf %42, %43 : vector<256x1xf32>
    %45 = vector.broadcast %44 : vector<256x1xf32> to vector<256x32xf32>
    %46 = arith.subf %40, %45 : vector<256x32xf32>
    %47 = arith.mulf %46, %46 : vector<256x32xf32>
    %cst_24 = arith.constant dense<0.000000e+00> : vector<256xf32>
    %48 = vector.multi_reduction <add>, %47, %cst_24 [1] : vector<256x32xf32> to vector<256xf32>
    %49 = vector.shape_cast %48 : vector<256xf32> to vector<256x1xf32>
    %cst_25 = arith.constant 3.200000e+01 : f32
    %50 = vector.broadcast %cst_25 : f32 to vector<256x1xf32>
    %51 = arith.divf %49, %50 : vector<256x1xf32>
    %52 = vector.broadcast %44 : vector<256x1xf32> to vector<256x32xf32>
    %53 = arith.subf %40, %52 : vector<256x32xf32>
    %cst_26 = arith.constant 9.99999974E-6 : f32
    %54 = vector.broadcast %cst_26 : f32 to vector<256x1xf32>
    %55 = arith.addf %51, %54 : vector<256x1xf32>
    %56 = math.rsqrt %55 : vector<256x1xf32>
    %57 = vector.broadcast %56 : vector<256x1xf32> to vector<256x32xf32>
    %58 = arith.mulf %53, %57 : vector<256x32xf32>
    %59 = arith.mulf %58, %3 : vector<256x32xf32>
    %60 = arith.addf %59, %6 : vector<256x32xf32>
    %61 = tpu.concatenate %33, %60 in 1 : vector<256x32xf32>, vector<256x32xf32> -> vector<256x64xf32>
    %62 = vector.shape_cast %61 : vector<256x64xf32> to vector<16x1x16x64xf32>
    %c0_27 = arith.constant 0 : index
    %c0_28 = arith.constant 0 : index
    %c0_29 = arith.constant 0 : index
    %c0_30 = arith.constant 0 : index
    %63 = vector.load %arg6[%c0_27, %c0_28, %c0_29, %c0_30] : memref<16x2x16x64xf32, #tpu.memory_space<vmem>>, vector<16x1x16x64xf32>
    tpu.vector_store %arg6[%c0_27, %c0_28, %c0_29, %c0_30], %62 {strides = array<i32>} : memref<16x2x16x64xf32, #tpu.memory_space<vmem>>, vector<16x1x16x64xf32>,
    %c1 = arith.constant 1 : index
    %c0_31 = arith.constant 0 : index
    %c0_32 = arith.constant 0 : index
    %64 = vector.load %arg2[%c1, %c0_31, %c0_32] : memref<4x32x32xf32, #tpu.memory_space<vmem>>, vector<1x32x32xf32>
    %65 = vector.shape_cast %64 : vector<1x32x32xf32> to vector<32x32xf32>
    %cst_33 = arith.constant dense<0.000000e+00> : vector<256x32xf32>
    %66 = tpu.matmul %0, %65, %cst_33 {dimension_numbers = #tpu.dot_dimension_numbers<[1], [0], [0], [1], [0, 0, 1, 1], [], []>} : vector<256x32xf32>, vector<32x32xf32>, vector<256x32xf32> -> vector<256x32xf32>
    %c1_34 = arith.constant 1 : index
    %c0_35 = arith.constant 0 : index
    %c0_36 = arith.constant 0 : index
    %67 = vector.load %arg3[%c1_34, %c0_35, %c0_36] : memref<4x1x32xf32, #tpu.memory_space<vmem>>, vector<1x1x32xf32>
    %68 = vector.shape_cast %67 : vector<1x1x32xf32> to vector<1x32xf32>
    %69 = vector.broadcast %68 : vector<1x32xf32> to vector<256x32xf32>
    %70 = arith.addf %66, %69 : vector<256x32xf32>
    %cst_37 = arith.constant dense<0.000000e+00> : vector<256xf32>
    %71 = vector.multi_reduction <add>, %70, %cst_37 [1] : vector<256x32xf32> to vector<256xf32>
    %72 = vector.shape_cast %71 : vector<256xf32> to vector<256x1xf32>
    %cst_38 = arith.constant 3.200000e+01 : f32
    %73 = vector.broadcast %cst_38 : f32 to vector<256x1xf32>
    %74 = arith.divf %72, %73 : vector<256x1xf32>
    %75 = vector.broadcast %74 : vector<256x1xf32> to vector<256x32xf32>
    %76 = arith.subf %70, %75 : vector<256x32xf32>
    %77 = arith.mulf %76, %76 : vector<256x32xf32>
    %cst_39 = arith.constant dense<0.000000e+00> : vector<256xf32>
    %78 = vector.multi_reduction <add>, %77, %cst_39 [1] : vector<256x32xf32> to vector<256xf32>
    %79 = vector.shape_cast %78 : vector<256xf32> to vector<256x1xf32>
    %cst_40 = arith.constant 3.200000e+01 : f32
    %80 = vector.broadcast %cst_40 : f32 to vector<256x1xf32>
    %81 = arith.divf %79, %80 : vector<256x1xf32>
    %82 = vector.broadcast %74 : vector<256x1xf32> to vector<256x32xf32>
    %83 = arith.subf %70, %82 : vector<256x32xf32>
    %cst_41 = arith.constant 9.99999974E-6 : f32
    %84 = vector.broadcast %cst_41 : f32 to vector<256x1xf32>
    %85 = arith.addf %81, %84 : vector<256x1xf32>
    %86 = math.rsqrt %85 : vector<256x1xf32>
    %87 = vector.broadcast %86 : vector<256x1xf32> to vector<256x32xf32>
    %88 = arith.mulf %83, %87 : vector<256x32xf32>
    %89 = arith.mulf %88, %3 : vector<256x32xf32>
    %90 = arith.addf %89, %6 : vector<256x32xf32>
    %c3 = arith.constant 3 : index
    %c0_42 = arith.constant 0 : index
    %c0_43 = arith.constant 0 : index
    %91 = vector.load %arg2[%c3, %c0_42, %c0_43] : memref<4x32x32xf32, #tpu.memory_space<vmem>>, vector<1x32x32xf32>
    %92 = vector.shape_cast %91 : vector<1x32x32xf32> to vector<32x32xf32>
    %cst_44 = arith.constant dense<0.000000e+00> : vector<256x32xf32>
    %93 = tpu.matmul %0, %92, %cst_44 {dimension_numbers = #tpu.dot_dimension_numbers<[1], [0], [0], [1], [0, 0, 1, 1], [], []>} : vector<256x32xf32>, vector<32x32xf32>, vector<256x32xf32> -> vector<256x32xf32>
    %c3_45 = arith.constant 3 : index
    %c0_46 = arith.constant 0 : index
    %c0_47 = arith.constant 0 : index
    %94 = vector.load %arg3[%c3_45, %c0_46, %c0_47] : memref<4x1x32xf32, #tpu.memory_space<vmem>>, vector<1x1x32xf32>
    %95 = vector.shape_cast %94 : vector<1x1x32xf32> to vector<1x32xf32>
    %96 = vector.broadcast %95 : vector<1x32xf32> to vector<256x32xf32>
    %97 = arith.addf %93, %96 : vector<256x32xf32>
    %cst_48 = arith.constant dense<0.000000e+00> : vector<256xf32>
    %98 = vector.multi_reduction <add>, %97, %cst_48 [1] : vector<256x32xf32> to vector<256xf32>
    %99 = vector.shape_cast %98 : vector<256xf32> to vector<256x1xf32>
    %cst_49 = arith.constant 3.200000e+01 : f32
    %100 = vector.broadcast %cst_49 : f32 to vector<256x1xf32>
    %101 = arith.divf %99, %100 : vector<256x1xf32>
    %102 = vector.broadcast %101 : vector<256x1xf32> to vector<256x32xf32>
    %103 = arith.subf %97, %102 : vector<256x32xf32>
    %104 = arith.mulf %103, %103 : vector<256x32xf32>
    %cst_50 = arith.constant dense<0.000000e+00> : vector<256xf32>
    %105 = vector.multi_reduction <add>, %104, %cst_50 [1] : vector<256x32xf32> to vector<256xf32>
    %106 = vector.shape_cast %105 : vector<256xf32> to vector<256x1xf32>
    %cst_51 = arith.constant 3.200000e+01 : f32
    %107 = vector.broadcast %cst_51 : f32 to vector<256x1xf32>
    %108 = arith.divf %106, %107 : vector<256x1xf32>
    %109 = vector.broadcast %101 : vector<256x1xf32> to vector<256x32xf32>
    %110 = arith.subf %97, %109 : vector<256x32xf32>
    %cst_52 = arith.constant 9.99999974E-6 : f32
    %111 = vector.broadcast %cst_52 : f32 to vector<256x1xf32>
    %112 = arith.addf %108, %111 : vector<256x1xf32>
    %113 = math.rsqrt %112 : vector<256x1xf32>
    %114 = vector.broadcast %113 : vector<256x1xf32> to vector<256x32xf32>
    %115 = arith.mulf %110, %114 : vector<256x32xf32>
    %116 = arith.mulf %115, %3 : vector<256x32xf32>
    %117 = arith.addf %116, %6 : vector<256x32xf32>
    %118 = tpu.concatenate %90, %117 in 1 : vector<256x32xf32>, vector<256x32xf32> -> vector<256x64xf32>
    %119 = vector.shape_cast %118 : vector<256x64xf32> to vector<16x1x16x64xf32>
    %c0_53 = arith.constant 0 : index
    %c1_54 = arith.constant 1 : index
    %c0_55 = arith.constant 0 : index
    %c0_56 = arith.constant 0 : index
    %120 = vector.load %arg6[%c0_53, %c1_54, %c0_55, %c0_56] : memref<16x2x16x64xf32, #tpu.memory_space<vmem>>, vector<16x1x16x64xf32>
    tpu.vector_store %arg6[%c0_53, %c1_54, %c0_55, %c0_56], %119 {strides = array<i32>} : memref<16x2x16x64xf32, #tpu.memory_space<vmem>>, vector<16x1x16x64xf32>,
    return
  }
  func.func @transform_0(%arg0: i32) -> (i32, i32) {
    %c0_i32 = arith.constant 0 : i32
    %c0_i32_0 = arith.constant 0 : i32
    return %arg0, %c0_i32 : i32, i32
  }
  func.func @transform_1(%arg0: i32) -> (i32, i32, i32) {
    %c0_i32 = arith.constant 0 : i32
    %c0_i32_0 = arith.constant 0 : i32
    %c0_i32_1 = arith.constant 0 : i32
    %c0_i32_2 = arith.constant 0 : i32
    return %c0_i32, %c0_i32_0, %c0_i32_1 : i32, i32, i32
  }
  func.func @transform_2(%arg0: i32) -> (i32, i32, i32) {
    %c0_i32 = arith.constant 0 : i32
    %c0_i32_0 = arith.constant 0 : i32
    %c0_i32_1 = arith.constant 0 : i32
    %c0_i32_2 = arith.constant 0 : i32
    return %c0_i32, %c0_i32_0, %c0_i32_1 : i32, i32, i32
  }
  func.func @transform_3(%arg0: i32) -> (i32, i32) {
    %c0_i32 = arith.constant 0 : i32
    %c0_i32_0 = arith.constant 0 : i32
    %c0_i32_1 = arith.constant 0 : i32
    return %c0_i32, %c0_i32_0 : i32, i32
  }
  func.func @transform_4(%arg0: i32) -> (i32, i32) {
    %c0_i32 = arith.constant 0 : i32
    %c0_i32_0 = arith.constant 0 : i32
    %c0_i32_1 = arith.constant 0 : i32
    return %c0_i32, %c0_i32_0 : i32, i32
  }
  func.func @transform_5(%arg0: i32) -> (i32, i32, i32, i32) {
    %c0_i32 = arith.constant 0 : i32
    %c0_i32_0 = arith.constant 0 : i32
    %c0_i32_1 = arith.constant 0 : i32
    %c0_i32_2 = arith.constant 0 : i32
    return %arg0, %c0_i32, %c0_i32_0, %c0_i32_1 : i32, i32, i32, i32
  }
}

</mosaic_0001>

<bundles_post_ra>
// kernel: tpu_custom_call.1
= control target key start
LH: loop header
LB: loop body
LE: loop exit
PB: predicated region body
PF: predicated region fallthrough
CT: control target
= control target key end

     0   :  { %10 = vsyncpa [#allocation3], 0  ;;  %s9956_s0 = inlined_call_operand.vmem [shape: f32[512,32], index: 0, kind: input, shape index: {}]   ;;  %s9957_s1 = inlined_call_operand.vmem [shape: f32[4,32,32], index: 1, kind: input, shape index: {}]   ;;  %s9958_s2 = inlined_call_operand.vmem [shape: f32[4,1,32], index: 2, kind: input, shape index: {}]   ;;  %s9959_s3 = inlined_call_operand.vmem [shape: f32[1,32], index: 3, kind: input, shape index: {}]   ;;  %s9960_s4 = inlined_call_operand.vmem [shape: f32[1,32], index: 4, kind: input, shape index: {}]   ;;  %s9961_s5 = inlined_call_operand.hbm [shape: f32[32,2,16,64], index: 5, kind: output, shape index: {}]  }
   0x1   :  { %12 = vsyncpa [#allocation3 + $0x1], 0  ;;  %s5038_s18 = smov 0   ;;  %s5040_s19 = smov 0  }
   0x2   :  { %s5042_s20 = smov 0   ;;  %s5044_s21 = smov 0  }
   0x3 LB: > { %s5059_s22 = sadd.s32 4294967295, %s5002_s21   ;;  %s4397_s23 = sadd.s32 4294967294, %s5002_s21   ;;  %s5002_s21 = sphi %s5044_s21, %s10596_s21   ;;  %s4998_s20 = sphi %s5042_s20, %s10595_s20   ;;  %s4994_s19 = sphi %s5040_s19, %s10594_s19   ;;  %s4990_s18 = sphi %s5038_s18, %s10593_s18  }
   0x4   : > { %s5063_s24 = sadd.s32 1, %s5002_s21   ;;  %s135_s25 = sadd.s32 1, %s4998_s20 }
   0x5   : > { %s132_s26 = ssub.s32 %s5002_s21, %s5063_s24  ;;  %p145_p0 = scmp.ne.s32.totalorder %s4998_s20, %s4994_s19 }
   0x6   : > { %p133_p1 = scmp.eq.s32.totalorder %s132_s26, 0  ;;  %p146_p2 = scmp.eq.s32.totalorder %s5059_s22, 1 }
   0x7   : > { %p151_p3 = scmp.ne.s32.totalorder %s4994_s19, %s4990_s18  ;;  %p152_p4 = scmp.eq.s32.totalorder %s4397_s23, 1 }
   0x8   : > { %s5074_s27 = scalar_select %p133_p1, %s4998_s20, %s135_s25  }
   0x9   : > { %p5076_p5 = por %p146_p2, %p145_p0  ;;  %p5080_p6 = por %p152_p4, %p151_p3 }
   0xa   : > { %p4400_p7 = scmp.ge.s32.totalorder %s5002_s21, 1  ;;  %p191_p8 = scmp.lt.s32.totalorder %s5002_s21, 3 }
   0xc   : > { %p192_p9 = pnand %p4400_p7, %p191_p8 }
   0xe   : > { %195 = sbr.rel (%p192_p9) target bundleno = 1782 (0x6f6), region = 40 }
  0x13   : > { %v269_v0 = vld [vmem:[%s9957_s1 + $0x18] sm:$0xff]  ;;  %s4402_s11 = sshll.u32 %s5059_s22, 5  ;;  %v268_v3 = vld [vmem:[%s9957_s1 + $0x10] sm:$0xff]  ;;  %v267_v6 = vld [vmem:[%s9957_s1 + $0x8] sm:$0xff]  ;;  %vm274_vm0 = vcmask 261120   ;;  %s5005_s25 = smov 32  }
  0x14   : > { %v4439_v1 = vld [vmem:[%s9957_s1 + $0x58] sm:$0xff]  ;;  %383 = vmatpush.msra.mxu0 %v269_v0  ;;  %v4438_v4 = vld [vmem:[%s9957_s1 + $0x50] sm:$0xff]  ;;  %p220_p10 = scmp.lt.s32.totalorder %s4402_s11, 63  ;;  %v4437_v7 = vld [vmem:[%s9957_s1 + $0x48] sm:$0xff]  ;;  %s216_s26 = sand.u32 1, %s4994_s19  }
  0x15   : > { %v4476_v2 = vld [vmem:[%s9957_s1 + $0x38] sm:$0xff]  ;;  %1281 = vmatpush.msra.mxu1 %v4439_v1  ;;  %v4475_v5 = vld [vmem:[%s9957_s1 + $0x30] sm:$0xff]  ;;  %v4474_v8 = vld [vmem:[%s9957_s1 + $0x28] sm:$0xff]  ;;  %s4401_s30 = sshll.u32 %s216_s26, 9 }
  0x16   : > { %2365 = vmatpush.msra.mxu2 %v4476_v2  ;;  %384 = vmatpush.msra.mxu0 %v268_v3  ;;  %v266_v9 = vld [vmem:[%s9957_s1] sm:$0xff]  ;;  %s10598_s11 = smov (!%p220_p10, %s4402_s11), 63  ;;  %s6486_s6 = scalar_lea.vmem [#allocation2], %s4401_s30 }
  0x17   : > { %1282 = vmatpush.msra.mxu1 %v4438_v4  ;;  %v4436_v10 = vld [vmem:[%s9957_s1 + $0x40] sm:$0xff]  ;;  %s4403_s15 = sshll.u32 %s10598_s11, 3  ;;  %s4319_s11 = scalar_lea.sflag [#allocation3], %s216_s26 }
  0x18   : > { %2366 = vmatpush.msra.mxu2 %v4475_v5  ;;  %385 = vmatpush.msra.mxu0 %v267_v6  ;;  %v4473_v11 = vld [vmem:[%s9957_s1 + $0x20] sm:$0xff]  ;;  %s5126_s23 = scalar_lea.vmem %s9956_s0, %s4403_s15 }
  0x19   : > { %1283 = vmatpush.msra.mxu1 %v4437_v7  ;;  %v226_v12 = vld [vmem:[%s5126_s23] sm:$0xff]  ;;  %v227_v13 = vld [vmem:[%s5126_s23 + $0x8] sm:$0xff]  ;;  %v228_v14 = vld [vmem:[%s5126_s23 + $0x10] sm:$0xff] }
  0x1a   : > { %2367 = vmatpush.msra.mxu2 %v4474_v8  ;;  %386 = vmatpush.msra.mxu0 %v266_v9  ;;  %v229_v15 = vld [vmem:[%s5126_s23 + $0x18] sm:$0xff]  ;;  %v230_v16 = vld [vmem:[%s5126_s23 + $0x20] sm:$0xff]  ;;  %v231_v17 = vld [vmem:[%s5126_s23 + $0x28] sm:$0xff] }
  0x1b   : > { %1284 = vmatpush.msra.mxu1 %v4436_v10  ;;  %4404 = vmatmul.msk.f32.vlgmr.msra.gmra.mxu0 %vm274_vm0, %v226_v12  ;;  %v232_v18 = vld [vmem:[%s5126_s23 + $0x30] sm:$0xff]  ;;  %v233_v19 = vld [vmem:[%s5126_s23 + $0x38] sm:$0xff]  ;;  %v234_v20 = vld [vmem:[%s5126_s23 + $0x40] sm:$0xff] }
  0x1c   : > { %2368 = vmatpush.msra.mxu2 %v4473_v11  ;;  %4441 = vmatmul.msk.f32.vlgmr.msra.gmra.mxu1 %vm274_vm0, %v226_v12  ;;  %v235_v21 = vld [vmem:[%s5126_s23 + $0x48] sm:$0xff]  ;;  %v236_v22 = vld [vmem:[%s5126_s23 + $0x50] sm:$0xff]  ;;  %v237_v23 = vld [vmem:[%s5126_s23 + $0x58] sm:$0xff] }
  0x1d   : > { %4478 = vmatmul.msk.f32.vlgmr.msra.gmra.mxu2 %vm274_vm0, %v226_v12  ;;  %v238_v24 = vld [vmem:[%s5126_s23 + $0x60] sm:$0xff]  ;;  %v239_v25 = vld [vmem:[%s5126_s23 + $0x68] sm:$0xff]  ;;  %v240_v26 = vld [vmem:[%s5126_s23 + $0x70] sm:$0xff] }
  0x1e   : > { %v241_v27 = vld [vmem:[%s5126_s23 + $0x78] sm:$0xff]  ;;  %v5195_v28 = vld [vmem:[%s9958_s2] ss:$0 sm:$0xff]  ;;  %v5200_v29 = vld [vmem:[%s9958_s2 + $0x2] ss:$0 sm:$0xff] }
  0x1f   : > { %v242_v31 = vld [vmem:[%s5126_s23 + $0x80] sm:$0xff]  ;;  %v243_v43 = vld [vmem:[%s5126_s23 + $0x88] sm:$0xff]  ;;  %v244_v52 = vld [vmem:[%s5126_s23 + $0x90] sm:$0xff] }
  0x20   : > { %v5217_v37 = vld [vmem:[%s9958_s2 + $0x1] ss:$0 sm:$0xff]  ;;  %v245_v62 = vld [vmem:[%s5126_s23 + $0x98] sm:$0xff] }
  0x21   : > { %v246_v7 = vld [vmem:[%s5126_s23 + $0xa0] sm:$0xff] }
  0x23   : > { %4405 = vmatmul.msk.f32.gmra.mxu0 %vm274_vm0, %v227_v13 }
  0x24   : > { %4442 = vmatmul.msk.f32.gmra.mxu1 %vm274_vm0, %v227_v13 }
  0x25   : > { %4479 = vmatmul.msk.f32.gmra.mxu2 %vm274_vm0, %v227_v13 }
  0x2b   : > { %4406 = vmatmul.msk.f32.gmra.mxu0 %vm274_vm0, %v228_v14 }
  0x2c   : > { %4443 = vmatmul.msk.f32.gmra.mxu1 %vm274_vm0, %v228_v14 }
  0x2d   : > { %4480 = vmatmul.msk.f32.gmra.mxu2 %vm274_vm0, %v228_v14 }
  0x33   : > { %4407 = vmatmul.msk.f32.gmra.mxu0 %vm274_vm0, %v229_v15 }
  0x34   : > { %4444 = vmatmul.msk.f32.gmra.mxu1 %vm274_vm0, %v229_v15 }
  0x35   : > { %4481 = vmatmul.msk.f32.gmra.mxu2 %vm274_vm0, %v229_v15 }
  0x3b   : > { %4408 = vmatmul.msk.f32.gmra.mxu0 %vm274_vm0, %v230_v16 }
  0x3c   : > { %4445 = vmatmul.msk.f32.gmra.mxu1 %vm274_vm0, %v230_v16 }
  0x3d   : > { %4482 = vmatmul.msk.f32.gmra.mxu2 %vm274_vm0, %v230_v16 }
  0x43   : > { %4409 = vmatmul.msk.f32.gmra.mxu0 %vm274_vm0, %v231_v17 }
  0x44   : > { %4446 = vmatmul.msk.f32.gmra.mxu1 %vm274_vm0, %v231_v17 }
  0x45   : > { %4483 = vmatmul.msk.f32.gmra.mxu2 %vm274_vm0, %v231_v17 }
  0x4b   : > { %4410 = vmatmul.msk.f32.gmra.mxu0 %vm274_vm0, %v232_v18 }
  0x4c   : > { %4447 = vmatmul.msk.f32.gmra.mxu1 %vm274_vm0, %v232_v18 }
  0x4d   : > { %4484 = vmatmul.msk.f32.gmra.mxu2 %vm274_vm0, %v232_v18 }
  0x53   : > { %4411 = vmatmul.msk.f32.gmra.mxu0 %vm274_vm0, %v233_v19 }
  0x54   : > { %4448 = vmatmul.msk.f32.gmra.mxu1 %vm274_vm0, %v233_v19 }
  0x55   : > { %4485 = vmatmul.msk.f32.gmra.mxu2 %vm274_vm0, %v233_v19 }
  0x5b   : > { %4412 = vmatmul.msk.f32.gmra.mxu0 %vm274_vm0, %v234_v20 }
  0x5c   : > { %4449 = vmatmul.msk.f32.gmra.mxu1 %vm274_vm0, %v234_v20 }
  0x5d   : > { %4486 = vmatmul.msk.f32.gmra.mxu2 %vm274_vm0, %v234_v20 }
  0x63   : > { %4413 = vmatmul.msk.f32.gmra.mxu0 %vm274_vm0, %v235_v21 }
  0x64   : > { %4450 = vmatmul.msk.f32.gmra.mxu1 %vm274_vm0, %v235_v21 }
  0x65   : > { %4487 = vmatmul.msk.f32.gmra.mxu2 %vm274_vm0, %v235_v21 }
  0x6b   : > { %4414 = vmatmul.msk.f32.gmra.mxu0 %vm274_vm0, %v236_v22 }
  0x6c   : > { %4451 = vmatmul.msk.f32.gmra.mxu1 %vm274_vm0, %v236_v22 }
  0x6d   : > { %4488 = vmatmul.msk.f32.gmra.mxu2 %vm274_vm0, %v236_v22 }
  0x73   : > { %4415 = vmatmul.msk.f32.gmra.mxu0 %vm274_vm0, %v237_v23 }
  0x74   : > { %4452 = vmatmul.msk.f32.gmra.mxu1 %vm274_vm0, %v237_v23 }
  0x75   : > { %4489 = vmatmul.msk.f32.gmra.mxu2 %vm274_vm0, %v237_v23 }
  0x7b   : > { %4416 = vmatmul.msk.f32.gmra.mxu0 %vm274_vm0, %v238_v24 }
  0x7c   : > { %4453 = vmatmul.msk.f32.gmra.mxu1 %vm274_vm0, %v238_v24 }
  0x7d   : > { %4490 = vmatmul.msk.f32.gmra.mxu2 %vm274_vm0, %v238_v24 }
  0x83   : > { %4417 = vmatmul.msk.f32.gmra.mxu0 %vm274_vm0, %v239_v25 }
  0x84   : > { %4454 = vmatmul.msk.f32.gmra.mxu1 %vm274_vm0, %v239_v25 }
  0x85   : > { %4491 = vmatmul.msk.f32.gmra.mxu2 %vm274_vm0, %v239_v25  ;;  %v247_v25 = vld [vmem:[%s5126_s23 + $0xa8] sm:$0xff] }
  0x8b   : > { %4418 = vmatmul.msk.f32.gmra.mxu0 %vm274_vm0, %v240_v26 }
  0x8c   : > { %4455 = vmatmul.msk.f32.gmra.mxu1 %vm274_vm0, %v240_v26 }
  0x8d   : > { %4492 = vmatmul.msk.f32.gmra.mxu2 %vm274_vm0, %v240_v26 }
  0x93   : > { %4419 = vmatmul.msk.f32.gmra.mxu0 %vm274_vm0, %v241_v27 }
  0x94   : > { %4456 = vmatmul.msk.f32.gmra.mxu1 %vm274_vm0, %v241_v27 }
  0x95   : > { %4493 = vmatmul.msk.f32.gmra.mxu2 %vm274_vm0, %v241_v27 }
  0x98   : > { %v388_v30 = vpop.f32.mrf.mxu0 }
  0x99   : > { %v1286_v32 = vpop.f32.mrf.mxu1  ;;  %v5204_v33 = vadd.f32 %v5195_v28, %v388_v30 }
  0x9a   : > { %v5207_v34 = vadd.f32 %v5200_v29, %v1286_v32 }
  0x9b   : > { %v484_v35 = vsel %vm274_vm0, %v5204_v33, 0.0  ;;  %4420 = vmatmul.msk.f32.gmra.mxu0 %vm274_vm0, %v242_v31 }
  0x9c   : > { %v1382_v36 = vsel %vm274_vm0, %v5207_v34, 0.0  ;;  %485 = vadd.xlane.f32.xlu0 %v484_v35  ;;  %4457 = vmatmul.msk.f32.gmra.mxu1 %vm274_vm0, %v242_v31 }
  0x9d   : > { %1383 = vadd.xlane.f32.xlu1 %v1382_v36  ;;  %4494 = vmatmul.msk.f32.gmra.mxu2 %vm274_vm0, %v242_v31 }
  0xa0   : > { %v2370_v38 = vpop.f32.mrf.mxu2  ;;  %v391_v39 = vpop.f32.mrf.mxu0 }
  0xa1   : > { %v5222_v40 = vadd.f32 %v5217_v37, %v2370_v38  ;;  %v5225_v41 = vadd.f32 %v5195_v28, %v391_v39  ;;  %v1289_v42 = vpop.f32.mrf.mxu1 }
  0xa2   : > { %v5234_v46 = vadd.f32 %v5200_v29, %v1289_v42  ;;  %v248_v42 = vld [vmem:[%s5126_s23 + $0xb0] sm:$0xff] }
  0xa3   : > { %10096 = vst [vmem:[#allocation5_spill] sm:$0xff] %v5222_v40  ;;  %v2466_v44 = vsel %vm274_vm0, %v5222_v40, 0.0  ;;  %v487_v45 = vsel %vm274_vm0, %v5225_v41, 0.0  ;;  %4421 = vmatmul.msk.f32.gmra.mxu0 %vm274_vm0, %v243_v43 }
  0xa4   : > { %2467 = vadd.xlane.f32.xlu2 %v2466_v44  ;;  %488 = vadd.xlane.f32.xlu0 %v487_v45  ;;  %v1385_v49 = vsel %vm274_vm0, %v5234_v46, 0.0 }
  0xa5   : > { %4458 = vmatmul.msk.f32.gmra.mxu1 %vm274_vm0, %v243_v43  ;;  %4495 = vmatmul.msk.f32.gmra.mxu2 %vm274_vm0, %v243_v43 }
  0xa8   : > { %v2373_v47 = vpop.f32.mrf.mxu2  ;;  %v394_v50 = vpop.f32.mrf.mxu0 }
  0xa9   : > { %v5239_v48 = vadd.f32 %v5217_v37, %v2373_v47  ;;  %v1292_v51 = vpop.f32.mrf.mxu1  ;;  %v5252_v56 = vadd.f32 %v5195_v28, %v394_v50 }
  0xaa   : > { %v5245_v53 = vadd.f32 %v5200_v29, %v1292_v51 }
  0xab   : > { %10097 = vst [vmem:[#allocation6_spill] sm:$0xff] %v5239_v48  ;;  %v2469_v54 = vsel %vm274_vm0, %v5239_v48, 0.0  ;;  %4422 = vmatmul.msk.f32.gmra.mxu0 %vm274_vm0, %v244_v52  ;;  %v490_v59 = vsel %vm274_vm0, %v5252_v56, 0.0 }
  0xac   : > { %1386 = vadd.xlane.f32.xlu2 %v1385_v49  ;;  %2470 = vadd.xlane.f32.xlu1 %v2469_v54  ;;  %v1388_v55 = vsel %vm274_vm0, %v5245_v53, 0.0 }
  0xad   : > { %4459 = vmatmul.msk.f32.gmra.mxu1 %vm274_vm0, %v244_v52  ;;  %1389 = vadd.xlane.f32.xlu0 %v1388_v55 }
  0xae   : > { %4496 = vmatmul.msk.f32.gmra.mxu2 %vm274_vm0, %v244_v52 }
  0xb0   : > { %v2376_v57 = vpop.f32.mrf.mxu2  ;;  %v397_v60 = vpop.f32.mrf.mxu0 }
  0xb1   : > { %v5258_v58 = vadd.f32 %v5217_v37, %v2376_v57  ;;  %v1295_v61 = vpop.f32.mrf.mxu1  ;;  %v5266_v0 = vadd.f32 %v5195_v28, %v397_v60 }
  0xb2   : > { %v5280_v8 = vadd.f32 %v5200_v29, %v1295_v61 }
  0xb3   : > { %10098 = vst [vmem:[#allocation7_spill] sm:$0xff] %v5258_v58  ;;  %v2472_v63 = vsel %vm274_vm0, %v5258_v58, 0.0  ;;  %4423 = vmatmul.msk.f32.gmra.mxu0 %vm274_vm0, %v245_v62  ;;  %v493_v3 = vsel %vm274_vm0, %v5266_v0, 0.0 }
  0xb4   : > { %491 = vadd.xlane.f32.xlu1 %v490_v59  ;;  %v1391_v12 = vsel %vm274_vm0, %v5280_v8, 0.0 }
  0xb5   : > { %4460 = vmatmul.msk.f32.gmra.mxu1 %vm274_vm0, %v245_v62  ;;  %2473 = vadd.xlane.f32.xlu0 %v2472_v63 }
  0xb6   : > { %4497 = vmatmul.msk.f32.gmra.mxu2 %vm274_vm0, %v245_v62 }
  0xb8   : > { %v2379_v1 = vpop.f32.mrf.mxu2  ;;  %v400_v4 = vpop.f32.mrf.mxu0 }
  0xb9   : > { %v5272_v2 = vadd.f32 %v5217_v37, %v2379_v1  ;;  %v1298_v5 = vpop.f32.mrf.mxu1  ;;  %v5283_v9 = vadd.f32 %v5195_v28, %v400_v4 }
  0xba   : > { %v5296_v16 = vadd.f32 %v5200_v29, %v1298_v5  ;;  %v249_v5 = vld [vmem:[%s5126_s23 + $0xb8] sm:$0xff] }
  0xbb   : > { %10099 = vst [vmem:[#allocation8_spill] sm:$0xff] %v5272_v2  ;;  %v2475_v6 = vsel %vm274_vm0, %v5272_v2, 0.0  ;;  %4424 = vmatmul.msk.f32.gmra.mxu0 %vm274_vm0, %v246_v7  ;;  %v496_v11 = vsel %vm274_vm0, %v5283_v9, 0.0 }
  0xbc   : > { %2476 = vadd.xlane.f32.xlu2 %v2475_v6  ;;  %494 = vadd.xlane.f32.xlu1 %v493_v3  ;;  %v1394_v21 = vsel %vm274_vm0, %v5296_v16, 0.0 }
  0xbd   : > { %4461 = vmatmul.msk.f32.gmra.mxu1 %vm274_vm0, %v246_v7 }
  0xbe   : > { %4498 = vmatmul.msk.f32.gmra.mxu2 %vm274_vm0, %v246_v7 }
  0xc0   : > { %v2382_v10 = vpop.f32.mrf.mxu2  ;;  %v403_v13 = vpop.f32.mrf.mxu0 }
  0xc1   : > { %v1301_v14 = vpop.f32.mrf.mxu1  ;;  %v5299_v17 = vadd.f32 %v5217_v37, %v2382_v10  ;;  %v5316_v27 = vadd.f32 %v5195_v28, %v403_v13 }
  0xc2   : > { %v5293_v15 = vadd.f32 %v5200_v29, %v1301_v14 }
  0xc3   : > { %10100 = vst [vmem:[#allocation9_spill] sm:$0xff] %v5299_v17  ;;  %v2478_v22 = vsel %vm274_vm0, %v5299_v17, 0.0  ;;  %4425 = vmatmul.msk.f32.gmra.mxu0 %vm274_vm0, %v247_v25  ;;  %v499_v35 = vsel %vm274_vm0, %v5316_v27, 0.0 }
  0xc4   : > { %497 = vadd.xlane.f32.xlu2 %v496_v11  ;;  %1392 = vadd.xlane.f32.xlu1 %v1391_v12  ;;  %v1397_v18 = vsel %vm274_vm0, %v5293_v15, 0.0 }
  0xc5   : > { %1398 = vadd.xlane.f32.xlu0 %v1397_v18  ;;  %4462 = vmatmul.msk.f32.gmra.mxu1 %vm274_vm0, %v247_v25 }
  0xc6   : > { %4499 = vmatmul.msk.f32.gmra.mxu2 %vm274_vm0, %v247_v25 }
  0xc8   : > { %v2385_v19 = vpop.f32.mrf.mxu2  ;;  %v406_v23 = vpop.f32.mrf.mxu0 }
  0xc9   : > { %v5304_v20 = vadd.f32 %v5217_v37, %v2385_v19  ;;  %v1304_v24 = vpop.f32.mrf.mxu1  ;;  %v5323_v31 = vadd.f32 %v5195_v28, %v406_v23 }
  0xca   : > { %v5319_v30 = vadd.f32 %v5200_v29, %v1304_v24 }
  0xcb   : > { %10101 = vst [vmem:[#allocation10_spill] sm:$0xff] %v5304_v20  ;;  %v2481_v26 = vsel %vm274_vm0, %v5304_v20, 0.0  ;;  %v502_v43 = vsel %vm274_vm0, %v5323_v31, 0.0  ;;  %4426 = vmatmul.msk.f32.gmra.mxu0 %vm274_vm0, %v248_v42 }
  0xcc   : > { %1395 = vadd.xlane.f32.xlu2 %v1394_v21  ;;  %2479 = vadd.xlane.f32.xlu1 %v2478_v22  ;;  %v1400_v36 = vsel %vm274_vm0, %v5319_v30, 0.0 }
  0xcd   : > { %2482 = vadd.xlane.f32.xlu0 %v2481_v26  ;;  %4463 = vmatmul.msk.f32.gmra.mxu1 %vm274_vm0, %v248_v42 }
  0xce   : > { %4500 = vmatmul.msk.f32.gmra.mxu2 %vm274_vm0, %v248_v42 }
  0xd0   : > { %v2388_v32 = vpop.f32.mrf.mxu2  ;;  %v409_v38 = vpop.f32.mrf.mxu0 }
  0xd1   : > { %v1307_v39 = vpop.f32.mrf.mxu1  ;;  %v5335_v44 = vadd.f32 %v5217_v37, %v2388_v32  ;;  %v5338_v45 = vadd.f32 %v5195_v28, %v409_v38 }
  0xd2   : > { %v5349_v55 = vadd.f32 %v5200_v29, %v1307_v39 }
  0xd3   : > { %10102 = vst [vmem:[#allocation11_spill] sm:$0xff] %v5335_v44  ;;  %v2484_v49 = vsel %vm274_vm0, %v5335_v44, 0.0  ;;  %v505_v50 = vsel %vm274_vm0, %v5338_v45, 0.0  ;;  %4427 = vmatmul.msk.f32.gmra.mxu0 %vm274_vm0, %v249_v5 }
  0xd4   : > { %500 = vadd.xlane.f32.xlu2 %v499_v35  ;;  %1401 = vadd.xlane.f32.xlu1 %v1400_v36  ;;  %v1403_v62 = vsel %vm274_vm0, %v5349_v55, 0.0  ;;  %v250_v35 = vld [vmem:[%s5126_s23 + $0xc0] sm:$0xff] }
  0xd5   : > { %503 = vadd.xlane.f32.xlu0 %v502_v43  ;;  %4464 = vmatmul.msk.f32.gmra.mxu1 %vm274_vm0, %v249_v5 }
  0xd6   : > { %4501 = vmatmul.msk.f32.gmra.mxu2 %vm274_vm0, %v249_v5 }
  0xd8   : > { %v2391_v47 = vpop.f32.mrf.mxu2  ;;  %v412_v51 = vpop.f32.mrf.mxu0 }
  0xd9   : > { %v1310_v52 = vpop.f32.mrf.mxu1  ;;  %v5352_v57 = vadd.f32 %v5217_v37, %v2391_v47  ;;  %v5367_v6 = vadd.f32 %v5195_v28, %v412_v51 }
  0xda   : > { %v5346_v54 = vadd.f32 %v5200_v29, %v1310_v52 }
  0xdb   : > { %10103 = vst [vmem:[#allocation12_spill] sm:$0xff] %v5352_v57  ;;  %v2487_v63 = vsel %vm274_vm0, %v5352_v57, 0.0  ;;  %v508_v12 = vsel %vm274_vm0, %v5367_v6, 0.0  ;;  %4428 = vmatmul.msk.f32.gmra.mxu0 %vm274_vm0, %v250_v35 }
  0xdc   : > { %2485 = vadd.xlane.f32.xlu2 %v2484_v49  ;;  %506 = vadd.xlane.f32.xlu1 %v505_v50  ;;  %v1406_v59 = vsel %vm274_vm0, %v5346_v54, 0.0 }
  0xdd   : > { %1407 = vadd.xlane.f32.xlu0 %v1406_v59  ;;  %4465 = vmatmul.msk.f32.gmra.mxu1 %vm274_vm0, %v250_v35  ;;  %v251_v59 = vld [vmem:[%s5126_s23 + $0xc8] sm:$0xff] }
  0xde   : > { %4502 = vmatmul.msk.f32.gmra.mxu2 %vm274_vm0, %v250_v35 }
  0xe0   : > { %v2394_v60 = vpop.f32.mrf.mxu2  ;;  %v415_v1 = vpop.f32.mrf.mxu0 }
  0xe1   : > { %v5357_v61 = vadd.f32 %v5217_v37, %v2394_v60  ;;  %v1313_v3 = vpop.f32.mrf.mxu1  ;;  %v5376_v10 = vadd.f32 %v5195_v28, %v415_v1 }
  0xe2   : > { %v5370_v7 = vadd.f32 %v5200_v29, %v1313_v3 }
  0xe3   : > { %10104 = vst [vmem:[#allocation13_spill] sm:$0xff] %v5357_v61  ;;  %v2490_v4 = vsel %vm274_vm0, %v5357_v61, 0.0  ;;  %v511_v19 = vsel %vm274_vm0, %v5376_v10, 0.0  ;;  %4429 = vmatmul.msk.f32.gmra.mxu0 %vm274_vm0, %v251_v59 }
  0xe4   : > { %1404 = vadd.xlane.f32.xlu2 %v1403_v62  ;;  %2488 = vadd.xlane.f32.xlu1 %v2487_v63  ;;  %v1409_v13 = vsel %vm274_vm0, %v5370_v7, 0.0  ;;  %v5004_v62 = vmov 32.0  }
  0xe5   : > { %2491 = vadd.xlane.f32.xlu0 %v2490_v4  ;;  %4636 = vrcp.f32 %v5004_v62  ;;  %4466 = vmatmul.msk.f32.gmra.mxu1 %vm274_vm0, %v251_v59 }
  0xe6   : > { %4503 = vmatmul.msk.f32.gmra.mxu2 %vm274_vm0, %v251_v59 }
  0xe8   : > { %v2397_v11 = vpop.f32.mrf.mxu2  ;;  %v418_v14 = vpop.f32.mrf.mxu0 }
  0xe9   : > { %v1316_v18 = vpop.f32.mrf.mxu1  ;;  %v5385_v21 = vadd.f32 %v5217_v37, %v2397_v11  ;;  %v5388_v22 = vadd.f32 %v5195_v28, %v418_v14 }
  0xea   : > { %v5401_v38 = vadd.f32 %v5200_v29, %v1316_v18 }
  0xeb   : > { %10105 = vst [vmem:[#allocation14_spill] sm:$0xff] %v5385_v21  ;;  %v2493_v24 = vsel %vm274_vm0, %v5385_v21, 0.0  ;;  %v514_v25 = vsel %vm274_vm0, %v5388_v22, 0.0  ;;  %v4637_v5 = vpop.eup %4636 }
  0xec   : > { %509 = vadd.xlane.f32.xlu2 %v508_v12  ;;  %1410 = vadd.xlane.f32.xlu1 %v1409_v13  ;;  %v1412_v49 = vsel %vm274_vm0, %v5401_v38, 0.0  ;;  %vm585_vm1 = vweird.f32 %v4637_v5 }
  0xed   : > { %512 = vadd.xlane.f32.xlu0 %v511_v19  ;;  %v581_v19 = vmul.f32 32.0, %v4637_v5 }
  0xf0   : > { %v2400_v23 = vpop.f32.mrf.mxu2  ;;  %v421_v26 = vpop.f32.mrf.mxu0 }
  0xf1   : > { %v1319_v32 = vpop.f32.mrf.mxu1  ;;  %v5404_v39 = vadd.f32 %v5217_v37, %v2400_v23  ;;  %v5422_v63 = vadd.f32 %v5195_v28, %v421_v26  ;;  %v582_v26 = vsub.f32 1.0, %v581_v19 }
  0xf2   : > { %v5396_v36 = vadd.f32 %v5200_v29, %v1319_v32 }
  0xf3   : > { %10106 = vst [vmem:[#allocation15_spill] sm:$0xff] %v5404_v39  ;;  %v2496_v50 = vsel %vm274_vm0, %v5404_v39, 0.0  ;;  %v517_v11 = vsel %vm274_vm0, %v5422_v63, 0.0 }
  0xf4   : > { %2494 = vadd.xlane.f32.xlu2 %v2493_v24  ;;  %515 = vadd.xlane.f32.xlu1 %v514_v25  ;;  %v1415_v42 = vsel %vm274_vm0, %v5396_v36, 0.0 }
  0xf5   : > { %1416 = vadd.xlane.f32.xlu0 %v1415_v42 }
  0xf8   : > { %v2403_v43 = vpop.f32.mrf.mxu2  ;;  %v424_v51 = vpop.f32.mrf.mxu0 }
  0xf9   : > { %v5410_v47 = vadd.f32 %v5217_v37, %v2403_v43  ;;  %v1322_v52 = vpop.f32.mrf.mxu1  ;;  %v5429_v3 = vadd.f32 %v5195_v28, %v424_v51  ;;  %v252_v51 = vld [vmem:[%s5126_s23 + $0xd0] sm:$0xff] }
  0xfa   : > { %v5425_v1 = vadd.f32 %v5200_v29, %v1322_v52  ;;  %4467 = vmatmul.msk.f32.gmra.mxu1 %vm274_vm0, %v252_v51  ;;  %4504 = vmatmul.msk.f32.gmra.mxu2 %vm274_vm0, %v252_v51 }
  0xfb   : > { %10107 = vst [vmem:[#allocation16_spill] sm:$0xff] %v5410_v47  ;;  %v2499_v60 = vsel %vm274_vm0, %v5410_v47, 0.0  ;;  %v520_v18 = vsel %vm274_vm0, %v5429_v3, 0.0  ;;  %4430 = vmatmul.msk.f32.gmra.mxu0 %vm274_vm0, %v252_v51 }
  0xfc   : > { %1413 = vadd.xlane.f32.xlu2 %v1412_v49  ;;  %2497 = vadd.xlane.f32.xlu1 %v2496_v50  ;;  %v1418_v12 = vsel %vm274_vm0, %v5425_v1, 0.0  ;;  %v583_v50 = vmul.f32 %v4637_v5, %v582_v26 }
  0xfd   : > { %2500 = vadd.xlane.f32.xlu0 %v2499_v60 }
  0xfe   : > { %v584_v62 = vadd.f32 %v4637_v5, %v583_v50 }
 0x100   : > { %v2406_v4 = vpop.f32.mrf.mxu2  ;;  %v427_v13 = vpop.f32.mrf.mxu0  ;;  %v5471_v26 = vsel %vm585_vm1, %v4637_v5, %v584_v62 }
 0x101   : > { %v1325_v14 = vpop.f32.mrf.mxu1  ;;  %v5438_v23 = vadd.f32 %v5217_v37, %v2406_v4  ;;  %v5441_v24 = vadd.f32 %v5195_v28, %v427_v13 }
 0x102   : > { %v5452_v52 = vadd.f32 %v5200_v29, %v1325_v14 }
 0x103   : > { %10108 = vst [vmem:[#allocation17_spill] sm:$0xff] %v5438_v23  ;;  %v2502_v32 = vsel %vm274_vm0, %v5438_v23, 0.0  ;;  %v523_v35 = vsel %vm274_vm0, %v5441_v24, 0.0 }
 0x104   : > { %518 = vadd.xlane.f32.xlu2 %v517_v11  ;;  %1419 = vadd.xlane.f32.xlu1 %v1418_v12  ;;  %v1421_v12 = vsel %vm274_vm0, %v5452_v52, 0.0 }
 0x105   : > { %521 = vadd.xlane.f32.xlu0 %v520_v18 }
 0x108   : > { %v2409_v25 = vpop.f32.mrf.mxu2  ;;  %v430_v42 = vpop.f32.mrf.mxu0 }
 0x109   : > { %v1328_v43 = vpop.f32.mrf.mxu1  ;;  %v5455_v59 = vadd.f32 %v5217_v37, %v2409_v25 }
 0x10a   : > { %v5448_v49 = vadd.f32 %v5200_v29, %v1328_v43 }
 0x10b   : > { %10109 = vst [vmem:[#allocation18_spill] sm:$0xff] %v5455_v59  ;;  %v2505_v13 = vsel %vm274_vm0, %v5455_v59, 0.0 }
 0x10c   : > { %2503 = vadd.xlane.f32.xlu2 %v2502_v32  ;;  %524 = vadd.xlane.f32.xlu1 %v523_v35  ;;  %v1424_v60 = vsel %vm274_vm0, %v5448_v49, 0.0  ;;  %v5474_v32 = vadd.f32 %v5195_v28, %v430_v42 }
 0x10d   : > { %1425 = vadd.xlane.f32.xlu0 %v1424_v60 }
 0x10e   : > { %v526_v62 = vsel %vm274_vm0, %v5474_v32, 0.0 }
 0x10f   : > { %v486_v19 = vpop.xlane.xlu0 %485 }
 0x110   : > { %v2412_v4 = vpop.f32.mrf.mxu2  ;;  %v433_v14 = vpop.f32.mrf.mxu0  ;;  %v587_v50 = vmul.f32 %v5471_v26, %v486_v19 }
 0x111   : > { %v5463_v11 = vadd.f32 %v5217_v37, %v2412_v4  ;;  %v1331_v18 = vpop.f32.mrf.mxu1  ;;  %v1384_v43 = vpop.xlane.xlu1 %1383  ;;  %v5483_v60 = vadd.f32 %v5195_v28, %v433_v14 }
 0x112   : > { %v5477_v35 = vadd.f32 %v5200_v29, %v1331_v18  ;;  %v1478_v5 = vmul.f32 %v1384_v43, %v5471_v26 }
 0x113   : > { %10110 = vst [vmem:[#allocation19_spill] sm:$0xff] %v5463_v11  ;;  %v2508_v25 = vsel %vm274_vm0, %v5463_v11, 0.0  ;;  %v529_v18 = vsel %vm274_vm0, %v5483_v60, 0.0 }
 0x114   : > { %1422 = vadd.xlane.f32.xlu2 %v1421_v12  ;;  %2506 = vadd.xlane.f32.xlu1 %v2505_v13  ;;  %v1427_v42 = vsel %vm274_vm0, %v5477_v35, 0.0  ;;  %v253_v12 = vld [vmem:[%s5126_s23 + $0xd8] sm:$0xff]  ;;  %v5492_v13 = vsub.f32 %v5204_v33, %v587_v50  ;;  %v5499_v14 = vsub.f32 %v5207_v34, %v1478_v5 }
 0x115   : > { %2509 = vadd.xlane.f32.xlu0 %v2508_v25  ;;  %4431 = vmatmul.msk.f32.gmra.mxu0 %vm274_vm0, %v253_v12 }
 0x116   : > { %10112 = vst [vmem:[#allocation21_spill] sm:$0xff] %v5492_v13  ;;  %4468 = vmatmul.msk.f32.gmra.mxu1 %vm274_vm0, %v253_v12  ;;  %4505 = vmatmul.msk.f32.gmra.mxu2 %vm274_vm0, %v253_v12  ;;  %v651_v50 = vmul.f32 %v5492_v13, %v5492_v13  ;;  %v1542_v5 = vmul.f32 %v5499_v14, %v5499_v14  ;;  %v254_v12 = vld [vmem:[%s5126_s23 + $0xe0] sm:$0xff] }
 0x117   : > { %v5480_v51 = vpop.xlane.xlu2 %2467  ;;  %v489_v19 = vpop.xlane.xlu0 %488 }
 0x118   : > { %10111 = vst [vmem:[#allocation20_spill] sm:$0xff] %v5480_v51  ;;  %v436_v4 = vpop.f32.mrf.mxu0  ;;  %v2415_v59 = vpop.f32.mrf.mxu2  ;;  %v683_v39 = vsel %vm274_vm0, %v651_v50, 0.0 }
 0x119   : > { %v5502_v25 = vadd.f32 %v5195_v28, %v436_v4  ;;  %v1334_v4 = vpop.f32.mrf.mxu1  ;;  %v5527_v57 = vadd.f32 %v5217_v37, %v2415_v59 }
 0x11b   : > { %v532_v34 = vsel %vm274_vm0, %v5502_v25, 0.0  ;;  %10115 = vst [vmem:[#allocation24_spill] sm:$0xff] %v5527_v57 }
 0x11c   : > { %527 = vadd.xlane.f32.xlu2 %v526_v62  ;;  %1428 = vadd.xlane.f32.xlu1 %v1427_v42  ;;  %v588_v42 = vmul.f32 %v5471_v26, %v489_v19 }
 0x11d   : > { %530 = vadd.xlane.f32.xlu0 %v529_v18  ;;  %4432 = vmatmul.msk.f32.gmra.mxu0 %vm274_vm0, %v254_v12 }
 0x11e   : > { %4469 = vmatmul.msk.f32.gmra.mxu1 %vm274_vm0, %v254_v12  ;;  %v5523_v19 = vsub.f32 %v5225_v41, %v588_v42  ;;  %4506 = vmatmul.msk.f32.gmra.mxu2 %vm274_vm0, %v254_v12 }
 0x11f   : > { %v1387_v33 = vpop.xlane.xlu2 %1386  ;;  %v5505_v43 = vpop.xlane.xlu1 %2470 }
 0x120   : > { %10113 = vst [vmem:[#allocation22_spill] sm:$0xff] %v5505_v43  ;;  %v1479_v62 = vmul.f32 %v1387_v33, %v5471_v26  ;;  %v1574_v33 = vsel %vm274_vm0, %v1542_v5, 0.0  ;;  %v652_v41 = vmul.f32 %v5523_v19, %v5523_v19  ;;  %v5538_v5 = vadd.f32 %v5200_v29, %v1334_v4 }
 0x121   : > { %10114 = vst [vmem:[#allocation23_spill] sm:$0xff] %v5523_v19 }
 0x122   : > { %v5517_v18 = vsub.f32 %v5234_v46, %v1479_v62  ;;  %v1390_v46 = vpop.xlane.xlu0 %1389  ;;  %v1337_v59 = vpop.f32.mrf.mxu1  ;;  %v686_v12 = vsel %vm274_vm0, %v652_v41, 0.0  ;;  %v1430_v41 = vsel %vm274_vm0, %v5538_v5, 0.0 }
 0x124   : > { %533 = vadd.xlane.f32.xlu1 %v532_v34  ;;  %684 = vadd.xlane.f32.xlu2 %v683_v39  ;;  %v1543_v50 = vmul.f32 %v5517_v18, %v5517_v18  ;;  %v2511_v34 = vsel %vm274_vm0, %v5527_v57, 0.0  ;;  %v2418_v39 = vpop.f32.mrf.mxu2  ;;  %v439_v57 = vpop.f32.mrf.mxu0 }
 0x125   : > { %1575 = vadd.xlane.f32.xlu0 %v1574_v33  ;;  %v5542_v33 = vadd.f32 %v5217_v37, %v2418_v39 }
 0x126   : > { %v1577_v42 = vsel %vm274_vm0, %v1543_v50, 0.0  ;;  %v5548_v50 = vadd.f32 %v5200_v29, %v1337_v59  ;;  %v5563_v59 = vadd.f32 %v5195_v28, %v439_v57 }
 0x127   : > { %v492_v62 = vpop.xlane.xlu1 %491  ;;  %10116 = vst [vmem:[#allocation25_spill] sm:$0xff] %v5542_v33  ;;  %v2514_v4 = vsel %vm274_vm0, %v5542_v33, 0.0 }
 0x128   : > { %v589_v23 = vmul.f32 %v5471_v26, %v492_v62  ;;  %v1433_v62 = vsel %vm274_vm0, %v5548_v50, 0.0  ;;  %v535_v21 = vsel %vm274_vm0, %v5563_v59, 0.0 }
 0x12a   : > { %v5557_v39 = vsub.f32 %v5252_v56, %v589_v23  ;;  %v1480_v56 = vmul.f32 %v1390_v46, %v5471_v26  ;;  %v1340_v48 = vpop.f32.mrf.mxu1 }
 0x12c   : > { %1578 = vadd.xlane.f32.xlu1 %v1577_v42  ;;  %2512 = vadd.xlane.f32.xlu2 %v2511_v34  ;;  %v5550_v34 = vpop.xlane.xlu0 %2473  ;;  %10119 = vst [vmem:[#allocation28_spill] sm:$0xff] %v5557_v39  ;;  %v2421_v42 = vpop.f32.mrf.mxu2 }
 0x12d   : > { %687 = vadd.xlane.f32.xlu0 %v686_v12  ;;  %10118 = vst [vmem:[#allocation27_spill] sm:$0xff] %v5550_v34  ;;  %v255_v12 = vld [vmem:[%s5126_s23 + $0xe8] sm:$0xff]  ;;  %v5570_v17 = vadd.f32 %v5217_v37, %v2421_v42 }
 0x12e   : > { %4470 = vmatmul.msk.f32.gmra.mxu1 %vm274_vm0, %v255_v12  ;;  %4507 = vmatmul.msk.f32.gmra.mxu2 %vm274_vm0, %v255_v12 }
 0x12f   : > { %v5545_v11 = vpop.xlane.xlu2 %2476  ;;  %v495_v47 = vpop.xlane.xlu1 %494  ;;  %4433 = vmatmul.msk.f32.gmra.mxu0 %vm274_vm0, %v255_v12  ;;  %10120 = vst [vmem:[#allocation29_spill] sm:$0xff] %v5570_v17  ;;  %v2517_v42 = vsel %vm274_vm0, %v5570_v17, 0.0  ;;  %v5585_v12 = vadd.f32 %v5200_v29, %v1340_v48 }
 0x130   : > { %10117 = vst [vmem:[#allocation26_spill] sm:$0xff] %v5545_v11  ;;  %v590_v43 = vmul.f32 %v5471_v26, %v495_v47 }
 0x131   : > { %v1436_v48 = vsel %vm274_vm0, %v5585_v12, 0.0 }
 0x132   : > { %v5602_v47 = vsub.f32 %v5266_v0, %v590_v43 }
 0x134   : > { %2515 = vadd.xlane.f32.xlu1 %v2514_v4  ;;  %1431 = vadd.xlane.f32.xlu2 %v1430_v41  ;;  %v653_v4 = vmul.f32 %v5557_v39, %v5557_v39  ;;  %v442_v41 = vpop.f32.mrf.mxu0  ;;  %10123 = vst [vmem:[#allocation32_spill] sm:$0xff] %v5602_v47  ;;  %v654_v20 = vmul.f32 %v5602_v47, %v5602_v47 }
 0x135   : > { %1434 = vadd.xlane.f32.xlu0 %v1433_v62  ;;  %v5579_v62 = vsub.f32 %v5245_v53, %v1480_v56  ;;  %v5591_v53 = vadd.f32 %v5195_v28, %v442_v41 }
 0x136   : > { %v689_v46 = vsel %vm274_vm0, %v653_v4, 0.0 }
 0x137   : > { %v498_v23 = vpop.xlane.xlu2 %497  ;;  %v1393_v33 = vpop.xlane.xlu1 %1392  ;;  %v1544_v56 = vmul.f32 %v5579_v62, %v5579_v62  ;;  %v538_v41 = vsel %vm274_vm0, %v5591_v53, 0.0 }
 0x138   : > { %v5574_v57 = vpop.xlane.xlu0 %1398  ;;  %v1481_v4 = vmul.f32 %v1393_v33, %v5471_v26 }
 0x13a   : > { %v5610_v33 = vsub.f32 %v5280_v8, %v1481_v4 }
 0x13c   : > { %690 = vadd.xlane.f32.xlu1 %v689_v46  ;;  %536 = vadd.xlane.f32.xlu2 %v535_v21  ;;  %v445_v21 = vpop.f32.mrf.mxu0  ;;  %v256_v46 = vld [vmem:[%s5126_s23 + $0xf0] sm:$0xff]  ;;  %v1545_v4 = vmul.f32 %v5610_v33, %v5610_v33 }
 0x13d   : > { %2518 = vadd.xlane.f32.xlu0 %v2517_v42  ;;  %v1580_v42 = vsel %vm274_vm0, %v1544_v56, 0.0  ;;  %4434 = vmatmul.msk.f32.gmra.mxu0 %vm274_vm0, %v256_v46 }
 0x13e   : > { %4471 = vmatmul.msk.f32.gmra.mxu1 %vm274_vm0, %v256_v46  ;;  %4508 = vmatmul.msk.f32.gmra.mxu2 %vm274_vm0, %v256_v46  ;;  %v257_v46 = vld [vmem:[%s5126_s23 + $0xf8] sm:$0xff]  ;;  %v1583_v2 = vsel %vm274_vm0, %v1545_v4, 0.0 }
 0x13f   : > { %v1396_v44 = vpop.xlane.xlu2 %1395  ;;  %v5588_v61 = vpop.xlane.xlu1 %2479 }
 0x140   : > { %10121 = vst [vmem:[#allocation30_spill] sm:$0xff] %v5588_v61  ;;  %v5596_v17 = vpop.xlane.xlu0 %2482  ;;  %v5613_v61 = vadd.f32 %v5195_v28, %v445_v21  ;;  %v1482_v0 = vmul.f32 %v1396_v44, %v5471_v26  ;;  %v1343_v21 = vpop.f32.mrf.mxu1 }
 0x141   : > { %10122 = vst [vmem:[#allocation31_spill] sm:$0xff] %v5596_v17 }
 0x142   : > { %v541_v8 = vsel %vm274_vm0, %v5613_v61, 0.0  ;;  %v5628_v44 = vsub.f32 %v5296_v16, %v1482_v0 }
 0x144   : > { %1437 = vadd.xlane.f32.xlu1 %v1436_v48  ;;  %1581 = vadd.xlane.f32.xlu2 %v1580_v42  ;;  %v2424_v48 = vpop.f32.mrf.mxu2  ;;  %v591_v42 = vmul.f32 %v5471_v26, %v498_v23  ;;  %v1546_v0 = vmul.f32 %v5628_v44, %v5628_v44  ;;  %v448_v40 = vpop.f32.mrf.mxu0 }
 0x145   : > { %539 = vadd.xlane.f32.xlu0 %v538_v41  ;;  %v692_v41 = vsel %vm274_vm0, %v654_v20, 0.0  ;;  %4435 = vmatmul.msk.f32.gmra.mxu0 %vm274_vm0, %v257_v46  ;;  %v5638_v11 = vadd.f32 %v5217_v37, %v2424_v48 }
 0x146   : > { %4472 = vmatmul.msk.f32.gmra.mxu1 %vm274_vm0, %v257_v46  ;;  %v5634_v23 = vsub.f32 %v5283_v9, %v591_v42  ;;  %4509 = vmatmul.msk.f32.gmra.mxu2 %vm274_vm0, %v257_v46  ;;  %v1586_v4 = vsel %vm274_vm0, %v1546_v0, 0.0  ;;  %v5655_v46 = vadd.f32 %v5200_v29, %v1343_v21 }
 0x147   : > { %v501_v43 = vpop.xlane.xlu2 %500  ;;  %v5617_v56 = vpop.xlane.xlu1 %1401  ;;  %10125 = vst [vmem:[#allocation34_spill] sm:$0xff] %v5638_v11  ;;  %v2520_v9 = vsel %vm274_vm0, %v5638_v11, 0.0 }
 0x148   : > { %v504_v17 = vpop.xlane.xlu0 %503  ;;  %10124 = vst [vmem:[#allocation33_spill] sm:$0xff] %v5634_v23  ;;  %v655_v42 = vmul.f32 %v5634_v23, %v5634_v23  ;;  %v592_v11 = vmul.f32 %v5471_v26, %v501_v43 }
 0x14c   : > { %542 = vadd.xlane.f32.xlu1 %v541_v8  ;;  %693 = vadd.xlane.f32.xlu2 %v692_v41  ;;  %v2427_v48 = vpop.f32.mrf.mxu2  ;;  %v695_v41 = vsel %vm274_vm0, %v655_v42, 0.0  ;;  %v1439_v42 = vsel %vm274_vm0, %v5655_v46, 0.0 }
 0x14d   : > { %1584 = vadd.xlane.f32.xlu0 %v1583_v2  ;;  %v1346_v2 = vpop.f32.mrf.mxu1 }
 0x14e   : > { %v5665_v0 = vadd.f32 %v5200_v29, %v1346_v2  ;;  %v5679_v2 = vadd.f32 %v5195_v28, %v448_v40 }
 0x14f   : > { %v5641_v16 = vpop.xlane.xlu2 %2485  ;;  %v5643_v20 = vpop.xlane.xlu1 %506 }
 0x150   : > { %10126 = vst [vmem:[#allocation35_spill] sm:$0xff] %v5641_v16  ;;  %v5647_v8 = vpop.xlane.xlu0 %1407  ;;  %v5659_v16 = vadd.f32 %v5217_v37, %v2427_v48  ;;  %v5674_v48 = vsub.f32 %v5316_v27, %v592_v11  ;;  %v1442_v43 = vsel %vm274_vm0, %v5665_v0, 0.0  ;;  %v544_v40 = vsel %vm274_vm0, %v5679_v2, 0.0 }
 0x152   : > { %10127 = vst [vmem:[#allocation36_spill] sm:$0xff] %v5659_v16  ;;  %v2523_v21 = vsel %vm274_vm0, %v5659_v16, 0.0  ;;  %v656_v11 = vmul.f32 %v5674_v48, %v5674_v48 }
 0x153   : > { %10130 = vst [vmem:[#allocation39_spill] sm:$0xff] %v5674_v48  ;;  %v593_v48 = vmul.f32 %v5471_v26, %v504_v17 }
 0x154   : > { %1587 = vadd.xlane.f32.xlu1 %v1586_v4  ;;  %2521 = vadd.xlane.f32.xlu2 %v2520_v9  ;;  %v2430_v4 = vpop.f32.mrf.mxu2 }
 0x155   : > { %696 = vadd.xlane.f32.xlu0 %v695_v41  ;;  %v1483_v41 = vmul.f32 %v5574_v57, %v5471_v26  ;;  %v5688_v27 = vadd.f32 %v5217_v37, %v2430_v4  ;;  %v698_v57 = vsel %vm274_vm0, %v656_v11, 0.0  ;;  %v1484_v11 = vmul.f32 %v5617_v56, %v5471_v26 }
 0x156   : > { %v5722_v17 = vsub.f32 %v5323_v31, %v593_v48 }
 0x157   : > { %v1405_v51 = vpop.xlane.xlu2 %1404  ;;  %v5662_v58 = vpop.xlane.xlu1 %2488  ;;  %10131 = vst [vmem:[#allocation40_spill] sm:$0xff] %v5688_v27  ;;  %v2526_v34 = vsel %vm274_vm0, %v5688_v27, 0.0  ;;  %v5728_v27 = vsub.f32 %v5319_v30, %v1484_v11 }
 0x158   : > { %10128 = vst [vmem:[#allocation37_spill] sm:$0xff] %v5662_v58  ;;  %v5667_v9 = vpop.xlane.xlu0 %2491  ;;  %v657_v48 = vmul.f32 %v5722_v17, %v5722_v17 }
 0x159   : > { %10129 = vst [vmem:[#allocation38_spill] sm:$0xff] %v5667_v9  ;;  %v5697_v9 = vsub.f32 %v5293_v15, %v1483_v41  ;;  %v1548_v11 = vmul.f32 %v5728_v27, %v5728_v27 }
 0x15a   : > { %10134 = vst [vmem:[#allocation43_spill] sm:$0xff] %v5722_v17 }
 0x15b   : > { %10132 = vst [vmem:[#allocation41_spill] sm:$0xff] %v5697_v9  ;;  %v1547_v41 = vmul.f32 %v5697_v9, %v5697_v9 }
 0x15c   : > { %2524 = vadd.xlane.f32.xlu1 %v2523_v21  ;;  %1440 = vadd.xlane.f32.xlu2 %v1439_v42  ;;  %v451_v21 = vpop.f32.mrf.mxu0 }
 0x15d   : > { %1443 = vadd.xlane.f32.xlu0 %v1442_v43  ;;  %v1349_v43 = vpop.f32.mrf.mxu1  ;;  %v5711_v15 = vadd.f32 %v5195_v28, %v451_v21 }
 0x15e   : > { %v5703_v4 = vadd.f32 %v5200_v29, %v1349_v43 }
 0x15f   : > { %v5683_v16 = vpop.xlane.xlu2 %509  ;;  %v5685_v58 = vpop.xlane.xlu1 %1410  ;;  %v547_v21 = vsel %vm274_vm0, %v5711_v15, 0.0 }
 0x160   : > { %v5692_v42 = vpop.xlane.xlu0 %512 }
 0x164   : > { %699 = vadd.xlane.f32.xlu1 %v698_v57  ;;  %545 = vadd.xlane.f32.xlu2 %v544_v40  ;;  %v454_v43 = vpop.f32.mrf.mxu0  ;;  %v1589_v57 = vsel %vm274_vm0, %v1547_v41, 0.0  ;;  %v2433_v41 = vpop.f32.mrf.mxu2 }
 0x165   : > { %2527 = vadd.xlane.f32.xlu0 %v2526_v34  ;;  %v1445_v34 = vsel %vm274_vm0, %v5703_v4, 0.0  ;;  %v5731_v56 = vadd.f32 %v5195_v28, %v454_v43 }
 0x167   : > { %v5706_v23 = vpop.xlane.xlu2 %2494  ;;  %v5708_v47 = vpop.xlane.xlu1 %515  ;;  %v550_v30 = vsel %vm274_vm0, %v5731_v56, 0.0 }
 0x168   : > { %10133 = vst [vmem:[#allocation42_spill] sm:$0xff] %v5706_v23  ;;  %v5717_v40 = vpop.xlane.xlu0 %1416  ;;  %v1485_v23 = vmul.f32 %v1405_v51, %v5471_v26  ;;  %v1352_v51 = vpop.f32.mrf.mxu1 }
 0x16a   : > { %v5749_v43 = vsub.f32 %v5349_v55, %v1485_v23 }
 0x16c   : > { %1446 = vadd.xlane.f32.xlu1 %v1445_v34  ;;  %1590 = vadd.xlane.f32.xlu2 %v1589_v57  ;;  %v594_v34 = vmul.f32 %v5471_v26, %v5643_v20  ;;  %10137 = vst [vmem:[#allocation46_spill] sm:$0xff] %v5749_v43  ;;  %v1592_v20 = vsel %vm274_vm0, %v1548_v11, 0.0  ;;  %v1549_v55 = vmul.f32 %v5749_v43, %v5749_v43  ;;  %v457_v43 = vpop.f32.mrf.mxu0 }
 0x16d   : > { %548 = vadd.xlane.f32.xlu0 %v547_v21  ;;  %v701_v21 = vsel %vm274_vm0, %v657_v48, 0.0  ;;  %v5773_v11 = vadd.f32 %v5200_v29, %v1352_v51 }
 0x16f   : > { %v5734_v9 = vpop.xlane.xlu2 %1413  ;;  %v5736_v31 = vpop.xlane.xlu1 %2497 }
 0x170   : > { %10135 = vst [vmem:[#allocation44_spill] sm:$0xff] %v5736_v31  ;;  %v5742_v57 = vpop.xlane.xlu0 %2500  ;;  %v5753_v31 = vsub.f32 %v5338_v45, %v594_v34  ;;  %v2436_v34 = vpop.f32.mrf.mxu2 }
 0x171   : > { %10136 = vst [vmem:[#allocation45_spill] sm:$0xff] %v5742_v57  ;;  %v5757_v57 = vadd.f32 %v5217_v37, %v2433_v41  ;;  %v1595_v41 = vsel %vm274_vm0, %v1549_v55, 0.0 }
 0x172   : > { %10138 = vst [vmem:[#allocation47_spill] sm:$0xff] %v5753_v31  ;;  %v658_v45 = vmul.f32 %v5753_v31, %v5753_v31 }
 0x173   : > { %10139 = vst [vmem:[#allocation48_spill] sm:$0xff] %v5757_v57  ;;  %v2529_v48 = vsel %vm274_vm0, %v5757_v57, 0.0  ;;  %v595_v57 = vmul.f32 %v5471_v26, %v5683_v16 }
 0x174   : > { %551 = vadd.xlane.f32.xlu1 %v550_v30  ;;  %702 = vadd.xlane.f32.xlu2 %v701_v21  ;;  %v1355_v30 = vpop.f32.mrf.mxu1  ;;  %v704_v21 = vsel %vm274_vm0, %v658_v45, 0.0  ;;  %v1448_v45 = vsel %vm274_vm0, %v5773_v11, 0.0 }
 0x175   : > { %1593 = vadd.xlane.f32.xlu0 %v1592_v20  ;;  %v5777_v20 = vadd.f32 %v5217_v37, %v2436_v34  ;;  %v5786_v55 = vadd.f32 %v5200_v29, %v1355_v30  ;;  %v5795_v34 = vsub.f32 %v5367_v6, %v595_v57  ;;  %v5800_v30 = vadd.f32 %v5195_v28, %v457_v43 }
 0x177   : > { %v5759_v17 = vpop.xlane.xlu2 %518  ;;  %v5761_v39 = vpop.xlane.xlu1 %1419  ;;  %10140 = vst [vmem:[#allocation49_spill] sm:$0xff] %v5777_v20  ;;  %v2532_v51 = vsel %vm274_vm0, %v5777_v20, 0.0  ;;  %v1451_v16 = vsel %vm274_vm0, %v5786_v55, 0.0  ;;  %v659_v57 = vmul.f32 %v5795_v34, %v5795_v34  ;;  %v553_v43 = vsel %vm274_vm0, %v5800_v30, 0.0 }
 0x178   : > { %v5765_v23 = vpop.xlane.xlu0 %521  ;;  %10142 = vst [vmem:[#allocation51_spill] sm:$0xff] %v5786_v55 }
 0x179   : > { %10143 = vst [vmem:[#allocation52_spill] sm:$0xff] %v5795_v34 }
 0x17c   : > { %1596 = vadd.xlane.f32.xlu1 %v1595_v41  ;;  %2530 = vadd.xlane.f32.xlu2 %v2529_v48  ;;  %v2439_v41 = vpop.f32.mrf.mxu2 }
 0x17d   : > { %705 = vadd.xlane.f32.xlu0 %v704_v21  ;;  %v1486_v21 = vmul.f32 %v5647_v8, %v5471_v26  ;;  %v5809_v6 = vadd.f32 %v5217_v37, %v2439_v41  ;;  %v707_v8 = vsel %vm274_vm0, %v659_v57, 0.0  ;;  %v596_v41 = vmul.f32 %v5471_v26, %v5692_v42 }
 0x17e   : > { %v1487_v57 = vmul.f32 %v5685_v58, %v5471_v26  ;;  %v5855_v58 = vld [vmem:[%s9958_s2] ss:$0 sm:$0xff] }
 0x17f   : > { %v5781_v31 = vpop.xlane.xlu2 %2503  ;;  %v5783_v19 = vpop.xlane.xlu1 %524  ;;  %10145 = vst [vmem:[#allocation54_spill] sm:$0xff] %v5809_v6  ;;  %v5818_v55 = vsub.f32 %v5346_v54, %v1486_v21  ;;  %v5844_v42 = vsub.f32 %v5376_v10, %v596_v41  ;;  %v1488_v10 = vmul.f32 %v5734_v9, %v5471_v26 }
 0x180   : > { %10141 = vst [vmem:[#allocation50_spill] sm:$0xff] %v5781_v31  ;;  %v5788_v48 = vpop.xlane.xlu0 %1425 }
 0x181   : > { %10147 = vst [vmem:[#allocation56_spill] sm:$0xff] %v5818_v55  ;;  %v1550_v21 = vmul.f32 %v5818_v55, %v5818_v55 }
 0x182   : > { %10150 = vst [vmem:[#allocation59_spill] sm:$0xff] %v5844_v42 }
 0x184   : > { %2533 = vadd.xlane.f32.xlu1 %v2532_v51  ;;  %1449 = vadd.xlane.f32.xlu2 %v1448_v45  ;;  %v460_v51 = vpop.f32.mrf.mxu0 }
 0x185   : > { %1452 = vadd.xlane.f32.xlu0 %v1451_v16  ;;  %v1358_v16 = vpop.f32.mrf.mxu1  ;;  %v5833_v54 = vadd.f32 %v5195_v28, %v460_v51  ;;  %v5850_v51 = vsub.f32 %v5370_v7, %v1487_v57  ;;  %v660_v7 = vmul.f32 %v5844_v42, %v5844_v42  ;;  %v2442_v57 = vpop.f32.mrf.mxu2 }
 0x186   : > { %v5824_v37 = vadd.f32 %v5200_v29, %v1358_v16  ;;  %v1598_v16 = vsel %vm274_vm0, %v1550_v21, 0.0 }
 0x187   : > { %v5804_v20 = vpop.xlane.xlu2 %1422  ;;  %v5806_v31 = vpop.xlane.xlu1 %2506  ;;  %10149 = vst [vmem:[#allocation58_spill] sm:$0xff] %v5833_v54  ;;  %v556_v28 = vsel %vm274_vm0, %v5833_v54, 0.0  ;;  %v710_v55 = vsel %vm274_vm0, %v660_v7, 0.0  ;;  %v5887_v54 = vld [vmem:[%s9958_s2 + $0x1] ss:$0 sm:$0xff] }
 0x188   : > { %10144 = vst [vmem:[#allocation53_spill] sm:$0xff] %v5806_v31  ;;  %v5813_v45 = vpop.xlane.xlu0 %2509  ;;  %v2535_v31 = vsel %vm274_vm0, %v5809_v6, 0.0  ;;  %v1454_v29 = vsel %vm274_vm0, %v5824_v37, 0.0  ;;  %v5877_v6 = vsub.f32 %v5401_v38, %v1488_v10 }
 0x189   : > { %10146 = vst [vmem:[#allocation55_spill] sm:$0xff] %v5813_v45 }
 0x18a   : > { %10148 = vst [vmem:[#allocation57_spill] sm:$0xff] %v5824_v37 }
 0x18b   : > { %10151 = vst [vmem:[#allocation60_spill] sm:$0xff] %v5850_v51 }
 0x18c   : > { %708 = vadd.xlane.f32.xlu1 %v707_v8  ;;  %554 = vadd.xlane.f32.xlu2 %v553_v43  ;;  %10153 = vst [vmem:[#allocation62_spill] sm:$0xff] %v5877_v6 }
 0x18d   : > { %2536 = vadd.xlane.f32.xlu0 %v2535_v31  ;;  %v463_v31 = vpop.f32.mrf.mxu0  ;;  %v1361_v9 = vpop.f32.mrf.mxu1 }
 0x18e   : > { %v5858_v8 = vadd.f32 %v5855_v58, %v463_v31 }
 0x18f   : > { %v5828_v45 = vpop.xlane.xlu2 %527  ;;  %v5830_v34 = vpop.xlane.xlu1 %1428 }
 0x190   : > { %v5839_v43 = vpop.xlane.xlu0 %530  ;;  %10152 = vst [vmem:[#allocation61_spill] sm:$0xff] %v5858_v8  ;;  %v559_v31 = vsel %vm274_vm0, %v5858_v8, 0.0 }
 0x194   : > { %1455 = vadd.xlane.f32.xlu1 %v1454_v29  ;;  %1599 = vadd.xlane.f32.xlu2 %v1598_v16  ;;  %v597_v29 = vmul.f32 %v5471_v26, %v5708_v47 }
 0x195   : > { %557 = vadd.xlane.f32.xlu0 %v556_v28  ;;  %v1551_v28 = vmul.f32 %v5850_v51, %v5850_v51  ;;  %v5890_v51 = vadd.f32 %v5887_v54, %v2442_v57 }
 0x196   : > { %v5881_v42 = vsub.f32 %v5388_v22, %v597_v29 }
 0x197   : > { %v5862_v41 = vpop.xlane.xlu1 %533  ;;  %v5864_v21 = vpop.xlane.xlu2 %684  ;;  %v1601_v47 = vsel %vm274_vm0, %v1551_v28, 0.0  ;;  %10155 = vst [vmem:[#allocation64_spill] sm:$0xff] %v5890_v51  ;;  %v2538_v7 = vsel %vm274_vm0, %v5890_v51, 0.0 }
 0x198   : > { %v5870_v16 = vpop.xlane.xlu0 %1575  ;;  %10154 = vst [vmem:[#allocation63_spill] sm:$0xff] %v5881_v42  ;;  %v661_v29 = vmul.f32 %v5881_v42, %v5881_v42  ;;  %v1364_v28 = vpop.f32.mrf.mxu1 }
 0x199   : > { %v466_v42 = vpop.f32.mrf.mxu0 }
 0x19c   : > { %560 = vadd.xlane.f32.xlu1 %v559_v31  ;;  %711 = vadd.xlane.f32.xlu2 %v710_v55  ;;  %v1552_v55 = vmul.f32 %v5877_v6, %v5877_v6  ;;  %v2445_v31 = vpop.f32.mrf.mxu2  ;;  %v713_v6 = vsel %vm274_vm0, %v661_v29, 0.0 }
 0x19d   : > { %1602 = vadd.xlane.f32.xlu0 %v1601_v47  ;;  %v5908_v47 = vld [vmem:[%s9958_s2 + $0x2] ss:$0 sm:$0xff]  ;;  %v5915_v51 = vadd.f32 %v5887_v54, %v2445_v31 }
 0x19e   : > { %v1604_v57 = vsel %vm274_vm0, %v1552_v55, 0.0  ;;  %v598_v55 = vmul.f32 %v5471_v26, %v5759_v17  ;;  %v5924_v8 = vadd.f32 %v5908_v47, %v1364_v28  ;;  %v5938_v28 = vadd.f32 %v5855_v58, %v466_v42 }
 0x19f   : > { %v5892_v38 = vpop.xlane.xlu1 %1578  ;;  %v5894_v10 = vpop.xlane.xlu2 %2512  ;;  %10158 = vst [vmem:[#allocation67_spill] sm:$0xff] %v5915_v51 }
 0x1a0   : > { %10156 = vst [vmem:[#allocation65_spill] sm:$0xff] %v5894_v10  ;;  %v5898_v22 = vpop.xlane.xlu0 %687  ;;  %v5911_v10 = vadd.f32 %v5908_v47, %v1361_v9  ;;  %v2541_v9 = vsel %vm274_vm0, %v5915_v51, 0.0  ;;  %v1460_v17 = vsel %vm274_vm0, %v5924_v8, 0.0  ;;  %v562_v42 = vsel %vm274_vm0, %v5938_v28, 0.0 }
 0x1a1   : > { %10160 = vst [vmem:[#allocation69_spill] sm:$0xff] %v5924_v8 }
 0x1a2   : > { %10157 = vst [vmem:[#allocation66_spill] sm:$0xff] %v5911_v10  ;;  %v1457_v29 = vsel %vm274_vm0, %v5911_v10, 0.0 }
 0x1a3   : > { %10162 = vst [vmem:[#allocation71_spill] sm:$0xff] %v5938_v28 }
 0x1a4   : > { %1605 = vadd.xlane.f32.xlu1 %v1604_v57  ;;  %2539 = vadd.xlane.f32.xlu2 %v2538_v7  ;;  %v2448_v31 = vpop.f32.mrf.mxu2 }
 0x1a5   : > { %714 = vadd.xlane.f32.xlu0 %v713_v6  ;;  %v5933_v6 = vsub.f32 %v5422_v63, %v598_v55  ;;  %v5947_v63 = vadd.f32 %v5887_v54, %v2448_v31 }
 0x1a7   : > { %v5919_v7 = vpop.xlane.xlu1 %2515  ;;  %v5921_v57 = vpop.xlane.xlu2 %1431  ;;  %10161 = vst [vmem:[#allocation70_spill] sm:$0xff] %v5933_v6  ;;  %v662_v55 = vmul.f32 %v5933_v6, %v5933_v6  ;;  %v2544_v10 = vsel %vm274_vm0, %v5947_v63, 0.0 }
 0x1a8   : > { %10159 = vst [vmem:[#allocation68_spill] sm:$0xff] %v5919_v7  ;;  %v5926_v37 = vpop.xlane.xlu0 %1434  ;;  %v1489_v7 = vmul.f32 %v5717_v40, %v5471_v26 }
 0x1a9   : > { %10163 = vst [vmem:[#allocation72_spill] sm:$0xff] %v5947_v63  ;;  %v716_v40 = vsel %vm274_vm0, %v662_v55, 0.0  ;;  %v1490_v55 = vmul.f32 %v5761_v39, %v5471_v26 }
 0x1aa   : > { %v5956_v8 = vsub.f32 %v5396_v36, %v1489_v7 }
 0x1ab   : > { %v5988_v63 = vsub.f32 %v5425_v1, %v1490_v55 }
 0x1ac   : > { %2542 = vadd.xlane.f32.xlu1 %v2541_v9  ;;  %1458 = vadd.xlane.f32.xlu2 %v1457_v29  ;;  %v469_v9 = vpop.f32.mrf.mxu0  ;;  %10165 = vst [vmem:[#allocation74_spill] sm:$0xff] %v5956_v8  ;;  %v1553_v7 = vmul.f32 %v5956_v8, %v5956_v8  ;;  %v1491_v8 = vmul.f32 %v5804_v20, %v5471_v26 }
 0x1ad   : > { %1461 = vadd.xlane.f32.xlu0 %v1460_v17  ;;  %v1367_v17 = vpop.f32.mrf.mxu1  ;;  %v5971_v36 = vadd.f32 %v5855_v58, %v469_v9  ;;  %10169 = vst [vmem:[#allocation78_spill] sm:$0xff] %v5988_v63 }
 0x1ae   : > { %v5962_v31 = vadd.f32 %v5908_v47, %v1367_v17 }
 0x1af   : > { %v5942_v51 = vpop.xlane.xlu1 %690  ;;  %v5944_v13 = vpop.xlane.xlu2 %536  ;;  %10167 = vst [vmem:[#allocation76_spill] sm:$0xff] %v5971_v36  ;;  %v565_v9 = vsel %vm274_vm0, %v5971_v36, 0.0 }
 0x1b0   : > { %v5951_v29 = vpop.xlane.xlu0 %2518  ;;  %10166 = vst [vmem:[#allocation75_spill] sm:$0xff] %v5962_v31 }
 0x1b1   : > { %10164 = vst [vmem:[#allocation73_spill] sm:$0xff] %v5951_v29  ;;  %v599_v29 = vmul.f32 %v5471_v26, %v5765_v23 }
 0x1b3   : > { %v5982_v23 = vsub.f32 %v5429_v3, %v599_v29 }
 0x1b4   : > { %717 = vadd.xlane.f32.xlu1 %v716_v40  ;;  %563 = vadd.xlane.f32.xlu2 %v562_v42  ;;  %v472_v17 = vpop.f32.mrf.mxu0  ;;  %v1607_v40 = vsel %vm274_vm0, %v1553_v7, 0.0  ;;  %v2451_v7 = vpop.f32.mrf.mxu2 }
 0x1b5   : > { %2545 = vadd.xlane.f32.xlu0 %v2544_v10  ;;  %v1463_v10 = vsel %vm274_vm0, %v5962_v31, 0.0  ;;  %10168 = vst [vmem:[#allocation77_spill] sm:$0xff] %v5982_v23  ;;  %v5991_v39 = vadd.f32 %v5855_v58, %v472_v17  ;;  %v663_v29 = vmul.f32 %v5982_v23, %v5982_v23  ;;  %v1554_v17 = vmul.f32 %v5988_v63, %v5988_v63  ;;  %v1370_v20 = vpop.f32.mrf.mxu1 }
 0x1b6   : > { %v6018_v36 = vadd.f32 %v5887_v54, %v2451_v7 }
 0x1b7   : > { %v5966_v6 = vpop.xlane.xlu1 %1437  ;;  %v5968_v28 = vpop.xlane.xlu2 %1581  ;;  %10170 = vst [vmem:[#allocation79_spill] sm:$0xff] %v5991_v39  ;;  %v568_v55 = vsel %vm274_vm0, %v5991_v39, 0.0 }
 0x1b8   : > { %v5977_v42 = vpop.xlane.xlu0 %539  ;;  %10173 = vst [vmem:[#allocation82_spill] sm:$0xff] %v6018_v36 }
 0x1bc   : > { %1464 = vadd.xlane.f32.xlu1 %v1463_v10  ;;  %1608 = vadd.xlane.f32.xlu2 %v1607_v40  ;;  %v600_v10 = vmul.f32 %v5471_v26, %v5783_v19  ;;  %v6010_v40 = vsub.f32 %v5452_v52, %v1491_v8  ;;  %v1610_v19 = vsel %vm274_vm0, %v1554_v17, 0.0  ;;  %v6034_v17 = vadd.f32 %v5908_v47, %v1370_v20 }
 0x1bd   : > { %566 = vadd.xlane.f32.xlu0 %v565_v9  ;;  %v719_v9 = vsel %vm274_vm0, %v663_v29, 0.0  ;;  %v2547_v29 = vsel %vm274_vm0, %v6018_v36, 0.0  ;;  %v601_v36 = vmul.f32 %v5471_v26, %v5828_v45 }
 0x1be   : > { %10171 = vst [vmem:[#allocation80_spill] sm:$0xff] %v6010_v40  ;;  %v6014_v23 = vsub.f32 %v5441_v24, %v600_v10  ;;  %v1555_v52 = vmul.f32 %v6010_v40, %v6010_v40  ;;  %v2454_v10 = vpop.f32.mrf.mxu2 }
 0x1bf   : > { %v5995_v31 = vpop.xlane.xlu1 %542  ;;  %v5997_v3 = vpop.xlane.xlu2 %693  ;;  %10175 = vst [vmem:[#allocation84_spill] sm:$0xff] %v6034_v17 }
 0x1c0   : > { %v6003_v1 = vpop.xlane.xlu0 %1584  ;;  %10172 = vst [vmem:[#allocation81_spill] sm:$0xff] %v6014_v23  ;;  %v664_v24 = vmul.f32 %v6014_v23, %v6014_v23  ;;  %v1613_v7 = vsel %vm274_vm0, %v1555_v52, 0.0 }
 0x1c4   : > { %569 = vadd.xlane.f32.xlu1 %v568_v55  ;;  %720 = vadd.xlane.f32.xlu2 %v719_v9  ;;  %v1373_v55 = vpop.f32.mrf.mxu1  ;;  %v722_v9 = vsel %vm274_vm0, %v664_v24, 0.0  ;;  %v1466_v24 = vsel %vm274_vm0, %v6034_v17, 0.0 }
 0x1c5   : > { %1611 = vadd.xlane.f32.xlu0 %v1610_v19  ;;  %v6038_v19 = vadd.f32 %v5887_v54, %v2454_v10  ;;  %v6047_v52 = vadd.f32 %v5908_v47, %v1373_v55  ;;  %v6056_v10 = vsub.f32 %v5474_v32, %v601_v36 }
 0x1c7   : > { %v6020_v39 = vpop.xlane.xlu1 %1587  ;;  %v6022_v63 = vpop.xlane.xlu2 %2521  ;;  %10176 = vst [vmem:[#allocation85_spill] sm:$0xff] %v6038_v19  ;;  %v2550_v20 = vsel %vm274_vm0, %v6038_v19, 0.0  ;;  %v1469_v45 = vsel %vm274_vm0, %v6047_v52, 0.0  ;;  %v665_v36 = vmul.f32 %v6056_v10, %v6056_v10 }
 0x1c8   : > { %10174 = vst [vmem:[#allocation83_spill] sm:$0xff] %v6022_v63  ;;  %v6026_v8 = vpop.xlane.xlu0 %696  ;;  %v475_v63 = vpop.f32.mrf.mxu0 }
 0x1c9   : > { %10178 = vst [vmem:[#allocation87_spill] sm:$0xff] %v6047_v52  ;;  %v6061_v55 = vadd.f32 %v5855_v58, %v475_v63 }
 0x1ca   : > { %10179 = vst [vmem:[#allocation88_spill] sm:$0xff] %v6056_v10 }
 0x1cb   : > { %v571_v63 = vsel %vm274_vm0, %v6061_v55, 0.0 }
 0x1cc   : > { %1614 = vadd.xlane.f32.xlu1 %v1613_v7  ;;  %2548 = vadd.xlane.f32.xlu2 %v2547_v29  ;;  %v2457_v7 = vpop.f32.mrf.mxu2 }
 0x1cd   : > { %723 = vadd.xlane.f32.xlu0 %v722_v9  ;;  %v1492_v9 = vmul.f32 %v5788_v48, %v5471_v26  ;;  %v6070_v32 = vadd.f32 %v5887_v54, %v2457_v7  ;;  %v725_v48 = vsel %vm274_vm0, %v665_v36, 0.0  ;;  %v602_v7 = vmul.f32 %v5471_v26, %v5839_v43 }
 0x1ce   : > { %v1493_v36 = vmul.f32 %v5830_v34, %v5471_v26 }
 0x1cf   : > { %v6042_v23 = vpop.xlane.xlu1 %2524  ;;  %v6044_v40 = vpop.xlane.xlu2 %1440  ;;  %10180 = vst [vmem:[#allocation89_spill] sm:$0xff] %v6070_v32  ;;  %v6079_v52 = vsub.f32 %v5448_v49, %v1492_v9  ;;  %v2553_v17 = vsel %vm274_vm0, %v6070_v32, 0.0  ;;  %v6105_v43 = vsub.f32 %v5483_v60, %v602_v7 }
 0x1d0   : > { %10177 = vst [vmem:[#allocation86_spill] sm:$0xff] %v6042_v23  ;;  %v6049_v29 = vpop.xlane.xlu0 %1443  ;;  %v6111_v32 = vsub.f32 %v5477_v35, %v1493_v36  ;;  %v603_v35 = vmul.f32 %v5471_v26, %v5862_v41 }
 0x1d1   : > { %10182 = vst [vmem:[#allocation91_spill] sm:$0xff] %v6079_v52  ;;  %v1556_v9 = vmul.f32 %v6079_v52, %v6079_v52  ;;  %v1494_v52 = vmul.f32 %v5921_v57, %v5471_v26  ;;  %v666_v7 = vmul.f32 %v6105_v43, %v6105_v43 }
 0x1d2   : > { %10185 = vst [vmem:[#allocation94_spill] sm:$0xff] %v6105_v43  ;;  %v6143_v41 = vsub.f32 %v5502_v25, %v603_v35 }
 0x1d3   : > { %10186 = vst [vmem:[#allocation95_spill] sm:$0xff] %v6111_v32 }
 0x1d4   : > { %2551 = vadd.xlane.f32.xlu1 %v2550_v20  ;;  %1467 = vadd.xlane.f32.xlu2 %v1466_v24  ;;  %v478_v20 = vpop.f32.mrf.mxu0  ;;  %10188 = vst [vmem:[#allocation97_spill] sm:$0xff] %v6143_v41 }
 0x1d5   : > { %1470 = vadd.xlane.f32.xlu0 %v1469_v45  ;;  %v1376_v45 = vpop.f32.mrf.mxu1  ;;  %v6094_v49 = vadd.f32 %v5855_v58, %v478_v20 }
 0x1d6   : > { %v6085_v54 = vadd.f32 %v5908_v47, %v1376_v45 }
 0x1d7   : > { %v6065_v19 = vpop.xlane.xlu1 %699  ;;  %v6067_v23 = vpop.xlane.xlu2 %545  ;;  %10184 = vst [vmem:[#allocation93_spill] sm:$0xff] %v6094_v49  ;;  %v574_v20 = vsel %vm274_vm0, %v6094_v49, 0.0 }
 0x1d8   : > { %v6074_v24 = vpop.xlane.xlu0 %2527  ;;  %10183 = vst [vmem:[#allocation92_spill] sm:$0xff] %v6085_v54 }
 0x1d9   : > { %10181 = vst [vmem:[#allocation90_spill] sm:$0xff] %v6074_v24 }
 0x1dc   : > { %726 = vadd.xlane.f32.xlu1 %v725_v48  ;;  %572 = vadd.xlane.f32.xlu2 %v571_v63  ;;  %v481_v45 = vpop.f32.mrf.mxu0  ;;  %v1616_v48 = vsel %vm274_vm0, %v1556_v9, 0.0  ;;  %v1671_v9 = vmul.f32 %v5892_v38, %v5471_v26  ;;  %v728_v38 = vsel %vm274_vm0, %v666_v7, 0.0 }
 0x1dd   : > { %2554 = vadd.xlane.f32.xlu0 %v2553_v17  ;;  %v1472_v17 = vsel %vm274_vm0, %v6085_v54, 0.0  ;;  %v6114_v34 = vadd.f32 %v5855_v58, %v481_v45  ;;  %v1670_v58 = vmul.f32 %v5870_v16, %v5471_v26  ;;  %v1379_v45 = vpop.f32.mrf.mxu1 }
 0x1de   : > { %v6149_v49 = vadd.f32 %v5908_v47, %v1379_v45  ;;  %v1496_v47 = vmul.f32 %v5966_v6, %v5471_v26 }
 0x1df   : > { %v6089_v24 = vpop.xlane.xlu1 %1446  ;;  %v6091_v10 = vpop.xlane.xlu2 %1590  ;;  %v577_v57 = vsel %vm274_vm0, %v6114_v34, 0.0  ;;  %v6145_v16 = vadd.f32 1e-05, %v1670_v58 }
 0x1e0   : > { %v6100_v63 = vpop.xlane.xlu0 %548  ;;  %v6181_v6 = vsub.f32 %v5585_v12, %v1496_v47 }
 0x1e1   : > { %vm1740_vm6 = vweird.f32 %v6145_v16 }
 0x1e2   : > { %10192 = vst [vmem:[#allocation101_spill] sm:$0xff] %v6181_v6 }
 0x1e4   : > { %1473 = vadd.xlane.f32.xlu1 %v1472_v17  ;;  %1617 = vadd.xlane.f32.xlu2 %v1616_v48  ;;  %v1557_v17 = vmul.f32 %v6111_v32, %v6111_v32  ;;  %v6137_v48 = vsub.f32 %v5538_v5, %v1494_v52  ;;  %v1495_v5 = vmul.f32 %v5926_v37, %v5471_v26  ;;  %v1475_v37 = vsel %vm274_vm0, %v6149_v49, 0.0 }
 0x1e5   : > { %575 = vadd.xlane.f32.xlu0 %v574_v20  ;;  %v6140_v20 = vadd.f32 1e-05, %v1671_v9  ;;  %v604_v52 = vmul.f32 %v5471_v26, %v5944_v13  ;;  %v667_v13 = vmul.f32 %v6143_v41, %v6143_v41 }
 0x1e6   : > { %10187 = vst [vmem:[#allocation96_spill] sm:$0xff] %v6137_v48  ;;  %v1619_v43 = vsel %vm274_vm0, %v1557_v17, 0.0  ;;  %v1558_v25 = vmul.f32 %v6137_v48, %v6137_v48 }
 0x1e7   : > { %v6118_v54 = vpop.xlane.xlu1 %551  ;;  %v6120_v60 = vpop.xlane.xlu2 %702  ;;  %4638 = vrsqrt.f32 %v6140_v20  ;;  %v6175_v58 = vsub.f32 %v5563_v59, %v604_v52  ;;  %v731_v45 = vsel %vm274_vm0, %v667_v13, 0.0  ;;  %v1497_v52 = vmul.f32 %v6044_v40, %v5471_v26 }
 0x1e8   : > { %v6130_v36 = vpop.xlane.xlu0 %1593  ;;  %4640 = vrsqrt.f32 %v6145_v16  ;;  %v1622_v17 = vsel %vm274_vm0, %v1558_v25, 0.0  ;;  %v606_v13 = vmul.f32 %v5471_v26, %v5995_v31  ;;  %vm1750_vm4 = vweird.f32 %v6140_v20 }
 0x1e9   : > { %10191 = vst [vmem:[#allocation100_spill] sm:$0xff] %v6175_v58  ;;  %v668_v47 = vmul.f32 %v6175_v58, %v6175_v58 }
 0x1ea   : > { %v6223_v58 = vsub.f32 %v5613_v61, %v606_v13 }
 0x1eb   : > { %v734_v31 = vsel %vm274_vm0, %v668_v47, 0.0 }
 0x1ec   : > { %578 = vadd.xlane.f32.xlu1 %v577_v57  ;;  %729 = vadd.xlane.f32.xlu2 %v728_v38  ;;  %v1672_v57 = vmul.f32 %v5968_v28, %v5471_v26  ;;  %v605_v28 = vmul.f32 %v5471_v26, %v5977_v42  ;;  %v1560_v42 = vmul.f32 %v6181_v6, %v6181_v6 }
 0x1ed   : > { %1620 = vadd.xlane.f32.xlu0 %v1619_v43  ;;  %v6172_v43 = vsub.f32 %v5548_v50, %v1495_v5  ;;  %v6184_v38 = vpop.eup %4638  ;;  %10196 = vst [vmem:[#allocation105_spill] sm:$0xff] %v6223_v58 }
 0x1ee   : > { %v6188_v59 = vpop.eup %4640  ;;  %v6190_v5 = vadd.f32 1e-05, %v1672_v57  ;;  %v1628_v41 = vsel %vm274_vm0, %v1560_v42, 0.0  ;;  %vm1751_vm2 = vweird.f32 %v6184_v38 }
 0x1ef   : > { %v6155_v7 = vpop.xlane.xlu1 %1596  ;;  %v6157_v9 = vpop.xlane.xlu2 %2530  ;;  %10190 = vst [vmem:[#allocation99_spill] sm:$0xff] %v6172_v43  ;;  %v1559_v50 = vmul.f32 %v6172_v43, %v6172_v43  ;;  %v1735_v40 = vmul.f32 %v6188_v59, %v6145_v16  ;;  %vm1741_vm3 = vweird.f32 %v6188_v59  ;;  %vm1752_vm5 = vmor %vm1750_vm4, %vm1751_vm2 }
 0x1f0   : > { %10189 = vst [vmem:[#allocation98_spill] sm:$0xff] %v6157_v9  ;;  %v6165_v35 = vpop.xlane.xlu0 %705  ;;  %4642 = vrsqrt.f32 %v6190_v5  ;;  %vm1742_vm7 = vmor %vm1740_vm6, %vm1741_vm3  ;;  %vm1760_vm9 = vweird.f32 %v6190_v5 }
 0x1f4   : > { %1623 = vadd.xlane.f32.xlu1 %v1622_v17  ;;  %1476 = vadd.xlane.f32.xlu2 %v1475_v37  ;;  %v1745_v37 = vmul.f32 %v6184_v38, %v6140_v20  ;;  %v1625_v17 = vsel %vm274_vm0, %v1559_v50, 0.0  ;;  %v1736_v50 = vmul.f32 %v6188_v59, %v1735_v40 }
 0x1f5   : > { %732 = vadd.xlane.f32.xlu0 %v731_v45  ;;  %v6215_v45 = vsub.f32 %v5591_v53, %v605_v28  ;;  %v607_v53 = vmul.f32 %v5471_v26, %v6067_v23 }
 0x1f6   : > { %v1746_v9 = vmul.f32 %v6184_v38, %v1745_v37  ;;  %v4643_v61 = vpop.eup %4642  ;;  %v1737_v42 = vmul.f32 0.5, %v1736_v50 }
 0x1f7   : > { %v6196_v12 = vpop.xlane.xlu1 %2533  ;;  %v6198_v25 = vpop.xlane.xlu2 %1449  ;;  %10194 = vst [vmem:[#allocation103_spill] sm:$0xff] %v6215_v45  ;;  %v669_v47 = vmul.f32 %v6215_v45, %v6215_v45  ;;  %v6242_v23 = vsub.f32 %v5679_v2, %v607_v53  ;;  %vm1761_vm8 = vweird.f32 %v4643_v61 }
 0x1f8   : > { %10193 = vst [vmem:[#allocation102_spill] sm:$0xff] %v6196_v12  ;;  %v6206_v57 = vpop.xlane.xlu0 %1452  ;;  %v6218_v12 = vsub.f32 %v5655_v46, %v1497_v52  ;;  %v1747_v37 = vmul.f32 0.5, %v1746_v9  ;;  %vm1762_vm10 = vmor %vm1760_vm9, %vm1761_vm8 }
 0x1f9   : > { %10198 = vst [vmem:[#allocation107_spill] sm:$0xff] %v6242_v23  ;;  %v671_v2 = vmul.f32 %v6242_v23, %v6242_v23 }
 0x1fa   : > { %10195 = vst [vmem:[#allocation104_spill] sm:$0xff] %v6218_v12  ;;  %v1561_v52 = vmul.f32 %v6218_v12, %v6218_v12  ;;  %v1748_v45 = vsub.f32 1.5, %v1747_v37  ;;  %v609_v12 = vmul.f32 %v5471_v26, %v6118_v54  ;;  %v1500_v54 = vmul.f32 %v6198_v25, %v5471_v26 }
 0x1fb   : > { %v743_v37 = vsel %vm274_vm0, %v671_v2, 0.0 }
 0x1fc   : > { %735 = vadd.xlane.f32.xlu1 %v734_v31  ;;  %1626 = vadd.xlane.f32.xlu2 %v1625_v17  ;;  %v1631_v40 = vsel %vm274_vm0, %v1561_v52, 0.0  ;;  %v737_v17 = vsel %vm274_vm0, %v669_v47, 0.0  ;;  %v1755_v31 = vmul.f32 %v4643_v61, %v6190_v5  ;;  %v1749_v53 = vmul.f32 %v6184_v38, %v1748_v45 }
 0x1fd   : > { %1629 = vadd.xlane.f32.xlu0 %v1628_v41  ;;  %v670_v41 = vmul.f32 %v6223_v58, %v6223_v58 }
 0x1fe   : > { %v1756_v50 = vmul.f32 %v4643_v61, %v1755_v31 }
 0x1ff   : > { %v6229_v28 = vpop.xlane.xlu1 %708  ;;  %v6231_v46 = vpop.xlane.xlu2 %554  ;;  %v740_v9 = vsel %vm274_vm0, %v670_v41, 0.0 }
 0x200   : > { %v6237_v13 = vpop.xlane.xlu0 %2536  ;;  %v1757_v41 = vmul.f32 0.5, %v1756_v50 }
 0x201   : > { %10197 = vst [vmem:[#allocation106_spill] sm:$0xff] %v6237_v13  ;;  %v1738_v13 = vsub.f32 1.5, %v1737_v42  ;;  %v1753_v42 = vsel %vm1752_vm5, %v6184_v38, %v1749_v53 }
 0x202   : > { %v2055_v31 = vmul.f32 %v1753_v42, %v5517_v18 }
 0x203   : > { %v1739_v47 = vmul.f32 %v6188_v59, %v1738_v13 }
 0x204   : > { %1632 = vadd.xlane.f32.xlu1 %v1631_v40  ;;  %738 = vadd.xlane.f32.xlu2 %v737_v17  ;;  %v1758_v17 = vsub.f32 1.5, %v1757_v41 }
 0x205   : > { %741 = vadd.xlane.f32.xlu0 %v740_v9  ;;  %v1743_v13 = vsel %vm1742_vm7, %v6188_v59, %v1739_v47  ;;  %v6275_v9 = vld [vmem:[%s9959_s3] ss:$0 sm:$0xff] }
 0x206   : > { %v2054_v16 = vmul.f32 %v1743_v13, %v5499_v14  ;;  %v1759_v38 = vmul.f32 %v4643_v61, %v1758_v17  ;;  %v2087_v2 = vmul.f32 %v6275_v9, %v2055_v31  ;;  %v6283_v59 = vld [vmem:[%s9960_s4] ss:$0 sm:$0xff] }
 0x207   : > { %v6248_v43 = vpop.xlane.xlu1 %1455  ;;  %v6250_v58 = vpop.xlane.xlu2 %1599 }
 0x208   : > { %v6256_v52 = vpop.xlane.xlu0 %557  ;;  %v2086_v18 = vmul.f32 %v6275_v9, %v2054_v16  ;;  %v2119_v14 = vadd.f32 %v6283_v59, %v2087_v2  ;;  %v1763_v47 = vsel %vm1762_vm10, %v4643_v61, %v1759_v38 }
 0x209   : > { %v2056_v41 = vmul.f32 %v1763_v47, %v5579_v62  ;;  %v1674_v62 = vmul.f32 %v6020_v39, %v5471_v26  ;;  %v1498_v39 = vmul.f32 %v6049_v29, %v5471_v26 }
 0x20a   : > { %v2118_v5 = vadd.f32 %v6283_v59, %v2086_v18 }
 0x20b   : > { %v2088_v17 = vmul.f32 %v6275_v9, %v2056_v41  ;;  %v1673_v41 = vmul.f32 %v6003_v1, %v5471_v26 }
 0x20c   : > { %744 = vadd.xlane.f32.xlu1 %v743_v37 }
 0x20d   : > { %v2120_v61 = vadd.f32 %v6283_v59, %v2088_v17  ;;  %v6322_v17 = vadd.f32 1e-05, %v1673_v41  ;;  %v6339_v41 = vsub.f32 %v5665_v0, %v1498_v39 }
 0x20f   : > { %v6264_v45 = vpop.xlane.xlu1 %560  ;;  %v6266_v40 = vpop.xlane.xlu2 %711  ;;  %10204 = vst [vmem:[#allocation113_spill] sm:$0xff] %v6339_v41  ;;  %v1562_v0 = vmul.f32 %v6339_v41, %v6339_v41  ;;  %vm1770_vm15 = vweird.f32 %v6322_v17 }
 0x210   : > { %v6270_v20 = vpop.xlane.xlu0 %1602 }
 0x211   : > { %v1634_v41 = vsel %vm274_vm0, %v1562_v0, 0.0 }
 0x217   : > { %v6286_v50 = vpop.xlane.xlu1 %1605  ;;  %v6288_v53 = vpop.xlane.xlu2 %2539 }
 0x218   : > { %10199 = vst [vmem:[#allocation108_spill] sm:$0xff] %v6288_v53  ;;  %v6291_v37 = vpop.xlane.xlu0 %714 }
 0x219   : > { %2184 = vrot.lane.b32.xlu0 %v2119_v14, %s5005_s25 }
 0x21c   : > { %2182 = vrot.lane.b32.xlu2 %v2118_v5, %s5005_s25  ;;  %v1706_v5 = vadd.f32 1e-05, %v1674_v62 }
 0x21e   : > { %4644 = vrsqrt.f32 %v1706_v5  ;;  %vm1780_vm12 = vweird.f32 %v1706_v5 }
 0x21f   : > { %v6297_v42 = vpop.xlane.xlu1 %2542  ;;  %v6299_v13 = vpop.xlane.xlu2 %1458  ;;  %4646 = vrsqrt.f32 %v6322_v17 }
 0x220   : > { %10200 = vst [vmem:[#allocation109_spill] sm:$0xff] %v6297_v42  ;;  %v6302_v31 = vpop.xlane.xlu0 %1461 }
 0x224   : > { %v4645_v1 = vpop.eup %4644 }
 0x225   : > { %2186 = vrot.lane.b32.xlu1 %v2120_v61, %s5005_s25  ;;  %v1499_v61 = vmul.f32 %v6089_v24, %v5471_v26  ;;  %v1676_v24 = vmul.f32 %v6130_v36, %v5471_v26  ;;  %vm1781_vm11 = vweird.f32 %v4645_v1 }
 0x226   : > { %vm1782_vm13 = vmor %vm1780_vm12, %vm1781_vm11  ;;  %vm2310_vm11 = vcmask 523264  }
 0x227   : > { %v6306_v16 = vpop.xlane.xlu1 %717  ;;  %v6308_v38 = vpop.xlane.xlu2 %563  ;;  %v6336_v62 = vsub.f32 %v5703_v4, %v1499_v61  ;;  %v608_v4 = vmul.f32 %v5471_v26, %v6100_v63  ;;  %v6357_v36 = vadd.f32 1e-05, %v1676_v24  ;;  %v6372_v24 = vsub.f32 %v5773_v11, %v1500_v54 }
 0x228   : > { %10201 = vst [vmem:[#allocation110_spill] sm:$0xff] %v6306_v16  ;;  %v6310_v2 = vpop.xlane.xlu0 %2545  ;;  %v4647_v61 = vpop.eup %4646 }
 0x229   : > { %10202 = vst [vmem:[#allocation111_spill] sm:$0xff] %v6310_v2  ;;  %v1775_v2 = vmul.f32 %v4645_v1, %v1706_v5  ;;  %v1563_v48 = vmul.f32 %v6336_v62, %v6336_v62  ;;  %v1765_v32 = vmul.f32 %v4647_v61, %v6322_v17  ;;  %v6367_v63 = vsub.f32 %v5711_v15, %v608_v4 }
 0x22a   : > { %10203 = vst [vmem:[#allocation112_spill] sm:$0xff] %v6336_v62  ;;  %4648 = vrsqrt.f32 %v6357_v36  ;;  %v1564_v11 = vmul.f32 %v6372_v24, %v6372_v24  ;;  %vm1771_vm14 = vweird.f32 %v4647_v61  ;;  %vm1800_vm3 = vweird.f32 %v6357_v36 }
 0x22b   : > { %v1776_v16 = vmul.f32 %v4645_v1, %v1775_v2  ;;  %v1637_v62 = vsel %vm274_vm0, %v1563_v48, 0.0  ;;  %10207 = vst [vmem:[#allocation116_spill] sm:$0xff] %v6367_v63  ;;  %v1766_v48 = vmul.f32 %v4647_v61, %v1765_v32  ;;  %v672_v15 = vmul.f32 %v6367_v63, %v6367_v63  ;;  %vm1772_vm1 = vmor %vm1770_vm15, %vm1771_vm14 }
 0x22c   : > { %10208 = vst [vmem:[#allocation117_spill] sm:$0xff] %v6372_v24  ;;  %v10217_v24 = vld [vmem:[#allocation21_spill] sm:$0xff] }
 0x22d   : > { %v1777_v25 = vmul.f32 0.5, %v1776_v16  ;;  %v1767_v54 = vmul.f32 0.5, %v1766_v48  ;;  %v746_v32 = vsel %vm274_vm0, %v672_v15, 0.0 }
 0x22f   : > { %v6314_v18 = vpop.xlane.xlu1 %1464  ;;  %v6316_v14 = vpop.xlane.xlu2 %1608  ;;  %v1778_v16 = vsub.f32 1.5, %v1777_v25  ;;  %v1768_v48 = vsub.f32 1.5, %v1767_v54 }
 0x230   : > { %v6318_v47 = vpop.xlane.xlu0 %566  ;;  %v4649_v0 = vpop.eup %4648 }
 0x231   : > { %v1779_v63 = vmul.f32 %v4645_v1, %v1778_v16  ;;  %v1795_v25 = vmul.f32 %v4649_v0, %v6357_v36  ;;  %v1769_v16 = vmul.f32 %v4647_v61, %v1768_v48  ;;  %vm1801_vm2 = vweird.f32 %v4649_v0 }
 0x232   : > { %vm1802_vm4 = vmor %vm1800_vm3, %vm1801_vm2 }
 0x237   : > { %v6326_v42 = vpop.xlane.xlu1 %569  ;;  %v6328_v23 = vpop.xlane.xlu2 %720 }
 0x238   : > { %v6332_v53 = vpop.xlane.xlu0 %1611 }
 0x23f   : > { %v6345_v6 = vpop.xlane.xlu1 %1614  ;;  %v6347_v29 = vpop.xlane.xlu2 %2548 }
 0x240   : > { %10205 = vst [vmem:[#allocation114_spill] sm:$0xff] %v6347_v29  ;;  %v6355_v39 = vpop.xlane.xlu0 %723  ;;  %v6362_v29 = vsub.f32 %v5731_v56, %v609_v12 }
 0x242   : > { %10206 = vst [vmem:[#allocation115_spill] sm:$0xff] %v6362_v29  ;;  %v673_v56 = vmul.f32 %v6362_v29, %v6362_v29 }
 0x243   : > { %1638 = vadd.xlane.f32.xlu0 %v1637_v62 }
 0x244   : > { %v749_v4 = vsel %vm274_vm0, %v673_v56, 0.0 }
 0x245   : > { %1635 = vadd.xlane.f32.xlu2 %v1634_v41  ;;  %v610_v41 = vmul.f32 %v5471_v26, %v6231_v46  ;;  %v779_v46 = vmul.f32 %v5864_v21, %v5471_v26  ;;  %v1783_v21 = vsel %vm1782_vm13, %v4645_v1, %v1779_v63  ;;  %v780_v1 = vmul.f32 %v5898_v22, %v5471_v26 }
 0x246   : > { %v2058_v54 = vmul.f32 %v1783_v21, %v5628_v44 }
 0x247   : > { %v6374_v2 = vpop.xlane.xlu2 %1467  ;;  %v6380_v12 = vpop.xlane.xlu1 %2551  ;;  %v6391_v29 = vsub.f32 %v5800_v30, %v610_v41  ;;  %v811_v41 = vadd.f32 1e-05, %v779_v46 }
 0x248   : > { %10209 = vst [vmem:[#allocation118_spill] sm:$0xff] %v6380_v12  ;;  %v6382_v62 = vpop.xlane.xlu0 %1470  ;;  %v1640_v12 = vsel %vm274_vm0, %v1564_v11, 0.0  ;;  %v1796_v11 = vmul.f32 %v4649_v0, %v1795_v25  ;;  %v2090_v46 = vmul.f32 %v6275_v9, %v2058_v54  ;;  %v781_v54 = vmul.f32 %v5942_v51, %v5471_v26 }
 0x249   : > { %10210 = vst [vmem:[#allocation119_spill] sm:$0xff] %v6391_v29  ;;  %v674_v30 = vmul.f32 %v6391_v29, %v6391_v29  ;;  %4650 = vrsqrt.f32 %v811_v41  ;;  %v1773_v29 = vsel %vm1772_vm1, %v4647_v61, %v1769_v16  ;;  %vm849_vm6 = vweird.f32 %v811_v41 }
 0x24a   : > { %v1797_v5 = vmul.f32 0.5, %v1796_v11  ;;  %v2057_v25 = vmul.f32 %v1773_v29, %v5610_v33  ;;  %v2122_v44 = vadd.f32 %v6283_v59, %v2090_v46  ;;  %v812_v11 = vadd.f32 1e-05, %v780_v1 }
 0x24b   : > { %750 = vadd.xlane.f32.xlu0 %v749_v4 }
 0x24c   : > { %v1798_v63 = vsub.f32 1.5, %v1797_v5  ;;  %v2089_v61 = vmul.f32 %v6275_v9, %v2057_v25  ;;  %4652 = vrsqrt.f32 %v812_v11  ;;  %vm859_vm9 = vweird.f32 %v812_v11 }
 0x24d   : > { %747 = vadd.xlane.f32.xlu2 %v746_v32 }
 0x24e   : > { %v1799_v21 = vmul.f32 %v4649_v0, %v1798_v63  ;;  %v2121_v22 = vadd.f32 %v6283_v59, %v2089_v61 }
 0x24f   : > { %1641 = vadd.xlane.f32.xlu1 %v1640_v12  ;;  %v6397_v56 = vpop.xlane.xlu2 %572  ;;  %v6403_v4 = vpop.xlane.xlu1 %726  ;;  %v752_v12 = vsel %vm274_vm0, %v674_v30, 0.0 }
 0x250   : > { %v6399_v15 = vpop.xlane.xlu0 %2554  ;;  %10212 = vst [vmem:[#allocation121_spill] sm:$0xff] %v6403_v4  ;;  %v4651_v48 = vpop.eup %4650  ;;  %v1803_v33 = vsel %vm1802_vm4, %v4649_v0, %v1799_v21 }
 0x251   : > { %10211 = vst [vmem:[#allocation120_spill] sm:$0xff] %v6399_v15  ;;  %v844_v16 = vmul.f32 %v4651_v48, %v811_v41  ;;  %v2060_v5 = vmul.f32 %v1803_v33, %v5728_v27  ;;  %vm850_vm5 = vweird.f32 %v4651_v48 }
 0x252   : > { %v4653_v25 = vpop.eup %4652  ;;  %vm851_vm7 = vmor %vm849_vm6, %vm850_vm5 }
 0x253   : > { %v845_v29 = vmul.f32 %v4651_v48, %v844_v16  ;;  %v2092_v0 = vmul.f32 %v6275_v9, %v2060_v5  ;;  %v854_v61 = vmul.f32 %v4653_v25, %v812_v11  ;;  %v1677_v5 = vmul.f32 %v6155_v7, %v5471_v26 }
 0x254   : > { %vm860_vm8 = vweird.f32 %v4653_v25 }
 0x255   : > { %v846_v36 = vmul.f32 0.5, %v845_v29  ;;  %v2124_v51 = vadd.f32 %v6283_v59, %v2092_v0  ;;  %v855_v33 = vmul.f32 %v4653_v25, %v854_v61  ;;  %v6457_v15 = vadd.f32 1e-05, %v1677_v5  ;;  %vm861_vm10 = vmor %vm859_vm9, %vm860_vm8 }
 0x257   : > { %753 = vadd.xlane.f32.xlu1 %v752_v12  ;;  %v6408_v32 = vpop.xlane.xlu2 %1617  ;;  %v6416_v30 = vpop.xlane.xlu1 %1473  ;;  %v847_v21 = vsub.f32 1.5, %v846_v36  ;;  %vm1810_vm4 = vweird.f32 %v6457_v15 }
 0x258   : > { %v6414_v17 = vpop.xlane.xlu0 %575 }
 0x259   : > { %v848_v27 = vmul.f32 %v4651_v48, %v847_v21  ;;  %v856_v21 = vmul.f32 0.5, %v855_v33 }
 0x25b   : > { %v852_v0 = vsel %vm851_vm7, %v4651_v48, %v848_v27 }
 0x25f   : > { %v6419_v12 = vpop.xlane.xlu2 %729  ;;  %2190 = vrot.lane.b32.xlu0 %v2122_v44, %s5005_s25  ;;  %v6431_v1 = vpop.xlane.xlu1 %578  ;;  %v6435_v44 = vadd.f32 1e-05, %v781_v54  ;;  %v1675_v54 = vmul.f32 %v6091_v10, %v5471_v26  ;;  %v1163_v10 = vmul.f32 %v852_v0, %v10217_v24  ;;  %v1502_v24 = vmul.f32 %v6248_v43, %v5471_v26 }
 0x260   : > { %10213 = vst [vmem:[#allocation122_spill] sm:$0xff] %v6419_v12  ;;  %v6429_v46 = vpop.xlane.xlu0 %1620 }
 0x261   : > { %4654 = vrsqrt.f32 %v6435_v44  ;;  %v6453_v61 = vadd.f32 1e-05, %v1675_v54  ;;  %v1195_v33 = vmul.f32 %v6275_v9, %v1163_v10  ;;  %v1501_v10 = vmul.f32 %v6206_v57, %v5471_v26 }
 0x262   : > { %vm869_vm13 = vweird.f32 %v6435_v44 }
 0x263   : > { %4656 = vrsqrt.f32 %v6453_v61  ;;  %v1227_v0 = vadd.f32 %v6283_v59, %v1195_v33  ;;  %vm1790_vm2 = vweird.f32 %v6453_v61 }
 0x264   : > { %4658 = vrsqrt.f32 %v6457_v15 }
 0x265   : > { %2188 = vrot.lane.b32.xlu2 %v2121_v22, %s5005_s25 }
 0x267   : > { %v6433_v63 = vpop.xlane.xlu2 %1476  ;;  %v6445_v29 = vpop.xlane.xlu1 %1623 }
 0x268   : > { %v6442_v22 = vpop.xlane.xlu0 %732  ;;  %v6451_v36 = vpop.eup %4654 }
 0x269   : > { %10215 = vst [vmem:[#allocation124_spill] sm:$0xff] %v6442_v22  ;;  %v857_v22 = vsub.f32 1.5, %v856_v21  ;;  %vm870_vm12 = vweird.f32 %v6451_v36 }
 0x26a   : > { %vm871_vm14 = vmor %vm869_vm13, %vm870_vm12 }
 0x26b   : > { %v858_v54 = vmul.f32 %v4653_v25, %v857_v22 }
 0x26f   : > { %v6440_v16 = vpop.xlane.xlu2 %1626  ;;  %v6468_v27 = vpop.xlane.xlu1 %735 }
 0x270   : > { %10214 = vst [vmem:[#allocation123_spill] sm:$0xff] %v6440_v16  ;;  %2194 = vrot.lane.b32.xlu1 %v2124_v51, %s5005_s25  ;;  %v864_v51 = vmul.f32 %v6451_v36, %v6435_v44  ;;  %v6464_v7 = vpop.xlane.xlu0 %1629 }
 0x271   : > { %10218 = vst [vmem:[#allocation21_spill] sm:$0xff] %v6468_v27  ;;  %v10219_v27 = vld [vmem:[#allocation57_spill] sm:$0xff] }
 0x272   : > { %v865_v48 = vmul.f32 %v6451_v36, %v864_v51  ;;  %v6476_v51 = vpop.eup %4656  ;;  %v6483_v4 = vsub.f32 %v10219_v27, %v1502_v24  ;;  %v612_v24 = vmul.f32 %v5471_v26, %v6264_v45  ;;  %v10225_v45 = vld [vmem:[#allocation61_spill] sm:$0xff] }
 0x273   : > { %v6480_v22 = vpop.eup %4658  ;;  %vm1791_vm15 = vweird.f32 %v6476_v51 }
 0x274   : > { %v866_v5 = vmul.f32 0.5, %v865_v48  ;;  %10220 = vst [vmem:[#allocation57_spill] sm:$0xff] %v6483_v4  ;;  %v10221_v48 = vld [vmem:[#allocation23_spill] sm:$0xff]  ;;  %v1805_v57 = vmul.f32 %v6480_v22, %v6457_v15  ;;  %vm1811_vm1 = vweird.f32 %v6480_v22  ;;  %vm1792_vm3 = vmor %vm1790_vm2, %vm1791_vm15 }
 0x275   : > { %vm1812_vm5 = vmor %vm1810_vm4, %vm1811_vm1 }
 0x276   : > { %v867_v11 = vsub.f32 1.5, %v866_v5  ;;  %v1566_v5 = vmul.f32 %v6483_v4, %v6483_v4 }
 0x277   : > { %v6459_v41 = vpop.xlane.xlu2 %738 }
 0x278   : > { %10216 = vst [vmem:[#allocation125_spill] sm:$0xff] %v6459_v41  ;;  %v862_v41 = vsel %vm861_vm10, %v4653_v25, %v858_v54  ;;  %v1785_v25 = vmul.f32 %v6476_v51, %v6453_v61  ;;  %v10222_v54 = vld [vmem:[#allocation51_spill] sm:$0xff]  ;;  %v6498_v27 = vpop.xlane.xlu0 %741  ;;  %v1646_v4 = vsel %vm274_vm0, %v1566_v5, 0.0 }
 0x279   : > { %v1164_v33 = vmul.f32 %v862_v41, %v10221_v48  ;;  %v6496_v12 = vsub.f32 %v10222_v54, %v1501_v10  ;;  %10224 = vst [vmem:[#allocation51_spill] sm:$0xff] %v6498_v27  ;;  %v868_v41 = vmul.f32 %v6451_v36, %v867_v11  ;;  %v1806_v10 = vmul.f32 %v6480_v22, %v1805_v57 }
 0x27a   : > { %v6515_v54 = vsub.f32 %v10225_v45, %v612_v24  ;;  %v1679_v11 = vmul.f32 %v6270_v20, %v5471_v26  ;;  %v1503_v24 = vmul.f32 %v6299_v13, %v5471_v26 }
 0x27b   : > { %10223 = vst [vmem:[#allocation23_spill] sm:$0xff] %v6496_v12  ;;  %v1565_v48 = vmul.f32 %v6496_v12, %v6496_v12  ;;  %v1807_v27 = vmul.f32 0.5, %v1806_v10 }
 0x27c   : > { %v1711_v16 = vadd.f32 1e-05, %v1679_v11  ;;  %v676_v20 = vmul.f32 %v6515_v54, %v6515_v54 }
 0x27d   : > { %v1643_v44 = vsel %vm274_vm0, %v1565_v48, 0.0 }
 0x27e   : > { %4660 = vrsqrt.f32 %v1711_v16  ;;  %v758_v13 = vsel %vm274_vm0, %v676_v20, 0.0  ;;  %vm1830_vm7 = vweird.f32 %v1711_v16 }
 0x27f   : > { %v2183_v21 = vpop.permute.xlu2 %2182 }
 0x280   : > { %v2278_v43 = vsel %vm274_vm0, %v1227_v0, %v2183_v21  ;;  %v6502_v0 = vpop.xlane.xlu1 %1632  ;;  %v1196_v21 = vmul.f32 %v6275_v9, %v1164_v33  ;;  %v872_v33 = vsel %vm871_vm14, %v6451_v36, %v868_v41 }
 0x281   : > { %2311 = vst.msk [vmem:[%s6486_s6] sm:$0xff] %vm2310_vm11, %v2278_v43  ;;  %v1786_v43 = vmul.f32 %v6476_v51, %v1785_v25 }
 0x282   : > { %v1228_v25 = vadd.f32 %v6283_v59, %v1196_v21  ;;  %v1808_v21 = vsub.f32 1.5, %v1807_v27  ;;  %v613_v27 = vmul.f32 %v5471_v26, %v6308_v38 }
 0x283   : > { %v1787_v57 = vmul.f32 0.5, %v1786_v43  ;;  %v10227_v43 = vld [vmem:[#allocation66_spill] sm:$0xff] }
 0x284   : > { %v6534_v10 = vsub.f32 %v10227_v43, %v1503_v24  ;;  %v1809_v11 = vmul.f32 %v6480_v22, %v1808_v21  ;;  %v10229_v21 = vld [vmem:[#allocation41_spill] sm:$0xff]  ;;  %v10230_v43 = vld [vmem:[#allocation46_spill] sm:$0xff] }
 0x285   : > { %v1788_v41 = vsub.f32 1.5, %v1787_v57  ;;  %v4661_v57 = vpop.eup %4660 }
 0x286   : > { %v1813_v20 = vsel %vm1812_vm5, %v6480_v22, %v1809_v11  ;;  %v783_v11 = vmul.f32 %v6026_v8, %v5471_v26  ;;  %vm1831_vm6 = vweird.f32 %v4661_v57 }
 0x287   : > { %v1789_v48 = vmul.f32 %v6476_v51, %v1788_v41  ;;  %v1825_v41 = vmul.f32 %v4661_v57, %v1711_v16  ;;  %vm1832_vm8 = vmor %vm1830_vm7, %vm1831_vm6 }
 0x288   : > { %v6531_v5 = vpop.xlane.xlu1 %744 }
 0x289   : > { %1647 = vadd.xlane.f32.xlu0 %v1646_v4  ;;  %v10226_v4 = vld [vmem:[#allocation28_spill] sm:$0xff]  ;;  %v1793_v38 = vsel %vm1792_vm3, %v6476_v51, %v1789_v48  ;;  %v1826_v51 = vmul.f32 %v4661_v57, %v1825_v41 }
 0x28a   : > { %v1165_v36 = vmul.f32 %v872_v33, %v10226_v4  ;;  %v1567_v33 = vmul.f32 %v6534_v10, %v6534_v10  ;;  %v10228_v4 = vld [vmem:[#allocation71_spill] sm:$0xff]  ;;  %v2059_v15 = vmul.f32 %v1793_v38, %v10229_v21 }
 0x28b   : > { %v2185_v12 = vpop.permute.xlu0 %2184 }
 0x28c   : > { %v2279_v45 = vsel %vm274_vm0, %v1228_v25, %v2185_v12  ;;  %v1197_v12 = vmul.f32 %v6275_v9, %v1165_v36  ;;  %v6555_v36 = vsub.f32 %v10228_v4, %v613_v27  ;;  %v1649_v61 = vsel %vm274_vm0, %v1567_v33, 0.0 }
 0x28d   : > { %2312 = vst.msk [vmem:[%s6486_s6 + $0x8] sm:$0xff] %vm2310_vm11, %v2279_v45  ;;  %v2091_v48 = vmul.f32 %v6275_v9, %v2059_v15  ;;  %v1827_v33 = vmul.f32 0.5, %v1826_v51  ;;  %v785_v15 = vmul.f32 %v6120_v60, %v5471_v26  ;;  %v1680_v60 = vmul.f32 %v6286_v50, %v5471_v26 }
 0x28e   : > { %1644 = vadd.xlane.f32.xlu2 %v1643_v44  ;;  %v1229_v25 = vadd.f32 %v6283_v59, %v1197_v12  ;;  %v782_v44 = vmul.f32 %v5997_v3, %v5471_v26  ;;  %v677_v12 = vmul.f32 %v6555_v36, %v6555_v36 }
 0x28f   : > { %v1828_v38 = vsub.f32 1.5, %v1827_v33 }
 0x290   : > { %v814_v3 = vadd.f32 1e-05, %v782_v44  ;;  %v761_v27 = vsel %vm274_vm0, %v677_v12, 0.0  ;;  %v2123_v44 = vadd.f32 %v6283_v59, %v2091_v48 }
 0x291   : > { %759 = vadd.xlane.f32.xlu0 %v758_v13  ;;  %v2061_v13 = vmul.f32 %v1813_v20, %v10230_v43  ;;  %v1829_v4 = vmul.f32 %v4661_v57, %v1828_v38  ;;  %v10231_v43 = vld [vmem:[#allocation60_spill] sm:$0xff] }
 0x292   : > { %4662 = vrsqrt.f32 %v814_v3  ;;  %vm879_vm10 = vweird.f32 %v814_v3 }
 0x293   : > { %v2093_v22 = vmul.f32 %v6275_v9, %v2061_v13 }
 0x297   : > { %v2187_v24 = vpop.permute.xlu1 %2186 }
 0x298   : > { %v2280_v45 = vsel %vm274_vm0, %v1229_v25, %v2187_v24  ;;  %v2125_v25 = vadd.f32 %v6283_v59, %v2093_v22  ;;  %v4663_v24 = vpop.eup %4662  ;;  %v6576_v22 = vadd.f32 1e-05, %v785_v15 }
 0x299   : > { %2313 = vst.msk [vmem:[%s6486_s6 + $0x20] sm:$0xff] %vm2310_vm11, %v2280_v45  ;;  %v815_v45 = vadd.f32 1e-05, %v783_v11  ;;  %v874_v20 = vmul.f32 %v4663_v24, %v814_v3  ;;  %vm880_vm9 = vweird.f32 %v4663_v24 }
 0x29a   : > { %1650 = vadd.xlane.f32.xlu1 %v1649_v61  ;;  %v1833_v61 = vsel %vm1832_vm8, %v4661_v57, %v1829_v4  ;;  %vm881_vm12 = vmor %vm879_vm10, %vm880_vm9  ;;  %vm909_vm2 = vweird.f32 %v6576_v22 }
 0x29b   : > { %4664 = vrsqrt.f32 %v815_v45  ;;  %v875_v8 = vmul.f32 %v4663_v24, %v874_v20  ;;  %v2063_v13 = vmul.f32 %v1833_v61, %v10231_v43  ;;  %v6588_v20 = vadd.f32 1e-05, %v1680_v60 }
 0x29c   : > { %4666 = vrsqrt.f32 %v6576_v22  ;;  %v1505_v43 = vmul.f32 %v6314_v18, %v5471_v26  ;;  %vm889_vm14 = vweird.f32 %v815_v45 }
 0x29d   : > { %v876_v21 = vmul.f32 0.5, %v875_v8  ;;  %v2095_v48 = vmul.f32 %v6275_v9, %v2063_v13  ;;  %v10232_v8 = vld [vmem:[#allocation32_spill] sm:$0xff]  ;;  %4668 = vrsqrt.f32 %v6588_v20  ;;  %vm1840_vm5 = vweird.f32 %v6588_v20 }
 0x29f   : > { %v877_v51 = vsub.f32 1.5, %v876_v21  ;;  %v2127_v16 = vadd.f32 %v6283_v59, %v2095_v48  ;;  %v10233_v48 = vld [vmem:[#allocation58_spill] sm:$0xff] }
 0x2a1   : > { %v4665_v41 = vpop.eup %4664 }
 0x2a2   : > { %762 = vadd.xlane.f32.xlu1 %v761_v27  ;;  %v884_v12 = vmul.f32 %v4665_v41, %v815_v45  ;;  %v878_v27 = vmul.f32 %v4663_v24, %v877_v51  ;;  %v6590_v4 = vpop.eup %4666  ;;  %vm890_vm13 = vweird.f32 %v4665_v41  ;;  %v10235_v45 = vld [vmem:[#allocation33_spill] sm:$0xff] }
 0x2a3   : > { %vm891_vm15 = vmor %vm889_vm14, %vm890_vm13  ;;  %vm910_vm1 = vweird.f32 %v6590_v4 }
 0x2a4   : > { %v885_v11 = vmul.f32 %v4665_v41, %v884_v12  ;;  %vm911_vm3 = vmor %vm909_vm2, %vm910_vm1 }
 0x2a5   : > { %2196 = vrot.lane.b32.xlu0 %v2125_v25, %s5005_s25  ;;  %v882_v25 = vsel %vm881_vm12, %v4663_v24, %v878_v27  ;;  %v904_v24 = vmul.f32 %v6590_v4, %v6576_v22  ;;  %v10234_v27 = vld [vmem:[#allocation75_spill] sm:$0xff] }
 0x2a6   : > { %2192 = vrot.lane.b32.xlu2 %v2123_v44, %s5005_s25  ;;  %v886_v57 = vmul.f32 0.5, %v885_v11  ;;  %v1678_v44 = vmul.f32 %v6250_v58, %v5471_v26  ;;  %v1166_v61 = vmul.f32 %v882_v25, %v10232_v8  ;;  %v611_v58 = vmul.f32 %v5471_v26, %v6256_v52  ;;  %v10238_v22 = vld [vmem:[#allocation43_spill] sm:$0xff] }
 0x2a7   : > { %v905_v51 = vmul.f32 %v6590_v4, %v904_v24  ;;  %v6613_v52 = vsub.f32 %v10234_v27, %v1505_v43  ;;  %v615_v24 = vmul.f32 %v5471_v26, %v6326_v42 }
 0x2a8   : > { %v887_v38 = vsub.f32 1.5, %v886_v57  ;;  %v6597_v50 = vadd.f32 1e-05, %v1678_v44  ;;  %v1198_v13 = vmul.f32 %v6275_v9, %v1166_v61  ;;  %v6610_v11 = vsub.f32 %v10233_v48, %v611_v58  ;;  %v6616_v57 = vpop.eup %4668 }
 0x2a9   : > { %v906_v44 = vmul.f32 0.5, %v905_v51  ;;  %v1569_v58 = vmul.f32 %v6613_v52, %v6613_v52  ;;  %vm1841_vm4 = vweird.f32 %v6616_v57 }
 0x2aa   : > { %v888_v15 = vmul.f32 %v4665_v41, %v887_v38  ;;  %4670 = vrsqrt.f32 %v6597_v50  ;;  %v675_v8 = vmul.f32 %v6610_v11, %v6610_v11  ;;  %vm1842_vm7 = vmor %vm1840_vm5, %vm1841_vm4  ;;  %vm1820_vm8 = vweird.f32 %v6597_v50 }
 0x2ab   : > { %v907_v43 = vsub.f32 1.5, %v906_v44  ;;  %v1655_v42 = vsel %vm274_vm0, %v1569_v58, 0.0 }
 0x2ac   : > { %v892_v12 = vsel %vm891_vm15, %v4665_v41, %v888_v15  ;;  %v1504_v41 = vmul.f32 %v6302_v31, %v5471_v26  ;;  %v1835_v15 = vmul.f32 %v6616_v57, %v6588_v20  ;;  %v755_v48 = vsel %vm274_vm0, %v675_v8, 0.0 }
 0x2ad   : > { %v1167_v25 = vmul.f32 %v892_v12, %v10235_v45  ;;  %v10236_v12 = vld [vmem:[#allocation69_spill] sm:$0xff] }
 0x2ae   : > { %v6640_v51 = vsub.f32 %v10236_v12, %v1504_v41  ;;  %v1836_v27 = vmul.f32 %v6616_v57, %v1835_v15  ;;  %v784_v12 = vmul.f32 %v6065_v19, %v5471_v26  ;;  %v1682_v19 = vmul.f32 %v6332_v53, %v5471_v26 }
 0x2af   : > { %v1199_v31 = vmul.f32 %v6275_v9, %v1167_v25  ;;  %v908_v25 = vmul.f32 %v6590_v4, %v907_v43  ;;  %v616_v53 = vmul.f32 %v5471_v26, %v6397_v56 }
 0x2b0   : > { %v6628_v61 = vpop.eup %4670  ;;  %v1568_v8 = vmul.f32 %v6640_v51, %v6640_v51  ;;  %v1837_v15 = vmul.f32 0.5, %v1836_v27 }
 0x2b1   : > { %v1231_v45 = vadd.f32 %v6283_v59, %v1199_v31  ;;  %v912_v31 = vsel %vm911_vm3, %v6590_v4, %v908_v25  ;;  %v816_v4 = vadd.f32 1e-05, %v784_v12  ;;  %vm1821_vm6 = vweird.f32 %v6628_v61  ;;  %v10240_v12 = vld [vmem:[#allocation62_spill] sm:$0xff] }
 0x2b2   : > { %vm1822_vm9 = vmor %vm1820_vm8, %vm1821_vm6 }
 0x2b3   : > { %4672 = vrsqrt.f32 %v816_v4  ;;  %vm899_vm12 = vweird.f32 %v816_v4 }
 0x2b6   : > { %v6593_v21 = vpop.xlane.xlu0 %1638 }
 0x2b8   : > { %v6579_v33 = vpop.xlane.xlu2 %1635 }
 0x2bb   : > { %2200 = vrot.lane.b32.xlu1 %v2127_v16, %s5005_s25  ;;  %v1230_v16 = vadd.f32 %v6283_v59, %v1198_v13  ;;  %v1815_v13 = vmul.f32 %v6628_v61, %v6597_v50  ;;  %v6696_v50 = vsub.f32 %v6061_v55, %v616_v53 }
 0x2bd   : > { %v1816_v44 = vmul.f32 %v6628_v61, %v1815_v13  ;;  %v1652_v13 = vsel %vm274_vm0, %v1568_v8, 0.0  ;;  %10241 = vst [vmem:[#allocation61_spill] sm:$0xff] %v6696_v50 }
 0x2be   : > { %v6622_v38 = vpop.xlane.xlu0 %750 }
 0x2bf   : > { %v1817_v43 = vmul.f32 0.5, %v1816_v44  ;;  %v10239_v44 = vld [vmem:[#allocation84_spill] sm:$0xff] }
 0x2c0   : > { %v6595_v3 = vpop.xlane.xlu2 %747 }
 0x2c8   : > { %v2189_v18 = vpop.permute.xlu2 %2188 }
 0x2c9   : > { %v2281_v60 = vsel %vm274_vm0, %v1230_v16, %v2189_v18  ;;  %v10237_v16 = vld [vmem:[#allocation79_spill] sm:$0xff] }
 0x2ca   : > { %2314 = vst.msk [vmem:[%s6486_s6 + $0x28] sm:$0xff] %vm2310_vm11, %v2281_v60  ;;  %v6645_v18 = vsub.f32 %v10237_v16, %v615_v24  ;;  %v6648_v60 = vpop.xlane.xlu1 %1641  ;;  %v1506_v16 = vmul.f32 %v6374_v2, %v5471_v26 }
 0x2cc   : > { %v679_v58 = vmul.f32 %v6645_v18, %v6645_v18  ;;  %v6677_v8 = vsub.f32 %v10239_v44, %v1506_v16  ;;  %v4673_v16 = vpop.eup %4672 }
 0x2cd   : > { %vm900_vm10 = vweird.f32 %v4673_v16 }
 0x2ce   : > { %v767_v27 = vsel %vm274_vm0, %v679_v58, 0.0  ;;  %v1714_v58 = vadd.f32 1e-05, %v1682_v19  ;;  %v1570_v20 = vmul.f32 %v6677_v8, %v6677_v8  ;;  %v680_v19 = vmul.f32 %v6696_v50, %v6696_v50  ;;  %vm901_vm13 = vmor %vm899_vm12, %vm900_vm10  ;;  %v4901_v50 = vld [vmem:[%s5126_s23 + $0x8] sm:$0xff] }
 0x2cf   : > { %756 = vadd.xlane.f32.xlu2 %v755_v48  ;;  %1656 = vadd.xlane.f32.xlu0 %v1655_v42  ;;  %v1838_v48 = vsub.f32 1.5, %v1837_v15  ;;  %v1169_v42 = vmul.f32 %v912_v31, %v10238_v22  ;;  %v10242_v22 = vld [vmem:[#allocation56_spill] sm:$0xff] }
 0x2d0   : > { %4674 = vrsqrt.f32 %v1714_v58  ;;  %v1658_v56 = vsel %vm274_vm0, %v1570_v20, 0.0  ;;  %v770_v20 = vsel %vm274_vm0, %v680_v19, 0.0  ;;  %vm1860_vm15 = vweird.f32 %v1714_v58 }
 0x2d1   : > { %v2191_v41 = vpop.permute.xlu0 %2190  ;;  %v1839_v25 = vmul.f32 %v6616_v57, %v1838_v48  ;;  %v1201_v2 = vmul.f32 %v6275_v9, %v1169_v42 }
 0x2d2   : > { %v2282_v24 = vsel %vm274_vm0, %v1231_v45, %v2191_v41  ;;  %v1818_v45 = vsub.f32 1.5, %v1817_v43  ;;  %v6670_v41 = vpop.xlane.xlu1 %753  ;;  %v6690_v43 = vpop.f32.mrf.mxu2 }
 0x2d3   : > { %2315 = vst.msk [vmem:[%s6486_s6 + $0x40] sm:$0xff] %vm2310_vm11, %v2282_v24  ;;  %v1843_v24 = vsel %vm1842_vm7, %v6616_v57, %v1839_v25  ;;  %v1233_v31 = vadd.f32 %v6283_v59, %v1201_v2  ;;  %v894_v25 = vmul.f32 %v4673_v16, %v816_v4 }
 0x2d4   : > { %v1819_v15 = vmul.f32 %v6628_v61, %v1818_v45  ;;  %v2064_v48 = vmul.f32 %v1843_v24, %v10240_v12 }
 0x2d5   : > { %v895_v53 = vmul.f32 %v4673_v16, %v894_v25 }
 0x2d6   : > { %v2096_v45 = vmul.f32 %v6275_v9, %v2064_v48  ;;  %v4675_v44 = vpop.eup %4674 }
 0x2d7   : > { %1653 = vadd.xlane.f32.xlu2 %v1652_v13  ;;  %768 = vadd.xlane.f32.xlu0 %v767_v27  ;;  %v1823_v13 = vsel %vm1822_vm9, %v6628_v61, %v1819_v15  ;;  %v786_v61 = vmul.f32 %v6165_v35, %v5471_v26  ;;  %v896_v48 = vmul.f32 0.5, %v895_v53  ;;  %vm1861_vm14 = vweird.f32 %v4675_v44  ;;  %v10243_v53 = vld [vmem:[#allocation39_spill] sm:$0xff] }
 0x2d8   : > { %v2062_v42 = vmul.f32 %v1823_v13, %v10242_v22  ;;  %v2128_v2 = vadd.f32 %v6283_v59, %v2096_v45  ;;  %v6715_v13 = vld [vmem:[%s9958_s2 + $0x1] ss:$0 sm:$0xff]  ;;  %vm1862_vm1 = vmor %vm1860_vm15, %vm1861_vm14 }
 0x2d9   : > { %v818_v15 = vadd.f32 1e-05, %v786_v61 }
 0x2da   : > { %v2094_v55 = vmul.f32 %v6275_v9, %v2062_v42  ;;  %v2463_v24 = vpop.f32.mrf.mxu2 }
 0x2db   : > { %v6718_v12 = vadd.f32 %v6715_v13, %v2463_v24  ;;  %4676 = vrsqrt.f32 %v818_v15  ;;  %vm919_vm3 = vweird.f32 %v818_v15 }
 0x2dc   : > { %v2126_v35 = vadd.f32 %v6283_v59, %v2094_v55 }
 0x2e1   : > { %v4677_v22 = vpop.eup %4676 }
 0x2e2   : > { %v2195_v27 = vpop.permute.xlu1 %2194  ;;  %v914_v61 = vmul.f32 %v4677_v22, %v818_v15  ;;  %vm920_vm2 = vweird.f32 %v4677_v22  ;;  %v10246_v15 = vld [vmem:[#allocation76_spill] sm:$0xff] }
 0x2e3   : > { %v2284_v57 = vsel %vm274_vm0, %v1233_v31, %v2195_v27  ;;  %v1855_v31 = vmul.f32 %v4675_v44, %v1714_v58  ;;  %vm921_vm4 = vmor %vm919_vm3, %vm920_vm2 }
 0x2e4   : > { %2317 = vst.msk [vmem:[%s6486_s6 + $0x60] sm:$0xff] %vm2310_vm11, %v2284_v57  ;;  %v2559_v57 = vsel %vm274_vm0, %v6718_v12, 0.0  ;;  %v915_v55 = vmul.f32 %v4677_v22, %v914_v61 }
 0x2e5   : > { %1659 = vadd.xlane.f32.xlu1 %v1658_v56  ;;  %v1856_v27 = vmul.f32 %v4675_v44, %v1855_v31  ;;  %v897_v56 = vsub.f32 1.5, %v896_v48  ;;  %v1683_v48 = vmul.f32 %v6345_v6, %v5471_v26 }
 0x2e6   : > { %v916_v31 = vmul.f32 0.5, %v915_v55 }
 0x2e7   : > { %v1857_v42 = vmul.f32 0.5, %v1856_v27  ;;  %v898_v45 = vmul.f32 %v4673_v16, %v897_v56  ;;  %v6735_v58 = vadd.f32 1e-05, %v1683_v48  ;;  %v10245_v48 = vld [vmem:[#allocation92_spill] sm:$0xff] }
 0x2e9   : > { %v1858_v25 = vsub.f32 1.5, %v1857_v42  ;;  %v902_v19 = vsel %vm901_vm13, %v4673_v16, %v898_v45  ;;  %v1681_v42 = vmul.f32 %v6316_v14, %v5471_v26  ;;  %vm1870_vm9 = vweird.f32 %v6735_v58 }
 0x2eb   : > { %2202 = vrot.lane.b32.xlu0 %v2128_v2, %s5005_s25  ;;  %v788_v2 = vmul.f32 %v6266_v40, %v5471_v26  ;;  %v1859_v24 = vmul.f32 %v4675_v44, %v1858_v25  ;;  %v10244_v40 = vld [vmem:[#allocation78_spill] sm:$0xff]  ;;  %v1508_v25 = vmul.f32 %v6416_v30, %v5471_v26 }
 0x2ed   : > { %771 = vadd.xlane.f32.xlu1 %v770_v20  ;;  %v1168_v20 = vmul.f32 %v902_v19, %v10243_v53  ;;  %v1863_v27 = vsel %vm1862_vm1, %v4675_v44, %v1859_v24  ;;  %v614_v24 = vmul.f32 %v5471_v26, %v6318_v47  ;;  %v6756_v30 = vsub.f32 %v10245_v48, %v1508_v25 }
 0x2ee   : > { %v2066_v56 = vmul.f32 %v1863_v27, %v10244_v40 }
 0x2ef   : > { %2198 = vrot.lane.b32.xlu2 %v2126_v35, %s5005_s25  ;;  %v6726_v35 = vadd.f32 1e-05, %v788_v2  ;;  %v1200_v16 = vmul.f32 %v6275_v9, %v1168_v20  ;;  %v6746_v2 = vadd.f32 1e-05, %v1681_v42  ;;  %v618_v42 = vmul.f32 %v5471_v26, %v6431_v1 }
 0x2f0   : > { %v2098_v61 = vmul.f32 %v6275_v9, %v2066_v56 }
 0x2f1   : > { %4678 = vrsqrt.f32 %v6726_v35  ;;  %v1232_v6 = vadd.f32 %v6283_v59, %v1200_v16  ;;  %v6761_v16 = vsub.f32 %v10246_v15, %v614_v24  ;;  %vm939_vm6 = vweird.f32 %v6726_v35 }
 0x2f2   : > { %4680 = vrsqrt.f32 %v6735_v58  ;;  %v2130_v20 = vadd.f32 %v6283_v59, %v2098_v61  ;;  %vm1850_vm13 = vweird.f32 %v6746_v2 }
 0x2f3   : > { %4682 = vrsqrt.f32 %v6746_v2  ;;  %v678_v61 = vmul.f32 %v6761_v16, %v6761_v16 }
 0x2f5   : > { %2560 = vadd.xlane.f32.xlu1 %v2559_v57  ;;  %v917_v57 = vsub.f32 1.5, %v916_v31 }
 0x2f7   : > { %v918_v44 = vmul.f32 %v4677_v22, %v917_v57  ;;  %v4679_v55 = vpop.eup %4678  ;;  %v10247_v57 = vld [vmem:[#allocation47_spill] sm:$0xff] }
 0x2f8   : > { %v934_v31 = vmul.f32 %v4679_v55, %v6726_v35  ;;  %v4681_v27 = vpop.eup %4680  ;;  %vm940_vm5 = vweird.f32 %v4679_v55 }
 0x2f9   : > { %v922_v53 = vsel %vm921_vm4, %v4677_v22, %v918_v44  ;;  %v1865_v56 = vmul.f32 %v4681_v27, %v6735_v58  ;;  %v1507_v44 = vmul.f32 %v6382_v62, %v5471_v26  ;;  %v764_v62 = vsel %vm274_vm0, %v678_v61, 0.0  ;;  %vm941_vm7 = vmor %vm939_vm6, %vm940_vm5 }
 0x2fa   : > { %v1170_v47 = vmul.f32 %v922_v53, %v10247_v57  ;;  %v935_v22 = vmul.f32 %v4679_v55, %v934_v31  ;;  %v6777_v53 = vsub.f32 %v6114_v34, %v618_v42  ;;  %v10248_v31 = vld [vmem:[#allocation87_spill] sm:$0xff]  ;;  %vm1871_vm8 = vweird.f32 %v4681_v27 }
 0x2fb   : > { %v1866_v24 = vmul.f32 %v4681_v27, %v1865_v56  ;;  %v6782_v48 = vsub.f32 %v10248_v31, %v1507_v44  ;;  %vm1872_vm10 = vmor %vm1870_vm9, %vm1871_vm8 }
 0x2fc   : > { %v6739_v45 = vpop.xlane.xlu0 %1647  ;;  %v1202_v25 = vmul.f32 %v6275_v9, %v1170_v47  ;;  %v682_v34 = vmul.f32 %v6777_v53, %v6777_v53 }
 0x2fd   : > { %v1867_v47 = vmul.f32 0.5, %v1866_v24  ;;  %v787_v24 = vmul.f32 %v6229_v28, %v5471_v26 }
 0x2fe   : > { %v1234_v15 = vadd.f32 %v6283_v59, %v1202_v25  ;;  %v776_v61 = vsel %vm274_vm0, %v682_v34, 0.0  ;;  %v10250_v34 = vld [vmem:[#allocation80_spill] sm:$0xff] }
 0x2ff   : > { %v1868_v59 = vsub.f32 1.5, %v1867_v47 }
 0x301   : > { %v6730_v4 = vpop.xlane.xlu2 %1644 }
 0x304   : > { %v6764_v40 = vpop.xlane.xlu0 %759 }
 0x309   : > { %v2193_v19 = vpop.permute.xlu2 %2192 }
 0x30a   : > { %v2283_v14 = vsel %vm274_vm0, %v1232_v6, %v2193_v19  ;;  %v1572_v6 = vmul.f32 %v6756_v30, %v6756_v30  ;;  %v4683_v19 = vpop.eup %4682 }
 0x30b   : > { %2316 = vst.msk [vmem:[%s6486_s6 + $0x48] sm:$0xff] %vm2310_vm11, %v2283_v14  ;;  %v936_v14 = vmul.f32 0.5, %v935_v22  ;;  %vm1851_vm12 = vweird.f32 %v4683_v19 }
 0x30c   : > { %v1664_v1 = vsel %vm274_vm0, %v1572_v6, 0.0  ;;  %v1571_v6 = vmul.f32 %v6782_v48, %v6782_v48  ;;  %vm1852_vm14 = vmor %vm1850_vm13, %vm1851_vm12 }
 0x30d   : > { %v937_v57 = vsub.f32 1.5, %v936_v14  ;;  %v6791_v42 = vpop.xlane.xlu1 %1650 }
 0x30e   : > { %2206 = vrot.lane.b32.xlu1 %v2130_v20, %s5005_s25  ;;  %v1845_v20 = vmul.f32 %v4683_v19, %v6746_v2  ;;  %v1661_v14 = vsel %vm274_vm0, %v1571_v6, 0.0  ;;  %v1509_v6 = vmul.f32 %v6433_v63, %v5471_v26  ;;  %v10251_v2 = vld [vmem:[#allocation74_spill] sm:$0xff] }
 0x30f   : > { %v938_v44 = vmul.f32 %v4679_v55, %v937_v57 }
 0x310   : > { %v1846_v56 = vmul.f32 %v4683_v19, %v1845_v20  ;;  %v1869_v20 = vmul.f32 %v4681_v27, %v1868_v59  ;;  %v6828_v63 = vsub.f32 %v6149_v49, %v1509_v6 }
 0x312   : > { %v1847_v25 = vmul.f32 0.5, %v1846_v56  ;;  %v1873_v57 = vsel %vm1872_vm10, %v4681_v27, %v1869_v20 }
 0x313   : > { %v2067_v28 = vmul.f32 %v1873_v57, %v10250_v34  ;;  %v1573_v57 = vmul.f32 %v6828_v63, %v6828_v63  ;;  %v10253_v34 = vld [vmem:[#allocation7_spill] sm:$0xff] }
 0x314   : > { %v1848_v31 = vsub.f32 1.5, %v1847_v25 }
 0x315   : > { %1665 = vadd.xlane.f32.xlu0 %v1664_v1  ;;  %v942_v1 = vsel %vm941_vm7, %v4679_v55, %v938_v44  ;;  %v6802_v35 = vpop.xlane.xlu1 %762  ;;  %v6810_v55 = vld [vmem:[%s9959_s3] ss:$0 sm:$0xff] }
 0x316   : > { %v1849_v47 = vmul.f32 %v4683_v19, %v1848_v31  ;;  %v2099_v59 = vmul.f32 %v6810_v55, %v2067_v28 }
 0x317   : > { %v2197_v9 = vpop.permute.xlu0 %2196 }
 0x318   : > { %765 = vadd.xlane.f32.xlu2 %v764_v62  ;;  %v2285_v22 = vsel %vm274_vm0, %v1234_v15, %v2197_v9  ;;  %v10249_v62 = vld [vmem:[#allocation59_spill] sm:$0xff]  ;;  %v819_v9 = vadd.f32 1e-05, %v787_v24  ;;  %v1853_v27 = vsel %vm1852_vm14, %v4683_v19, %v1849_v47 }
 0x319   : > { %2318 = vst.msk [vmem:[%s6486_s6 + $0x68] sm:$0xff] %vm2310_vm11, %v2285_v22  ;;  %v1172_v15 = vmul.f32 %v942_v1, %v10249_v62  ;;  %v1685_v22 = vmul.f32 %v6429_v46, %v5471_v26  ;;  %v6819_v46 = vld [vmem:[%s9960_s4] ss:$0 sm:$0xff]  ;;  %v10252_v62 = vld [vmem:[#allocation27_spill] sm:$0xff] }
 0x31a   : > { %4684 = vrsqrt.f32 %v819_v9  ;;  %v2131_v1 = vadd.f32 %v6819_v46, %v2099_v59  ;;  %vm929_vm1 = vweird.f32 %v819_v9 }
 0x31b   : > { %v1204_v58 = vmul.f32 %v6810_v55, %v1172_v15  ;;  %v1717_v56 = vadd.f32 1e-05, %v1685_v22  ;;  %v2564_v15 = vmul.f32 %v10252_v62, %v5471_v26 }
 0x31d   : > { %777 = vadd.xlane.f32.xlu0 %v776_v61  ;;  %v1236_v44 = vadd.f32 %v6819_v46, %v1204_v58  ;;  %v789_v61 = vmul.f32 %v6291_v37, %v5471_v26  ;;  %4686 = vrsqrt.f32 %v1717_v56  ;;  %v6841_v28 = vsub.f32 %v10253_v34, %v2564_v15  ;;  %v10255_v34 = vld [vmem:[#allocation52_spill] sm:$0xff] }
 0x31e   : > { %v1667_v58 = vsel %vm274_vm0, %v1573_v57, 0.0  ;;  %vm1890_vm4 = vweird.f32 %v1717_v56 }
 0x31f   : > { %v821_v20 = vadd.f32 1e-05, %v789_v61  ;;  %10254 = vst [vmem:[#allocation28_spill] sm:$0xff] %v6841_v28  ;;  %v2628_v59 = vmul.f32 %v6841_v28, %v6841_v28 }
 0x320   : > { %1662 = vadd.xlane.f32.xlu2 %v1661_v14  ;;  %v2065_v14 = vmul.f32 %v1853_v27, %v10251_v2  ;;  %v4685_v24 = vpop.eup %4684 }
 0x321   : > { %v924_v31 = vmul.f32 %v4685_v24, %v819_v9  ;;  %4688 = vrsqrt.f32 %v821_v20  ;;  %vm930_vm15 = vweird.f32 %v4685_v24  ;;  %vm949_vm7 = vweird.f32 %v821_v20 }
 0x322   : > { %v2097_v37 = vmul.f32 %v6810_v55, %v2065_v14  ;;  %v2664_v14 = vsel %vm274_vm0, %v2628_v59, 0.0  ;;  %vm931_vm2 = vmor %vm929_vm1, %vm930_vm15 }
 0x323   : > { %v4687_v47 = vpop.eup %4686  ;;  %v925_v49 = vmul.f32 %v4685_v24, %v924_v31 }
 0x324   : > { %v2129_v22 = vadd.f32 %v6819_v46, %v2097_v37  ;;  %v1885_v27 = vmul.f32 %v4687_v47, %v1717_v56  ;;  %vm1891_vm3 = vweird.f32 %v4687_v47  ;;  %v1684_v56 = vmul.f32 %v6408_v32, %v5471_v26 }
 0x325   : > { %v926_v6 = vmul.f32 0.5, %v925_v49  ;;  %v1686_v49 = vmul.f32 %v6445_v29, %v5471_v26  ;;  %vm1892_vm5 = vmor %vm1890_vm4, %vm1891_vm3 }
 0x326   : > { %v1886_v61 = vmul.f32 %v4687_v47, %v1885_v27 }
 0x32d   : > { %v2201_v25 = vpop.permute.xlu1 %2200 }
 0x32e   : > { %v2287_v19 = vsel %vm274_vm0, %v1236_v44, %v2201_v25  ;;  %v4689_v44 = vpop.eup %4688  ;;  %v927_v25 = vsub.f32 1.5, %v926_v6  ;;  %v6853_v6 = vadd.f32 1e-05, %v1686_v49 }
 0x32f   : > { %2320 = vst.msk [vmem:[%s6486_s6 + $0x88] sm:$0xff] %vm2310_vm11, %v2287_v19  ;;  %v944_v2 = vmul.f32 %v4689_v44, %v821_v20  ;;  %v1887_v19 = vmul.f32 0.5, %v1886_v61  ;;  %vm950_vm6 = vweird.f32 %v4689_v44  ;;  %v617_v20 = vmul.f32 %v5471_v26, %v6414_v17 }
 0x330   : > { %4690 = vrsqrt.f32 %v6853_v6  ;;  %vm951_vm8 = vmor %vm949_vm7, %vm950_vm6  ;;  %vm1900_vm10 = vweird.f32 %v6853_v6 }
 0x331   : > { %2208 = vrot.lane.b32.xlu0 %v2131_v1, %s5005_s25  ;;  %v928_v1 = vmul.f32 %v4685_v24, %v927_v25  ;;  %v945_v31 = vmul.f32 %v4689_v44, %v944_v2  ;;  %v1888_v62 = vsub.f32 1.5, %v1887_v19  ;;  %v10257_v19 = vld [vmem:[#allocation95_spill] sm:$0xff] }
 0x333   : > { %v932_v15 = vsel %vm931_vm2, %v4685_v24, %v928_v1  ;;  %v946_v57 = vmul.f32 0.5, %v945_v31  ;;  %v10256_v24 = vld [vmem:[#allocation20_spill] sm:$0xff]  ;;  %v10258_v31 = vld [vmem:[#allocation5_spill] sm:$0xff] }
 0x334   : > { %v2562_v25 = vmul.f32 %v10256_v24, %v5471_v26  ;;  %v10261_v24 = vld [vmem:[#allocation26_spill] sm:$0xff] }
 0x335   : > { %v947_v27 = vsub.f32 1.5, %v946_v57 }
 0x336   : > { %v4691_v32 = vpop.eup %4690 }
 0x337   : > { %v948_v29 = vmul.f32 %v4689_v44, %v947_v27  ;;  %vm1901_vm9 = vweird.f32 %v4691_v32 }
 0x338   : > { %1668 = vadd.xlane.f32.xlu1 %v1667_v58  ;;  %2204 = vrot.lane.b32.xlu2 %v2129_v22, %s5005_s25  ;;  %v1889_v22 = vmul.f32 %v4687_v47, %v1888_v62  ;;  %v1171_v58 = vmul.f32 %v932_v15, %v10255_v34  ;;  %v6870_v62 = vsub.f32 %v10258_v31, %v2562_v25  ;;  %vm1902_vm12 = vmor %vm1900_vm10, %vm1901_vm9 }
 0x339   : > { %v952_v15 = vsel %vm951_vm8, %v4689_v44, %v948_v29  ;;  %v2565_v25 = vmul.f32 %v10261_v24, %v5471_v26  ;;  %v10262_v29 = vld [vmem:[#allocation93_spill] sm:$0xff] }
 0x33a   : > { %v1893_v61 = vsel %vm1892_vm5, %v4687_v47, %v1889_v22  ;;  %v1203_v2 = vmul.f32 %v6810_v55, %v1171_v58  ;;  %10259 = vst [vmem:[#allocation66_spill] sm:$0xff] %v6870_v62  ;;  %v10260_v58 = vld [vmem:[#allocation63_spill] sm:$0xff] }
 0x33b   : > { %v2069_v47 = vmul.f32 %v1893_v61, %v10257_v19  ;;  %v1173_v27 = vmul.f32 %v952_v15, %v10260_v58  ;;  %v2626_v61 = vmul.f32 %v6870_v62, %v6870_v62  ;;  %v10263_v19 = vld [vmem:[#allocation8_spill] sm:$0xff] }
 0x33c   : > { %v1235_v1 = vadd.f32 %v6819_v46, %v1203_v2  ;;  %v1895_v2 = vmul.f32 %v4691_v32, %v6853_v6  ;;  %v1688_v6 = vmul.f32 %v6464_v7, %v5471_v26 }
 0x33d   : > { %v2101_v34 = vmul.f32 %v6810_v55, %v2069_v47  ;;  %v6899_v47 = vsub.f32 %v10263_v19, %v2565_v25  ;;  %v2658_v31 = vsel %vm274_vm0, %v2626_v61, 0.0 }
 0x33f   : > { %v2133_v17 = vadd.f32 %v6819_v46, %v2101_v34  ;;  %10264 = vst [vmem:[#allocation71_spill] sm:$0xff] %v6899_v47 }
 0x340   : > { %2665 = vadd.xlane.f32.xlu1 %v2664_v14  ;;  %v791_v14 = vmul.f32 %v6328_v23, %v5471_v26  ;;  %v6874_v23 = vadd.f32 1e-05, %v1684_v56  ;;  %v1205_v56 = vmul.f32 %v6810_v55, %v1173_v27  ;;  %v2629_v27 = vmul.f32 %v6899_v47, %v6899_v47 }
 0x342   : > { %v6848_v37 = vpop.xlane.xlu2 %756  ;;  %v6857_v9 = vpop.xlane.xlu0 %1656  ;;  %v6872_v57 = vadd.f32 1e-05, %v791_v14  ;;  %v6894_v14 = vsub.f32 %v10262_v29, %v617_v20  ;;  %v1237_v34 = vadd.f32 %v6819_v46, %v1205_v56  ;;  %v2667_v29 = vsel %vm274_vm0, %v2629_v27, 0.0 }
 0x343   : > { %vm1880_vm2 = vweird.f32 %v6874_v23 }
 0x344   : > { %4692 = vrsqrt.f32 %v6872_v57  ;;  %vm969_vm15 = vweird.f32 %v6872_v57 }
 0x345   : > { %4694 = vrsqrt.f32 %v6874_v23 }
 0x34a   : > { %v6855_v59 = vpop.xlane.xlu2 %1653  ;;  %v6884_v44 = vpop.xlane.xlu0 %768 }
 0x34b   : > { %v4693_v15 = vpop.eup %4692 }
 0x34c   : > { %v964_v25 = vmul.f32 %v4693_v15, %v6872_v57  ;;  %vm970_vm13 = vweird.f32 %v4693_v15 }
 0x34d   : > { %vm971_vm1 = vmor %vm969_vm15, %vm970_vm13 }
 0x34e   : > { %v965_v56 = vmul.f32 %v4693_v15, %v964_v25 }
 0x352   : > { %v2199_v49 = vpop.permute.xlu2 %2198 }
 0x353   : > { %v2286_v22 = vsel %vm274_vm0, %v1235_v1, %v2199_v49  ;;  %v1896_v1 = vmul.f32 %v4691_v32, %v1895_v2  ;;  %v681_v49 = vmul.f32 %v6894_v14, %v6894_v14 }
 0x354   : > { %2319 = vst.msk [vmem:[%s6486_s6 + $0x80] sm:$0xff] %vm2310_vm11, %v2286_v22  ;;  %v4695_v22 = vpop.eup %4694 }
 0x355   : > { %v1897_v58 = vmul.f32 0.5, %v1896_v1  ;;  %v1875_v2 = vmul.f32 %v4695_v22, %v6874_v23  ;;  %v773_v61 = vsel %vm274_vm0, %v681_v49, 0.0  ;;  %v6916_v1 = vadd.f32 %v6715_v13, %v6690_v43 }
 0x356   : > { %vm1881_vm14 = vweird.f32 %v4695_v22 }
 0x357   : > { %v1876_v19 = vmul.f32 %v4695_v22, %v1875_v2  ;;  %v2556_v49 = vsel %vm274_vm0, %v6916_v1, 0.0  ;;  %v10266_v2 = vld [vmem:[#allocation96_spill] sm:$0xff]  ;;  %vm1882_vm3 = vmor %vm1880_vm2, %vm1881_vm14 }
 0x359   : > { %2212 = vrot.lane.b32.xlu1 %v2133_v17, %s5005_s25  ;;  %v1898_v17 = vsub.f32 1.5, %v1897_v58  ;;  %v1877_v28 = vmul.f32 0.5, %v1876_v19  ;;  %v10265_v58 = vld [vmem:[#allocation110_spill] sm:$0xff] }
 0x35b   : > { %2659 = vadd.xlane.f32.xlu0 %v2658_v31  ;;  %v6918_v31 = vpop.xlane.xlu1 %1659  ;;  %v1878_v13 = vsub.f32 1.5, %v1877_v28 }
 0x35d   : > { %v2203_v20 = vpop.permute.xlu0 %2202 }
 0x35e   : > { %v2288_v24 = vsel %vm274_vm0, %v1237_v34, %v2203_v20  ;;  %v1899_v34 = vmul.f32 %v4691_v32, %v1898_v17  ;;  %v966_v20 = vmul.f32 0.5, %v965_v56  ;;  %v1879_v56 = vmul.f32 %v4695_v22, %v1878_v13 }
 0x35f   : > { %2321 = vst.msk [vmem:[%s6486_s6 + $0xa0] sm:$0xff] %vm2310_vm11, %v2288_v24  ;;  %v790_v24 = vmul.f32 %v10265_v58, %v5471_v26  ;;  %v1720_v58 = vadd.f32 1e-05, %v1688_v6 }
 0x360   : > { %v1903_v27 = vsel %vm1902_vm12, %v4691_v32, %v1899_v34  ;;  %v967_v43 = vsub.f32 1.5, %v966_v20  ;;  %v792_v32 = vmul.f32 %v6355_v39, %v5471_v26  ;;  %v1883_v34 = vsel %vm1882_vm3, %v4695_v22, %v1879_v56  ;;  %v10267_v20 = vld [vmem:[#allocation31_spill] sm:$0xff]  ;;  %v10270_v39 = vld [vmem:[#allocation10_spill] sm:$0xff] }
 0x361   : > { %774 = vadd.xlane.f32.xlu2 %v773_v61  ;;  %v822_v25 = vadd.f32 1e-05, %v790_v24  ;;  %v2070_v61 = vmul.f32 %v1903_v27, %v10266_v2  ;;  %v10268_v27 = vld [vmem:[#allocation91_spill] sm:$0xff]  ;;  %v10272_v56 = vld [vmem:[#allocation38_spill] sm:$0xff]  ;;  %vm1920_vm9 = vweird.f32 %v1720_v58 }
 0x362   : > { %v824_v24 = vadd.f32 1e-05, %v792_v32  ;;  %v2068_v23 = vmul.f32 %v1883_v34, %v10268_v27  ;;  %v2570_v6 = vmul.f32 %v10272_v56, %v5471_v26 }
 0x363   : > { %2668 = vadd.xlane.f32.xlu0 %v2667_v29  ;;  %v6926_v17 = vpop.xlane.xlu1 %771  ;;  %v968_v29 = vmul.f32 %v4693_v15, %v967_v43  ;;  %4696 = vrsqrt.f32 %v822_v25  ;;  %v2102_v28 = vmul.f32 %v6810_v55, %v2070_v61  ;;  %v10269_v43 = vld [vmem:[#allocation77_spill] sm:$0xff]  ;;  %vm959_vm5 = vweird.f32 %v822_v25 }
 0x364   : > { %4698 = vrsqrt.f32 %v1720_v58  ;;  %vm979_vm10 = vweird.f32 %v824_v24 }
 0x365   : > { %v972_v19 = vsel %vm971_vm1, %v4693_v15, %v968_v29  ;;  %v2134_v57 = vadd.f32 %v6819_v46, %v2102_v28  ;;  %4700 = vrsqrt.f32 %v824_v24  ;;  %v2100_v29 = vmul.f32 %v6810_v55, %v2068_v23 }
 0x366   : > { %v1175_v13 = vmul.f32 %v972_v19, %v10269_v43  ;;  %v10273_v43 = vld [vmem:[#allocation13_spill] sm:$0xff] }
 0x367   : > { %v2132_v34 = vadd.f32 %v6819_v46, %v2100_v29  ;;  %v6957_v23 = vsub.f32 %v10273_v43, %v2570_v6 }
 0x368   : > { %v1207_v22 = vmul.f32 %v6810_v55, %v1175_v13 }
 0x369   : > { %2557 = vadd.xlane.f32.xlu2 %v2556_v49  ;;  %v2567_v49 = vmul.f32 %v10267_v20, %v5471_v26  ;;  %v4697_v7 = vpop.eup %4696  ;;  %10274 = vst [vmem:[#allocation46_spill] sm:$0xff] %v6957_v23  ;;  %v2634_v29 = vmul.f32 %v6957_v23, %v6957_v23  ;;  %v10282_v23 = vld [vmem:[#allocation81_spill] sm:$0xff] }
 0x36a   : > { %v954_v15 = vmul.f32 %v4697_v7, %v822_v25  ;;  %v1239_v19 = vadd.f32 %v6819_v46, %v1207_v22  ;;  %v4699_v20 = vpop.eup %4698  ;;  %vm960_vm4 = vweird.f32 %v4697_v7 }
 0x36b   : > { %v6940_v2 = vpop.xlane.xlu1 %2560  ;;  %v6944_v61 = vsub.f32 %v10270_v39, %v2567_v49  ;;  %vm961_vm6 = vmor %vm959_vm5, %vm960_vm4  ;;  %vm1921_vm7 = vweird.f32 %v4699_v20 }
 0x36c   : > { %v955_v32 = vmul.f32 %v4697_v7, %v954_v15  ;;  %v1915_v15 = vmul.f32 %v4699_v20, %v1720_v58  ;;  %vm1922_vm12 = vmor %vm1920_vm9, %vm1921_vm7  ;;  %v10281_v58 = vld [vmem:[#allocation101_spill] sm:$0xff] }
 0x36d   : > { %10271 = vst [vmem:[#allocation41_spill] sm:$0xff] %v6944_v61  ;;  %v2631_v28 = vmul.f32 %v6944_v61, %v6944_v61 }
 0x36e   : > { %v956_v39 = vmul.f32 0.5, %v955_v32  ;;  %v1916_v61 = vmul.f32 %v4699_v20, %v1915_v15 }
 0x36f   : > { %v2673_v13 = vsel %vm274_vm0, %v2631_v28, 0.0  ;;  %v1689_v28 = vmul.f32 %v6502_v0, %v5471_v26  ;;  %v10276_v0 = vld [vmem:[#allocation35_spill] sm:$0xff] }
 0x370   : > { %v957_v56 = vsub.f32 1.5, %v956_v39  ;;  %v1917_v6 = vmul.f32 0.5, %v1916_v61 }
 0x371   : > { %v6969_v39 = vadd.f32 1e-05, %v1689_v28  ;;  %v10278_v28 = vld [vmem:[#allocation11_spill] sm:$0xff] }
 0x372   : > { %v1918_v43 = vsub.f32 1.5, %v1917_v6  ;;  %v10277_v6 = vld [vmem:[#allocation123_spill] sm:$0xff] }
 0x373   : > { %4702 = vrsqrt.f32 %v6969_v39  ;;  %vm1930_vm15 = vweird.f32 %v6969_v39 }
 0x377   : > { %2214 = vrot.lane.b32.xlu0 %v2134_v57, %s5005_s25  ;;  %v4701_v57 = vpop.eup %4700 }
 0x378   : > { %v974_v22 = vmul.f32 %v4701_v57, %v824_v24  ;;  %vm980_vm8 = vweird.f32 %v4701_v57 }
 0x379   : > { %vm981_vm13 = vmor %vm979_vm10, %vm980_vm8 }
 0x37a   : > { %v975_v47 = vmul.f32 %v4701_v57, %v974_v22  ;;  %v10275_v22 = vld [vmem:[#allocation70_spill] sm:$0xff] }
 0x380   : > { %v2207_v49 = vpop.permute.xlu1 %2206 }
 0x381   : > { %v2290_v27 = vsel %vm274_vm0, %v1239_v19, %v2207_v49  ;;  %2210 = vrot.lane.b32.xlu2 %v2132_v34, %s5005_s25  ;;  %v2682_v19 = vsel %vm274_vm0, %v2634_v29, 0.0  ;;  %v958_v34 = vmul.f32 %v4697_v7, %v957_v56  ;;  %v1919_v56 = vmul.f32 %v4699_v20, %v1918_v43  ;;  %v6985_v43 = vpop.eup %4702 }
 0x382   : > { %2323 = vst.msk [vmem:[%s6486_s6 + $0xc0] sm:$0xff] %vm2310_vm11, %v2290_v27  ;;  %v976_v27 = vmul.f32 0.5, %v975_v47  ;;  %v2568_v47 = vmul.f32 %v10276_v0, %v5471_v26  ;;  %vm1931_vm14 = vweird.f32 %v6985_v43 }
 0x383   : > { %2674 = vadd.xlane.f32.xlu1 %v2673_v13  ;;  %v962_v32 = vsel %vm961_vm6, %v4697_v7, %v958_v34  ;;  %v1923_v7 = vsel %vm1922_vm12, %v4699_v20, %v1919_v56  ;;  %vm1932_vm1 = vmor %vm1930_vm15, %vm1931_vm14 }
 0x384   : > { %v977_v13 = vsub.f32 1.5, %v976_v27  ;;  %v1174_v29 = vmul.f32 %v962_v32, %v10275_v22  ;;  %v1687_v27 = vmul.f32 %v10277_v6, %v5471_v26  ;;  %v6983_v32 = vsub.f32 %v10278_v28, %v2568_v47  ;;  %v10284_v28 = vld [vmem:[#allocation42_spill] sm:$0xff] }
 0x385   : > { %v2072_v24 = vmul.f32 %v1923_v7, %v10281_v58  ;;  %v2571_v62 = vmul.f32 %v10284_v28, %v5471_v26  ;;  %v1925_v7 = vmul.f32 %v6985_v43, %v6969_v39 }
 0x386   : > { %v1206_v25 = vmul.f32 %v6810_v55, %v1174_v29  ;;  %10279 = vst [vmem:[#allocation60_spill] sm:$0xff] %v6983_v32 }
 0x388   : > { %v6971_v15 = vpop.xlane.xlu0 %1665  ;;  %v1238_v0 = vadd.f32 %v6819_v46, %v1206_v25 }
 0x38b   : > { %v6965_v49 = vpop.xlane.xlu2 %765  ;;  %2683 = vadd.xlane.f32.xlu1 %v2682_v19  ;;  %v978_v19 = vmul.f32 %v4701_v57, %v977_v13  ;;  %v10280_v13 = vld [vmem:[#allocation122_spill] sm:$0xff] }
 0x38c   : > { %v794_v22 = vmul.f32 %v10280_v13, %v5471_v26  ;;  %v10285_v13 = vld [vmem:[#allocation6_spill] sm:$0xff] }
 0x38d   : > { %v982_v34 = vsel %vm981_vm13, %v4701_v57, %v978_v19  ;;  %v10283_v57 = vld [vmem:[#allocation22_spill] sm:$0xff]  ;;  %v6994_v19 = vadd.f32 1e-05, %v1687_v27 }
 0x38e   : > { %v1176_v20 = vmul.f32 %v982_v34, %v10282_v23  ;;  %v2563_v56 = vmul.f32 %v10283_v57, %v5471_v26  ;;  %v2632_v23 = vmul.f32 %v6983_v32, %v6983_v32  ;;  %v7007_v25 = vadd.f32 1e-05, %v794_v22 }
 0x38f   : > { %v2104_v34 = vmul.f32 %v6810_v55, %v2072_v24  ;;  %4704 = vrsqrt.f32 %v6994_v19  ;;  %v1926_v57 = vmul.f32 %v6985_v43, %v1925_v7  ;;  %vm1910_vm4 = vweird.f32 %v6994_v19 }
 0x390   : > { %v6996_v6 = vpop.xlane.xlu0 %777  ;;  %v1208_v27 = vmul.f32 %v6810_v55, %v1176_v20  ;;  %v7012_v58 = vsub.f32 %v10285_v13, %v2563_v56  ;;  %4706 = vrsqrt.f32 %v7007_v25  ;;  %vm999_vm6 = vweird.f32 %v7007_v25 }
 0x391   : > { %v2136_v22 = vadd.f32 %v6819_v46, %v2104_v34  ;;  %v1927_v13 = vmul.f32 0.5, %v1926_v57  ;;  %v4513_v34 = vld [vmem:[%s9957_s1 + $0x78] sm:$0xff]  ;;  %v4512_v57 = vld [vmem:[%s9957_s1 + $0x70] sm:$0xff] }
 0x392   : > { %10286 = vst [vmem:[#allocation32_spill] sm:$0xff] %v7012_v58  ;;  %v1240_v24 = vadd.f32 %v6819_v46, %v1208_v27  ;;  %v2627_v56 = vmul.f32 %v7012_v58, %v7012_v58  ;;  %3256 = vmatpush.msra.mxu3 %v4513_v34  ;;  %v4510_v34 = vld [vmem:[%s9957_s1 + $0x60] sm:$0xff]  ;;  %v10293_v58 = vld [vmem:[#allocation104_spill] sm:$0xff] }
 0x393   : > { %v6974_v61 = vpop.xlane.xlu2 %1662 }
 0x394   : > { %3257 = vmatpush.msra.mxu3 %v4512_v57 }
 0x39b   : > { %v2205_v29 = vpop.permute.xlu2 %2204 }
 0x39c   : > { %v2289_v47 = vsel %vm274_vm0, %v1238_v0, %v2205_v29  ;;  %v10287_v0 = vld [vmem:[#allocation14_spill] sm:$0xff] }
 0x39d   : > { %2322 = vst.msk [vmem:[%s6486_s6 + $0xa8] sm:$0xff] %vm2310_vm11, %v2289_v47  ;;  %v7016_v29 = vsub.f32 %v10287_v0, %v2571_v62  ;;  %v2676_v47 = vsel %vm274_vm0, %v2632_v23, 0.0  ;;  %v10289_v62 = vld [vmem:[#allocation30_spill] sm:$0xff]  ;;  %v4705_v0 = vpop.eup %4704 }
 0x39e   : > { %v2566_v28 = vmul.f32 %v10289_v62, %v5471_v26  ;;  %v4707_v27 = vpop.eup %4706  ;;  %v1928_v62 = vsub.f32 1.5, %v1927_v13  ;;  %vm1911_vm2 = vweird.f32 %v4705_v0 }
 0x39f   : > { %10288 = vst [vmem:[#allocation58_spill] sm:$0xff] %v7016_v29  ;;  %v2635_v23 = vmul.f32 %v7016_v29, %v7016_v29  ;;  %vm1000_vm3 = vweird.f32 %v4707_v27  ;;  %vm1912_vm5 = vmor %vm1910_vm4, %vm1911_vm2 }
 0x3a0   : > { %v1929_v29 = vmul.f32 %v6985_v43, %v1928_v62  ;;  %v10292_v62 = vld [vmem:[#allocation121_spill] sm:$0xff]  ;;  %vm1001_vm7 = vmor %vm999_vm6, %vm1000_vm3 }
 0x3a1   : > { %2677 = vadd.xlane.f32.xlu0 %v2676_v47  ;;  %v2661_v47 = vsel %vm274_vm0, %v2627_v56, 0.0  ;;  %v4511_v56 = vld [vmem:[%s9957_s1 + $0x68] sm:$0xff] }
 0x3a2   : > { %3258 = vmatpush.msra.mxu3 %v4511_v56  ;;  %v793_v56 = vmul.f32 %v10292_v62, %v5471_v26 }
 0x3a3   : > { %v2209_v20 = vpop.permute.xlu0 %2208 }
 0x3a4   : > { %2218 = vrot.lane.b32.xlu1 %v2136_v22, %s5005_s25  ;;  %v2291_v7 = vsel %vm274_vm0, %v1240_v24, %v2209_v20  ;;  %v10290_v22 = vld [vmem:[#allocation9_spill] sm:$0xff]  ;;  %v1905_v20 = vmul.f32 %v4705_v0, %v6994_v19  ;;  %3259 = vmatpush.msra.mxu3 %v4510_v34  ;;  %v10295_v19 = vld [vmem:[#allocation99_spill] sm:$0xff] }
 0x3a5   : > { %2324 = vst.msk [vmem:[%s6486_s6 + $0xc8] sm:$0xff] %vm2310_vm11, %v2291_v7  ;;  %v7041_v24 = vsub.f32 %v10290_v22, %v2566_v28  ;;  %v2685_v7 = vsel %vm274_vm0, %v2635_v23, 0.0  ;;  %v994_v28 = vmul.f32 %v4707_v27, %v7007_v25  ;;  %v4900_v23 = vld [vmem:[%s5126_s23] sm:$0xff] }
 0x3a6   : > { %v1906_v22 = vmul.f32 %v4705_v0, %v1905_v20  ;;  %4515 = vmatmul.msk.f32.vlgmr.msra.gmra.mxu3 %vm274_vm0, %v4900_v23 }
 0x3a7   : > { %10291 = vst [vmem:[#allocation75_spill] sm:$0xff] %v7041_v24  ;;  %v2630_v13 = vmul.f32 %v7041_v24, %v7041_v24 }
 0x3a8   : > { %v1907_v57 = vmul.f32 0.5, %v1906_v22 }
 0x3a9   : > { %2686 = vadd.xlane.f32.xlu0 %v2685_v7  ;;  %v1933_v7 = vsel %vm1932_vm1, %v6985_v43, %v1929_v29  ;;  %v2670_v20 = vsel %vm274_vm0, %v2630_v13, 0.0  ;;  %v10294_v43 = vld [vmem:[#allocation124_spill] sm:$0xff] }
 0x3aa   : > { %2662 = vadd.xlane.f32.xlu2 %v2661_v47  ;;  %v995_v47 = vmul.f32 %v4707_v27, %v994_v28  ;;  %v2073_v24 = vmul.f32 %v1933_v7, %v10293_v58  ;;  %v1908_v34 = vsub.f32 1.5, %v1907_v57  ;;  %v7066_v28 = vadd.f32 1e-05, %v793_v56  ;;  %v4902_v57 = vld [vmem:[%s5126_s23 + $0x10] sm:$0xff]  ;;  %v10296_v56 = vld [vmem:[#allocation45_spill] sm:$0xff] }
 0x3ab   : > { %v795_v29 = vmul.f32 %v10294_v43, %v5471_v26  ;;  %v7071_v23 = vpop.xlane.xlu1 %1668  ;;  %v2573_v25 = vmul.f32 %v10296_v56, %v5471_v26 }
 0x3ac   : > { %v996_v32 = vmul.f32 0.5, %v995_v47  ;;  %v2105_v22 = vmul.f32 %v6810_v55, %v2073_v24  ;;  %v1909_v13 = vmul.f32 %v4705_v0, %v1908_v34  ;;  %4708 = vrsqrt.f32 %v7066_v28  ;;  %v10297_v34 = vld [vmem:[#allocation94_spill] sm:$0xff] }
 0x3ad   : > { %v1691_v47 = vmul.f32 %v6593_v21, %v5471_v26  ;;  %vm989_vm9 = vweird.f32 %v7066_v28 }
 0x3ae   : > { %4516 = vmatmul.msk.f32.gmra.mxu3 %vm274_vm0, %v4901_v50  ;;  %v997_v39 = vsub.f32 1.5, %v996_v32  ;;  %v2137_v50 = vadd.f32 %v6819_v46, %v2105_v22  ;;  %v7077_v32 = vadd.f32 1e-05, %v795_v29  ;;  %v1913_v24 = vsel %vm1912_vm5, %v4705_v0, %v1909_v13  ;;  %v10299_v29 = vld [vmem:[#allocation16_spill] sm:$0xff] }
 0x3af   : > { %v7088_v0 = vadd.f32 1e-05, %v1691_v47 }
 0x3b0   : > { %v998_v58 = vmul.f32 %v4707_v27, %v997_v39  ;;  %4710 = vrsqrt.f32 %v7077_v32  ;;  %vm1009_vm13 = vweird.f32 %v7077_v32 }
 0x3b1   : > { %4712 = vrsqrt.f32 %v7088_v0  ;;  %vm1950_vm1 = vweird.f32 %v7088_v0 }
 0x3b2   : > { %2671 = vadd.xlane.f32.xlu2 %v2670_v20  ;;  %v1002_v7 = vsel %vm1001_vm7, %v4707_v27, %v998_v58  ;;  %v2071_v20 = vmul.f32 %v1913_v24, %v10295_v19  ;;  %v4709_v62 = vpop.eup %4708  ;;  %v7096_v27 = vsub.f32 %v10299_v29, %v2573_v25  ;;  %v4903_v58 = vld [vmem:[%s5126_s23 + $0x18] sm:$0xff]  ;;  %v10302_v29 = vld [vmem:[#allocation19_spill] sm:$0xff] }
 0x3b3   : > { %v1178_v21 = vmul.f32 %v1002_v7, %v10297_v34  ;;  %v7091_v39 = vpop.xlane.xlu1 %2665  ;;  %v984_v22 = vmul.f32 %v4709_v62, %v7066_v28  ;;  %vm990_vm8 = vweird.f32 %v4709_v62  ;;  %v10305_v28 = vld [vmem:[#allocation50_spill] sm:$0xff] }
 0x3b4   : > { %10298 = vst [vmem:[#allocation33_spill] sm:$0xff] %v7091_v39  ;;  %v2103_v43 = vmul.f32 %v6810_v55, %v2071_v20  ;;  %v2637_v19 = vmul.f32 %v7096_v27, %v7096_v27  ;;  %v4904_v39 = vld [vmem:[%s5126_s23 + $0x20] sm:$0xff]  ;;  %vm991_vm10 = vmor %vm989_vm9, %vm990_vm8 }
 0x3b5   : > { %10300 = vst [vmem:[#allocation69_spill] sm:$0xff] %v7096_v27  ;;  %v1210_v13 = vmul.f32 %v6810_v55, %v1178_v21  ;;  %v985_v24 = vmul.f32 %v4709_v62, %v984_v22 }
 0x3b6   : > { %4517 = vmatmul.msk.f32.gmra.mxu3 %vm274_vm0, %v4902_v57  ;;  %v2135_v47 = vadd.f32 %v6819_v46, %v2103_v43  ;;  %v10301_v57 = vld [vmem:[#allocation55_spill] sm:$0xff] }
 0x3b7   : > { %v2576_v7 = vmul.f32 %v10301_v57, %v5471_v26  ;;  %v1242_v56 = vadd.f32 %v6819_v46, %v1210_v13  ;;  %v986_v21 = vmul.f32 0.5, %v985_v24 }
 0x3b9   : > { %v7112_v43 = vsub.f32 %v10302_v29, %v2576_v7  ;;  %v987_v13 = vsub.f32 1.5, %v986_v21  ;;  %v1692_v7 = vmul.f32 %v6648_v60, %v5471_v26  ;;  %v4905_v21 = vld [vmem:[%s5126_s23 + $0x28] sm:$0xff] }
 0x3bb   : > { %10303 = vst [vmem:[#allocation79_spill] sm:$0xff] %v7112_v43  ;;  %v2640_v24 = vmul.f32 %v7112_v43, %v7112_v43  ;;  %v10313_v43 = vld [vmem:[#allocation112_spill] sm:$0xff] }
 0x3bd   : > { %2220 = vrot.lane.b32.xlu0 %v2137_v50, %s5005_s25  ;;  %v4711_v50 = vpop.eup %4710 }
 0x3be   : > { %4518 = vmatmul.msk.f32.gmra.mxu3 %vm274_vm0, %v4903_v58  ;;  %v1004_v20 = vmul.f32 %v4711_v50, %v7077_v32  ;;  %v4713_v25 = vpop.eup %4712  ;;  %v2691_v58 = vsel %vm274_vm0, %v2637_v19, 0.0  ;;  %vm1010_vm12 = vweird.f32 %v4711_v50  ;;  %v1690_v32 = vmul.f32 %v6579_v33, %v5471_v26 }
 0x3bf   : > { %v1945_v27 = vmul.f32 %v4713_v25, %v7088_v0  ;;  %vm1011_vm14 = vmor %vm1009_vm13, %vm1010_vm12  ;;  %vm1951_vm15 = vweird.f32 %v4713_v25 }
 0x3c0   : > { %v1005_v57 = vmul.f32 %v4711_v50, %v1004_v20  ;;  %v2700_v20 = vsel %vm274_vm0, %v2640_v24, 0.0  ;;  %v10306_v24 = vld [vmem:[#allocation88_spill] sm:$0xff]  ;;  %vm1952_vm2 = vmor %vm1950_vm1, %vm1951_vm15 }
 0x3c6   : > { %4519 = vmatmul.msk.f32.gmra.mxu3 %vm274_vm0, %v4904_v39  ;;  %v7128_v39 = vadd.f32 1e-05, %v1692_v7 }
 0x3c8   : > { %4714 = vrsqrt.f32 %v7128_v39  ;;  %vm1960_vm4 = vweird.f32 %v7128_v39 }
 0x3ca   : > { %2216 = vrot.lane.b32.xlu2 %v2135_v47, %s5005_s25  ;;  %v1006_v47 = vmul.f32 0.5, %v1005_v57 }
 0x3cb   : > { %v2213_v34 = vpop.permute.xlu1 %2212 }
 0x3cc   : > { %v2293_v22 = vsel %vm274_vm0, %v1242_v56, %v2213_v34  ;;  %v1946_v56 = vmul.f32 %v4713_v25, %v1945_v27  ;;  %v988_v34 = vmul.f32 %v4709_v62, %v987_v13  ;;  %v2574_v13 = vmul.f32 %v10305_v28, %v5471_v26  ;;  %v10311_v28 = vld [vmem:[#allocation65_spill] sm:$0xff] }
 0x3cd   : > { %2326 = vst.msk [vmem:[%s6486_s6 + $0xe8] sm:$0xff] %vm2310_vm11, %v2293_v22  ;;  %v1007_v22 = vsub.f32 1.5, %v1006_v47 }
 0x3ce   : > { %2692 = vadd.xlane.f32.xlu1 %v2691_v58  ;;  %v1947_v29 = vmul.f32 0.5, %v1946_v56  ;;  %4520 = vmatmul.msk.f32.gmra.mxu3 %vm274_vm0, %v4905_v21  ;;  %v992_v27 = vsel %vm991_vm10, %v4709_v62, %v988_v34  ;;  %v7132_v60 = vpop.xlane.xlu0 %2659  ;;  %v4906_v62 = vld [vmem:[%s5126_s23 + $0x30] sm:$0xff]  ;;  %v10307_v34 = vld [vmem:[#allocation17_spill] sm:$0xff]  ;;  %v7147_v21 = vpop.eup %4714 }
 0x3cf   : > { %10304 = vst [vmem:[#allocation43_spill] sm:$0xff] %v7132_v60  ;;  %v1008_v58 = vmul.f32 %v4711_v50, %v1007_v22  ;;  %v1177_v47 = vmul.f32 %v992_v27, %v10306_v24  ;;  %v7144_v22 = vsub.f32 %v10307_v34, %v2574_v13  ;;  %v2577_v13 = vmul.f32 %v10311_v28, %v5471_v26  ;;  %v10314_v28 = vld [vmem:[#allocation37_spill] sm:$0xff] }
 0x3d0   : > { %v1948_v57 = vsub.f32 1.5, %v1947_v29  ;;  %v1955_v24 = vmul.f32 %v7147_v21, %v7128_v39  ;;  %vm1961_vm3 = vweird.f32 %v7147_v21  ;;  %v10323_v39 = vld [vmem:[#allocation21_spill] sm:$0xff] }
 0x3d1   : > { %v1012_v7 = vsel %vm1011_vm14, %v4711_v50, %v1008_v58  ;;  %10308 = vst [vmem:[#allocation84_spill] sm:$0xff] %v7144_v22  ;;  %v1209_v29 = vmul.f32 %v6810_v55, %v1177_v47  ;;  %v10309_v50 = vld [vmem:[#allocation97_spill] sm:$0xff]  ;;  %v2638_v0 = vmul.f32 %v7144_v22, %v7144_v22  ;;  %v10315_v22 = vld [vmem:[#allocation24_spill] sm:$0xff]  ;;  %vm1962_vm5 = vmor %vm1960_vm4, %vm1961_vm3 }
 0x3d2   : > { %v1179_v27 = vmul.f32 %v1012_v7, %v10309_v50 }
 0x3d3   : > { %v1241_v47 = vadd.f32 %v6819_v46, %v1209_v29  ;;  %v4907_v29 = vld [vmem:[%s5126_s23 + $0x38] sm:$0xff] }
 0x3d4   : > { %v7124_v19 = vpop.xlane.xlu2 %774  ;;  %v1211_v50 = vmul.f32 %v6810_v55, %v1179_v27 }
 0x3d6   : > { %2701 = vadd.xlane.f32.xlu1 %v2700_v20  ;;  %v1949_v20 = vmul.f32 %v4713_v25, %v1948_v57  ;;  %4521 = vmatmul.msk.f32.gmra.mxu3 %vm274_vm0, %v4906_v62  ;;  %v7153_v57 = vpop.xlane.xlu0 %2668  ;;  %v10312_v62 = vld [vmem:[#allocation125_spill] sm:$0xff]  ;;  %v1243_v27 = vadd.f32 %v6819_v46, %v1211_v50 }
 0x3d7   : > { %10310 = vst [vmem:[#allocation62_spill] sm:$0xff] %v7153_v57  ;;  %v797_v33 = vmul.f32 %v10312_v62, %v5471_v26  ;;  %v2569_v57 = vmul.f32 %v10314_v28, %v5471_v26  ;;  %v7176_v62 = vsub.f32 %v10315_v22, %v2577_v13 }
 0x3d8   : > { %v1953_v58 = vsel %vm1952_vm2, %v4713_v25, %v1949_v20  ;;  %v7165_v25 = vadd.f32 1e-05, %v1690_v32  ;;  %v2694_v32 = vsel %vm274_vm0, %v2638_v0, 0.0 }
 0x3d9   : > { %v2075_v7 = vmul.f32 %v1953_v58, %v10313_v43  ;;  %10316 = vst [vmem:[#allocation56_spill] sm:$0xff] %v7176_v62  ;;  %v1956_v43 = vmul.f32 %v7147_v21, %v1955_v24  ;;  %v7180_v58 = vadd.f32 1e-05, %v797_v33  ;;  %v2641_v24 = vmul.f32 %v7176_v62, %v7176_v62  ;;  %v10319_v33 = vld [vmem:[#allocation44_spill] sm:$0xff] }
 0x3da   : > { %4716 = vrsqrt.f32 %v7165_v25  ;;  %v2572_v50 = vmul.f32 %v10319_v33, %v5471_v26  ;;  %v796_v62 = vmul.f32 %v10323_v39, %v5471_v26  ;;  %vm1940_vm7 = vweird.f32 %v7165_v25 }
 0x3db   : > { %v1957_v22 = vmul.f32 0.5, %v1956_v43  ;;  %4718 = vrsqrt.f32 %v7180_v58  ;;  %vm1029_vm10 = vweird.f32 %v7180_v58 }
 0x3dc   : > { %v7139_v56 = vpop.xlane.xlu2 %2557 }
 0x3dd   : > { %v1958_v43 = vsub.f32 1.5, %v1957_v22 }
 0x3de   : > { %4522 = vmatmul.msk.f32.gmra.mxu3 %vm274_vm0, %v4907_v29 }
 0x3df   : > { %v1959_v33 = vmul.f32 %v7147_v21, %v1958_v43 }
 0x3e0   : > { %v4717_v29 = vpop.eup %4716 }
 0x3e1   : > { %vm1941_vm6 = vweird.f32 %v4717_v29 }
 0x3e2   : > { %vm1942_vm8 = vmor %vm1940_vm7, %vm1941_vm6 }
 0x3e4   : > { %v2211_v34 = vpop.permute.xlu2 %2210 }
 0x3e5   : > { %v2292_v20 = vsel %vm274_vm0, %v1241_v47, %v2211_v34  ;;  %v2107_v47 = vmul.f32 %v6810_v55, %v2075_v7  ;;  %v10317_v34 = vld [vmem:[#allocation12_spill] sm:$0xff]  ;;  %v4908_v7 = vld [vmem:[%s5126_s23 + $0x40] sm:$0xff] }
 0x3e6   : > { %2325 = vst.msk [vmem:[%s6486_s6 + $0xe0] sm:$0xff] %vm2310_vm11, %v2292_v20  ;;  %v7186_v20 = vsub.f32 %v10317_v34, %v2569_v57  ;;  %4523 = vmatmul.msk.f32.gmra.mxu3 %vm274_vm0, %v4908_v7 }
 0x3e7   : > { %2695 = vadd.xlane.f32.xlu0 %v2694_v32  ;;  %v2139_v0 = vadd.f32 %v6819_v46, %v2107_v47  ;;  %v2703_v32 = vsel %vm274_vm0, %v2641_v24, 0.0  ;;  %v1935_v47 = vmul.f32 %v4717_v29, %v7165_v25  ;;  %v10326_v25 = vld [vmem:[#allocation113_spill] sm:$0xff] }
 0x3e8   : > { %10318 = vst [vmem:[#allocation39_spill] sm:$0xff] %v7186_v20  ;;  %v2633_v57 = vmul.f32 %v7186_v20, %v7186_v20 }
 0x3e9   : > { %v2215_v28 = vpop.permute.xlu0 %2214  ;;  %v1936_v24 = vmul.f32 %v4717_v29, %v1935_v47 }
 0x3ea   : > { %v2294_v13 = vsel %vm274_vm0, %v1243_v27, %v2215_v28  ;;  %v10320_v27 = vld [vmem:[#allocation15_spill] sm:$0xff]  ;;  %v2679_v28 = vsel %vm274_vm0, %v2633_v57, 0.0  ;;  %v1963_v57 = vsel %vm1962_vm5, %v7147_v21, %v1959_v33  ;;  %v7226_v33 = vadd.f32 1e-05, %v796_v62 }
 0x3eb   : > { %2327 = vst.msk [vmem:[%s6486_s6 + $0x100] sm:$0xff] %vm2310_vm11, %v2294_v13  ;;  %v7204_v34 = vsub.f32 %v10320_v27, %v2572_v50  ;;  %v4719_v13 = vpop.eup %4718  ;;  %v4909_v50 = vld [vmem:[%s5126_s23 + $0x48] sm:$0xff]  ;;  %v1937_v43 = vmul.f32 0.5, %v1936_v24 }
 0x3ec   : > { %v1024_v22 = vmul.f32 %v4719_v13, %v7180_v58  ;;  %4720 = vrsqrt.f32 %v7226_v33  ;;  %vm1030_vm9 = vweird.f32 %v4719_v13  ;;  %v10328_v58 = vld [vmem:[#allocation103_spill] sm:$0xff]  ;;  %vm1019_vm14 = vweird.f32 %v7226_v33 }
 0x3ed   : > { %10321 = vst [vmem:[#allocation78_spill] sm:$0xff] %v7204_v34  ;;  %v1938_v20 = vsub.f32 1.5, %v1937_v43  ;;  %v4911_v43 = vld [vmem:[%s5126_s23 + $0x58] sm:$0xff]  ;;  %vm1031_vm12 = vmor %vm1029_vm10, %vm1030_vm9 }
 0x3ee   : > { %4524 = vmatmul.msk.f32.gmra.mxu3 %vm274_vm0, %v4909_v50  ;;  %v1025_v7 = vmul.f32 %v4719_v13, %v1024_v22  ;;  %v10324_v50 = vld [vmem:[#allocation51_spill] sm:$0xff] }
 0x3ef   : > { %2224 = vrot.lane.b32.xlu1 %v2139_v0, %s5005_s25  ;;  %2704 = vadd.xlane.f32.xlu0 %v2703_v32  ;;  %v2636_v0 = vmul.f32 %v7204_v34, %v7204_v34  ;;  %v10322_v32 = vld [vmem:[#allocation117_spill] sm:$0xff]  ;;  %v4910_v34 = vld [vmem:[%s5126_s23 + $0x50] sm:$0xff]  ;;  %v798_v21 = vmul.f32 %v10324_v50, %v5471_v26  ;;  %v1939_v24 = vmul.f32 %v4717_v29, %v1938_v20 }
 0x3f0   : > { %v2076_v27 = vmul.f32 %v1963_v57, %v10322_v32  ;;  %v1026_v47 = vmul.f32 0.5, %v1025_v7 }
 0x3f1   : > { %v7229_v57 = vadd.f32 1e-05, %v798_v21  ;;  %v1943_v62 = vsel %vm1942_vm8, %v4717_v29, %v1939_v24 }
 0x3f2   : > { %v2108_v60 = vmul.f32 %v6810_v55, %v2076_v27  ;;  %v1027_v22 = vsub.f32 1.5, %v1026_v47  ;;  %v2074_v20 = vmul.f32 %v1943_v62, %v10326_v25  ;;  %v4721_v32 = vpop.eup %4720  ;;  %v10332_v25 = vld [vmem:[#allocation90_spill] sm:$0xff] }
 0x3f3   : > { %2680 = vadd.xlane.f32.xlu2 %v2679_v28  ;;  %v2688_v28 = vsel %vm274_vm0, %v2636_v0, 0.0  ;;  %4722 = vrsqrt.f32 %v7229_v57  ;;  %v1014_v50 = vmul.f32 %v4721_v32, %v7226_v33  ;;  %vm1020_vm13 = vweird.f32 %v4721_v32 }
 0x3f4   : > { %v2140_v0 = vadd.f32 %v6819_v46, %v2108_v60  ;;  %v1694_v60 = vmul.f32 %v6739_v45, %v5471_v26  ;;  %v2106_v21 = vmul.f32 %v6810_v55, %v2074_v20  ;;  %v4912_v45 = vld [vmem:[%s5126_s23 + $0x60] sm:$0xff]  ;;  %v2582_v20 = vmul.f32 %v10332_v25, %v5471_v26  ;;  %vm1021_vm15 = vmor %vm1019_vm14, %vm1020_vm13 }
 0x3f5   : > { %v1015_v62 = vmul.f32 %v4721_v32, %v1014_v50  ;;  %vm1039_vm2 = vweird.f32 %v7229_v57 }
 0x3f6   : > { %4525 = vmatmul.msk.f32.gmra.mxu3 %vm274_vm0, %v4910_v34  ;;  %v7233_v7 = vpop.xlane.xlu1 %2674  ;;  %v1028_v34 = vmul.f32 %v4719_v13, %v1027_v22  ;;  %v7245_v29 = vadd.f32 1e-05, %v1694_v60 }
 0x3f7   : > { %10325 = vst [vmem:[#allocation92_spill] sm:$0xff] %v7233_v7 }
 0x3f8   : > { %v1032_v27 = vsel %vm1031_vm12, %v4719_v13, %v1028_v34  ;;  %v10330_v13 = vld [vmem:[#allocation29_spill] sm:$0xff]  ;;  %4724 = vrsqrt.f32 %v7245_v29  ;;  %vm1980_vm5 = vweird.f32 %v7245_v29 }
 0x3f9   : > { %v7247_v47 = vpop.eup %4722  ;;  %v1181_v22 = vmul.f32 %v1032_v27, %v10328_v58 }
 0x3fa   : > { %v1034_v34 = vmul.f32 %v7247_v47, %v7229_v57  ;;  %vm1040_vm1 = vweird.f32 %v7247_v47  ;;  %v7322_v57 = vld [vmem:[%s9959_s3] ss:$0 sm:$0xff] }
 0x3fb   : > { %2689 = vadd.xlane.f32.xlu2 %v2688_v28  ;;  %v10327_v28 = vld [vmem:[#allocation73_spill] sm:$0xff]  ;;  %v1213_v60 = vmul.f32 %v6810_v55, %v1181_v22  ;;  %v10333_v22 = vld [vmem:[#allocation40_spill] sm:$0xff]  ;;  %vm1041_vm3 = vmor %vm1039_vm2, %vm1040_vm1 }
 0x3fc   : > { %v2579_v39 = vmul.f32 %v10327_v28, %v5471_v26  ;;  %v1035_v27 = vmul.f32 %v7247_v47, %v1034_v34  ;;  %v1695_v34 = vmul.f32 %v6791_v42, %v5471_v26 }
 0x3fd   : > { %v1245_v58 = vadd.f32 %v6819_v46, %v1213_v60 }
 0x3fe   : > { %4526 = vmatmul.msk.f32.gmra.mxu3 %vm274_vm0, %v4911_v43  ;;  %v7252_v24 = vpop.xlane.xlu1 %2683  ;;  %v2138_v43 = vadd.f32 %v6819_v46, %v2106_v21  ;;  %v4913_v21 = vld [vmem:[%s5126_s23 + $0x68] sm:$0xff] }
 0x3ff   : > { %10329 = vst [vmem:[#allocation76_spill] sm:$0xff] %v7252_v24  ;;  %v4915_v24 = vld [vmem:[%s5126_s23 + $0x78] sm:$0xff] }
 0x403   : > { %2226 = vrot.lane.b32.xlu0 %v2140_v0, %s5005_s25  ;;  %v7257_v0 = vsub.f32 %v10330_v13, %v2579_v39  ;;  %v1016_v39 = vmul.f32 0.5, %v1015_v62  ;;  %v7277_v13 = vsub.f32 %v10333_v22, %v2582_v20 }
 0x405   : > { %10331 = vst [vmem:[#allocation47_spill] sm:$0xff] %v7257_v0  ;;  %v2643_v28 = vmul.f32 %v7257_v0, %v7257_v0  ;;  %v1017_v62 = vsub.f32 1.5, %v1016_v39  ;;  %v2646_v20 = vmul.f32 %v7277_v13, %v7277_v13  ;;  %v10336_v39 = vld [vmem:[#allocation83_spill] sm:$0xff] }
 0x406   : > { %4527 = vmatmul.msk.f32.gmra.mxu3 %vm274_vm0, %v4912_v45  ;;  %v7271_v45 = vpop.eup %4724  ;;  %10334 = vst [vmem:[#allocation87_spill] sm:$0xff] %v7277_v13 }
 0x407   : > { %v2709_v46 = vsel %vm274_vm0, %v2643_v28, 0.0  ;;  %v1975_v60 = vmul.f32 %v7271_v45, %v7245_v29  ;;  %v4914_v28 = vld [vmem:[%s5126_s23 + $0x70] sm:$0xff]  ;;  %vm1981_vm4 = vweird.f32 %v7271_v45 }
 0x408   : > { %vm7337_vm6 = vmor %vm1980_vm5, %vm1981_vm4 }
 0x40e   : > { %4528 = vmatmul.msk.f32.gmra.mxu3 %vm274_vm0, %v4913_v21  ;;  %v7286_v21 = vadd.f32 1e-05, %v1695_v34 }
 0x410   : > { %4726 = vrsqrt.f32 %v7286_v21  ;;  %vm1990_vm8 = vweird.f32 %v7286_v21 }
 0x413   : > { %2222 = vrot.lane.b32.xlu2 %v2138_v43, %s5005_s25  ;;  %v1036_v43 = vmul.f32 0.5, %v1035_v27  ;;  %v1976_v27 = vmul.f32 %v7271_v45, %v1975_v60 }
 0x415   : > { %v1037_v25 = vsub.f32 1.5, %v1036_v43  ;;  %v2718_v43 = vsel %vm274_vm0, %v2646_v20, 0.0 }
 0x416   : > { %v2219_v50 = vpop.permute.xlu1 %2218  ;;  %4529 = vmatmul.msk.f32.gmra.mxu3 %vm274_vm0, %v4914_v28  ;;  %v10339_v28 = vld [vmem:[#allocation100_spill] sm:$0xff]  ;;  %v7312_v0 = vpop.eup %4726 }
 0x417   : > { %v2296_v55 = vsel %vm274_vm0, %v1245_v58, %v2219_v50  ;;  %v1018_v58 = vmul.f32 %v4721_v32, %v1017_v62  ;;  %v7293_v50 = vpop.xlane.xlu0 %2677  ;;  %v1038_v22 = vmul.f32 %v7247_v47, %v1037_v25  ;;  %v10337_v62 = vld [vmem:[#allocation34_spill] sm:$0xff]  ;;  %vm1991_vm7 = vweird.f32 %v7312_v0 }
 0x418   : > { %2329 = vst.msk [vmem:[%s6486_s6 + $0x120] sm:$0xff] %vm2310_vm11, %v2296_v55  ;;  %v2580_v55 = vmul.f32 %v10336_v39, %v5471_v26  ;;  %vm1992_vm9 = vmor %vm1990_vm8, %vm1991_vm7 }
 0x419   : > { %2710 = vadd.xlane.f32.xlu1 %v2709_v46  ;;  %10335 = vst [vmem:[#allocation59_spill] sm:$0xff] %v7293_v50  ;;  %v1022_v34 = vsel %vm1021_vm15, %v4721_v32, %v1018_v58  ;;  %v1977_v46 = vmul.f32 0.5, %v1976_v27  ;;  %v1042_v33 = vsel %vm1041_vm3, %v7247_v47, %v1038_v22  ;;  %v10341_v32 = vld [vmem:[#allocation105_spill] sm:$0xff]  ;;  %v10363_v50 = vld [vmem:[#allocation72_spill] sm:$0xff] }
 0x41a   : > { %v7306_v60 = vsub.f32 %v10337_v62, %v2580_v55  ;;  %v1180_v39 = vmul.f32 %v1022_v34, %v10339_v28  ;;  %v1182_v20 = vmul.f32 %v1042_v33, %v10341_v32  ;;  %v10343_v55 = vld [vmem:[#allocation98_spill] sm:$0xff]  ;;  %v1693_v34 = vmul.f32 %v6730_v4, %v5471_v26  ;;  %v7344_v33 = vld [vmem:[%s9960_s4] ss:$0 sm:$0xff] }
 0x41b   : > { %v1978_v25 = vsub.f32 1.5, %v1977_v46  ;;  %v2583_v22 = vmul.f32 %v10343_v55, %v5471_v26 }
 0x41c   : > { %10338 = vst [vmem:[#allocation80_spill] sm:$0xff] %v7306_v60  ;;  %v1212_v47 = vmul.f32 %v7322_v57, %v1180_v39  ;;  %v2644_v27 = vmul.f32 %v7306_v60, %v7306_v60  ;;  %v1214_v46 = vmul.f32 %v7322_v57, %v1182_v20  ;;  %v10346_v39 = vld [vmem:[#allocation48_spill] sm:$0xff]  ;;  %v7355_v55 = vadd.f32 1e-05, %v1693_v34 }
 0x41d   : > { %v7291_v42 = vpop.xlane.xlu2 %2662 }
 0x41e   : > { %4530 = vmatmul.msk.f32.gmra.mxu3 %vm274_vm0, %v4915_v24  ;;  %v1985_v24 = vmul.f32 %v7312_v0, %v7286_v21  ;;  %v1244_v28 = vadd.f32 %v7344_v33, %v1212_v47  ;;  %v2712_v20 = vsel %vm274_vm0, %v2644_v27, 0.0  ;;  %v10348_v47 = vld [vmem:[#allocation53_spill] sm:$0xff]  ;;  %v800_v27 = vmul.f32 %v6595_v3, %v5471_v26 }
 0x41f   : > { %v7317_v58 = vpop.xlane.xlu0 %2686  ;;  %4728 = vrsqrt.f32 %v7355_v55  ;;  %vm1970_vm12 = vweird.f32 %v7355_v55 }
 0x420   : > { %10342 = vst [vmem:[#allocation27_spill] sm:$0xff] %v7317_v58  ;;  %v1986_v29 = vmul.f32 %v7312_v0, %v1985_v24  ;;  %v4918_v58 = vld [vmem:[%s5126_s23 + $0x80] sm:$0xff] }
 0x421   : > { %2719 = vadd.xlane.f32.xlu1 %v2718_v43  ;;  %v1979_v43 = vmul.f32 %v7271_v45, %v1978_v25  ;;  %v7348_v25 = vsub.f32 %v10346_v39, %v2583_v22  ;;  %v2575_v22 = vmul.f32 %v10348_v47, %v5471_v26  ;;  %v10352_v47 = vld [vmem:[#allocation68_spill] sm:$0xff] }
 0x422   : > { %v1987_v62 = vmul.f32 0.5, %v1986_v29 }
 0x423   : > { %10347 = vst [vmem:[#allocation7_spill] sm:$0xff] %v7348_v25  ;;  %v1983_v4 = vsel %vm7337_vm6, %v7271_v45, %v1979_v43  ;;  %v1246_v45 = vadd.f32 %v7344_v33, %v1214_v46  ;;  %v10349_v43 = vld [vmem:[#allocation57_spill] sm:$0xff]  ;;  %v7377_v46 = vadd.f32 1e-05, %v800_v27 }
 0x424   : > { %v2078_v24 = vmul.f32 %v1983_v4, %v10349_v43  ;;  %v1988_v4 = vsub.f32 1.5, %v1987_v62 }
 0x425   : > { %v7310_v13 = vpop.xlane.xlu2 %2671  ;;  %v4729_v27 = vpop.eup %4728  ;;  %4730 = vrsqrt.f32 %v7377_v46  ;;  %vm1059_vm15 = vweird.f32 %v7377_v46 }
 0x426   : > { %10340 = vst [vmem:[#allocation74_spill] sm:$0xff] %v7310_v13  ;;  %4531 = vmatmul.msk.f32.gmra.mxu3 %vm274_vm0, %v4918_v58  ;;  %v2647_v58 = vmul.f32 %v7348_v25, %v7348_v25  ;;  %v2110_v3 = vmul.f32 %v7322_v57, %v2078_v24  ;;  %v1989_v24 = vmul.f32 %v7312_v0, %v1988_v4  ;;  %vm1971_vm10 = vweird.f32 %v4729_v27  ;;  %v10372_v13 = vld [vmem:[#allocation114_spill] sm:$0xff] }
 0x427   : > { %vm1972_vm13 = vmor %vm1970_vm12, %vm1971_vm10 }
 0x428   : > { %v2721_v29 = vsel %vm274_vm0, %v2647_v58, 0.0  ;;  %v2142_v43 = vadd.f32 %v7344_v33, %v2110_v3  ;;  %v1993_v3 = vsel %vm1992_vm9, %v7312_v0, %v1989_v24 }
 0x42b   : > { %v4731_v4 = vpop.eup %4730 }
 0x42c   : > { %v1054_v21 = vmul.f32 %v4731_v4, %v7377_v46  ;;  %vm1060_vm14 = vweird.f32 %v4731_v4  ;;  %v10357_v46 = vld [vmem:[#allocation106_spill] sm:$0xff] }
 0x42d   : > { %v2217_v32 = vpop.permute.xlu2 %2216  ;;  %2713 = vadd.xlane.f32.xlu0 %v2712_v20  ;;  %v4919_v20 = vld [vmem:[%s5126_s23 + $0x88] sm:$0xff]  ;;  %vm1061_vm1 = vmor %vm1059_vm15, %vm1060_vm14 }
 0x42e   : > { %v2295_v60 = vsel %vm274_vm0, %v1244_v28, %v2217_v32  ;;  %v7380_v32 = vpop.f32.mrf.mxu3  ;;  %4532 = vmatmul.msk.f32.gmra.mxu3 %vm274_vm0, %v4919_v20 }
 0x42f   : > { %2328 = vst.msk [vmem:[%s6486_s6 + $0x108] sm:$0xff] %vm2310_vm11, %v2295_v60  ;;  %v2221_v34 = vpop.permute.xlu0 %2220  ;;  %v10350_v60 = vld [vmem:[#allocation18_spill] sm:$0xff] }
 0x430   : > { %v2297_v28 = vsel %vm274_vm0, %v1246_v45, %v2221_v34  ;;  %v7375_v39 = vsub.f32 %v10350_v60, %v2575_v22  ;;  %v2578_v45 = vmul.f32 %v10352_v47, %v5471_v26  ;;  %v10353_v34 = vld [vmem:[#allocation25_spill] sm:$0xff] }
 0x431   : > { %2330 = vst.msk [vmem:[%s6486_s6 + $0x128] sm:$0xff] %vm2310_vm11, %v2297_v28  ;;  %v1965_v28 = vmul.f32 %v4729_v27, %v7355_v55  ;;  %v1697_v55 = vmul.f32 %v6857_v9, %v5471_v26 }
 0x432   : > { %10351 = vst [vmem:[#allocation52_spill] sm:$0xff] %v7375_v39  ;;  %v2639_v22 = vmul.f32 %v7375_v39, %v7375_v39  ;;  %v7395_v62 = vsub.f32 %v10353_v34, %v2578_v45  ;;  %v2079_v45 = vmul.f32 %v1993_v3, %v6534_v10  ;;  %v799_v34 = vmul.f32 %v6531_v5, %v5471_v26 }
 0x433   : > { %v1966_v20 = vmul.f32 %v4729_v27, %v1965_v28  ;;  %v801_v28 = vmul.f32 %v6622_v38, %v5471_v26  ;;  %v7453_v9 = vadd.f32 1e-05, %v1697_v55 }
 0x434   : > { %10354 = vst [vmem:[#allocation20_spill] sm:$0xff] %v7395_v62  ;;  %v2697_v58 = vsel %vm274_vm0, %v2639_v22, 0.0  ;;  %v2642_v47 = vmul.f32 %v7395_v62, %v7395_v62  ;;  %v2111_v0 = vmul.f32 %v7322_v57, %v2079_v45  ;;  %v7419_v3 = vadd.f32 1e-05, %v799_v34 }
 0x435   : > { %2722 = vadd.xlane.f32.xlu0 %v2721_v29  ;;  %v4920_v29 = vld [vmem:[%s5126_s23 + $0x90] sm:$0xff]  ;;  %v1967_v22 = vmul.f32 0.5, %v1966_v20  ;;  %vm2010_vm9 = vweird.f32 %v7453_v9 }
 0x436   : > { %v7400_v60 = vpop.f32.mrf.mxu3  ;;  %4533 = vmatmul.msk.f32.gmra.mxu3 %vm274_vm0, %v4920_v29  ;;  %v4921_v29 = vld [vmem:[%s5126_s23 + $0x98] sm:$0xff]  ;;  %v2143_v20 = vadd.f32 %v7344_v33, %v2111_v0  ;;  %4732 = vrsqrt.f32 %v7419_v3  ;;  %vm1049_vm4 = vweird.f32 %v7419_v3 }
 0x437   : > { %v1968_v10 = vsub.f32 1.5, %v1967_v22  ;;  %v4922_v22 = vld [vmem:[%s5126_s23 + $0xa0] sm:$0xff] }
 0x439   : > { %v1969_v45 = vmul.f32 %v4729_v27, %v1968_v10 }
 0x43a   : > { %2230 = vrot.lane.b32.xlu1 %v2142_v43, %s5005_s25  ;;  %v2706_v43 = vsel %vm274_vm0, %v2642_v47, 0.0  ;;  %v7422_v47 = vadd.f32 1e-05, %v801_v28 }
 0x43c   : > { %2698 = vadd.xlane.f32.xlu2 %v2697_v58  ;;  %v1055_v58 = vmul.f32 %v4731_v4, %v1054_v21  ;;  %4734 = vrsqrt.f32 %v7422_v47  ;;  %v7434_v28 = vpop.eup %4732  ;;  %vm1069_vm6 = vweird.f32 %v7422_v47 }
 0x43d   : > { %4736 = vrsqrt.f32 %v7453_v9  ;;  %vm1050_vm2 = vweird.f32 %v7434_v28 }
 0x43e   : > { %v7413_v24 = vpop.f32.mrf.mxu3  ;;  %4534 = vmatmul.msk.f32.gmra.mxu3 %vm274_vm0, %v4921_v29  ;;  %v1056_v5 = vmul.f32 0.5, %v1055_v58  ;;  %v10356_v58 = vld [vmem:[#allocation23_spill] sm:$0xff]  ;;  %vm1051_vm5 = vmor %vm1049_vm4, %vm1050_vm2 }
 0x440   : > { %v1057_v21 = vsub.f32 1.5, %v1056_v5 }
 0x441   : > { %v7432_v34 = vpop.xlane.xlu1 %2692 }
 0x442   : > { %10355 = vst [vmem:[#allocation95_spill] sm:$0xff] %v7432_v34  ;;  %v1058_v0 = vmul.f32 %v4731_v4, %v1057_v21  ;;  %v7437_v10 = vpop.eup %4734 }
 0x443   : > { %vm1070_vm3 = vweird.f32 %v7437_v10 }
 0x444   : > { %2707 = vadd.xlane.f32.xlu2 %v2706_v43  ;;  %v1973_v43 = vsel %vm1972_vm13, %v4729_v27, %v1969_v45  ;;  %v1062_v5 = vsel %vm1061_vm1, %v4731_v4, %v1058_v0  ;;  %v1044_v27 = vmul.f32 %v7434_v28, %v7419_v3  ;;  %v1064_v45 = vmul.f32 %v7437_v10, %v7422_v47  ;;  %vm1071_vm7 = vmor %vm1069_vm6, %vm1070_vm3  ;;  %v10370_v47 = vld [vmem:[#allocation107_spill] sm:$0xff] }
 0x445   : > { %v2077_v29 = vmul.f32 %v1973_v43, %v10356_v58  ;;  %v2585_v43 = vmul.f32 %v10357_v46, %v5471_v26  ;;  %v10358_v58 = vld [vmem:[#allocation116_spill] sm:$0xff] }
 0x446   : > { %v7426_v38 = vpop.f32.mrf.mxu3  ;;  %4535 = vmatmul.msk.f32.gmra.mxu3 %vm274_vm0, %v4922_v22  ;;  %v4923_v22 = vld [vmem:[%s5126_s23 + $0xa8] sm:$0xff]  ;;  %v1184_v25 = vmul.f32 %v1062_v5, %v10358_v58  ;;  %v1045_v0 = vmul.f32 %v7434_v28, %v1044_v27  ;;  %v1065_v34 = vmul.f32 %v7437_v10, %v1064_v45  ;;  %v1698_v27 = vmul.f32 %v6918_v31, %v5471_v26  ;;  %v4924_v45 = vld [vmem:[%s5126_s23 + $0xb0] sm:$0xff] }
 0x447   : > { %v2109_v21 = vmul.f32 %v7322_v57, %v2077_v29  ;;  %v10360_v29 = vld [vmem:[#allocation54_spill] sm:$0xff] }
 0x448   : > { %v7462_v39 = vsub.f32 %v10360_v29, %v2585_v43  ;;  %v1216_v55 = vmul.f32 %v7322_v57, %v1184_v25  ;;  %v1046_v5 = vmul.f32 0.5, %v1045_v0  ;;  %v1066_v46 = vmul.f32 0.5, %v1065_v34  ;;  %v7478_v25 = vpop.eup %4736 }
 0x449   : > { %2232 = vrot.lane.b32.xlu0 %v2143_v20, %s5005_s25  ;;  %v7456_v4 = vpop.xlane.xlu1 %2701  ;;  %v2141_v62 = vadd.f32 %v7344_v33, %v2109_v21  ;;  %v10362_v21 = vld [vmem:[#allocation111_spill] sm:$0xff]  ;;  %v7480_v34 = vadd.f32 1e-05, %v1698_v27  ;;  %vm2011_vm8 = vweird.f32 %v7478_v25 }
 0x44a   : > { %10359 = vst [vmem:[#allocation5_spill] sm:$0xff] %v7456_v4  ;;  %v2588_v43 = vmul.f32 %v10362_v21, %v5471_v26  ;;  %v2649_v58 = vmul.f32 %v7462_v39, %v7462_v39  ;;  %v1047_v4 = vsub.f32 1.5, %v1046_v5  ;;  %v1067_v0 = vsub.f32 1.5, %v1066_v46  ;;  %vm2012_vm10 = vmor %vm2010_vm9, %vm2011_vm8 }
 0x44b   : > { %10361 = vst [vmem:[#allocation63_spill] sm:$0xff] %v7462_v39  ;;  %4738 = vrsqrt.f32 %v7480_v34  ;;  %vm2020_vm13 = vweird.f32 %v7480_v34 }
 0x44c   : > { %v2727_v21 = vsel %vm274_vm0, %v2649_v58, 0.0  ;;  %v1048_v46 = vmul.f32 %v7434_v28, %v1047_v4  ;;  %v1068_v27 = vmul.f32 %v7437_v10, %v1067_v0  ;;  %v10367_v58 = vld [vmem:[#allocation108_spill] sm:$0xff] }
 0x44e   : > { %v7442_v20 = vpop.f32.mrf.mxu3  ;;  %4536 = vmatmul.msk.f32.gmra.mxu3 %vm274_vm0, %v4923_v22  ;;  %v1052_v0 = vsel %vm1051_vm5, %v7434_v28, %v1048_v46  ;;  %v2589_v28 = vmul.f32 %v10372_v13, %v5471_v26  ;;  %v10374_v13 = vld [vmem:[#allocation82_spill] sm:$0xff] }
 0x44f   : > { %v1183_v7 = vmul.f32 %v1052_v0, %v10370_v47 }
 0x451   : > { %v7517_v3 = vpop.eup %4738  ;;  %v1215_v0 = vmul.f32 %v7322_v57, %v1183_v7 }
 0x452   : > { %vm2021_vm12 = vweird.f32 %v7517_v3 }
 0x453   : > { %v1247_v7 = vadd.f32 %v7344_v33, %v1215_v0  ;;  %vm2022_vm14 = vmor %vm2020_vm13, %vm2021_vm12 }
 0x456   : > { %v7467_v22 = vpop.f32.mrf.mxu3  ;;  %4537 = vmatmul.msk.f32.gmra.mxu3 %vm274_vm0, %v4924_v45  ;;  %v7484_v45 = vsub.f32 %v10363_v50, %v2588_v43  ;;  %v4925_v43 = vld [vmem:[%s5126_s23 + $0xb8] sm:$0xff] }
 0x458   : > { %10364 = vst [vmem:[#allocation26_spill] sm:$0xff] %v7484_v45 }
 0x45a   : > { %v7491_v39 = vpop.xlane.xlu0 %2695 }
 0x45b   : > { %10365 = vst [vmem:[#allocation93_spill] sm:$0xff] %v7491_v39 }
 0x45c   : > { %2228 = vrot.lane.b32.xlu2 %v2141_v62, %s5005_s25  ;;  %v1248_v62 = vadd.f32 %v7344_v33, %v1216_v55  ;;  %v2005_v55 = vmul.f32 %v7478_v25, %v7453_v9 }
 0x45e   : > { %v7493_v5 = vpop.f32.mrf.mxu3  ;;  %4538 = vmatmul.msk.f32.gmra.mxu3 %vm274_vm0, %v4925_v43  ;;  %v2006_v4 = vmul.f32 %v7478_v25, %v2005_v55 }
 0x460   : > { %v2007_v39 = vmul.f32 0.5, %v2006_v4 }
 0x461   : > { %v2225_v29 = vpop.permute.xlu1 %2224 }
 0x462   : > { %v2299_v31 = vsel %vm274_vm0, %v1248_v62, %v2225_v29  ;;  %v2586_v62 = vmul.f32 %v10367_v58, %v5471_v26  ;;  %v2652_v29 = vmul.f32 %v7484_v45, %v7484_v45  ;;  %v7525_v46 = vpop.xlane.xlu0 %2704  ;;  %v2008_v4 = vsub.f32 1.5, %v2007_v39 }
 0x463   : > { %2332 = vst.msk [vmem:[%s6486_s6 + $0x148] sm:$0xff] %vm2310_vm11, %v2299_v31  ;;  %v1072_v31 = vsel %vm1071_vm7, %v7437_v10, %v1068_v27  ;;  %v4926_v27 = vld [vmem:[%s5126_s23 + $0xc0] sm:$0xff] }
 0x464   : > { %2728 = vadd.xlane.f32.xlu1 %v2727_v21  ;;  %v10368_v21 = vld [vmem:[#allocation64_spill] sm:$0xff]  ;;  %v2736_v58 = vsel %vm274_vm0, %v2652_v29, 0.0  ;;  %10373 = vst [vmem:[#allocation96_spill] sm:$0xff] %v7525_v46 }
 0x465   : > { %v7514_v43 = vsub.f32 %v10368_v21, %v2586_v62  ;;  %v2015_v62 = vmul.f32 %v7517_v3, %v7480_v34  ;;  %v1696_v21 = vmul.f32 %v6855_v59, %v5471_v26 }
 0x466   : > { %v7500_v50 = vpop.xlane.xlu2 %2680  ;;  %v7519_v45 = vpop.f32.mrf.mxu3  ;;  %4539 = vmatmul.msk.f32.gmra.mxu3 %vm274_vm0, %v4926_v27  ;;  %v2009_v27 = vmul.f32 %v7478_v25, %v2008_v4 }
 0x467   : > { %10366 = vst [vmem:[#allocation8_spill] sm:$0xff] %v7500_v50  ;;  %v10371_v50 = vld [vmem:[#allocation115_spill] sm:$0xff]  ;;  %v2650_v29 = vmul.f32 %v7514_v43, %v7514_v43  ;;  %v7555_v4 = vadd.f32 1e-05, %v1696_v21  ;;  %v803_v21 = vmul.f32 %v6848_v37, %v5471_v26  ;;  %v10379_v37 = vld [vmem:[#allocation102_spill] sm:$0xff] }
 0x468   : > { %10369 = vst [vmem:[#allocation110_spill] sm:$0xff] %v7514_v43  ;;  %v1185_v55 = vmul.f32 %v1072_v31, %v10371_v50  ;;  %v7538_v31 = vsub.f32 %v10374_v13, %v2589_v28  ;;  %v2013_v43 = vsel %vm2012_vm10, %v7478_v25, %v2009_v27  ;;  %v4928_v25 = vld [vmem:[%s5126_s23 + $0xd0] sm:$0xff] }
 0x469   : > { %v2730_v47 = vsel %vm274_vm0, %v2650_v29, 0.0  ;;  %v4927_v29 = vld [vmem:[%s5126_s23 + $0xc8] sm:$0xff]  ;;  %4740 = vrsqrt.f32 %v7555_v4  ;;  %v7578_v27 = vadd.f32 1e-05, %v803_v21  ;;  %vm2000_vm1 = vweird.f32 %v7555_v4 }
 0x46a   : > { %v1217_v50 = vmul.f32 %v7322_v57, %v1185_v55  ;;  %10375 = vst [vmem:[#allocation31_spill] sm:$0xff] %v7538_v31 }
 0x46b   : > { %4742 = vrsqrt.f32 %v7578_v27  ;;  %vm1089_vm4 = vweird.f32 %v7578_v27 }
 0x46c   : > { %2737 = vadd.xlane.f32.xlu1 %v2736_v58  ;;  %v2016_v58 = vmul.f32 %v7517_v3, %v2015_v62  ;;  %v1249_v55 = vadd.f32 %v7344_v33, %v1217_v50  ;;  %v2653_v62 = vmul.f32 %v7538_v31, %v7538_v31  ;;  %v10376_v50 = vld [vmem:[#allocation86_spill] sm:$0xff] }
 0x46d   : > { %v2581_v9 = vmul.f32 %v10376_v50, %v5471_v26 }
 0x46e   : > { %v7527_v10 = vpop.xlane.xlu2 %2689  ;;  %v7546_v39 = vpop.f32.mrf.mxu3  ;;  %4540 = vmatmul.msk.f32.gmra.mxu3 %vm274_vm0, %v4927_v29  ;;  %v2017_v13 = vmul.f32 0.5, %v2016_v58  ;;  %v2739_v29 = vsel %vm274_vm0, %v2653_v62, 0.0  ;;  %v2081_v58 = vmul.f32 %v2013_v43, %v6613_v52  ;;  %v2584_v43 = vmul.f32 %v10379_v37, %v5471_v26 }
 0x46f   : > { %v804_v37 = vmul.f32 %v6764_v40, %v5471_v26 }
 0x470   : > { %v2113_v52 = vmul.f32 %v7322_v57, %v2081_v58 }
 0x472   : > { %v2145_v50 = vadd.f32 %v7344_v33, %v2113_v52 }
 0x473   : > { %2731 = vadd.xlane.f32.xlu0 %v2730_v47 }
 0x475   : > { %v2227_v28 = vpop.permute.xlu0 %2226 }
 0x476   : > { %v2223_v59 = vpop.permute.xlu2 %2222  ;;  %v2300_v47 = vsel %vm274_vm0, %v1249_v55, %v2227_v28  ;;  %v10377_v55 = vld [vmem:[#allocation36_spill] sm:$0xff]  ;;  %v7574_v28 = vpop.f32.mrf.mxu3  ;;  %4541 = vmatmul.msk.f32.gmra.mxu3 %vm274_vm0, %v4928_v25 }
 0x477   : > { %v2298_v0 = vsel %vm274_vm0, %v1247_v7, %v2223_v59  ;;  %2333 = vst.msk [vmem:[%s6486_s6 + $0x160] sm:$0xff] %vm2310_vm11, %v2300_v47  ;;  %v2018_v7 = vsub.f32 1.5, %v2017_v13  ;;  %v7572_v59 = vsub.f32 %v10377_v55, %v2581_v9  ;;  %v10380_v9 = vld [vmem:[#allocation49_spill] sm:$0xff]  ;;  %v4929_v55 = vld [vmem:[%s5126_s23 + $0xd8] sm:$0xff] }
 0x478   : > { %2331 = vst.msk [vmem:[%s6486_s6 + $0x140] sm:$0xff] %vm2310_vm11, %v2298_v0  ;;  %v4741_v0 = vpop.eup %4740 }
 0x479   : > { %10378 = vst [vmem:[#allocation91_spill] sm:$0xff] %v7572_v59  ;;  %v2019_v62 = vmul.f32 %v7517_v3, %v2018_v7  ;;  %v2645_v13 = vmul.f32 %v7572_v59, %v7572_v59  ;;  %v1995_v21 = vmul.f32 %v4741_v0, %v7555_v4  ;;  %vm2001_vm15 = vweird.f32 %v4741_v0 }
 0x47a   : > { %vm2002_vm2 = vmor %vm2000_vm1, %vm2001_vm15 }
 0x47b   : > { %2740 = vadd.xlane.f32.xlu0 %v2739_v29  ;;  %v2023_v47 = vsel %vm2022_vm14, %v7517_v3, %v2019_v62  ;;  %v7592_v29 = vsub.f32 %v10380_v9, %v2584_v43  ;;  %v2715_v58 = vsel %vm274_vm0, %v2645_v13, 0.0  ;;  %v1996_v3 = vmul.f32 %v4741_v0, %v1995_v21  ;;  %v4743_v62 = vpop.eup %4742  ;;  %v4930_v21 = vld [vmem:[%s5126_s23 + $0xe0] sm:$0xff] }
 0x47c   : > { %v2082_v34 = vmul.f32 %v2023_v47, %v6677_v8  ;;  %v1084_v43 = vmul.f32 %v4743_v62, %v7578_v27  ;;  %v802_v8 = vmul.f32 %v6670_v41, %v5471_v26  ;;  %vm1090_vm3 = vweird.f32 %v4743_v62 }
 0x47d   : > { %10381 = vst [vmem:[#allocation77_spill] sm:$0xff] %v7592_v29  ;;  %v2648_v25 = vmul.f32 %v7592_v29, %v7592_v29  ;;  %v1997_v13 = vmul.f32 0.5, %v1996_v3  ;;  %vm1091_vm5 = vmor %vm1089_vm4, %vm1090_vm3  ;;  %v1701_v29 = vmul.f32 %v7071_v23, %v5471_v26 }
 0x47e   : > { %v7596_v7 = vpop.f32.mrf.mxu3  ;;  %4542 = vmatmul.msk.f32.gmra.mxu3 %vm274_vm0, %v4929_v55  ;;  %v2114_v52 = vmul.f32 %v7322_v57, %v2082_v34  ;;  %v1085_v40 = vmul.f32 %v4743_v62, %v1084_v43  ;;  %v7619_v55 = vadd.f32 1e-05, %v802_v8 }
 0x47f   : > { %v1998_v34 = vsub.f32 1.5, %v1997_v13  ;;  %v7669_v23 = vadd.f32 1e-05, %v1701_v29  ;;  %v2592_v29 = vmul.f32 %v7139_v56, %v5471_v26 }
 0x480   : > { %v2146_v47 = vadd.f32 %v7344_v33, %v2114_v52  ;;  %v1086_v3 = vmul.f32 0.5, %v1085_v40  ;;  %v4931_v52 = vld [vmem:[%s5126_s23 + $0xe8] sm:$0xff]  ;;  %vm1079_vm10 = vweird.f32 %v7619_v55 }
 0x485   : > { %2716 = vadd.xlane.f32.xlu2 %v2715_v58  ;;  %2236 = vrot.lane.b32.xlu1 %v2145_v50, %s5005_s25  ;;  %v2724_v50 = vsel %vm274_vm0, %v2648_v25, 0.0  ;;  %v7616_v58 = vadd.f32 1e-05, %v804_v37  ;;  %v1999_v25 = vmul.f32 %v4741_v0, %v1998_v34  ;;  %v1087_v37 = vsub.f32 1.5, %v1086_v3  ;;  %v4932_v34 = vld [vmem:[%s5126_s23 + $0xf0] sm:$0xff] }
 0x486   : > { %v7609_v9 = vpop.f32.mrf.mxu3  ;;  %4543 = vmatmul.msk.f32.gmra.mxu3 %vm274_vm0, %v4930_v21 }
 0x487   : > { %4744 = vrsqrt.f32 %v7616_v58  ;;  %v2003_v43 = vsel %vm2002_vm2, %v4741_v0, %v1999_v25  ;;  %v1088_v40 = vmul.f32 %v4743_v62, %v1087_v37  ;;  %v1700_v0 = vmul.f32 %v6971_v15, %v5471_v26  ;;  %v10383_v37 = vld [vmem:[#allocation120_spill] sm:$0xff] }
 0x488   : > { %4746 = vrsqrt.f32 %v7619_v55  ;;  %v2080_v8 = vmul.f32 %v2003_v43, %v6640_v51  ;;  %v2591_v43 = vmul.f32 %v10383_v37, %v5471_v26  ;;  %vm1099_vm7 = vweird.f32 %v7616_v58 }
 0x489   : > { %v7650_v27 = vadd.f32 1e-05, %v1700_v0  ;;  %vm2050_vm2 = vweird.f32 %v7669_v23 }
 0x48a   : > { %v2112_v3 = vmul.f32 %v7322_v57, %v2080_v8 }
 0x48b   : > { %4748 = vrsqrt.f32 %v7650_v27  ;;  %vm2040_vm14 = vweird.f32 %v7650_v27 }
 0x48c   : > { %v2144_v31 = vadd.f32 %v7344_v33, %v2112_v3  ;;  %4750 = vrsqrt.f32 %v7669_v23 }
 0x48d   : > { %2725 = vadd.xlane.f32.xlu2 %v2724_v50  ;;  %v7628_v13 = vpop.eup %4744  ;;  %v7630_v50 = vpop.xlane.xlu1 %2710 }
 0x48e   : > { %v7622_v41 = vpop.f32.mrf.mxu3  ;;  %4544 = vmatmul.msk.f32.gmra.mxu3 %vm274_vm0, %v4931_v52  ;;  %10382 = vst [vmem:[#allocation10_spill] sm:$0xff] %v7630_v50  ;;  %v1094_v21 = vmul.f32 %v7628_v13, %v7616_v58  ;;  %v1092_v52 = vsel %vm1091_vm5, %v4743_v62, %v1088_v40  ;;  %v10385_v62 = vld [vmem:[#allocation89_spill] sm:$0xff]  ;;  %v4933_v40 = vld [vmem:[%s5126_s23 + $0xf8] sm:$0xff]  ;;  %vm1100_vm6 = vweird.f32 %v7628_v13  ;;  %s4586_s23 = sshll.u32 %s5059_s22, 9  ;;  %s4332_s22 = sshll.u32 %s6486_s6, 4  ;;  %s4333_s22 = int_to_ptr.vmem [resolvable:$true] %s4332_s22 }
 0x48f   : > { %2238 = vrot.lane.b32.xlu0 %v2146_v47, %s5005_s25  ;;  %v7633_v47 = vpop.eup %4746  ;;  %vm1101_vm9 = vmor %vm1099_vm7, %vm1100_vm6  ;;  %s4331_s16 = scalar_lea.hbm %s9961_s5, %s4586_s23 }
 0x490   : > { %v1074_v51 = vmul.f32 %v7633_v47, %v7619_v55  ;;  %v1095_v25 = vmul.f32 %v7628_v13, %v1094_v21  ;;  %v7663_v21 = vsub.f32 %v10385_v62, %v2591_v43  ;;  %v7690_v62 = vld [vmem:[%s9958_s2 + $0x3] ss:$0 sm:$0xff]  ;;  %vm1080_vm8 = vweird.f32 %v7633_v47  ;;  %s4334_s17 = sshll.u32 %s4331_s16, 4  ;;  %s4335_s17 = int_to_ptr.hbm [resolvable:$true] %s4334_s17 }
 0x491   : > { %v7676_v37 = vpop.eup %4748  ;;  %vm1081_vm12 = vmor %vm1079_vm10, %vm1080_vm8  ;;  %s4954_s30 = sshra.s32 %s4335_s17, 4  ;;  %s4955_s30 = int_to_ptr.hbm [resolvable:$true] %s4954_s30 }
 0x492   : > { %v1075_v15 = vmul.f32 %v7633_v47, %v1074_v51  ;;  %v1096_v50 = vmul.f32 0.5, %v1095_v25  ;;  %10386 = vst [vmem:[#allocation13_spill] sm:$0xff] %v7663_v21  ;;  %v2035_v56 = vmul.f32 %v7676_v37, %v7650_v27  ;;  %vm2041_vm13 = vweird.f32 %v7676_v37  ;;  %s4956_s7 = scalar_lea.hbm %s4955_s30, 512  ;;  %p4961_p0 = scmp.lt.s32.totalorder %s4955_s30, %s9961_s5 }
 0x493   : > { %vm2042_vm15 = vmor %vm2040_vm14, %vm2041_vm13  ;;  %p4957_p11 = scmp.ne.s32.totalorder %s4955_s30, %s4956_s7 }
 0x494   : > { %v1076_v0 = vmul.f32 0.5, %v1075_v15  ;;  %v1097_v51 = vsub.f32 1.5, %v1096_v50 }
 0x495   : > { %v7657_v46 = vpop.xlane.xlu1 %2719  ;;  %p4958_p12 = pnand %p4957_p11, %p5076_p5 }
 0x496   : > { %v7637_v4 = vpop.f32.mrf.mxu3  ;;  %4545 = vmatmul.msk.f32.gmra.mxu3 %vm274_vm0, %v4932_v34  ;;  %v1187_v34 = vmul.f32 %v1092_v52, %v6610_v11  ;;  %10384 = vst [vmem:[#allocation38_spill] sm:$0xff] %v7657_v46  ;;  %v1077_v25 = vsub.f32 1.5, %v1076_v0  ;;  %v1098_v43 = vmul.f32 %v7628_v13, %v1097_v51  ;;  %v7704_v51 = vsub.f32 %v6916_v1, %v2592_v29 }
 0x497   : > { %p4959_p13 = pneg %p4958_p12 }
 0x498   : > { %v1219_v11 = vmul.f32 %v7322_v57, %v1187_v34  ;;  %v1078_v0 = vmul.f32 %v7633_v47, %v1077_v25  ;;  %v1102_v58 = vsel %vm1101_vm9, %v7628_v13, %v1098_v43  ;;  %10388 = vst [vmem:[#allocation35_spill] sm:$0xff] %v7704_v51  ;;  %v2656_v1 = vmul.f32 %v7704_v51, %v7704_v51 }
 0x49a   : > { %v1251_v52 = vadd.f32 %v7344_v33, %v1219_v11  ;;  %v1082_v25 = vsel %vm1081_vm12, %v7633_v47, %v1078_v0 }
 0x49e   : > { %v7659_v8 = vpop.f32.mrf.mxu3  ;;  %4546 = vmatmul.msk.f32.gmra.mxu3 %vm274_vm0, %v4933_v40 }
 0x4a0   : > { %v7671_v3 = vpop.xlane.xlu0 %2713 }
 0x4a1   : > { %10387 = vst [vmem:[#allocation70_spill] sm:$0xff] %v7671_v3 }
 0x4a5   : > { %2234 = vrot.lane.b32.xlu2 %v2144_v31, %s5005_s25  ;;  %v2655_v31 = vmul.f32 %v7663_v21, %v7663_v21 }
 0x4a6   : > { %v7681_v15 = vpop.f32.mrf.mxu3 }
 0x4a7   : > { %v2745_v40 = vsel %vm274_vm0, %v2655_v31, 0.0  ;;  %v7708_v31 = vadd.f32 %v7690_v62, %v7380_v32  ;;  %v10390_v32 = vld [vmem:[#allocation119_spill] sm:$0xff] }
 0x4a8   : > { %v1186_v29 = vmul.f32 %v1082_v25, %v10390_v32 }
 0x4a9   : > { %v3357_v43 = vsel %vm274_vm0, %v7708_v31, 0.0 }
 0x4ac   : > { %v2231_v50 = vpop.permute.xlu1 %2230 }
 0x4ad   : > { %v2302_v34 = vsel %vm274_vm0, %v1251_v52, %v2231_v50  ;;  %v4751_v52 = vpop.eup %4750  ;;  %v2036_v50 = vmul.f32 %v7676_v37, %v2035_v56  ;;  %v2748_v56 = vsel %vm274_vm0, %v2656_v1, 0.0 }
 0x4ae   : > { %2335 = vst.msk [vmem:[%s6486_s6 + $0x180] sm:$0xff] %vm2310_vm11, %v2302_v34  ;;  %v1188_v34 = vmul.f32 %v1102_v58, %v6515_v54  ;;  %v7715_v13 = vpop.f32.mrf.mxu3  ;;  %v2045_v55 = vmul.f32 %v4751_v52, %v7669_v23  ;;  %v1218_v58 = vmul.f32 %v7322_v57, %v1186_v29  ;;  %vm2051_vm1 = vweird.f32 %v4751_v52 }
 0x4af   : > { %v7699_v11 = vpop.xlane.xlu2 %2698  ;;  %2746 = vadd.xlane.f32.xlu1 %v2745_v40  ;;  %v7713_v40 = vpop.xlane.xlu0 %2722  ;;  %v2037_v21 = vmul.f32 0.5, %v2036_v50  ;;  %vm2052_vm3 = vmor %vm2050_vm2, %vm2051_vm1 }
 0x4b0   : > { %10389 = vst [vmem:[#allocation123_spill] sm:$0xff] %v7713_v40  ;;  %v1220_v54 = vmul.f32 %v7322_v57, %v1188_v34  ;;  %v2046_v0 = vmul.f32 %v4751_v52, %v2045_v55  ;;  %v1699_v40 = vmul.f32 %v6974_v61, %v5471_v26  ;;  %v7735_v34 = vadd.f32 %v7690_v62, %v7400_v60 }
 0x4b1   : > { %v2038_v46 = vsub.f32 1.5, %v2037_v21  ;;  %v1250_v21 = vadd.f32 %v7344_v33, %v1218_v58 }
 0x4b2   : > { %v1252_v51 = vadd.f32 %v7344_v33, %v1220_v54  ;;  %v2047_v32 = vmul.f32 0.5, %v2046_v0  ;;  %v10392_v54 = vld [vmem:[#allocation109_spill] sm:$0xff] }
 0x4b3   : > { %v2039_v1 = vmul.f32 %v7676_v37, %v2038_v46  ;;  %v2587_v0 = vmul.f32 %v10392_v54, %v5471_v26 }
 0x4b4   : > { %v2048_v60 = vsub.f32 1.5, %v2047_v32  ;;  %v806_v32 = vmul.f32 %v6965_v49, %v5471_v26 }
 0x4b5   : > { %v2043_v46 = vsel %vm2042_vm15, %v7676_v37, %v2039_v1 }
 0x4b6   : > { %v7731_v50 = vpop.f32.mrf.mxu3  ;;  %v2084_v27 = vmul.f32 %v2043_v46, %v6756_v30 }
 0x4b7   : > { %v7723_v47 = vpop.xlane.xlu2 %2707  ;;  %3358 = vadd.xlane.f32.xlu1 %v3357_v43  ;;  %v1731_v43 = vadd.f32 1e-05, %v1699_v40  ;;  %v10393_v40 = vld [vmem:[#allocation67_spill] sm:$0xff] }
 0x4b8   : > { %10391 = vst [vmem:[#allocation11_spill] sm:$0xff] %v7723_v47  ;;  %v7755_v58 = vsub.f32 %v10393_v40, %v2587_v0  ;;  %v2116_v54 = vmul.f32 %v7322_v57, %v2084_v27  ;;  %v807_v40 = vmul.f32 %v6884_v44, %v5471_v26 }
 0x4b9   : > { %2749 = vadd.xlane.f32.xlu0 %v2748_v56  ;;  %4752 = vrsqrt.f32 %v1731_v43  ;;  %vm2030_vm5 = vweird.f32 %v1731_v43 }
 0x4ba   : > { %10394 = vst [vmem:[#allocation122_spill] sm:$0xff] %v7755_v58  ;;  %v2651_v1 = vmul.f32 %v7755_v58, %v7755_v58 }
 0x4bb   : > { %v2233_v25 = vpop.permute.xlu0 %2232 }
 0x4bc   : > { %v2303_v55 = vsel %vm274_vm0, %v1252_v51, %v2233_v25  ;;  %v3360_v51 = vsel %vm274_vm0, %v7735_v34, 0.0  ;;  %v2049_v25 = vmul.f32 %v4751_v52, %v2048_v60  ;;  %v10396_v60 = vld [vmem:[#allocation85_spill] sm:$0xff] }
 0x4bd   : > { %2336 = vst.msk [vmem:[%s6486_s6 + $0x188] sm:$0xff] %vm2310_vm11, %v2303_v55  ;;  %v10395_v55 = vld [vmem:[#allocation118_spill] sm:$0xff] }
 0x4be   : > { %v7752_v56 = vpop.f32.mrf.mxu3  ;;  %v2053_v37 = vsel %vm2052_vm3, %v4751_v52, %v2049_v25  ;;  %v2148_v52 = vadd.f32 %v7344_v33, %v2116_v54  ;;  %v805_v54 = vmul.f32 %v6802_v35, %v5471_v26 }
 0x4bf   : > { %v2229_v61 = vpop.permute.xlu2 %2228  ;;  %v2085_v0 = vmul.f32 %v2053_v37, %v6828_v63 }
 0x4c0   : > { %v2301_v29 = vsel %vm274_vm0, %v1250_v21, %v2229_v61  ;;  %v2590_v21 = vmul.f32 %v10395_v55, %v5471_v26  ;;  %v4753_v61 = vpop.eup %4752 }
 0x4c1   : > { %2334 = vst.msk [vmem:[%s6486_s6 + $0x168] sm:$0xff] %vm2310_vm11, %v2301_v29  ;;  %3361 = vadd.xlane.f32.xlu0 %v3360_v51  ;;  %v838_v29 = vadd.f32 1e-05, %v806_v32  ;;  %v2025_v23 = vmul.f32 %v4753_v61, %v1731_v43  ;;  %v2733_v51 = vsel %vm274_vm0, %v2651_v1, 0.0  ;;  %v2117_v46 = vmul.f32 %v7322_v57, %v2085_v0 }
 0x4c2   : > { %v7770_v49 = vsub.f32 %v10396_v60, %v2590_v21  ;;  %v839_v21 = vadd.f32 1e-05, %v807_v40  ;;  %v837_v60 = vadd.f32 1e-05, %v805_v54  ;;  %vm2031_vm4 = vweird.f32 %v4753_v61 }
 0x4c3   : > { %4754 = vrsqrt.f32 %v838_v29  ;;  %v2026_v63 = vmul.f32 %v4753_v61, %v2025_v23  ;;  %v2149_v32 = vadd.f32 %v7344_v33, %v2117_v46  ;;  %vm2032_vm6 = vmor %vm2030_vm5, %vm2031_vm4  ;;  %vm1119_vm8 = vweird.f32 %v838_v29 }
 0x4c4   : > { %10397 = vst [vmem:[#allocation101_spill] sm:$0xff] %v7770_v49  ;;  %v2654_v25 = vmul.f32 %v7770_v49, %v7770_v49  ;;  %4756 = vrsqrt.f32 %v839_v21  ;;  %vm1129_vm12 = vweird.f32 %v839_v21  ;;  %vm1109_vm15 = vweird.f32 %v837_v60 }
 0x4c5   : > { %v2027_v37 = vmul.f32 0.5, %v2026_v63  ;;  %4758 = vrsqrt.f32 %v837_v60 }
 0x4c6   : > { %v7767_v30 = vpop.f32.mrf.mxu3  ;;  %v2742_v1 = vsel %vm274_vm0, %v2654_v25, 0.0 }
 0x4c7   : > { %v2028_v0 = vsub.f32 1.5, %v2027_v37 }
 0x4c9   : > { %v4755_v27 = vpop.eup %4754 }
 0x4ca   : > { %v1114_v44 = vmul.f32 %v4755_v27, %v838_v29  ;;  %v4757_v46 = vpop.eup %4756  ;;  %vm1120_vm7 = vweird.f32 %v4755_v27 }
 0x4cb   : > { %v1124_v25 = vmul.f32 %v4757_v46, %v839_v21  ;;  %v4759_v49 = vpop.eup %4758  ;;  %vm1121_vm9 = vmor %vm1119_vm8, %vm1120_vm7  ;;  %vm1130_vm10 = vweird.f32 %v4757_v46 }
 0x4cc   : > { %v1115_v23 = vmul.f32 %v4755_v27, %v1114_v44  ;;  %vm1131_vm13 = vmor %vm1129_vm12, %vm1130_vm10  ;;  %vm1110_vm14 = vweird.f32 %v4759_v49 }
 0x4cd   : > { %v1125_v54 = vmul.f32 %v4757_v46, %v1124_v25  ;;  %vm1111_vm1 = vmor %vm1109_vm15, %vm1110_vm14 }
 0x4ce   : > { %2734 = vadd.xlane.f32.xlu2 %v2733_v51  ;;  %v7781_v55 = vpop.f32.mrf.mxu3  ;;  %v1116_v40 = vmul.f32 0.5, %v1115_v23 }
 0x4cf   : > { %v1126_v23 = vmul.f32 0.5, %v1125_v54 }
 0x4d0   : > { %2242 = vrot.lane.b32.xlu1 %v2148_v52, %s5005_s25  ;;  %v2029_v52 = vmul.f32 %v4753_v61, %v2028_v0  ;;  %v1104_v0 = vmul.f32 %v4759_v49, %v837_v60 }
 0x4d2   : > { %v2033_v63 = vsel %vm2032_vm6, %v4753_v61, %v2029_v52  ;;  %v1105_v61 = vmul.f32 %v4759_v49, %v1104_v0 }
 0x4d5   : > { %2244 = vrot.lane.b32.xlu0 %v2149_v32, %s5005_s25  ;;  %v1117_v32 = vsub.f32 1.5, %v1116_v40  ;;  %v1127_v40 = vsub.f32 1.5, %v1126_v23 }
 0x4d6   : > { %2743 = vadd.xlane.f32.xlu2 %v2742_v1  ;;  %v7787_v51 = vpop.f32.mrf.mxu3  ;;  %v2083_v1 = vmul.f32 %v2033_v63, %v6782_v48 }
 0x4d7   : > { %v7792_v37 = vpop.xlane.xlu1 %2728  ;;  %v1118_v44 = vmul.f32 %v4755_v27, %v1117_v32  ;;  %v1106_v32 = vmul.f32 0.5, %v1105_v61  ;;  %v1128_v29 = vmul.f32 %v4757_v46, %v1127_v40 }
 0x4d8   : > { %10398 = vst [vmem:[#allocation81_spill] sm:$0xff] %v7792_v37  ;;  %v2115_v58 = vmul.f32 %v7322_v57, %v2083_v1 }
 0x4d9   : > { %v1122_v43 = vsel %vm1121_vm9, %v4755_v27, %v1118_v44  ;;  %v1107_v1 = vsub.f32 1.5, %v1106_v32 }
 0x4da   : > { %v2147_v52 = vadd.f32 %v7344_v33, %v2115_v58  ;;  %v1190_v48 = vmul.f32 %v1122_v43, %v6761_v16  ;;  %v7807_v58 = vadd.f32 %v7690_v62, %v7426_v38  ;;  %v1132_v16 = vsel %vm1131_vm13, %v4757_v46, %v1128_v29 }
 0x4db   : > { %v1108_v0 = vmul.f32 %v4759_v49, %v1107_v1  ;;  %v1191_v38 = vmul.f32 %v1132_v16, %v6645_v18  ;;  %v7843_v1 = vadd.f32 %v7690_v62, %v7519_v45 }
 0x4dc   : > { %v1222_v27 = vmul.f32 %v7322_v57, %v1190_v48  ;;  %v3366_v21 = vsel %vm274_vm0, %v7807_v58, 0.0  ;;  %v7828_v48 = vadd.f32 %v7690_v62, %v7493_v5 }
 0x4dd   : > { %v1112_v40 = vsel %vm1111_vm1, %v4759_v49, %v1108_v0  ;;  %v1223_v32 = vmul.f32 %v7322_v57, %v1191_v38 }
 0x4de   : > { %v7790_v35 = vpop.f32.mrf.mxu3  ;;  %v1254_v54 = vadd.f32 %v7344_v33, %v1222_v27  ;;  %v1189_v60 = vmul.f32 %v1112_v40, %v6555_v36 }
 0x4df   : > { %v7800_v25 = vpop.xlane.xlu1 %2737  ;;  %v1255_v27 = vadd.f32 %v7344_v33, %v1223_v32 }
 0x4e0   : > { %10399 = vst [vmem:[#allocation22_spill] sm:$0xff] %v7800_v25  ;;  %v1221_v36 = vmul.f32 %v7322_v57, %v1189_v60  ;;  %v2593_v57 = vmul.f32 %v6940_v2, %v5471_v26  ;;  %v809_v2 = vmul.f32 %v7124_v19, %v5471_v26  ;;  %v7892_v60 = vadd.f32 %v7690_v62, %v7681_v15 }
 0x4e1   : > { %v7904_v15 = vadd.f32 %v7690_v62, %v7413_v24 }
 0x4e2   : > { %v1253_v0 = vadd.f32 %v7344_v33, %v1221_v36  ;;  %v7871_v33 = vadd.f32 %v7690_v62, %v7622_v41  ;;  %v7874_v40 = vsub.f32 %v6718_v12, %v2593_v57  ;;  %v7886_v41 = vadd.f32 %v7690_v62, %v7637_v4 }
 0x4e3   : > { %v7888_v12 = vadd.f32 1e-05, %v809_v2  ;;  %v3402_v4 = vsel %vm274_vm0, %v7892_v60, 0.0  ;;  %v7914_v36 = vadd.f32 %v7690_v62, %v7752_v56  ;;  %v7935_v57 = vadd.f32 %v7690_v62, %v7767_v30 }
 0x4e4   : > { %10404 = vst [vmem:[#allocation9_spill] sm:$0xff] %v7874_v40  ;;  %v7943_v2 = vadd.f32 %v7690_v62, %v7787_v51 }
 0x4e5   : > { %4760 = vrsqrt.f32 %v7888_v12  ;;  %v3411_v56 = vsel %vm274_vm0, %v7914_v36, 0.0  ;;  %vm1149_vm3 = vweird.f32 %v7888_v12 }
 0x4e6   : > { %v7798_v63 = vpop.f32.mrf.mxu3  ;;  %v7802_v37 = vpop.xlane.xlu0 %2731 }
 0x4e7   : > { %10400 = vst [vmem:[#allocation42_spill] sm:$0xff] %v7802_v37 }
 0x4ee   : > { %2240 = vrot.lane.b32.xlu2 %v2147_v52, %s5005_s25  ;;  %v7813_v61 = vpop.f32.mrf.mxu3  ;;  %v7820_v46 = vpop.xlane.xlu0 %2740  ;;  %v7824_v52 = vadd.f32 %v7690_v62, %v7442_v20  ;;  %v3375_v20 = vsel %vm274_vm0, %v7828_v48, 0.0 }
 0x4ef   : > { %10402 = vst [vmem:[#allocation14_spill] sm:$0xff] %v7820_v46 }
 0x4f0   : > { %v3369_v18 = vsel %vm274_vm0, %v7824_v52, 0.0 }
 0x4f6   : > { %v7839_v5 = vpop.f32.mrf.mxu3 }
 0x4f7   : > { %v2237_v44 = vpop.permute.xlu1 %2236 }
 0x4f8   : > { %v2305_v23 = vsel %vm274_vm0, %v1254_v54, %v2237_v44  ;;  %v7811_v43 = vpop.xlane.xlu2 %2716  ;;  %v7851_v54 = vadd.f32 %v7690_v62, %v7574_v28  ;;  %v3378_v44 = vsel %vm274_vm0, %v7843_v1, 0.0  ;;  %v7865_v28 = vadd.f32 %v7690_v62, %v7596_v7 }
 0x4f9   : > { %10401 = vst [vmem:[#allocation6_spill] sm:$0xff] %v7811_v43  ;;  %v3393_v7 = vsel %vm274_vm0, %v7871_v33, 0.0 }
 0x4fa   : > { %2338 = vst.msk [vmem:[%s6486_s6 + $0x1a8] sm:$0xff] %vm2310_vm11, %v2305_v23  ;;  %3367 = vadd.xlane.f32.xlu1 %v3366_v21  ;;  %v3384_v21 = vsel %vm274_vm0, %v7851_v54, 0.0  ;;  %v3387_v32 = vsel %vm274_vm0, %v7865_v28, 0.0 }
 0x4fe   : > { %v7867_v38 = vpop.f32.mrf.mxu3 }
 0x4ff   : > { %3370 = vadd.xlane.f32.xlu0 %v3369_v18  ;;  %v2657_v18 = vmul.f32 %v7874_v40, %v7874_v40 }
 0x500   : > { %v7834_v29 = vpop.xlane.xlu2 %2725 }
 0x501   : > { %10403 = vst [vmem:[#allocation30_spill] sm:$0xff] %v7834_v29  ;;  %v2239_v49 = vpop.permute.xlu0 %2238 }
 0x502   : > { %3376 = vadd.xlane.f32.xlu1 %v3375_v20  ;;  %v2306_v16 = vsel %vm274_vm0, %v1255_v27, %v2239_v49  ;;  %v2751_v20 = vsel %vm274_vm0, %v2657_v18, 0.0  ;;  %v810_v27 = vmul.f32 %v6996_v6, %v5471_v26  ;;  %v3396_v49 = vsel %vm274_vm0, %v7886_v41, 0.0 }
 0x503   : > { %2339 = vst.msk [vmem:[%s6486_s6 + $0x1c0] sm:$0xff] %vm2310_vm11, %v2306_v16  ;;  %v7910_v6 = vadd.f32 %v7690_v62, %v7715_v13 }
 0x504   : > { %v7906_v16 = vadd.f32 1e-05, %v810_v27  ;;  %v7957_v27 = vadd.f32 %v7690_v62, %v7546_v39 }
 0x505   : > { %v3405_v24 = vsel %vm274_vm0, %v7910_v6, 0.0 }
 0x506   : > { %v3342_v19 = vpop.f32.mrf.mxu3  ;;  %4762 = vrsqrt.f32 %v7906_v16  ;;  %v3381_v39 = vsel %vm274_vm0, %v7957_v27, 0.0  ;;  %vm1159_vm6 = vweird.f32 %v7906_v16 }
 0x507   : > { %3379 = vadd.xlane.f32.xlu0 %v3378_v44  ;;  %v3363_v44 = vsel %vm274_vm0, %v7904_v15, 0.0 }
 0x508   : > { %v2235_v23 = vpop.permute.xlu2 %2234 }
 0x509   : > { %v2304_v45 = vsel %vm274_vm0, %v1253_v0, %v2235_v23  ;;  %v7918_v0 = vpop.eup %4760  ;;  %v808_v23 = vmul.f32 %v6926_v17, %v5471_v26 }
 0x50a   : > { %2337 = vst.msk [vmem:[%s6486_s6 + $0x1a0] sm:$0xff] %vm2310_vm11, %v2304_v45  ;;  %3385 = vadd.xlane.f32.xlu1 %v3384_v21  ;;  %v1144_v45 = vmul.f32 %v7918_v0, %v7888_v12  ;;  %v7931_v21 = vadd.f32 %v7690_v62, %v7467_v22  ;;  %v3414_v22 = vsel %vm274_vm0, %v7935_v57, 0.0  ;;  %vm1150_vm2 = vweird.f32 %v7918_v0 }
 0x50b   : > { %vm1151_vm4 = vmor %vm1149_vm3, %vm1150_vm2 }
 0x50c   : > { %v7939_v17 = vpop.eup %4762  ;;  %v3372_v18 = vsel %vm274_vm0, %v7931_v21, 0.0 }
 0x50d   : > { %v1154_v30 = vmul.f32 %v7939_v17, %v7906_v16  ;;  %vm1160_vm5 = vweird.f32 %v7939_v17 }
 0x50e   : > { %v3345_v13 = vpop.f32.mrf.mxu3  ;;  %vm1161_vm7 = vmor %vm1159_vm6, %vm1160_vm5 }
 0x50f   : > { %3388 = vadd.xlane.f32.xlu0 %v3387_v32  ;;  %v7937_v32 = vadd.f32 1e-05, %v808_v23 }
 0x511   : > { %4764 = vrsqrt.f32 %v7937_v32  ;;  %vm1139_vm9 = vweird.f32 %v7937_v32 }
 0x512   : > { %3394 = vadd.xlane.f32.xlu1 %v3393_v7  ;;  %v1145_v7 = vmul.f32 %v7918_v0, %v1144_v45 }
 0x514   : > { %v1146_v51 = vmul.f32 0.5, %v1145_v7 }
 0x517   : > { %2752 = vadd.xlane.f32.xlu2 %v2751_v20  ;;  %3397 = vadd.xlane.f32.xlu0 %v3396_v49  ;;  %v3420_v20 = vsel %vm274_vm0, %v7943_v2, 0.0  ;;  %v7959_v49 = vpop.f32.mrf.mxu3  ;;  %v7970_v23 = vpop.eup %4764 }
 0x518   : > { %vm1140_vm8 = vweird.f32 %v7970_v23 }
 0x519   : > { %vm1141_vm10 = vmor %vm1139_vm9, %vm1140_vm8 }
 0x51a   : > { %3403 = vadd.xlane.f32.xlu1 %v3402_v4  ;;  %v7963_v4 = vadd.f32 %v7690_v62, %v7790_v35 }
 0x51c   : > { %v3423_v45 = vsel %vm274_vm0, %v7963_v4, 0.0 }
 0x51f   : > { %3364 = vadd.xlane.f32.xlu2 %v3363_v44  ;;  %3406 = vadd.xlane.f32.xlu0 %v3405_v24  ;;  %v7967_v44 = vadd.f32 %v7690_v62, %v7813_v61  ;;  %v1155_v24 = vmul.f32 %v7939_v17, %v1154_v30  ;;  %v7986_v30 = vadd.f32 %v7690_v62, %v7839_v5 }
 0x521   : > { %v3429_v35 = vsel %vm274_vm0, %v7967_v44, 0.0  ;;  %v1156_v7 = vmul.f32 0.5, %v1155_v24  ;;  %v7995_v24 = vadd.f32 %v7690_v62, %v3342_v19  ;;  %v3432_v5 = vsel %vm274_vm0, %v7986_v30, 0.0 }
 0x522   : > { %3412 = vadd.xlane.f32.xlu1 %v3411_v56  ;;  %v1147_v56 = vsub.f32 1.5, %v1146_v51  ;;  %v7992_v51 = vadd.f32 %v7690_v62, %v7609_v9 }
 0x523   : > { %v3438_v19 = vsel %vm274_vm0, %v7995_v24, 0.0 }
 0x524   : > { %v3390_v9 = vsel %vm274_vm0, %v7992_v51, 0.0 }
 0x527   : > { %3373 = vadd.xlane.f32.xlu2 %v3372_v18  ;;  %3415 = vadd.xlane.f32.xlu0 %v3414_v22  ;;  %v7978_v18 = vpop.xlane.xlu1 %2746  ;;  %v1134_v22 = vmul.f32 %v7970_v23, %v7937_v32 }
 0x528   : > { %10405 = vst [vmem:[#allocation121_spill] sm:$0xff] %v7978_v18 }
 0x529   : > { %v1135_v18 = vmul.f32 %v7970_v23, %v1134_v22 }
 0x52a   : > { %3421 = vadd.xlane.f32.xlu1 %v3420_v20  ;;  %v1148_v20 = vmul.f32 %v7918_v0, %v1147_v56 }
 0x52b   : > { %v1136_v12 = vmul.f32 0.5, %v1135_v18 }
 0x52c   : > { %v7980_v61 = vpop.xlane.xlu0 %2749  ;;  %v1152_v56 = vsel %vm1151_vm4, %v7918_v0, %v1148_v20  ;;  %v8015_v0 = vadd.f32 %v7690_v62, %v7659_v8  ;;  %v8027_v8 = vld [vmem:[%s9959_s3] ss:$0 sm:$0xff] }
 0x52d   : > { %10406 = vst [vmem:[#allocation104_spill] sm:$0xff] %v7980_v61  ;;  %v1193_v22 = vmul.f32 %v1152_v56, %v6894_v14 }
 0x52e   : > { %v3399_v56 = vsel %vm274_vm0, %v8015_v0, 0.0 }
 0x52f   : > { %3382 = vadd.xlane.f32.xlu2 %v3381_v39  ;;  %3424 = vadd.xlane.f32.xlu0 %v3423_v45  ;;  %v1157_v39 = vsub.f32 1.5, %v1156_v7  ;;  %v3351_v45 = vpop.f32.mrf.mxu3  ;;  %v8009_v7 = vadd.f32 %v7690_v62, %v3345_v13  ;;  %v3359_v20 = vpop.xlane.xlu1 %3358  ;;  %v1225_v16 = vmul.f32 %v8027_v8, %v1193_v22 }
 0x531   : > { %v3441_v14 = vsel %vm274_vm0, %v8009_v7, 0.0 }
 0x532   : > { %3430 = vadd.xlane.f32.xlu1 %v3429_v35  ;;  %v1158_v35 = vmul.f32 %v7939_v17, %v1157_v39  ;;  %v8018_v39 = vadd.f32 %v7690_v62, %v3351_v45 }
 0x534   : > { %v1162_v18 = vsel %vm1161_vm7, %v7939_v17, %v1158_v35  ;;  %v3447_v17 = vsel %vm274_vm0, %v8018_v39, 0.0 }
 0x537   : > { %3391 = vadd.xlane.f32.xlu2 %v3390_v9  ;;  %3433 = vadd.xlane.f32.xlu0 %v3432_v5  ;;  %v3362_v9 = vpop.xlane.xlu0 %3361  ;;  %v1137_v5 = vsub.f32 1.5, %v1136_v12  ;;  %v3354_v45 = vpop.f32.mrf.mxu3 }
 0x538   : > { %v3454_v13 = vmul.f32 %v3362_v9, %v5471_v26  ;;  %v8045_v9 = vld [vmem:[%s9960_s4] ss:$0 sm:$0xff] }
 0x539   : > { %v1138_v35 = vmul.f32 %v7970_v23, %v1137_v5 }
 0x53a   : > { %3439 = vadd.xlane.f32.xlu1 %v3438_v19  ;;  %v1194_v19 = vmul.f32 %v1162_v18, %v6777_v53  ;;  %v8038_v12 = vsub.f32 %v7735_v34, %v3454_v13  ;;  %v8049_v53 = vadd.f32 %v7690_v62, %v3354_v45  ;;  %v8053_v18 = vadd.f32 %v7690_v62, %v7731_v50 }
 0x53c   : > { %v1226_v13 = vmul.f32 %v8027_v8, %v1194_v19  ;;  %v3518_v50 = vmul.f32 %v8038_v12, %v8038_v12  ;;  %v3408_v45 = vsel %vm274_vm0, %v8053_v18, 0.0  ;;  %v10408_v19 = vld [vmem:[#allocation61_spill] sm:$0xff] }
 0x53e   : > { %v1258_v32 = vadd.f32 %v8045_v9, %v1226_v13 }
 0x53f   : > { %3400 = vadd.xlane.f32.xlu2 %v3399_v56  ;;  %3442 = vadd.xlane.f32.xlu0 %v3441_v14  ;;  %v1257_v56 = vadd.f32 %v8045_v9, %v1225_v16  ;;  %v1142_v14 = vsel %vm1141_vm10, %v7970_v23, %v1138_v35  ;;  %v3450_v16 = vsel %vm274_vm0, %v8049_v53, 0.0  ;;  %v3552_v35 = vsel %vm274_vm0, %v3518_v50, 0.0 }
 0x541   : > { %v8040_v22 = vpop.xlane.xlu2 %2734 }
 0x542   : > { %10407 = vst [vmem:[#allocation124_spill] sm:$0xff] %v8040_v22  ;;  %3448 = vadd.xlane.f32.xlu1 %v3447_v17  ;;  %v2243_v5 = vpop.permute.xlu1 %2242 }
 0x543   : > { %v2308_v34 = vsel %vm274_vm0, %v1257_v56, %v2243_v5  ;;  %v1192_v56 = vmul.f32 %v1142_v14, %v10408_v19 }
 0x544   : > { %2341 = vst.msk [vmem:[%s6486_s6 + $0x1e0] sm:$0xff] %vm2310_vm11, %v2308_v34  ;;  %v8075_v34 = vadd.f32 %v7690_v62, %v7781_v55 }
 0x545   : > { %v1224_v13 = vmul.f32 %v8027_v8, %v1192_v56  ;;  %v3453_v56 = vmul.f32 %v3359_v20, %v5471_v26 }
 0x547   : > { %3409 = vadd.xlane.f32.xlu2 %v3408_v45  ;;  %3451 = vadd.xlane.f32.xlu0 %v3450_v16  ;;  %v2245_v17 = vpop.permute.xlu0 %2244  ;;  %v3417_v16 = vsel %vm274_vm0, %v8075_v34, 0.0  ;;  %v1256_v14 = vadd.f32 %v8045_v9, %v1224_v13 }
 0x548   : > { %v2309_v5 = vsel %vm274_vm0, %v1258_v32, %v2245_v17  ;;  %v8085_v32 = vadd.f32 %v7690_v62, %v7798_v63  ;;  %v8094_v17 = vadd.f32 %v7690_v62, %v7867_v38  ;;  %v8101_v63 = vadd.f32 %v7690_v62, %v7959_v49 }
 0x549   : > { %v8070_v23 = vpop.xlane.xlu2 %2743  ;;  %2342 = vst.msk [vmem:[%s6486_s6 + $0x1e8] sm:$0xff] %vm2310_vm11, %v2309_v5  ;;  %v8104_v5 = vsub.f32 %v7708_v31, %v3453_v56 }
 0x54a   : > { %10409 = vst [vmem:[#allocation99_spill] sm:$0xff] %v8070_v23  ;;  %3553 = vadd.xlane.f32.xlu1 %v3552_v35  ;;  %v3426_v55 = vsel %vm274_vm0, %v8085_v32, 0.0  ;;  %v3435_v19 = vsel %vm274_vm0, %v8094_v17, 0.0  ;;  %v3444_v35 = vsel %vm274_vm0, %v8101_v63, 0.0 }
 0x54b   : > { %v3517_v38 = vmul.f32 %v8104_v5, %v8104_v5 }
 0x54f   : > { %3418 = vadd.xlane.f32.xlu2 %v3417_v16 }
 0x551   : > { %v2241_v45 = vpop.permute.xlu2 %2240 }
 0x552   : > { %v2307_v50 = vsel %vm274_vm0, %v1256_v14, %v2241_v45  ;;  %v3549_v14 = vsel %vm274_vm0, %v3517_v38, 0.0 }
 0x553   : > { %2340 = vst.msk [vmem:[%s6486_s6 + $0x1c8] sm:$0xff] %vm2310_vm11, %v2307_v50 }
 0x557   : > { %3427 = vadd.xlane.f32.xlu2 %v3426_v55 }
 0x55f   : > { %3436 = vadd.xlane.f32.xlu2 %v3435_v19 }
 0x567   : > { %3445 = vadd.xlane.f32.xlu2 %v3444_v35 }
 0x56d   : > { %v3368_v13 = vpop.xlane.xlu1 %3367 }
 0x56e   : > { %v3456_v16 = vmul.f32 %v3368_v13, %v5471_v26 }
 0x56f   : > { %3550 = vadd.xlane.f32.xlu2 %v3549_v14 }
 0x570   : > { %v8113_v20 = vsub.f32 %v7807_v58, %v3456_v16 }
 0x572   : > { %v3520_v62 = vmul.f32 %v8113_v20, %v8113_v20  ;;  %v3371_v31 = vpop.xlane.xlu0 %3370 }
 0x573   : > { %v3457_v49 = vmul.f32 %v3371_v31, %v5471_v26 }
 0x574   : > { %v3558_v19 = vsel %vm274_vm0, %v3520_v62, 0.0 }
 0x575   : > { %v3377_v45 = vpop.xlane.xlu1 %3376  ;;  %v8119_v50 = vsub.f32 %v7824_v52, %v3457_v49 }
 0x576   : > { %v3459_v55 = vmul.f32 %v3377_v45, %v5471_v26 }
 0x577   : > { %3559 = vadd.xlane.f32.xlu2 %v3558_v19  ;;  %v3521_v58 = vmul.f32 %v8119_v50, %v8119_v50 }
 0x578   : > { %v8124_v56 = vsub.f32 %v7828_v48, %v3459_v55 }
 0x579   : > { %v3561_v35 = vsel %vm274_vm0, %v3521_v58, 0.0 }
 0x57a   : > { %v3523_v38 = vmul.f32 %v8124_v56, %v8124_v56  ;;  %3562 = vadd.xlane.f32.xlu1 %v3561_v35  ;;  %v3380_v13 = vpop.xlane.xlu0 %3379 }
 0x57b   : > { %v3460_v52 = vmul.f32 %v3380_v13, %v5471_v26 }
 0x57c   : > { %v3567_v48 = vsel %vm274_vm0, %v3523_v38, 0.0 }
 0x57d   : > { %v3386_v16 = vpop.xlane.xlu1 %3385  ;;  %v8133_v14 = vsub.f32 %v7843_v1, %v3460_v52 }
 0x57e   : > { %v3462_v62 = vmul.f32 %v3386_v16, %v5471_v26 }
 0x57f   : > { %3568 = vadd.xlane.f32.xlu2 %v3567_v48  ;;  %v3524_v49 = vmul.f32 %v8133_v14, %v8133_v14 }
 0x580   : > { %v8138_v31 = vsub.f32 %v7851_v54, %v3462_v62 }
 0x581   : > { %v3570_v45 = vsel %vm274_vm0, %v3524_v49, 0.0 }
 0x582   : > { %v3526_v55 = vmul.f32 %v8138_v31, %v8138_v31  ;;  %3571 = vadd.xlane.f32.xlu1 %v3570_v45  ;;  %v3389_v19 = vpop.xlane.xlu0 %3388 }
 0x583   : > { %v3463_v1 = vmul.f32 %v3389_v19, %v5471_v26 }
 0x584   : > { %v3576_v54 = vsel %vm274_vm0, %v3526_v55, 0.0 }
 0x585   : > { %v3395_v58 = vpop.xlane.xlu1 %3394  ;;  %v8147_v35 = vsub.f32 %v7865_v28, %v3463_v1 }
 0x586   : > { %v3465_v38 = vmul.f32 %v3395_v58, %v5471_v26 }
 0x587   : > { %3577 = vadd.xlane.f32.xlu2 %v3576_v54  ;;  %v3527_v52 = vmul.f32 %v8147_v35, %v8147_v35 }
 0x588   : > { %v8152_v13 = vsub.f32 %v7871_v33, %v3465_v38 }
 0x589   : > { %v3579_v62 = vsel %vm274_vm0, %v3527_v52, 0.0 }
 0x58a   : > { %v8156_v16 = vpop.xlane.xlu2 %2752  ;;  %v3529_v48 = vmul.f32 %v8152_v13, %v8152_v13  ;;  %3580 = vadd.xlane.f32.xlu1 %v3579_v62  ;;  %v3398_v28 = vpop.xlane.xlu0 %3397 }
 0x58b   : > { %10410 = vst [vmem:[#allocation45_spill] sm:$0xff] %v8156_v16  ;;  %v3466_v49 = vmul.f32 %v3398_v28, %v5471_v26 }
 0x58c   : > { %v3585_v19 = vsel %vm274_vm0, %v3529_v48, 0.0 }
 0x58d   : > { %v3404_v45 = vpop.xlane.xlu1 %3403  ;;  %v8163_v55 = vsub.f32 %v7886_v41, %v3466_v49 }
 0x58e   : > { %v3468_v33 = vmul.f32 %v3404_v45, %v5471_v26 }
 0x58f   : > { %3586 = vadd.xlane.f32.xlu2 %v3585_v19  ;;  %v3530_v58 = vmul.f32 %v8163_v55, %v8163_v55 }
 0x590   : > { %v8168_v1 = vsub.f32 %v7892_v60, %v3468_v33 }
 0x591   : > { %v3588_v54 = vsel %vm274_vm0, %v3530_v58, 0.0 }
 0x592   : > { %v3365_v38 = vpop.xlane.xlu2 %3364  ;;  %v3532_v52 = vmul.f32 %v8168_v1, %v8168_v1  ;;  %3589 = vadd.xlane.f32.xlu1 %v3588_v54  ;;  %v3407_v62 = vpop.xlane.xlu0 %3406 }
 0x593   : > { %v3455_v41 = vmul.f32 %v3365_v38, %v5471_v26  ;;  %v3469_v28 = vmul.f32 %v3407_v62, %v5471_v26 }
 0x594   : > { %v3594_v33 = vsel %vm274_vm0, %v3532_v52, 0.0 }
 0x595   : > { %v8178_v48 = vsub.f32 %v7904_v15, %v3455_v41  ;;  %v3413_v60 = vpop.xlane.xlu1 %3412  ;;  %v8181_v49 = vsub.f32 %v7910_v6, %v3469_v28 }
 0x596   : > { %v3471_v45 = vmul.f32 %v3413_v60, %v5471_v26 }
 0x597   : > { %3595 = vadd.xlane.f32.xlu2 %v3594_v33  ;;  %v3519_v19 = vmul.f32 %v8178_v48, %v8178_v48  ;;  %v3533_v38 = vmul.f32 %v8181_v49, %v8181_v49 }
 0x598   : > { %v8188_v58 = vsub.f32 %v7914_v36, %v3471_v45 }
 0x599   : > { %v3555_v15 = vsel %vm274_vm0, %v3519_v19, 0.0  ;;  %v3597_v6 = vsel %vm274_vm0, %v3533_v38, 0.0 }
 0x59a   : > { %3556 = vadd.xlane.f32.xlu0 %v3555_v15  ;;  %v3374_v54 = vpop.xlane.xlu2 %3373  ;;  %v3535_v41 = vmul.f32 %v8188_v58, %v8188_v58  ;;  %3598 = vadd.xlane.f32.xlu1 %v3597_v6  ;;  %v3416_v62 = vpop.xlane.xlu0 %3415 }
 0x59b   : > { %v3458_v52 = vmul.f32 %v3374_v54, %v5471_v26  ;;  %v3472_v28 = vmul.f32 %v3416_v62, %v5471_v26 }
 0x59c   : > { %v3603_v19 = vsel %vm274_vm0, %v3535_v41, 0.0 }
 0x59d   : > { %v8199_v36 = vsub.f32 %v7931_v21, %v3458_v52  ;;  %v3422_v60 = vpop.xlane.xlu1 %3421  ;;  %v8202_v45 = vsub.f32 %v7935_v57, %v3472_v28 }
 0x59e   : > { %v3474_v33 = vmul.f32 %v3422_v60, %v5471_v26 }
 0x59f   : > { %3604 = vadd.xlane.f32.xlu2 %v3603_v19  ;;  %v3522_v38 = vmul.f32 %v8199_v36, %v8199_v36  ;;  %v3536_v54 = vmul.f32 %v8202_v45, %v8202_v45 }
 0x5a0   : > { %v8209_v15 = vsub.f32 %v7943_v2, %v3474_v33 }
 0x5a1   : > { %v3564_v21 = vsel %vm274_vm0, %v3522_v38, 0.0  ;;  %v3606_v57 = vsel %vm274_vm0, %v3536_v54, 0.0 }
 0x5a2   : > { %3565 = vadd.xlane.f32.xlu0 %v3564_v21  ;;  %v3383_v6 = vpop.xlane.xlu2 %3382  ;;  %v3538_v52 = vmul.f32 %v8209_v15, %v8209_v15  ;;  %3607 = vadd.xlane.f32.xlu1 %v3606_v57  ;;  %v3425_v62 = vpop.xlane.xlu0 %3424 }
 0x5a3   : > { %v3461_v41 = vmul.f32 %v3383_v6, %v5471_v26  ;;  %v3475_v28 = vmul.f32 %v3425_v62, %v5471_v26 }
 0x5a4   : > { %v3612_v38 = vsel %vm274_vm0, %v3538_v52, 0.0 }
 0x5a5   : > { %v8220_v2 = vsub.f32 %v7957_v27, %v3461_v41  ;;  %v3431_v60 = vpop.xlane.xlu1 %3430  ;;  %v8223_v33 = vsub.f32 %v7963_v4, %v3475_v28 }
 0x5a6   : > { %v3477_v19 = vmul.f32 %v3431_v60, %v5471_v26 }
 0x5a7   : > { %3613 = vadd.xlane.f32.xlu2 %v3612_v38  ;;  %v3525_v54 = vmul.f32 %v8220_v2, %v8220_v2  ;;  %v3539_v6 = vmul.f32 %v8223_v33, %v8223_v33 }
 0x5a8   : > { %v8230_v21 = vsub.f32 %v7967_v44, %v3477_v19 }
 0x5a9   : > { %v3573_v27 = vsel %vm274_vm0, %v3525_v54, 0.0  ;;  %v3615_v4 = vsel %vm274_vm0, %v3539_v6, 0.0 }
 0x5aa   : > { %10411 = vst [vmem:[#allocation94_spill] sm:$0xff] %v8230_v21  ;;  %3574 = vadd.xlane.f32.xlu0 %v3573_v27  ;;  %v3392_v57 = vpop.xlane.xlu2 %3391  ;;  %v3541_v41 = vmul.f32 %v8230_v21, %v8230_v21  ;;  %3616 = vadd.xlane.f32.xlu1 %v3615_v4  ;;  %v3434_v62 = vpop.xlane.xlu0 %3433 }
 0x5ab   : > { %v3464_v52 = vmul.f32 %v3392_v57, %v5471_v26  ;;  %v3478_v28 = vmul.f32 %v3434_v62, %v5471_v26 }
 0x5ac   : > { %v3621_v54 = vsel %vm274_vm0, %v3541_v41, 0.0 }
 0x5ad   : > { %v8241_v44 = vsub.f32 %v7992_v51, %v3464_v52  ;;  %v3440_v60 = vpop.xlane.xlu1 %3439  ;;  %v8244_v19 = vsub.f32 %v7986_v30, %v3478_v28 }
 0x5ae   : > { %v3480_v38 = vmul.f32 %v3440_v60, %v5471_v26 }
 0x5af   : > { %3622 = vadd.xlane.f32.xlu2 %v3621_v54  ;;  %v3528_v6 = vmul.f32 %v8241_v44, %v8241_v44  ;;  %v3542_v57 = vmul.f32 %v8244_v19, %v8244_v19 }
 0x5b0   : > { %v8251_v27 = vsub.f32 %v7995_v24, %v3480_v38 }
 0x5b1   : > { %v3582_v51 = vsel %vm274_vm0, %v3528_v6, 0.0  ;;  %v3624_v30 = vsel %vm274_vm0, %v3542_v57, 0.0 }
 0x5b2   : > { %10412 = vst [vmem:[#allocation16_spill] sm:$0xff] %v8251_v27  ;;  %3583 = vadd.xlane.f32.xlu0 %v3582_v51  ;;  %v3401_v4 = vpop.xlane.xlu2 %3400  ;;  %v3544_v52 = vmul.f32 %v8251_v27, %v8251_v27  ;;  %3625 = vadd.xlane.f32.xlu1 %v3624_v30  ;;  %v3443_v62 = vpop.xlane.xlu0 %3442 }
 0x5b3   : > { %v3467_v41 = vmul.f32 %v3401_v4, %v5471_v26  ;;  %v3481_v28 = vmul.f32 %v3443_v62, %v5471_v26 }
 0x5b4   : > { %v3630_v6 = vsel %vm274_vm0, %v3544_v52, 0.0 }
 0x5b5   : > { %v8262_v24 = vsub.f32 %v8015_v0, %v3467_v41  ;;  %v3449_v60 = vpop.xlane.xlu1 %3448  ;;  %v8265_v38 = vsub.f32 %v8009_v7, %v3481_v28 }
 0x5b6   : > { %v3483_v54 = vmul.f32 %v3449_v60, %v5471_v26 }
 0x5b7   : > { %3631 = vadd.xlane.f32.xlu2 %v3630_v6  ;;  %v3531_v57 = vmul.f32 %v8262_v24, %v8262_v24  ;;  %v3545_v4 = vmul.f32 %v8265_v38, %v8265_v38 }
 0x5b8   : > { %v8272_v51 = vsub.f32 %v8018_v39, %v3483_v54 }
 0x5b9   : > { %v3591_v0 = vsel %vm274_vm0, %v3531_v57, 0.0  ;;  %v3633_v7 = vsel %vm274_vm0, %v3545_v4, 0.0 }
 0x5ba   : > { %10413 = vst [vmem:[#allocation55_spill] sm:$0xff] %v8272_v51  ;;  %v3410_v30 = vpop.xlane.xlu2 %3409  ;;  %3592 = vadd.xlane.f32.xlu0 %v3591_v0  ;;  %v3547_v41 = vmul.f32 %v8272_v51, %v8272_v51  ;;  %3634 = vadd.xlane.f32.xlu1 %v3633_v7  ;;  %v3452_v62 = vpop.xlane.xlu0 %3451 }
 0x5bb   : > { %v3470_v52 = vmul.f32 %v3410_v30, %v5471_v26  ;;  %v3484_v28 = vmul.f32 %v3452_v62, %v5471_v26 }
 0x5bc   : > { %v3639_v57 = vsel %vm274_vm0, %v3547_v41, 0.0 }
 0x5bd   : > { %v8283_v39 = vsub.f32 %v8053_v18, %v3470_v52  ;;  %v3554_v60 = vpop.xlane.xlu1 %3553  ;;  %v8286_v54 = vsub.f32 %v8049_v53, %v3484_v28 }
 0x5be   : > { %v3646_v6 = vmul.f32 %v3554_v60, %v5471_v26 }
 0x5bf   : > { %3640 = vadd.xlane.f32.xlu2 %v3639_v57  ;;  %v3534_v4 = vmul.f32 %v8283_v39, %v8283_v39  ;;  %v3548_v30 = vmul.f32 %v8286_v54, %v8286_v54 }
 0x5c0   : > { %v3678_v0 = vadd.f32 1e-05, %v3646_v6 }
 0x5c1   : > { %v3600_v7 = vsel %vm274_vm0, %v3534_v4, 0.0  ;;  %v3642_v53 = vsel %vm274_vm0, %v3548_v30, 0.0 }
 0x5c2   : > { %4766 = vrsqrt.f32 %v3678_v0  ;;  %v3419_v18 = vpop.xlane.xlu2 %3418  ;;  %3601 = vadd.xlane.f32.xlu0 %v3600_v7  ;;  %3643 = vadd.xlane.f32.xlu1 %v3642_v53  ;;  %vm3725_vm13 = vweird.f32 %v3678_v0 }
 0x5c3   : > { %v3473_v52 = vmul.f32 %v3419_v18, %v5471_v26 }
 0x5c5   : > { %v8298_v41 = vsub.f32 %v8075_v34, %v3473_v52 }
 0x5c7   : > { %10414 = vst [vmem:[#allocation19_spill] sm:$0xff] %v8298_v41  ;;  %v3537_v62 = vmul.f32 %v8298_v41, %v8298_v41 }
 0x5c8   : > { %v4767_v28 = vpop.eup %4766 }
 0x5c9   : > { %v3720_v60 = vmul.f32 %v4767_v28, %v3678_v0  ;;  %v3609_v6 = vsel %vm274_vm0, %v3537_v62, 0.0  ;;  %vm3726_vm12 = vweird.f32 %v4767_v28 }
 0x5ca   : > { %v3428_v57 = vpop.xlane.xlu2 %3427  ;;  %3610 = vadd.xlane.f32.xlu0 %v3609_v6  ;;  %vm3727_vm14 = vmor %vm3725_vm13, %vm3726_vm12 }
 0x5cb   : > { %v3721_v4 = vmul.f32 %v4767_v28, %v3720_v60  ;;  %v3476_v7 = vmul.f32 %v3428_v57, %v5471_v26 }
 0x5cd   : > { %v3722_v61 = vmul.f32 0.5, %v3721_v4  ;;  %v8305_v30 = vsub.f32 %v8085_v32, %v3476_v7 }
 0x5cf   : > { %10415 = vst [vmem:[#allocation50_spill] sm:$0xff] %v8305_v30  ;;  %v3723_v18 = vsub.f32 1.5, %v3722_v61  ;;  %v3540_v34 = vmul.f32 %v8305_v30, %v8305_v30 }
 0x5d1   : > { %v3724_v53 = vmul.f32 %v4767_v28, %v3723_v18  ;;  %v3618_v52 = vsel %vm274_vm0, %v3540_v34, 0.0 }
 0x5d2   : > { %v3437_v62 = vpop.xlane.xlu2 %3436  ;;  %3619 = vadd.xlane.f32.xlu0 %v3618_v52  ;;  %v2755_v52 = vmul.f32 %v7291_v42, %v5471_v26 }
 0x5d3   : > { %v3728_v6 = vsel %vm3727_vm14, %v4767_v28, %v3724_v53  ;;  %v3479_v60 = vmul.f32 %v3437_v62, %v5471_v26 }
 0x5d4   : > { %v4030_v57 = vmul.f32 %v3728_v6, %v8038_v12  ;;  %v10418_v6 = vld [vmem:[#allocation43_spill] sm:$0xff] }
 0x5d5   : > { %v8313_v32 = vsub.f32 %v8094_v17, %v3479_v60  ;;  %v2754_v60 = vmul.f32 %v10418_v6, %v5471_v26 }
 0x5d6   : > { %v4062_v61 = vmul.f32 %v8027_v8, %v4030_v57 }
 0x5d7   : > { %10416 = vst [vmem:[#allocation88_spill] sm:$0xff] %v8313_v32  ;;  %v3543_v4 = vmul.f32 %v8313_v32, %v8313_v32 }
 0x5d8   : > { %v4094_v0 = vadd.f32 %v8045_v9, %v4062_v61  ;;  %v8333_v61 = vadd.f32 1e-05, %v2755_v52  ;;  %v10420_v52 = vld [vmem:[#allocation62_spill] sm:$0xff] }
 0x5d9   : > { %v3627_v7 = vsel %vm274_vm0, %v3543_v4, 0.0 }
 0x5da   : > { %v3446_v18 = vpop.xlane.xlu2 %3445  ;;  %3628 = vadd.xlane.f32.xlu0 %v3627_v7  ;;  %4159 = vrot.lane.b32.xlu2 %v4094_v0, %s5005_s25  ;;  %vm2834_vm13 = vweird.f32 %v8333_v61 }
 0x5db   : > { %v3482_v28 = vmul.f32 %v3446_v18, %v5471_v26  ;;  %v10419_v18 = vld [vmem:[#allocation74_spill] sm:$0xff] }
 0x5dd   : > { %v8323_v12 = vsub.f32 %v8101_v63, %v3482_v28  ;;  %v8335_v63 = vadd.f32 1e-05, %v2754_v60  ;;  %v2758_v28 = vmul.f32 %v10419_v18, %v5471_v26 }
 0x5df   : > { %10417 = vst [vmem:[#allocation17_spill] sm:$0xff] %v8323_v12  ;;  %v3546_v17 = vmul.f32 %v8323_v12, %v8323_v12  ;;  %v8351_v46 = vadd.f32 1e-05, %v2758_v28  ;;  %vm2824_vm8 = vweird.f32 %v8335_v63 }
 0x5e1   : > { %v3636_v34 = vsel %vm274_vm0, %v3546_v17, 0.0 }
 0x5e2   : > { %3637 = vadd.xlane.f32.xlu0 %v3636_v34  ;;  %v3551_v53 = vpop.xlane.xlu2 %3550 }
 0x5e3   : > { %v3645_v62 = vmul.f32 %v3551_v53, %v5471_v26 }
 0x5e5   : > { %v3677_v57 = vadd.f32 1e-05, %v3645_v62  ;;  %v2757_v62 = vmul.f32 %v10420_v52, %v5471_v26 }
 0x5e7   : > { %4768 = vrsqrt.f32 %v3677_v57  ;;  %v8354_v18 = vadd.f32 1e-05, %v2757_v62  ;;  %vm3715_vm1 = vweird.f32 %v3677_v57 }
 0x5e8   : > { %4770 = vrsqrt.f32 %v8333_v61 }
 0x5e9   : > { %4772 = vrsqrt.f32 %v8335_v63  ;;  %10422 = vst [vmem:[#allocation65_spill] sm:$0xff] %v8354_v18 }
 0x5ea   : > { %v3560_v4 = vpop.xlane.xlu2 %3559 }
 0x5eb   : > { %v3648_v0 = vmul.f32 %v3560_v4, %v5471_v26 }
 0x5ed   : > { %v4769_v7 = vpop.eup %4768  ;;  %v3680_v42 = vadd.f32 1e-05, %v3648_v0  ;;  %v3563_v34 = vpop.xlane.xlu1 %3562 }
 0x5ee   : > { %v3710_v17 = vmul.f32 %v4769_v7, %v3677_v57  ;;  %v3649_v53 = vmul.f32 %v3563_v34, %v5471_v26  ;;  %v8345_v60 = vpop.eup %4770  ;;  %vm3716_vm15 = vweird.f32 %v4769_v7 }
 0x5ef   : > { %4774 = vrsqrt.f32 %v3680_v42  ;;  %v8349_v4 = vpop.eup %4772  ;;  %v2829_v34 = vmul.f32 %v8345_v60, %v8333_v61  ;;  %vm3717_vm2 = vmor %vm3715_vm1, %vm3716_vm15  ;;  %vm3745_vm4 = vweird.f32 %v3680_v42  ;;  %vm2835_vm10 = vweird.f32 %v8345_v60 }
 0x5f0   : > { %v3711_v6 = vmul.f32 %v4769_v7, %v3710_v17  ;;  %v8347_v25 = vadd.f32 1e-05, %v3649_v53  ;;  %10421 = vst [vmem:[#allocation97_spill] sm:$0xff] %v8349_v4  ;;  %v2819_v53 = vmul.f32 %v8349_v4, %v8335_v63  ;;  %vm2825_vm12 = vweird.f32 %v8349_v4  ;;  %vm8420_vm14 = vmor %vm2834_vm13, %vm2835_vm10 }
 0x5f2   : > { %v3712_v0 = vmul.f32 0.5, %v3711_v6  ;;  %v3569_v40 = vpop.xlane.xlu2 %3568  ;;  %4776 = vrsqrt.f32 %v8347_v25  ;;  %v2820_v22 = vmul.f32 %v8349_v4, %v2819_v53  ;;  %vm3755_vm7 = vweird.f32 %v8347_v25 }
 0x5f3   : > { %v3651_v52 = vmul.f32 %v3569_v40, %v5471_v26  ;;  %4778 = vrsqrt.f32 %v8351_v46 }
 0x5f4   : > { %v3713_v37 = vsub.f32 1.5, %v3712_v0  ;;  %4780 = vrsqrt.f32 %v8354_v18  ;;  %v2830_v0 = vmul.f32 %v8345_v60, %v2829_v34 }
 0x5f5   : > { %v4775_v17 = vpop.eup %4774  ;;  %v3572_v3 = vpop.xlane.xlu1 %3571  ;;  %v8367_v12 = vadd.f32 1e-05, %v3651_v52 }
 0x5f6   : > { %v3714_v28 = vmul.f32 %v4769_v7, %v3713_v37  ;;  %v3740_v6 = vmul.f32 %v4775_v17, %v3680_v42  ;;  %v3652_v62 = vmul.f32 %v3572_v3, %v5471_v26  ;;  %vm3746_vm3 = vweird.f32 %v4775_v17 }
 0x5f7   : > { %vm3747_vm5 = vmor %vm3745_vm4, %vm3746_vm3 }
 0x5f8   : > { %v3718_v59 = vsel %vm3717_vm2, %v4769_v7, %v3714_v28  ;;  %v3741_v16 = vmul.f32 %v4775_v17, %v3740_v6  ;;  %v4777_v23 = vpop.eup %4776  ;;  %v8369_v37 = vadd.f32 1e-05, %v3652_v62  ;;  %v2831_v28 = vmul.f32 0.5, %v2830_v0  ;;  %v10423_v0 = vld [vmem:[#allocation8_spill] sm:$0xff]  ;;  %vm8461_vm3 = vmor %vm2824_vm8, %vm2825_vm12 }
 0x5f9   : > { %v4029_v40 = vmul.f32 %v3718_v59, %v8104_v5  ;;  %v3750_v51 = vmul.f32 %v4777_v23, %v8347_v25  ;;  %v8375_v34 = vpop.eup %4778  ;;  %v2821_v5 = vmul.f32 0.5, %v2820_v22  ;;  %vm3756_vm6 = vweird.f32 %v4777_v23 }
 0x5fa   : > { %v3742_v57 = vmul.f32 0.5, %v3741_v16  ;;  %v3578_v29 = vpop.xlane.xlu2 %3577  ;;  %4782 = vrsqrt.f32 %v8369_v37  ;;  %v8379_v52 = vpop.eup %4780  ;;  %vm3757_vm9 = vmor %vm3755_vm7, %vm3756_vm6  ;;  %vm3785_vm1 = vweird.f32 %v8369_v37  ;;  %vm2865_vm4 = vweird.f32 %v8375_v34 }
 0x5fb   : > { %v3654_v3 = vmul.f32 %v3578_v29, %v5471_v26  ;;  %v4061_v7 = vmul.f32 %v8027_v8, %v4029_v40  ;;  %v3751_v59 = vmul.f32 %v4777_v23, %v3750_v51  ;;  %4784 = vrsqrt.f32 %v8367_v12 }
 0x5fc   : > { %v3743_v53 = vsub.f32 1.5, %v3742_v57  ;;  %v2859_v40 = vmul.f32 %v8375_v34, %v8351_v46  ;;  %v2761_v57 = vmul.f32 %v10423_v0, %v5471_v26  ;;  %v2832_v51 = vsub.f32 1.5, %v2831_v28 }
 0x5fd   : > { %v4093_v16 = vadd.f32 %v8045_v9, %v4061_v7  ;;  %v3752_v62 = vmul.f32 0.5, %v3751_v59  ;;  %v8381_v32 = vadd.f32 1e-05, %v3654_v3  ;;  %v3581_v29 = vpop.xlane.xlu1 %3580  ;;  %v2822_v3 = vsub.f32 1.5, %v2821_v5 }
 0x5fe   : > { %v3744_v6 = vmul.f32 %v4775_v17, %v3743_v53  ;;  %v3655_v22 = vmul.f32 %v3581_v29, %v5471_v26  ;;  %v2849_v53 = vmul.f32 %v8379_v52, %v8354_v18  ;;  %v2860_v5 = vmul.f32 %v8375_v34, %v2859_v40 }
 0x5ff   : > { %4157 = vrot.lane.b32.xlu0 %v4093_v16, %s5005_s25  ;;  %v3753_v27 = vsub.f32 1.5, %v3752_v62  ;;  %4786 = vrsqrt.f32 %v8381_v32  ;;  %vm2864_vm7 = vweird.f32 %v8351_v46  ;;  %vm3775_vm12 = vweird.f32 %v8367_v12 }
 0x600   : > { %v3748_v7 = vsel %vm3747_vm5, %v4775_v17, %v3744_v6  ;;  %v8389_v42 = vpop.eup %4782  ;;  %v8394_v43 = vadd.f32 1e-05, %v3655_v22  ;;  %v8404_v6 = vadd.f32 1e-05, %v2761_v57  ;;  %v2850_v29 = vmul.f32 %v8379_v52, %v2849_v53 }
 0x601   : > { %v4032_v59 = vmul.f32 %v3748_v7, %v8113_v20  ;;  %v3754_v0 = vmul.f32 %v4777_v23, %v3753_v27  ;;  %v3780_v16 = vmul.f32 %v8389_v42, %v8369_v37  ;;  %v8400_v28 = vpop.eup %4784  ;;  %v2833_v20 = vmul.f32 %v8345_v60, %v2832_v51 }
 0x602   : > { %v3587_v17 = vpop.xlane.xlu2 %3586  ;;  %4788 = vrsqrt.f32 %v8394_v43  ;;  %v3770_v22 = vmul.f32 %v8400_v28, %v8367_v12  ;;  %vm3786_vm15 = vweird.f32 %v8389_v42  ;;  %vm3815_vm6 = vweird.f32 %v8394_v43 }
 0x603   : > { %v4064_v25 = vmul.f32 %v8027_v8, %v4032_v59  ;;  %v3758_v27 = vsel %vm3757_vm9, %v4777_v23, %v3754_v0  ;;  %v3781_v62 = vmul.f32 %v8389_v42, %v3780_v16  ;;  %v3657_v51 = vmul.f32 %v3587_v17, %v5471_v26  ;;  %vm3787_vm2 = vmor %vm3785_vm1, %vm3786_vm15 }
 0x604   : > { %v4033_v40 = vmul.f32 %v3758_v27, %v8119_v50  ;;  %v2861_v0 = vmul.f32 0.5, %v2860_v5  ;;  %4790 = vrsqrt.f32 %v8404_v6  ;;  %v8431_v16 = vmul.f32 %v8349_v4, %v2822_v3  ;;  %vm8515_vm9 = vmor %vm2864_vm7, %vm2865_vm4 }
 0x605   : > { %v4096_v57 = vadd.f32 %v8045_v9, %v4064_v25  ;;  %v3782_v7 = vmul.f32 0.5, %v3781_v62  ;;  %v3590_v59 = vpop.xlane.xlu1 %3589  ;;  %v8428_v53 = vpop.eup %4786  ;;  %v2837_v17 = vsel %vm8420_vm14, %v8345_v60, %v2833_v20  ;;  %v2851_v27 = vmul.f32 0.5, %v2850_v29  ;;  %v10428_v29 = vld [vmem:[#allocation33_spill] sm:$0xff] }
 0x606   : > { %v3658_v50 = vmul.f32 %v3590_v59, %v5471_v26  ;;  %v4065_v61 = vmul.f32 %v8027_v8, %v4033_v40  ;;  %10426 = vst [vmem:[#allocation125_spill] sm:$0xff] %v8431_v16  ;;  %v8447_v60 = vadd.f32 1e-05, %v3657_v51  ;;  %v2862_v30 = vsub.f32 1.5, %v2861_v0 }
 0x607   : > { %4163 = vrot.lane.b32.xlu0 %v4096_v57, %s5005_s25  ;;  %v3783_v25 = vsub.f32 1.5, %v3782_v7  ;;  %v3771_v57 = vmul.f32 %v8400_v28, %v3770_v22  ;;  %v10427_v7 = vld [vmem:[#allocation32_spill] sm:$0xff]  ;;  %v8455_v22 = vmul.f32 %v10428_v29, %v5471_v26  ;;  %v10430_v51 = vmov 0 }
 0x608   : > { %v8437_v5 = vpop.eup %4788  ;;  %v8440_v62 = vadd.f32 1e-05, %v3658_v50  ;;  %v4097_v40 = vadd.f32 %v8045_v9, %v4065_v61  ;;  %v3139_v23 = vmul.f32 %v2837_v17, %v10427_v7  ;;  %v10431_v51 = vsel %vm8461_vm3, 4294967295, %v10430_v51 }
 0x609   : > { %v3784_v3 = vmul.f32 %v8389_v42, %v3783_v25  ;;  %v3810_v59 = vmul.f32 %v8437_v5, %v8394_v43  ;;  %10429 = vst [vmem:[#allocation112_spill] sm:$0xff] %v8455_v22  ;;  %v3800_v50 = vmul.f32 %v8428_v53, %v8381_v32  ;;  %v3772_v7 = vmul.f32 0.5, %v3771_v57 }
 0x60a   : > { %v3596_v20 = vpop.xlane.xlu2 %3595  ;;  %4792 = vrsqrt.f32 %v8440_v62  ;;  %4165 = vrot.lane.b32.xlu2 %v4097_v40, %s5005_s25  ;;  %10432 = vst [vmem:[#allocation37_spill] sm:$0xff] %v10431_v51  ;;  %v8469_v17 = vpop.eup %4790  ;;  %v2852_v40 = vsub.f32 1.5, %v2851_v27  ;;  %v2863_v29 = vmul.f32 %v8375_v34, %v2862_v30  ;;  %v3171_v27 = vmul.f32 %v8027_v8, %v3139_v23 }
 0x60b   : > { %v3660_v37 = vmul.f32 %v3596_v20, %v5471_v26  ;;  %v3788_v0 = vsel %vm3787_vm2, %v8389_v42, %v3784_v3  ;;  %v3811_v61 = vmul.f32 %v8437_v5, %v3810_v59  ;;  %4794 = vrsqrt.f32 %v8447_v60 }
 0x60c   : > { %v4036_v63 = vmul.f32 %v3788_v0, %v8133_v14  ;;  %v2889_v25 = vmul.f32 %v8469_v17, %v8404_v6  ;;  %v3801_v14 = vmul.f32 %v8428_v53, %v3800_v50  ;;  %vm3816_vm5 = vweird.f32 %v8437_v5 }
 0x60d   : > { %v3557_v20 = vpop.xlane.xlu0 %3556  ;;  %v3812_v42 = vmul.f32 0.5, %v3811_v61  ;;  %v8478_v3 = vadd.f32 1e-05, %v3660_v37  ;;  %v3599_v59 = vpop.xlane.xlu1 %3598  ;;  %v2764_v43 = vmul.f32 %v7527_v10, %v5471_v26  ;;  %vm8506_vm8 = vmor %vm3815_vm6, %vm3816_vm5  ;;  %v8530_v4 = vadd.f32 %v8045_v9, %v3171_v27 }
 0x60e   : > { %v3647_v22 = vmul.f32 %v3557_v20, %v5471_v26  ;;  %v3661_v51 = vmul.f32 %v3599_v59, %v5471_v26  ;;  %v4068_v61 = vmul.f32 %v8027_v8, %v4036_v63  ;;  %v3773_v20 = vsub.f32 1.5, %v3772_v7 }
 0x60f   : > { %v3813_v57 = vsub.f32 1.5, %v3812_v42  ;;  %4796 = vrsqrt.f32 %v8478_v3  ;;  %v8501_v42 = vmul.f32 %v8379_v52, %v2852_v40  ;;  %v3802_v40 = vmul.f32 0.5, %v3801_v14 }
 0x610   : > { %v8488_v0 = vpop.eup %4792  ;;  %v8491_v37 = vadd.f32 1e-05, %v3647_v22  ;;  %v8493_v30 = vadd.f32 1e-05, %v3661_v51  ;;  %v2867_v7 = vsel %vm8515_vm9, %v8375_v34, %v2863_v29  ;;  %v3774_v14 = vmul.f32 %v8400_v28, %v3773_v20 }
 0x611   : > { %v3814_v23 = vmul.f32 %v8437_v5, %v3813_v57  ;;  %v3840_v59 = vmul.f32 %v8488_v0, %v8440_v62  ;;  %10433 = vst [vmem:[#allocation24_spill] sm:$0xff] %v8501_v42  ;;  %v8511_v51 = vpop.eup %4794  ;;  %v2890_v57 = vmul.f32 %v8469_v17, %v2889_v25  ;;  %v4100_v42 = vadd.f32 %v8045_v9, %v4068_v61  ;;  %v10438_v61 = vld [vmem:[#allocation75_spill] sm:$0xff] }
 0x612   : > { %v3605_v50 = vpop.xlane.xlu2 %3604  ;;  %4798 = vrsqrt.f32 %v8491_v37  ;;  %vm3776_vm10 = vweird.f32 %v8400_v28  ;;  %v3830_v34 = vmul.f32 %v8511_v51, %v8447_v60  ;;  %v3142_v20 = vmul.f32 %v2867_v7, %v10438_v61 }
 0x613   : > { %v3818_v46 = vsel %vm8506_vm8, %v8437_v5, %v3814_v23  ;;  %v3841_v10 = vmul.f32 %v8488_v0, %v3840_v59  ;;  %4800 = vrsqrt.f32 %v8493_v30  ;;  %v3663_v23 = vmul.f32 %v3605_v50, %v5471_v26  ;;  %4171 = vrot.lane.b32.xlu2 %v4100_v42, %s5005_s25  ;;  %vm8551_vm13 = vmor %vm3775_vm12, %vm3776_vm10 }
 0x614   : > { %v4039_v22 = vmul.f32 %v3818_v46, %v8147_v35  ;;  %v8544_v63 = vadd.f32 1e-05, %v2764_v43  ;;  %v3803_v50 = vsub.f32 1.5, %v3802_v40  ;;  %v2891_v35 = vmul.f32 0.5, %v2890_v57 }
 0x615   : > { %v3566_v16 = vpop.xlane.xlu0 %3565  ;;  %v3842_v5 = vmul.f32 0.5, %v3841_v10  ;;  %v3608_v59 = vpop.xlane.xlu1 %3607  ;;  %vm3806_vm14 = vweird.f32 %v8428_v53  ;;  %v3778_v12 = vsel %vm8551_vm13, %v8400_v28, %v3774_v14  ;;  %v8567_v57 = vadd.f32 1e-05, %v3663_v23 }
 0x616   : > { %v3650_v25 = vmul.f32 %v3566_v16, %v5471_v26  ;;  %v3664_v29 = vmul.f32 %v3608_v59, %v5471_v26  ;;  %v8541_v27 = vpop.eup %4796  ;;  %v3831_v61 = vmul.f32 %v8511_v51, %v3830_v34  ;;  %v3804_v21 = vmul.f32 %v8428_v53, %v3803_v50 }
 0x617   : > { %v3843_v40 = vsub.f32 1.5, %v3842_v5  ;;  %v3860_v28 = vmul.f32 %v8541_v27, %v8478_v3  ;;  %v2892_v5 = vsub.f32 1.5, %v2891_v35  ;;  %v4035_v23 = vmul.f32 %v3778_v12, %v8124_v56 }
 0x618   : > { %v8547_v10 = vpop.eup %4798  ;;  %v8556_v16 = vadd.f32 1e-05, %v3650_v25  ;;  %v8558_v46 = vadd.f32 1e-05, %v3664_v29  ;;  %v4071_v29 = vmul.f32 %v8027_v8, %v4039_v22  ;;  %vm3805_vm15 = vweird.f32 %v8381_v32 }
 0x619   : > { %v8560_v43 = vpop.eup %4800  ;;  %v3730_v7 = vmul.f32 %v8547_v10, %v8491_v37  ;;  %v3844_v41 = vmul.f32 %v8488_v0, %v3843_v40  ;;  %vm3846_vm1 = vweird.f32 %v8488_v0  ;;  %vm8587_vm2 = vmor %vm3805_vm15, %vm3806_vm14  ;;  %v3832_v56 = vmul.f32 0.5, %v3831_v61 }
 0x61a   : > { %v3614_v59 = vpop.xlane.xlu2 %3613  ;;  %v3870_v25 = vmul.f32 %v8560_v43, %v8493_v30  ;;  %4802 = vrsqrt.f32 %v8556_v16  ;;  %v4103_v32 = vadd.f32 %v8045_v9, %v4071_v29  ;;  %v3808_v40 = vsel %vm8587_vm2, %v8428_v53, %v3804_v21 }
 0x61b   : > { %v3731_v14 = vmul.f32 %v8547_v10, %v3730_v7  ;;  %4804 = vrsqrt.f32 %v8558_v46  ;;  %vm3845_vm4 = vweird.f32 %v8440_v62  ;;  %v8602_v47 = vmul.f32 %v8469_v17, %v2892_v5 }
 0x61c   : > { %v3871_v34 = vmul.f32 %v8560_v43, %v3870_v25  ;;  %4806 = vrsqrt.f32 %v8567_v57  ;;  %v3861_v25 = vmul.f32 %v8541_v27, %v3860_v28  ;;  %vm8607_vm5 = vmor %vm3845_vm4, %vm3846_vm1  ;;  %4177 = vrot.lane.b32.xlu2 %v4103_v32, %s5005_s25  ;;  %v8613_v21 = vmul.f32 %v8027_v8, %v4035_v23 }
 0x61d   : > { %v3575_v42 = vpop.xlane.xlu0 %3574  ;;  %v3732_v22 = vmul.f32 0.5, %v3731_v14  ;;  %v3617_v50 = vpop.xlane.xlu1 %3616  ;;  %4808 = vrsqrt.f32 %v8544_v63  ;;  %v8616_v53 = vmul.f32 %v8027_v8, %v3142_v20  ;;  %vm3835_vm6 = vweird.f32 %v8447_v60 }
 0x61e   : > { %v3872_v35 = vmul.f32 0.5, %v3871_v34  ;;  %v3653_v12 = vmul.f32 %v3575_v42, %v5471_v26  ;;  %v3667_v14 = vmul.f32 %v3617_v50, %v5471_v26  ;;  %v3848_v61 = vsel %vm8607_vm5, %v8488_v0, %v3844_v41 }
 0x61f   : > { %v3733_v29 = vsub.f32 1.5, %v3732_v22  ;;  %v4038_v34 = vmul.f32 %v3808_v40, %v8138_v31  ;;  %v3833_v23 = vsub.f32 1.5, %v3832_v56  ;;  %v3862_v7 = vmul.f32 0.5, %v3861_v25 }
 0x620   : > { %v8599_v18 = vpop.eup %4802  ;;  %v3873_v28 = vsub.f32 1.5, %v3872_v35  ;;  %v8629_v20 = vadd.f32 1e-05, %v3653_v12  ;;  %vm3736_vm7 = vweird.f32 %v8547_v10  ;;  %v8637_v0 = vadd.f32 1e-05, %v3667_v14 }
 0x621   : > { %v8618_v62 = vpop.eup %4804  ;;  %v3760_v5 = vmul.f32 %v8599_v18, %v8556_v16  ;;  %v4042_v22 = vmul.f32 %v3848_v61, %v8163_v55  ;;  %v3666_v56 = vmul.f32 %v3614_v59, %v5471_v26  ;;  %vm3836_vm8 = vweird.f32 %v8511_v51 }
 0x622   : > { %v3900_v8 = vmul.f32 %v8618_v62, %v8558_v46  ;;  %v8631_v42 = vpop.xlane.xlu2 %3622  ;;  %v8633_v50 = vpop.eup %4806  ;;  %4810 = vrsqrt.f32 %v8629_v20  ;;  %v3734_v32 = vmul.f32 %v8547_v10, %v3733_v29  ;;  %v3874_v12 = vmul.f32 %v8560_v43, %v3873_v28  ;;  %vm8693_vm1 = vmor %vm3835_vm6, %vm3836_vm8 }
 0x623   : > { %v3761_v41 = vmul.f32 %v8599_v18, %v3760_v5  ;;  %vm3876_vm9 = vweird.f32 %v8560_v43  ;;  %v8647_v40 = vpop.eup %4808  ;;  %vm3735_vm10 = vweird.f32 %v8491_v37  ;;  %v3890_v55 = vmul.f32 %v8633_v50, %v8567_v57  ;;  %v8673_v5 = vld [vmem:[%s9959_s3] ss:$0 sm:$0xff] }
 0x624   : > { %v3901_v31 = vmul.f32 %v8618_v62, %v3900_v8  ;;  %4812 = vrsqrt.f32 %v8637_v0  ;;  %v8654_v14 = vmul.f32 %v8511_v51, %v3833_v23  ;;  %vm3865_vm12 = vweird.f32 %v8478_v3  ;;  %vm8659_vm13 = vmor %vm3735_vm10, %vm3736_vm7 }
 0x625   : > { %v3584_v35 = vpop.xlane.xlu0 %3583  ;;  %v3762_v25 = vmul.f32 0.5, %v3761_v41  ;;  %v3626_v59 = vpop.xlane.xlu1 %3625  ;;  %vm3875_vm14 = vweird.f32 %v8493_v30  ;;  %v3863_v61 = vsub.f32 1.5, %v3862_v7  ;;  %v8668_v28 = vadd.f32 1e-05, %v3666_v56 }
 0x626   : > { %v3902_v37 = vmul.f32 0.5, %v3901_v31  ;;  %vm8664_vm15 = vmor %vm3875_vm14, %vm3876_vm9  ;;  %v4074_v23 = vmul.f32 %v8673_v5, %v4042_v22  ;;  %v8677_v8 = vmul.f32 %v8673_v5, %v4038_v34  ;;  %v3738_v30 = vsel %vm8659_vm13, %v8547_v10, %v3734_v32 }
 0x627   : > { %v3878_v7 = vsel %vm8664_vm15, %v8560_v43, %v3874_v12  ;;  %v3656_v41 = vmul.f32 %v3584_v35, %v5471_v26  ;;  %v3670_v31 = vmul.f32 %v3626_v59, %v5471_v26  ;;  %vm3866_vm2 = vweird.f32 %v8541_v27  ;;  %v8702_v43 = vld [vmem:[%s9960_s4] ss:$0 sm:$0xff] }
 0x628   : > { %v8687_v56 = vpop.eup %4810  ;;  %v3891_v10 = vmul.f32 %v8633_v50, %v3890_v55  ;;  %v3763_v22 = vsub.f32 1.5, %v3762_v25  ;;  %v4106_v35 = vadd.f32 %v8702_v43, %v4074_v23  ;;  %v3838_v60 = vsel %vm8693_vm1, %v8511_v51, %v8654_v14  ;;  %vm8739_vm7 = vmor %vm3865_vm12, %vm3866_vm2 }
 0x629   : > { %vm3765_vm4 = vweird.f32 %v8556_v16  ;;  %v3903_v32 = vsub.f32 1.5, %v3902_v37  ;;  %v3790_v12 = vmul.f32 %v8687_v56, %v8629_v20  ;;  %v4031_v25 = vmul.f32 %v3738_v30, %v8178_v48 }
 0x62a   : > { %v8712_v55 = vpop.eup %4812  ;;  %v4045_v59 = vmul.f32 %v3878_v7, %v8181_v49  ;;  %4183 = vrot.lane.b32.xlu2 %v4106_v35, %s5005_s25  ;;  %v8717_v9 = vadd.f32 1e-05, %v3656_v41  ;;  %v8719_v29 = vadd.f32 1e-05, %v3670_v31  ;;  %v8721_v23 = vpop.xlane.xlu2 %3631  ;;  %v3864_v14 = vmul.f32 %v8541_v27, %v3863_v61 }
 0x62b   : > { %4814 = vrsqrt.f32 %v8668_v28  ;;  %v3791_v37 = vmul.f32 %v8687_v56, %v3790_v12  ;;  %v3930_v48 = vmul.f32 %v8712_v55, %v8637_v0  ;;  %v3892_v30 = vmul.f32 0.5, %v3891_v10 }
 0x62c   : > { %v3764_v49 = vmul.f32 %v8599_v18, %v3763_v22  ;;  %vm3766_vm5 = vweird.f32 %v8599_v18  ;;  %4816 = vrsqrt.f32 %v8717_v9  ;;  %v3904_v7 = vmul.f32 %v8618_v62, %v3903_v32 }
 0x62d   : > { %v3593_v51 = vpop.xlane.xlu0 %3592  ;;  %vm3906_vm6 = vweird.f32 %v8618_v62  ;;  %v3931_v61 = vmul.f32 %v8712_v55, %v3930_v48  ;;  %4818 = vrsqrt.f32 %v8719_v29  ;;  %v3792_v31 = vmul.f32 0.5, %v3791_v37  ;;  %vm8756_vm8 = vmor %vm3765_vm4, %vm3766_vm5 }
 0x62e   : > { %v4063_v34 = vmul.f32 %v8673_v5, %v4031_v25  ;;  %v4077_v10 = vmul.f32 %v8673_v5, %v4045_v59  ;;  %v3659_v22 = vmul.f32 %v3593_v51, %v5471_v26  ;;  %v8748_v35 = vmul.f32 %v8647_v40, %v8544_v63  ;;  %v3635_v25 = vpop.xlane.xlu1 %3634 }
 0x62f   : > { %v8752_v32 = vmul.f32 %v7699_v11, %v5471_v26  ;;  %vm3905_vm9 = vweird.f32 %v8558_v46  ;;  %v3932_v12 = vmul.f32 0.5, %v3931_v61  ;;  %v3893_v59 = vsub.f32 1.5, %v3892_v30 }
 0x630   : > { %v3768_v51 = vsel %vm8756_vm8, %v8599_v18, %v3764_v49  ;;  %vm8766_vm10 = vmor %vm3905_vm9, %vm3906_vm6  ;;  %v4095_v16 = vadd.f32 %v8702_v43, %v4063_v34  ;;  %v4099_v37 = vadd.f32 %v8702_v43, %v8613_v21  ;;  %v8776_v46 = vmul.f32 %v3838_v60, %v8152_v13 }
 0x631   : > { %v8773_v48 = vpop.eup %4814  ;;  %v3868_v18 = vsel %vm8739_vm7, %v8541_v27, %v3864_v14  ;;  %v3908_v30 = vsel %vm8766_vm10, %v8618_v62, %v3904_v7  ;;  %v4109_v49 = vadd.f32 %v8702_v43, %v4077_v10  ;;  %vm3895_vm12 = vweird.f32 %v8567_v57 }
 0x632   : > { %v8785_v61 = vpop.eup %4816  ;;  %v3793_v21 = vsub.f32 1.5, %v3792_v31  ;;  %4161 = vrot.lane.b32.xlu1 %v4095_v16, %s5005_s25  ;;  %v8789_v34 = vadd.f32 1e-05, %v3659_v22  ;;  %v3673_v13 = vmul.f32 %v3635_v25, %v5471_v26  ;;  %v8794_v27 = vadd.f32 %v8702_v43, %v8677_v8  ;;  %v8812_v3 = vpop.xlane.xlu2 %3640 }
 0x633   : > { %v8796_v14 = vpop.eup %4818  ;;  %vm3896_vm13 = vweird.f32 %v8633_v50  ;;  %v4034_v62 = vmul.f32 %v3768_v51, %v8199_v36  ;;  %v3933_v7 = vsub.f32 1.5, %v3932_v12  ;;  %v3820_v41 = vmul.f32 %v8785_v61, %v8717_v9  ;;  %4189 = vrot.lane.b32.xlu2 %v4109_v49, %s5005_s25 }
 0x634   : > { %v8804_v31 = vmul.f32 %v3868_v18, %v8168_v1  ;;  %v8807_v10 = vmul.f32 %v8633_v50, %v3893_v59  ;;  %v4048_v8 = vmul.f32 %v3908_v30, %v8202_v45  ;;  %v3960_v22 = vmul.f32 %v8796_v14, %v8719_v29  ;;  %vm8855_vm7 = vmor %vm3895_vm12, %vm3896_vm13 }
 0x635   : > { %v3602_v60 = vpop.xlane.xlu0 %3601  ;;  %v3920_v36 = vmul.f32 %v8773_v48, %v8668_v28  ;;  %v3669_v12 = vmul.f32 %v8631_v42, %v5471_v26  ;;  %v3821_v25 = vmul.f32 %v8785_v61, %v3820_v41  ;;  %4820 = vrsqrt.f32 %v8789_v34 }
 0x636   : > { %v3794_v1 = vmul.f32 %v8687_v56, %v3793_v21  ;;  %vm3796_vm14 = vweird.f32 %v8687_v56  ;;  %v3961_v45 = vmul.f32 %v8796_v14, %v3960_v22  ;;  %v8823_v59 = vadd.f32 1e-05, %v3673_v13 }
 0x637   : > { %v3934_v51 = vmul.f32 %v8712_v55, %v3933_v7  ;;  %vm3936_vm15 = vweird.f32 %v8712_v55  ;;  %v3822_v11 = vmul.f32 0.5, %v3821_v25  ;;  %v4066_v16 = vmul.f32 %v8673_v5, %v4034_v62  ;;  %v3644_v25 = vpop.xlane.xlu1 %3643 }
 0x638   : > { %vm3795_vm1 = vweird.f32 %v8629_v20  ;;  %v3962_v42 = vmul.f32 0.5, %v3961_v45  ;;  %4822 = vrsqrt.f32 %v8823_v59  ;;  %v4080_v18 = vmul.f32 %v8673_v5, %v4048_v8 }
 0x639   : > { %v3921_v30 = vmul.f32 %v8773_v48, %v3920_v36  ;;  %vm8832_vm2 = vmor %vm3795_vm1, %vm3796_vm14  ;;  %vm3935_vm4 = vweird.f32 %v8637_v0  ;;  %v8837_v21 = vadd.f32 1e-05, %v3669_v12  ;;  %v3823_v13 = vsub.f32 1.5, %v3822_v11 }
 0x63a   : > { %v3798_v20 = vsel %vm8832_vm2, %v8687_v56, %v3794_v1  ;;  %vm8842_vm5 = vmor %vm3935_vm4, %vm3936_vm15  ;;  %vm3826_vm6 = vweird.f32 %v8785_v61  ;;  %v3963_v7 = vsub.f32 1.5, %v3962_v42  ;;  %4169 = vrot.lane.b32.xlu1 %v4099_v37, %s5005_s25  ;;  %v4098_v41 = vadd.f32 %v8702_v43, %v4066_v16 }
 0x63b   : > { %v8849_v0 = vpop.eup %4820  ;;  %v3938_v22 = vsel %vm8842_vm5, %v8712_v55, %v3934_v51  ;;  %v3824_v36 = vmul.f32 %v8785_v61, %v3823_v13  ;;  %v4112_v37 = vadd.f32 %v8702_v43, %v4080_v18  ;;  %v3662_v12 = vmul.f32 %v3602_v60, %v5471_v26 }
 0x63c   : > { %v3898_v57 = vsel %vm8855_vm7, %v8633_v50, %v8807_v10  ;;  %v3964_v1 = vmul.f32 %v8796_v14, %v3963_v7  ;;  %vm3966_vm8 = vweird.f32 %v8796_v14  ;;  %v3850_v45 = vmul.f32 %v8849_v0, %v8789_v34  ;;  %4167 = vrot.lane.b32.xlu0 %v4098_v41, %s5005_s25 }
 0x63d   : > { %v3611_v8 = vpop.xlane.xlu0 %3610  ;;  %v4037_v55 = vmul.f32 %v3798_v20, %v8220_v2  ;;  %vm3825_vm9 = vweird.f32 %v8717_v9  ;;  %v3672_v60 = vmul.f32 %v8721_v23, %v5471_v26  ;;  %4195 = vrot.lane.b32.xlu2 %v4112_v37, %s5005_s25  ;;  %v8879_v51 = vadd.f32 1e-05, %v3662_v12  ;;  %v4160_v23 = vpop.permute.xlu2 %4159 }
 0x63e   : > { %v8881_v11 = vpop.eup %4822  ;;  %v4051_v16 = vmul.f32 %v3938_v22, %v8223_v33  ;;  %vm8886_vm10 = vmor %vm3825_vm9, %vm3826_vm6  ;;  %vm3965_vm12 = vweird.f32 %v8719_v29  ;;  %v3851_v2 = vmul.f32 %v8849_v0, %v3850_v45  ;;  %v3676_v9 = vmul.f32 %v3644_v25, %v5471_v26 }
 0x63f   : > { %v8893_v18 = vmul.f32 0.5, %v3921_v30  ;;  %4824 = vrsqrt.f32 %v8837_v21  ;;  %v3828_v33 = vsel %vm8886_vm10, %v8785_v61, %v3824_v36  ;;  %vm8901_vm13 = vmor %vm3965_vm12, %vm3966_vm8  ;;  %v3990_v29 = vmul.f32 %v8881_v11, %v8823_v59 }
 0x640   : > { %v3968_v30 = vsel %vm8901_vm13, %v8796_v14, %v3964_v1  ;;  %v3852_v13 = vmul.f32 0.5, %v3851_v2  ;;  %4826 = vrsqrt.f32 %v8879_v51  ;;  %v8911_v20 = vadd.f32 1e-05, %v3676_v9 }
 0x641   : > { %v8913_v62 = vadd.f32 1e-05, %v3672_v60  ;;  %v3991_v61 = vmul.f32 %v8881_v11, %v3990_v29  ;;  %v4254_v7 = vsel %vm274_vm0, %v8530_v4, %v4160_v23  ;;  %v4069_v41 = vmul.f32 %v8673_v5, %v4037_v55 }
 0x642   : > { %v4040_v22 = vmul.f32 %v3828_v33, %v8241_v44  ;;  %v3853_v36 = vsub.f32 1.5, %v3852_v13  ;;  %4828 = vrsqrt.f32 %v8911_v20  ;;  %4548 = vst.msk [vmem:[%s6486_s6 + $0x18] sm:$0xff] %vm2310_vm11, %v4254_v7  ;;  %4175 = vrot.lane.b32.xlu1 %v8794_v27, %s5005_s25  ;;  %v4083_v14 = vmul.f32 %v8673_v5, %v4051_v16 }
 0x643   : > { %v4054_v12 = vmul.f32 %v3968_v30, %v8244_v19  ;;  %vm3855_vm14 = vweird.f32 %v8789_v34  ;;  %vm3856_vm15 = vweird.f32 %v8849_v0  ;;  %v3992_v4 = vmul.f32 0.5, %v3991_v61 }
 0x644   : > { %v3854_v44 = vmul.f32 %v8849_v0, %v3853_v36  ;;  %v3675_v25 = vmul.f32 %v8812_v3, %v5471_v26  ;;  %v4101_v1 = vadd.f32 %v8702_v43, %v4069_v41  ;;  %v4115_v45 = vadd.f32 %v8702_v43, %v4083_v14  ;;  %vm8949_vm4 = vmor %vm3855_vm14, %vm3856_vm15 }
 0x645   : > { %v3620_v37 = vpop.xlane.xlu0 %3619  ;;  %v8934_v27 = vpop.eup %4824  ;;  %v3993_v55 = vsub.f32 1.5, %v3992_v4  ;;  %vm3996_vm1 = vweird.f32 %v8881_v11  ;;  %v3665_v19 = vmul.f32 %v3611_v8, %v5471_v26  ;;  %v4073_v60 = vmul.f32 %v8673_v5, %v8776_v46 }
 0x646   : > { %v8940_v16 = vpop.eup %4826  ;;  %v3923_v42 = vsub.f32 1.5, %v8893_v18  ;;  %vm3926_vm2 = vweird.f32 %v8773_v48  ;;  %4830 = vrsqrt.f32 %v8913_v62  ;;  %vm3995_vm5 = vweird.f32 %v8823_v59  ;;  %4173 = vrot.lane.b32.xlu0 %v4101_v1, %s5005_s25  ;;  %4201 = vrot.lane.b32.xlu2 %v4115_v45, %s5005_s25 }
 0x647   : > { %v4072_v46 = vmul.f32 %v8673_v5, %v4040_v22  ;;  %v3858_v8 = vsel %vm8949_vm4, %v8849_v0, %v3854_v44  ;;  %v3994_v2 = vmul.f32 %v8881_v11, %v3993_v55  ;;  %v3880_v34 = vmul.f32 %v8940_v16, %v8879_v51  ;;  %vm3997_vm8 = vmor %vm3995_vm5, %vm3996_vm1 }
 0x648   : > { %v4086_v9 = vmul.f32 %v8673_v5, %v4054_v12  ;;  %v8964_v23 = vpop.eup %4828  ;;  %vm3925_vm6 = vweird.f32 %v8668_v28  ;;  %v3950_v59 = vmul.f32 %v8934_v27, %v8837_v21  ;;  %v8971_v18 = vadd.f32 1e-05, %v3675_v25 }
 0x649   : > { %v8973_v0 = vadd.f32 1e-05, %v3665_v19  ;;  %v4105_v33 = vadd.f32 %v8702_v43, %v4073_v60  ;;  %v4047_v49 = vmul.f32 %v3898_v57, %v8188_v58  ;;  %v3998_v29 = vsel %vm3997_vm8, %v8881_v11, %v3994_v2  ;;  %vm9026_vm13 = vmor %vm3925_vm6, %vm3926_vm2 }
 0x64a   : > { %v3881_v30 = vmul.f32 %v8940_v16, %v3880_v34  ;;  %v4020_v13 = vmul.f32 %v8964_v23, %v8911_v20  ;;  %v4043_v61 = vmul.f32 %v3858_v8, %v8262_v24  ;;  %v4057_v7 = vmul.f32 %v3998_v29, %v8265_v38 }
 0x64b   : > { %4832 = vrsqrt.f32 %v8973_v0  ;;  %4181 = vrot.lane.b32.xlu1 %v4105_v33, %s5005_s25  ;;  %v4104_v56 = vadd.f32 %v8702_v43, %v4072_v46  ;;  %v3924_v58 = vmul.f32 %v8773_v48, %v3923_v42  ;;  %v4118_v57 = vadd.f32 %v8702_v43, %v4086_v9 }
 0x64c   : > { %v3882_v50 = vmul.f32 0.5, %v3881_v30  ;;  %v4021_v10 = vmul.f32 %v8964_v23, %v4020_v13  ;;  %v8994_v11 = vpop.eup %4830  ;;  %v3951_v24 = vmul.f32 %v8934_v27, %v3950_v59  ;;  %4834 = vrsqrt.f32 %v8971_v18 }
 0x64d   : > { %v3629_v41 = vpop.xlane.xlu0 %3628  ;;  %v3668_v38 = vmul.f32 %v3620_v37, %v5471_v26  ;;  %v4076_v22 = vmul.f32 %v8673_v5, %v8804_v31  ;;  %vm3886_vm7 = vweird.f32 %v8940_v16  ;;  %vm3885_vm9 = vweird.f32 %v8879_v51 }
 0x64e   : > { %v3883_v36 = vsub.f32 1.5, %v3882_v50  ;;  %v4022_v14 = vmul.f32 0.5, %v4021_v10  ;;  %v3671_v12 = vmul.f32 %v3629_v41, %v5471_v26  ;;  %4179 = vrot.lane.b32.xlu0 %v4104_v56, %s5005_s25  ;;  %4207 = vrot.lane.b32.xlu2 %v4118_v57, %s5005_s25  ;;  %v4075_v44 = vmul.f32 %v8673_v5, %v4043_v61  ;;  %vm3887_vm12 = vmor %vm3885_vm9, %vm3886_vm7 }
 0x64f   : > { %v9006_v4 = vadd.f32 1e-05, %v3668_v38  ;;  %v4089_v37 = vmul.f32 %v8673_v5, %v4057_v7  ;;  %vm4026_vm10 = vweird.f32 %v8964_v23  ;;  %v3952_v51 = vmul.f32 0.5, %v3951_v24 }
 0x650   : > { %v3884_v31 = vmul.f32 %v8940_v16, %v3883_v36  ;;  %v4023_v25 = vsub.f32 1.5, %v4022_v14  ;;  %v9012_v1 = vadd.f32 1e-05, %v3671_v12  ;;  %v3980_v55 = vmul.f32 %v8994_v11, %v8913_v62  ;;  %v10471_v14 = vld [vmem:[#allocation11_spill] sm:$0xff] }
 0x651   : > { %v9014_v45 = vpop.eup %4832  ;;  %4836 = vrsqrt.f32 %v9006_v4  ;;  %v4108_v19 = vadd.f32 %v8702_v43, %v4076_v22  ;;  %vm4025_vm14 = vweird.f32 %v8911_v20  ;;  %v4107_v28 = vadd.f32 %v8702_v43, %v4075_v44 }
 0x652   : > { %v3888_v42 = vsel %vm3887_vm12, %v8940_v16, %v3884_v31  ;;  %v4024_v3 = vmul.f32 %v8964_v23, %v4023_v25  ;;  %v3910_v46 = vmul.f32 %v9014_v45, %v8973_v0  ;;  %v9035_v8 = vpop.eup %4834  ;;  %vm4027_vm15 = vmor %vm4025_vm14, %vm4026_vm10  ;;  %v4121_v16 = vadd.f32 %v8702_v43, %v4089_v37  ;;  %v10474_v25 = vld [vmem:[#allocation65_spill] sm:$0xff] }
 0x653   : > { %v4046_v2 = vmul.f32 %v3888_v42, %v8283_v39  ;;  %4187 = vrot.lane.b32.xlu1 %v4108_v19, %s5005_s25  ;;  %4838 = vrsqrt.f32 %v9012_v1  ;;  %vm2895_vm1 = vweird.f32 %v8469_v17  ;;  %v3928_v20 = vsel %vm9026_vm13, %v8773_v48, %v3924_v58  ;;  %v10475_v19 = vld [vmem:[#allocation19_spill] sm:$0xff] }
 0x654   : > { %v4028_v39 = vsel %vm4027_vm15, %v8964_v23, %v4024_v3  ;;  %v3911_v9 = vmul.f32 %v9014_v45, %v3910_v46  ;;  %v3953_v33 = vsub.f32 1.5, %v3952_v51  ;;  %v3981_v29 = vmul.f32 %v8994_v11, %v3980_v55 }
 0x655   : > { %v3638_v34 = vpop.xlane.xlu0 %3637  ;;  %v4060_v30 = vmul.f32 %v4028_v39, %v8286_v54  ;;  %v4079_v13 = vmul.f32 %v8673_v5, %v4047_v49  ;;  %vm2894_vm2 = vweird.f32 %v8404_v6  ;;  %v2920_v61 = vmul.f32 %v8647_v40, %v8748_v35 }
 0x656   : > { %v3674_v59 = vmul.f32 %v3638_v34, %v5471_v26  ;;  %v9058_v48 = vadd.f32 1e-05, %v8752_v32  ;;  %v3912_v23 = vmul.f32 0.5, %v3911_v9  ;;  %v4050_v41 = vmul.f32 %v3928_v20, %v8209_v15  ;;  %4185 = vrot.lane.b32.xlu0 %v4107_v28, %s5005_s25  ;;  %4213 = vrot.lane.b32.xlu2 %v4121_v16, %s5005_s25  ;;  %vm9117_vm14 = vmor %vm2894_vm2, %vm2895_vm1 }
 0x657   : > { %v9062_v56 = vpop.eup %4836  ;;  %vm3956_vm4 = vweird.f32 %v8934_v27  ;;  %v4078_v54 = vmul.f32 %v8673_v5, %v4046_v2  ;;  %v4092_v35 = vmul.f32 %v8673_v5, %v4060_v30  ;;  %vm3916_vm5 = vweird.f32 %v9014_v45 }
 0x658   : > { %v9060_v7 = vadd.f32 1e-05, %v3674_v59  ;;  %v3913_v49 = vsub.f32 1.5, %v3912_v23  ;;  %v3940_v32 = vmul.f32 %v9062_v56, %v9006_v4  ;;  %v3954_v15 = vmul.f32 %v8934_v27, %v3953_v33  ;;  %v10479_v23 = vld [vmem:[#allocation50_spill] sm:$0xff] }
 0x659   : > { %v9074_v58 = vpop.eup %4838  ;;  %v3982_v50 = vmul.f32 0.5, %v3981_v29  ;;  %v4010_v10 = vmul.f32 %v9035_v8, %v8971_v18  ;;  %v4111_v57 = vadd.f32 %v8702_v43, %v4079_v13  ;;  %vm3915_vm6 = vweird.f32 %v8973_v0  ;;  %v10478_v29 = vld [vmem:[#allocation94_spill] sm:$0xff] }
 0x65a   : > { %4840 = vrsqrt.f32 %v9060_v7  ;;  %v3914_v24 = vmul.f32 %v9014_v45, %v3913_v49  ;;  %v3941_v38 = vmul.f32 %v9062_v56, %v3940_v32  ;;  %v3970_v22 = vmul.f32 %v9074_v58, %v9012_v1  ;;  %vm3917_vm9 = vmor %vm3915_vm6, %vm3916_vm5 }
 0x65b   : > { %vm2855_vm8 = vweird.f32 %v8379_v52  ;;  %4842 = vrsqrt.f32 %v9058_v48  ;;  %vm3955_vm7 = vweird.f32 %v8837_v21  ;;  %4193 = vrot.lane.b32.xlu1 %v4111_v57, %s5005_s25  ;;  %v4110_v36 = vadd.f32 %v8702_v43, %v4078_v54  ;;  %v10483_v57 = vld [vmem:[#allocation125_spill] sm:$0xff] }
 0x65c   : > { %v4124_v0 = vadd.f32 %v8702_v43, %v4092_v35  ;;  %v2770_v12 = vmul.f32 %v10471_v14, %v5471_v26  ;;  %vm9097_vm10 = vmor %vm3955_vm7, %vm3956_vm4  ;;  %v3918_v21 = vsel %vm3917_vm9, %v9014_v45, %v3914_v24  ;;  %v3942_v37 = vmul.f32 0.5, %v3941_v38  ;;  %v10489_v14 = vld [vmem:[#allocation39_spill] sm:$0xff] }
 0x65d   : > { %v3971_v31 = vmul.f32 %v9074_v58, %v3970_v22  ;;  %vm2854_vm12 = vweird.f32 %v10474_v25  ;;  %v3958_v51 = vsel %vm9097_vm10, %v8934_v27, %v3954_v15  ;;  %v3983_v55 = vsub.f32 1.5, %v3982_v50  ;;  %v10480_v50 = vld [vmem:[#allocation66_spill] sm:$0xff] }
 0x65e   : > { %v4049_v60 = vmul.f32 %v3918_v21, %v10475_v19  ;;  %v4082_v42 = vmul.f32 %v8673_v5, %v4050_v41  ;;  %v4011_v46 = vmul.f32 %v9035_v8, %v4010_v10  ;;  %v3943_v2 = vsub.f32 1.5, %v3942_v37  ;;  %4191 = vrot.lane.b32.xlu0 %v4110_v36, %s5005_s25  ;;  %4219 = vrot.lane.b32.xlu2 %v4124_v0, %s5005_s25  ;;  %v10482_v10 = vld [vmem:[#allocation97_spill] sm:$0xff]  ;;  %v10490_v37 = vld [vmem:[#allocation112_spill] sm:$0xff] }
 0x65f   : > { %vm3946_vm13 = vweird.f32 %v9062_v56  ;;  %v3972_v45 = vmul.f32 0.5, %v3971_v31  ;;  %v2921_v27 = vmul.f32 0.5, %v2920_v61  ;;  %v3206_v20 = vadd.f32 %v8702_v43, %v8616_v53 }
 0x660   : > { %v9109_v3 = vpop.eup %4840  ;;  %v4081_v34 = vmul.f32 %v8673_v5, %v4049_v60  ;;  %v2897_v6 = vsel %vm9117_vm14, %v8469_v17, %v8602_v47  ;;  %v3944_v39 = vmul.f32 %v9062_v56, %v3943_v2  ;;  %vm3945_vm15 = vweird.f32 %v9006_v4  ;;  %v10495_v2 = vld [vmem:[#allocation16_spill] sm:$0xff] }
 0x661   : > { %v4000_v16 = vmul.f32 %v9109_v3, %v9060_v7  ;;  %v3973_v9 = vsub.f32 1.5, %v3972_v45  ;;  %v9134_v59 = vpop.eup %4842  ;;  %v9136_v33 = vadd.f32 1e-05, %v2770_v12  ;;  %v4053_v30 = vmul.f32 %v3958_v51, %v10478_v29  ;;  %vm3947_vm1 = vmor %vm3945_vm15, %vm3946_vm13  ;;  %v10491_v51 = vld [vmem:[#allocation24_spill] sm:$0xff] }
 0x662   : > { %v4114_v13 = vadd.f32 %v8702_v43, %v4082_v42  ;;  %v3984_v47 = vmul.f32 %v8994_v11, %v3983_v55  ;;  %vm3986_vm2 = vweird.f32 %v8994_v11  ;;  %v4012_v17 = vmul.f32 0.5, %v4011_v46  ;;  %v10492_v55 = vld [vmem:[#allocation6_spill] sm:$0xff] }
 0x663   : > { %v4001_v53 = vmul.f32 %v9109_v3, %v4000_v16  ;;  %v3948_v4 = vsel %vm3947_vm1, %v9062_v56, %v3944_v39  ;;  %v2922_v61 = vsub.f32 1.5, %v2921_v27  ;;  %vm3985_vm4 = vweird.f32 %v8913_v62  ;;  %v10498_v39 = vld [vmem:[#allocation88_spill] sm:$0xff] }
 0x664   : > { %v4052_v41 = vmul.f32 %v3948_v4, %v10479_v23  ;;  %4199 = vrot.lane.b32.xlu1 %v4114_v13, %s5005_s25  ;;  %v4113_v54 = vadd.f32 %v8702_v43, %v4081_v34  ;;  %v4166_v35 = vpop.permute.xlu2 %4165  ;;  %v3974_v49 = vmul.f32 %v9074_v58, %v3973_v9  ;;  %vm3976_vm5 = vweird.f32 %v9074_v58  ;;  %vm9164_vm6 = vmor %vm3985_vm4, %vm3986_vm2 }
 0x665   : > { %v4002_v32 = vmul.f32 0.5, %v4001_v53  ;;  %v4257_v15 = vsel %vm274_vm0, %v3206_v20, %v4166_v35  ;;  %v10484_v62 = vsel %vm8461_vm3, %v10482_v10, %v10483_v57  ;;  %v2949_v38 = vmul.f32 %v9134_v59, %v9058_v48  ;;  %vm9175_vm3 = vmor %vm2854_vm12, %vm2855_vm8  ;;  %v10499_v53 = vld [vmem:[#allocation71_spill] sm:$0xff] }
 0x666   : > { %v3138_v24 = vmul.f32 %v10484_v62, %v10480_v50  ;;  %4844 = vrsqrt.f32 %v9136_v33  ;;  %v4085_v36 = vmul.f32 %v8673_v5, %v4053_v30  ;;  %4551 = vst.msk [vmem:[%s6486_s6 + $0x50] sm:$0xff] %vm2310_vm11, %v4257_v15  ;;  %v3145_v12 = vmul.f32 %v2897_v6, %v10489_v14  ;;  %4197 = vrot.lane.b32.xlu0 %v4113_v54, %s5005_s25 }
 0x667   : > { %v3988_v44 = vsel %vm9164_vm6, %v8994_v11, %v3984_v47  ;;  %v4013_v21 = vsub.f32 1.5, %v4012_v17  ;;  %vm3975_vm7 = vweird.f32 %v9012_v1  ;;  %v9185_v31 = vadd.f32 1e-05, %v10490_v37 }
 0x668   : > { %v2857_v25 = vsel %vm9175_vm3, %v8379_v52, %v10491_v51  ;;  %v2773_v19 = vmul.f32 %v10492_v55, %v5471_v26  ;;  %vm9195_vm8 = vmor %vm3975_vm7, %vm3976_vm5  ;;  %v4084_v11 = vmul.f32 %v8673_v5, %v4052_v41  ;;  %v2923_v1 = vmul.f32 %v8647_v40, %v2922_v61  ;;  %v10502_v41 = vld [vmem:[#allocation78_spill] sm:$0xff]  ;;  %v10508_v51 = vld [vmem:[#allocation92_spill] sm:$0xff] }
 0x669   : > { %vm2925_vm9 = vweird.f32 %v8647_v40  ;;  %v3978_v52 = vsel %vm9195_vm8, %v9074_v58, %v3974_v49  ;;  %v4003_v42 = vsub.f32 1.5, %v4002_v32  ;;  %v2950_v46 = vmul.f32 %v9134_v59, %v2949_v38 }
 0x66a   : > { %v4056_v45 = vmul.f32 %v3988_v44, %v10495_v2  ;;  %v4117_v28 = vadd.f32 %v8702_v43, %v4085_v36  ;;  %v3170_v27 = vmul.f32 %v8673_v5, %v3138_v24  ;;  %vm2924_vm10 = vweird.f32 %v8544_v63  ;;  %v10506_v24 = vld [vmem:[#allocation55_spill] sm:$0xff] }
 0x66b   : > { %v4014_v16 = vmul.f32 %v9035_v8, %v4013_v21  ;;  %vm4016_vm12 = vweird.f32 %v9035_v8  ;;  %v3177_v34 = vmul.f32 %v8673_v5, %v3145_v12  ;;  %4846 = vrsqrt.f32 %v9185_v31  ;;  %vm9217_vm13 = vmor %vm2924_vm10, %vm2925_vm9 }
 0x66c   : > { %v9214_v20 = vpop.eup %4844  ;;  %v9221_v6 = vadd.f32 1e-05, %v2773_v19  ;;  %v4055_v9 = vmul.f32 %v3978_v52, %v10498_v39  ;;  %4205 = vrot.lane.b32.xlu1 %v4117_v28, %s5005_s25  ;;  %v4116_v63 = vadd.f32 %v8702_v43, %v4084_v11  ;;  %v2927_v29 = vsel %vm9217_vm13, %v8647_v40, %v2923_v1  ;;  %v10511_v28 = vld [vmem:[#allocation124_spill] sm:$0xff] }
 0x66d   : > { %vm4015_vm14 = vweird.f32 %v8971_v18  ;;  %v4004_v30 = vmul.f32 %v9109_v3, %v4003_v42  ;;  %vm4006_vm15 = vweird.f32 %v9109_v3  ;;  %v3141_v13 = vmul.f32 %v2857_v25, %v10499_v53  ;;  %v4172_v32 = vpop.permute.xlu2 %4171 }
 0x66e   : > { %v2951_v47 = vmul.f32 0.5, %v2950_v46  ;;  %vm9235_vm1 = vmor %vm4015_vm14, %vm4016_vm12  ;;  %v4088_v4 = vmul.f32 %v8673_v5, %v4056_v45  ;;  %v3202_v61 = vadd.f32 %v8702_v43, %v3170_v27  ;;  %v2979_v40 = vmul.f32 %v9214_v20, %v9136_v33  ;;  %4203 = vrot.lane.b32.xlu0 %v4116_v63, %s5005_s25 }
 0x66f   : > { %v4018_v18 = vsel %vm9235_vm1, %v9035_v8, %v4014_v16  ;;  %vm4005_vm2 = vweird.f32 %v9060_v7  ;;  %v3209_v23 = vadd.f32 %v8702_v43, %v3177_v34  ;;  %v3148_v54 = vmul.f32 %v2927_v29, %v10502_v41  ;;  %v10505_v7 = vld [vmem:[#allocation30_spill] sm:$0xff]  ;;  %v10512_v34 = vld [vmem:[#allocation59_spill] sm:$0xff] }
 0x670   : > { %4848 = vrsqrt.f32 %v9221_v6  ;;  %vm9250_vm4 = vmor %vm4005_vm2, %vm4006_vm15  ;;  %v4087_v49 = vmul.f32 %v8673_v5, %v4055_v9  ;;  %v2776_v15 = vmul.f32 %v10505_v7, %v5471_v26  ;;  %v2952_v62 = vsub.f32 1.5, %v2951_v47  ;;  %v10515_v41 = vld [vmem:[#allocation27_spill] sm:$0xff] }
 0x671   : > { %v4158_v8 = vpop.permute.xlu0 %4157  ;;  %v4008_v50 = vsel %vm9250_vm4, %v9109_v3, %v4004_v30  ;;  %v4260_v56 = vsel %vm274_vm0, %v3209_v23, %v4172_v32  ;;  %v9263_v57 = vpop.eup %4846  ;;  %v4059_v38 = vmul.f32 %v4018_v18, %v10506_v24  ;;  %v4120_v22 = vadd.f32 %v8702_v43, %v4088_v4  ;;  %v10507_v3 = vld [vmem:[#allocation17_spill] sm:$0xff]  ;;  %v10516_v32 = vld [vmem:[#allocation99_spill] sm:$0xff] }
 0x672   : > { %v4253_v10 = vsel %vm274_vm0, %v3202_v61, %v4158_v8  ;;  %4554 = vst.msk [vmem:[%s6486_s6 + $0x78] sm:$0xff] %vm2310_vm11, %v4260_v56  ;;  %v2980_v36 = vmul.f32 %v9214_v20, %v2979_v40  ;;  %v3173_v0 = vmul.f32 %v8673_v5, %v3141_v13  ;;  %v4058_v14 = vmul.f32 %v4008_v50, %v10507_v3  ;;  %v10513_v13 = vld [vmem:[#allocation52_spill] sm:$0xff] }
 0x673   : > { %4547 = vst.msk [vmem:[%s6486_s6 + $0x10] sm:$0xff] %vm2310_vm11, %v4253_v10  ;;  %v4119_v12 = vadd.f32 %v8702_v43, %v4087_v49  ;;  %v3180_v44 = vmul.f32 %v8673_v5, %v3148_v54  ;;  %v9277_v21 = vadd.f32 1e-05, %v2776_v15  ;;  %v2759_v25 = vmul.f32 %v10508_v51, %v5471_v26  ;;  %v10514_v61 = vld [vmem:[#allocation76_spill] sm:$0xff] }
 0x674   : > { %4211 = vrot.lane.b32.xlu1 %v4120_v22, %s5005_s25  ;;  %v2953_v55 = vmul.f32 %v9134_v59, %v2952_v62  ;;  %vm2955_vm5 = vweird.f32 %v9134_v59  ;;  %v4091_v19 = vmul.f32 %v8673_v5, %v4059_v38  ;;  %v2981_v60 = vmul.f32 0.5, %v2980_v36 }
 0x675   : > { %v3205_v11 = vadd.f32 %v8702_v43, %v3173_v0  ;;  %v2839_v1 = vmul.f32 %v9263_v57, %v9185_v31  ;;  %vm2954_vm6 = vweird.f32 %v9058_v48  ;;  %v4090_v52 = vmul.f32 %v8673_v5, %v4058_v14  ;;  %v10517_v0 = vld [vmem:[#allocation20_spill] sm:$0xff] }
 0x676   : > { %v9279_v37 = vpop.eup %4848  ;;  %4209 = vrot.lane.b32.xlu0 %v4119_v12, %s5005_s25  ;;  %v3212_v42 = vadd.f32 %v8702_v43, %v3180_v44  ;;  %vm9293_vm3 = vmor %vm2954_vm6, %vm2955_vm5  ;;  %4850 = vrsqrt.f32 %v9277_v21  ;;  %v2779_v48 = vmul.f32 %v10511_v28, %v5471_v26  ;;  %v9303_v16 = vadd.f32 1e-05, %v2759_v25  ;;  %v4178_v63 = vpop.permute.xlu2 %4177 }
 0x677   : > { %v3009_v45 = vmul.f32 %v9279_v37, %v9221_v6  ;;  %v2760_v58 = vmul.f32 %v10512_v34, %v5471_v26  ;;  %v2957_v39 = vsel %vm9293_vm3, %v9134_v59, %v2953_v55  ;;  %v4123_v9 = vadd.f32 %v8702_v43, %v4091_v19  ;;  %v10518_v19 = vld [vmem:[#allocation45_spill] sm:$0xff] }
 0x678   : > { %v2982_v29 = vsub.f32 1.5, %v2981_v60  ;;  %v4263_v30 = vsel %vm274_vm0, %v3212_v42, %v4178_v63  ;;  %v4122_v53 = vadd.f32 %v8702_v43, %v4090_v52  ;;  %v3151_v47 = vmul.f32 %v2957_v39, %v10513_v13  ;;  %v10523_v34 = vld [vmem:[#allocation93_spill] sm:$0xff] }
 0x679   : > { %v4164_v46 = vpop.permute.xlu0 %4163  ;;  %4557 = vst.msk [vmem:[%s6486_s6 + $0xb0] sm:$0xff] %vm2310_vm11, %v4263_v30  ;;  %v3010_v17 = vmul.f32 %v9279_v37, %v3009_v45  ;;  %v9320_v4 = vadd.f32 1e-05, %v2779_v48  ;;  %v2840_v59 = vmul.f32 %v9263_v57, %v2839_v1  ;;  %4852 = vrsqrt.f32 %v9303_v16 }
 0x67a   : > { %v4256_v27 = vsel %vm274_vm0, %v3205_v11, %v4164_v46  ;;  %v2762_v40 = vmul.f32 %v10514_v61, %v5471_v26  ;;  %v9326_v18 = vadd.f32 1e-05, %v2760_v58  ;;  %v2763_v54 = vmul.f32 %v10515_v41, %v5471_v26  ;;  %v10525_v61 = vld [vmem:[#allocation91_spill] sm:$0xff] }
 0x67b   : > { %4550 = vst.msk [vmem:[%s6486_s6 + $0x38] sm:$0xff] %vm2310_vm11, %v4256_v27  ;;  %v2983_v35 = vmul.f32 %v9214_v20, %v2982_v29  ;;  %vm2985_vm7 = vweird.f32 %v9214_v20  ;;  %vm2984_vm8 = vweird.f32 %v9136_v33  ;;  %v3011_v49 = vmul.f32 0.5, %v3010_v17 }
 0x67c   : > { %4217 = vrot.lane.b32.xlu1 %v4123_v9, %s5005_s25  ;;  %v9328_v23 = vpop.eup %4850  ;;  %4854 = vrsqrt.f32 %v9320_v4  ;;  %v2782_v8 = vmul.f32 %v10516_v32, %v5471_v26  ;;  %v3183_v7 = vmul.f32 %v8673_v5, %v3151_v47  ;;  %v2841_v15 = vmul.f32 0.5, %v2840_v59  ;;  %vm2986_vm9 = vmor %vm2984_vm8, %vm2985_vm7 }
 0x67d   : > { %v9340_v50 = vadd.f32 1e-05, %v2762_v40  ;;  %4856 = vrsqrt.f32 %v9326_v18  ;;  %v3039_v56 = vmul.f32 %v9328_v23, %v9277_v21  ;;  %v9345_v33 = vadd.f32 1e-05, %v2763_v54 }
 0x67e   : > { %4215 = vrot.lane.b32.xlu0 %v4122_v53, %s5005_s25  ;;  %v2987_v10 = vsel %vm2986_vm9, %v9214_v20, %v2983_v35  ;;  %v3012_v24 = vsub.f32 1.5, %v3011_v49  ;;  %v9350_v38 = vadd.f32 1e-05, %v2782_v8  ;;  %v3215_v22 = vadd.f32 %v8702_v43, %v3183_v7  ;;  %v10527_v49 = vld [vmem:[#allocation96_spill] sm:$0xff]  ;;  %s4960_s25 = scalar_lea.hbm %s9961_s5, 1024 }
 0x67f   : > { %v9348_v62 = vpop.eup %4852  ;;  %v2842_v36 = vsub.f32 1.5, %v2841_v15  ;;  %4858 = vrsqrt.f32 %v9340_v50  ;;  %v3154_v3 = vmul.f32 %v2987_v10, %v10517_v0  ;;  %v3040_v14 = vmul.f32 %v9328_v23, %v3039_v56  ;;  %p4962_p1 = scmp.lt.s32.totalorder %s4960_s25, %s4956_s7 }
 0x680   : > { %v2869_v20 = vmul.f32 %v9348_v62, %v9303_v16  ;;  %4860 = vrsqrt.f32 %v9345_v33  ;;  %vm2845_vm10 = vweird.f32 %v9263_v57  ;;  %v3013_v55 = vmul.f32 %v9279_v37, %v3012_v24 }
 0x681   : > { %vm3015_vm12 = vweird.f32 %v9279_v37  ;;  %4862 = vrsqrt.f32 %v9350_v38  ;;  %v2785_v60 = vmul.f32 %v10518_v19, %v5471_v26  ;;  %v2843_v11 = vmul.f32 %v9263_v57, %v2842_v36  ;;  %p4963_p2 = por %p4962_p1, %p4961_p0 }
 0x682   : > { %v9356_v44 = vpop.eup %4854  ;;  %v3041_v1 = vmul.f32 0.5, %v3040_v14  ;;  %v3186_v42 = vmul.f32 %v8673_v5, %v3154_v3  ;;  %v2870_v46 = vmul.f32 %v9348_v62, %v2869_v20  ;;  %vm3014_vm13 = vweird.f32 %v9221_v6  ;;  %v10528_v3 = vld [vmem:[#allocation5_spill] sm:$0xff] }
 0x683   : > { %v9362_v25 = vpop.eup %4856  ;;  %v3069_v52 = vmul.f32 %v9356_v44, %v9320_v4  ;;  %vm2844_vm14 = vweird.f32 %v9185_v31  ;;  %vm9383_vm15 = vmor %vm3014_vm13, %vm3015_vm12  ;;  %v2766_v58 = vmul.f32 %v10523_v34, %v5471_v26  ;;  %v9400_v31 = vadd.f32 1e-05, %v2785_v60  ;;  %p4964_p3 = pnand %p4963_p2, %p4959_p13 }
 0x684   : > { %v4184_v12 = vpop.permute.xlu2 %4183  ;;  %v2879_v2 = vmul.f32 %v9362_v25, %v9326_v18  ;;  %vm9391_vm1 = vmor %vm2844_vm14, %vm2845_vm10  ;;  %v3017_v6 = vsel %vm9383_vm15, %v9279_v37, %v3013_v55  ;;  %v3042_v9 = vsub.f32 1.5, %v3041_v1  ;;  %v3218_v29 = vadd.f32 %v8702_v43, %v3186_v42  ;;  %v10526_v43 = vld [vmem:[#allocation28_spill] sm:$0xff]  ;;  %v9464_v42 = vld [vmem:[%s9960_s4] ss:$0 sm:$0xff] }
 0x685   : > { %v4266_v51 = vsel %vm274_vm0, %v3215_v22, %v4184_v12  ;;  %v9380_v45 = vpop.eup %4858  ;;  %v2847_v39 = vsel %vm9391_vm1, %v9263_v57, %v2843_v11  ;;  %v3070_v63 = vmul.f32 %v9356_v44, %v3069_v52  ;;  %v2871_v53 = vmul.f32 0.5, %v2870_v46  ;;  %v10524_v57 = vld [vmem:[#allocation95_spill] sm:$0xff] }
 0x686   : > { %4560 = vst.msk [vmem:[%s6486_s6 + $0xd8] sm:$0xff] %vm2310_vm11, %v4266_v51  ;;  %v9387_v48 = vpop.eup %4860  ;;  %v2899_v13 = vmul.f32 %v9380_v45, %v9340_v50  ;;  %v2880_v37 = vmul.f32 %v9362_v25, %v2879_v2  ;;  %v2765_v59 = vmul.f32 %v10524_v57, %v5471_v26  ;;  %v3157_v40 = vmul.f32 %v3017_v6, %v10525_v61  ;;  %v10552_v57 = vld [vmem:[#allocation58_spill] sm:$0xff] }
 0x687   : > { %v9407_v30 = vpop.eup %4862  ;;  %v2909_v17 = vmul.f32 %v9387_v48, %v9345_v33  ;;  %v3140_v54 = vmul.f32 %v2847_v39, %v10526_v43  ;;  %v9419_v35 = vadd.f32 1e-05, %v2766_v58  ;;  %v2769_v32 = vmul.f32 %v10527_v49, %v5471_v26 }
 0x688   : > { %4864 = vrsqrt.f32 %v9400_v31  ;;  %v3043_v8 = vmul.f32 %v9328_v23, %v3042_v9  ;;  %vm3045_vm2 = vweird.f32 %v9328_v23  ;;  %v3071_v7 = vmul.f32 0.5, %v3070_v63 }
 0x689   : > { %v3099_v15 = vmul.f32 %v9407_v30, %v9350_v38  ;;  %v2872_v56 = vsub.f32 1.5, %v2871_v53  ;;  %v2900_v10 = vmul.f32 %v9380_v45, %v2899_v13  ;;  %v2881_v24 = vmul.f32 0.5, %v2880_v37 }
 0x68a   : > { %v2910_v22 = vmul.f32 %v9387_v48, %v2909_v17  ;;  %v9432_v36 = vadd.f32 1e-05, %v2765_v59  ;;  %vm3044_vm4 = vweird.f32 %v9277_v21  ;;  %v3189_v0 = vmul.f32 %v8673_v5, %v3157_v40  ;;  %v9452_v5 = vld [vmem:[%s9959_s3] ss:$0 sm:$0xff] }
 0x68b   : > { %v2768_v14 = vmul.f32 %v10528_v3, %v5471_v26  ;;  %4866 = vrsqrt.f32 %v9419_v35  ;;  %v9439_v12 = vadd.f32 1e-05, %v2769_v32  ;;  %vm9441_vm5 = vmor %vm3044_vm4, %vm3045_vm2  ;;  %v3072_v55 = vsub.f32 1.5, %v3071_v7  ;;  %v10540_v7 = vld [vmem:[#allocation10_spill] sm:$0xff] }
 0x68c   : > { %v3047_v51 = vsel %vm9441_vm5, %v9328_v23, %v3043_v8  ;;  %v3100_v21 = vmul.f32 %v9407_v30, %v3099_v15  ;;  %v3172_v19 = vmul.f32 %v9452_v5, %v3140_v54  ;;  %v2873_v11 = vmul.f32 %v9348_v62, %v2872_v56  ;;  %v10537_v54 = vld [vmem:[#allocation41_spill] sm:$0xff] }
 0x68d   : > { %v4190_v47 = vpop.permute.xlu2 %4189  ;;  %vm2874_vm6 = vweird.f32 %v9303_v16  ;;  %vm2875_vm3 = vweird.f32 %v9348_v62  ;;  %v2901_v1 = vmul.f32 0.5, %v2900_v10  ;;  %v2882_v23 = vsub.f32 1.5, %v2881_v24  ;;  %v10531_v16 = vld [vmem:[#allocation77_spill] sm:$0xff] }
 0x68e   : > { %v4269_v41 = vsel %vm274_vm0, %v3218_v29, %v4190_v47  ;;  %v9455_v60 = vpop.eup %4864  ;;  %v2911_v52 = vmul.f32 0.5, %v2910_v22  ;;  %4868 = vrsqrt.f32 %v9432_v36  ;;  %v3221_v46 = vadd.f32 %v9464_v42, %v3189_v0  ;;  %vm9472_vm8 = vmor %vm2874_vm6, %vm2875_vm3  ;;  %v10541_v22 = vld [vmem:[#allocation122_spill] sm:$0xff] }
 0x68f   : > { %4563 = vst.msk [vmem:[%s6486_s6 + $0x110] sm:$0xff] %vm2310_vm11, %v4269_v41  ;;  %v9467_v2 = vadd.f32 1e-05, %v2768_v14  ;;  %4870 = vrsqrt.f32 %v9439_v12  ;;  %v3160_v28 = vmul.f32 %v3047_v51, %v10531_v16  ;;  %vm3075_vm7 = vweird.f32 %v9356_v44 }
 0x690   : > { %v3073_v58 = vmul.f32 %v9356_v44, %v3072_v55  ;;  %v3101_v6 = vmul.f32 0.5, %v3100_v21  ;;  %v3129_v39 = vmul.f32 %v9455_v60, %v9400_v31  ;;  %v2877_v29 = vsel %vm9472_vm8, %v9348_v62, %v2873_v11  ;;  %v10534_v62 = vld [vmem:[#allocation70_spill] sm:$0xff] }
 0x691   : > { %v9480_v63 = vpop.eup %4866  ;;  %v2902_v53 = vsub.f32 1.5, %v2901_v1  ;;  %vm2904_vm9 = vweird.f32 %v9340_v50  ;;  %v3204_v13 = vadd.f32 %v9464_v42, %v3172_v19  ;;  %v2883_v37 = vmul.f32 %v9362_v25, %v2882_v23  ;;  %v10546_v23 = vld [vmem:[#allocation60_spill] sm:$0xff] }
 0x692   : > { %vm2885_vm10 = vweird.f32 %v9362_v25  ;;  %v2912_v47 = vsub.f32 1.5, %v2911_v52  ;;  %vm3074_vm12 = vweird.f32 %v9320_v4  ;;  %vm2884_vm13 = vweird.f32 %v9326_v18 }
 0x693   : > { %4872 = vrsqrt.f32 %v9467_v2  ;;  %v2772_v17 = vmul.f32 %v10534_v62, %v5471_v26  ;;  %vm9498_vm14 = vmor %vm3074_vm12, %vm3075_vm7  ;;  %v3192_v59 = vmul.f32 %v9452_v5, %v3160_v28  ;;  %v2939_v4 = vmul.f32 %v9480_v63, %v9419_v35  ;;  %v10547_v28 = vld [vmem:[#allocation123_spill] sm:$0xff]  ;;  %v10551_v62 = vld [vmem:[#allocation46_spill] sm:$0xff] }
 0x694   : > { %v9503_v61 = vpop.eup %4868  ;;  %v3077_v18 = vsel %vm9498_vm14, %v9356_v44, %v3073_v58  ;;  %v3102_v40 = vsub.f32 1.5, %v3101_v6  ;;  %v3130_v41 = vmul.f32 %v9455_v60, %v3129_v39  ;;  %v3143_v49 = vmul.f32 %v2877_v29, %v10537_v54  ;;  %vm9518_vm1 = vmor %vm2884_vm13, %vm2885_vm10 }
 0x695   : > { %v9511_v43 = vpop.eup %4870  ;;  %v2903_v32 = vmul.f32 %v9380_v45, %v2902_v53  ;;  %vm2905_vm15 = vweird.f32 %v9380_v45  ;;  %v2771_v44 = vmul.f32 %v10540_v7, %v5471_v26  ;;  %v2887_v15 = vsel %vm9518_vm1, %v9362_v25, %v2883_v37  ;;  %v10550_v53 = vld [vmem:[#allocation38_spill] sm:$0xff] }
 0x696   : > { %v2913_v56 = vmul.f32 %v9387_v48, %v2912_v47  ;;  %vm2914_vm2 = vweird.f32 %v9345_v33  ;;  %vm2915_vm4 = vweird.f32 %v9387_v48  ;;  %v2929_v10 = vmul.f32 %v9503_v61, %v9432_v36  ;;  %vm9538_vm5 = vmor %vm2904_vm9, %vm2905_vm15 }
 0x697   : > { %v4196_v27 = vpop.permute.xlu2 %4195  ;;  %v9532_v24 = vadd.f32 1e-05, %v2772_v17  ;;  %v3163_v0 = vmul.f32 %v3077_v18, %v10541_v22  ;;  %v3224_v3 = vadd.f32 %v9464_v42, %v3192_v59  ;;  %v2940_v33 = vmul.f32 %v9480_v63, %v2939_v4  ;;  %vm9550_vm3 = vmor %vm2914_vm2, %vm2915_vm4 }
 0x698   : > { %v4272_v9 = vsel %vm274_vm0, %v3221_v46, %v4196_v27  ;;  %v3103_v14 = vmul.f32 %v9407_v30, %v3102_v40  ;;  %vm3105_vm6 = vweird.f32 %v9407_v30  ;;  %v3131_v20 = vmul.f32 0.5, %v3130_v41  ;;  %v10553_v40 = vld [vmem:[#allocation101_spill] sm:$0xff] }
 0x699   : > { %4566 = vst.msk [vmem:[%s6486_s6 + $0x138] sm:$0xff] %vm2310_vm11, %v4272_v9  ;;  %v9545_v55 = vpop.eup %4872  ;;  %v2907_v21 = vsel %vm9538_vm5, %v9380_v45, %v2903_v32  ;;  %v2969_v19 = vmul.f32 %v9511_v43, %v9439_v12  ;;  %v9556_v11 = vadd.f32 1e-05, %v2771_v44  ;;  %v3144_v52 = vmul.f32 %v2887_v15, %v10546_v23 }
 0x69a   : > { %v2917_v46 = vsel %vm9550_vm3, %v9387_v48, %v2913_v56  ;;  %vm3104_vm7 = vweird.f32 %v9350_v38  ;;  %v3175_v45 = vmul.f32 %v9452_v5, %v3143_v49  ;;  %v2930_v16 = vmul.f32 %v9503_v61, %v2929_v10 }
 0x69b   : > { %4874 = vrsqrt.f32 %v9532_v24  ;;  %v2775_v27 = vmul.f32 %v10547_v28, %v5471_v26  ;;  %vm9573_vm8 = vmor %vm3104_vm7, %vm3105_vm6  ;;  %v3195_v38 = vmul.f32 %v9452_v5, %v3163_v0  ;;  %v2959_v48 = vmul.f32 %v9545_v55, %v9467_v2 }
 0x69c   : > { %v2941_v58 = vmul.f32 0.5, %v2940_v33  ;;  %v3107_v6 = vsel %vm9573_vm8, %v9407_v30, %v3103_v14  ;;  %v3132_v39 = vsub.f32 1.5, %v3131_v20  ;;  %v2970_v29 = vmul.f32 %v9511_v43, %v2969_v19  ;;  %v10554_v14 = vld [vmem:[#allocation42_spill] sm:$0xff] }
 0x69d   : > { %4876 = vrsqrt.f32 %v9556_v11  ;;  %v2774_v37 = vmul.f32 %v10550_v53, %v5471_v26  ;;  %v3146_v17 = vmul.f32 %v2907_v21, %v10551_v62  ;;  %v3147_v59 = vmul.f32 %v2917_v46, %v10552_v57 }
 0x69e   : > { %v3176_v4 = vmul.f32 %v9452_v5, %v3144_v52  ;;  %v2931_v30 = vmul.f32 0.5, %v2930_v16  ;;  %v9593_v18 = vadd.f32 1e-05, %v2775_v27  ;;  %v3166_v41 = vmul.f32 %v3107_v6, %v10553_v40  ;;  %v10557_v16 = vld [vmem:[#allocation81_spill] sm:$0xff]  ;;  %v10564_v40 = vld [vmem:[#allocation14_spill] sm:$0xff] }
 0x69f   : > { %v3227_v54 = vadd.f32 %v9464_v42, %v3195_v38  ;;  %v2942_v49 = vsub.f32 1.5, %v2941_v58  ;;  %v3133_v32 = vmul.f32 %v9455_v60, %v3132_v39  ;;  %vm3135_vm9 = vweird.f32 %v9455_v60  ;;  %v10560_v38 = vld [vmem:[#allocation9_spill] sm:$0xff] }
 0x6a0   : > { %v4202_v51 = vpop.permute.xlu2 %4201  ;;  %v3207_v8 = vadd.f32 %v9464_v42, %v3175_v45  ;;  %v2960_v44 = vmul.f32 %v9545_v55, %v2959_v48  ;;  %v2971_v15 = vmul.f32 0.5, %v2970_v29  ;;  %v9603_v56 = vadd.f32 1e-05, %v2774_v37 }
 0x6a1   : > { %v4275_v1 = vsel %vm274_vm0, %v3224_v3, %v4202_v51  ;;  %v9600_v7 = vpop.eup %4874  ;;  %vm3134_vm10 = vweird.f32 %v9400_v31  ;;  %v3208_v22 = vadd.f32 %v9464_v42, %v3176_v4  ;;  %v3179_v0 = vmul.f32 %v9452_v5, %v3147_v59 }
 0x6a2   : > { %4569 = vst.msk [vmem:[%s6486_s6 + $0x170] sm:$0xff] %vm2310_vm11, %v4275_v1  ;;  %v3178_v3 = vmul.f32 %v9452_v5, %v3146_v17  ;;  %v2932_v33 = vsub.f32 1.5, %v2931_v30  ;;  %4878 = vrsqrt.f32 %v9593_v18  ;;  %v2778_v20 = vmul.f32 %v10554_v14, %v5471_v26  ;;  %vm9619_vm12 = vmor %vm3134_vm10, %vm3135_vm9  ;;  %v10563_v30 = vld [vmem:[#allocation84_spill] sm:$0xff] }
 0x6a3   : > { %v9612_v25 = vpop.eup %4876  ;;  %v3198_v51 = vmul.f32 %v9452_v5, %v3166_v41  ;;  %v2943_v21 = vmul.f32 %v9480_v63, %v2942_v49  ;;  %vm2945_vm13 = vweird.f32 %v9480_v63  ;;  %v2999_v50 = vmul.f32 %v9600_v7, %v9532_v24 }
 0x6a4   : > { %v4162_v9 = vpop.permute.xlu1 %4161  ;;  %v3137_v19 = vsel %vm9619_vm12, %v9455_v60, %v3133_v32  ;;  %v2961_v23 = vmul.f32 0.5, %v2960_v44  ;;  %v2972_v52 = vsub.f32 1.5, %v2971_v15  ;;  %4880 = vrsqrt.f32 %v9603_v56 }
 0x6a5   : > { %v4255_v47 = vsel %vm274_vm0, %v3204_v13, %v4162_v9  ;;  %vm2934_vm14 = vweird.f32 %v9432_v36  ;;  %vm2944_vm15 = vweird.f32 %v9419_v35  ;;  %v2989_v45 = vmul.f32 %v9612_v25, %v9556_v11 }
 0x6a6   : > { %4549 = vst.msk [vmem:[%s6486_s6 + $0x30] sm:$0xff] %vm2310_vm11, %v4255_v47  ;;  %v2777_v28 = vmul.f32 %v10557_v16, %v5471_v26  ;;  %vm9641_vm1 = vmor %vm2944_vm15, %vm2945_vm13  ;;  %v9645_v34 = vadd.f32 1e-05, %v2778_v20  ;;  %v3169_v48 = vmul.f32 %v3137_v19, %v10560_v38  ;;  %v3230_v35 = vadd.f32 %v9464_v42, %v3198_v51 }
 0x6a7   : > { %v2933_v6 = vmul.f32 %v9503_v61, %v2932_v33  ;;  %vm2935_vm2 = vweird.f32 %v9503_v61  ;;  %v2947_v39 = vsel %vm9641_vm1, %v9480_v63, %v2943_v21  ;;  %v3000_v9 = vmul.f32 %v9600_v7, %v2999_v50  ;;  %v10567_v33 = vld [vmem:[#allocation22_spill] sm:$0xff] }
 0x6a8   : > { %v4208_v13 = vpop.permute.xlu2 %4207  ;;  %v9658_v53 = vpop.eup %4878  ;;  %v2962_v37 = vsub.f32 1.5, %v2961_v23  ;;  %v2973_v47 = vmul.f32 %v9511_v43, %v2972_v52  ;;  %vm2975_vm4 = vweird.f32 %v9511_v43  ;;  %vm2974_vm5 = vweird.f32 %v9439_v12  ;;  %vm9676_vm6 = vmor %vm2934_vm14, %vm2935_vm2 }
 0x6a9   : > { %v4278_v10 = vsel %vm274_vm0, %v3227_v54, %v4208_v13  ;;  %v2990_v17 = vmul.f32 %v9612_v25, %v2989_v45  ;;  %v9665_v57 = vadd.f32 1e-05, %v2777_v28  ;;  %v3211_v63 = vadd.f32 %v9464_v42, %v3179_v0  ;;  %vm9688_vm3 = vmor %vm2974_vm5, %vm2975_vm4 }
 0x6aa   : > { %4572 = vst.msk [vmem:[%s6486_s6 + $0x198] sm:$0xff] %vm2310_vm11, %v4278_v10  ;;  %v9670_v59 = vpop.eup %4880  ;;  %v3150_v12 = vmul.f32 %v2947_v39, %v10563_v30  ;;  %4882 = vrsqrt.f32 %v9645_v34  ;;  %v2781_v41 = vmul.f32 %v10564_v40, %v5471_v26  ;;  %v3201_v54 = vmul.f32 %v9452_v5, %v3169_v48  ;;  %v10572_v48 = vld [vmem:[#allocation104_spill] sm:$0xff] }
 0x6ab   : > { %v2937_v49 = vsel %vm9676_vm6, %v9503_v61, %v2933_v6  ;;  %v3001_v32 = vmul.f32 0.5, %v3000_v9  ;;  %v3029_v13 = vmul.f32 %v9658_v53, %v9593_v18  ;;  %v3210_v44 = vadd.f32 %v9464_v42, %v3178_v3  ;;  %v10568_v3 = vld [vmem:[#allocation69_spill] sm:$0xff] }
 0x6ac   : > { %v4170_v1 = vpop.permute.xlu1 %4169  ;;  %v2963_v15 = vmul.f32 %v9545_v55, %v2962_v37  ;;  %vm2965_vm7 = vweird.f32 %v9545_v55  ;;  %v2977_v10 = vsel %vm9688_vm3, %v9511_v43, %v2973_v47  ;;  %v3019_v0 = vmul.f32 %v9670_v59, %v9603_v56  ;;  %v10573_v47 = vld [vmem:[#allocation79_spill] sm:$0xff] }
 0x6ad   : > { %v4259_v46 = vsel %vm274_vm0, %v3208_v22, %v4170_v1  ;;  %v2991_v22 = vmul.f32 0.5, %v2990_v17  ;;  %4884 = vrsqrt.f32 %v9665_v57  ;;  %v2780_v14 = vmul.f32 %v10567_v33, %v5471_v26 }
 0x6ae   : > { %4553 = vst.msk [vmem:[%s6486_s6 + $0x70] sm:$0xff] %vm2310_vm11, %v4259_v46  ;;  %v4168_v60 = vpop.permute.xlu0 %4167  ;;  %v3149_v20 = vmul.f32 %v2937_v49, %v10568_v3  ;;  %v9709_v31 = vadd.f32 1e-05, %v2781_v41  ;;  %v3233_v51 = vadd.f32 %v9464_v42, %v3201_v54  ;;  %v3182_v43 = vmul.f32 %v9452_v5, %v3150_v12  ;;  %v10571_v46 = vld [vmem:[#allocation56_spill] sm:$0xff]  ;;  %v10576_v41 = vld [vmem:[#allocation121_spill] sm:$0xff] }
 0x6af   : > { %v4258_v58 = vsel %vm274_vm0, %v3207_v8, %v4168_v60  ;;  %vm2964_vm8 = vweird.f32 %v9467_v2  ;;  %v3002_v21 = vsub.f32 1.5, %v3001_v32  ;;  %v3030_v50 = vmul.f32 %v9658_v53, %v3029_v13 }
 0x6b0   : > { %4552 = vst.msk [vmem:[%s6486_s6 + $0x58] sm:$0xff] %vm2310_vm11, %v4258_v58  ;;  %v4214_v29 = vpop.permute.xlu2 %4213  ;;  %v9715_v23 = vpop.eup %4882  ;;  %vm9719_vm9 = vmor %vm2964_vm8, %vm2965_vm7  ;;  %v3153_v45 = vmul.f32 %v2977_v10, %v10571_v46  ;;  %v2992_v60 = vsub.f32 1.5, %v2991_v22  ;;  %v3020_v27 = vmul.f32 %v9670_v59, %v3019_v0  ;;  %v9730_v38 = vadd.f32 1e-05, %v2780_v14  ;;  %v10579_v22 = vld [vmem:[#allocation80_spill] sm:$0xff]  ;;  %v10589_v46 = vld [vmem:[#allocation31_spill] sm:$0xff] }
 0x6b1   : > { %v4281_v62 = vsel %vm274_vm0, %v3230_v35, %v4214_v29  ;;  %v2967_v28 = vsel %vm9719_vm9, %v9545_v55, %v2963_v15  ;;  %4886 = vrsqrt.f32 %v9709_v31  ;;  %v2784_v58 = vmul.f32 %v10572_v48, %v5471_v26 }
 0x6b2   : > { %4575 = vst.msk [vmem:[%s6486_s6 + $0x1d0] sm:$0xff] %vm2310_vm11, %v4281_v62  ;;  %v3214_v35 = vadd.f32 %v9464_v42, %v3182_v43  ;;  %v3181_v6 = vmul.f32 %v9452_v5, %v3149_v20  ;;  %v3003_v39 = vmul.f32 %v9600_v7, %v3002_v21  ;;  %vm3005_vm10 = vweird.f32 %v9600_v7 }
 0x6b3   : > { %v9741_v55 = vpop.eup %4884  ;;  %v3031_v9 = vmul.f32 0.5, %v3030_v50  ;;  %v3059_v29 = vmul.f32 %v9715_v23, %v9645_v34  ;;  %v3152_v62 = vmul.f32 %v2967_v28, %v10573_v47  ;;  %vm2995_vm12 = vweird.f32 %v9612_v25 }
 0x6b4   : > { %v4176_v8 = vpop.permute.xlu1 %4175  ;;  %v2993_v4 = vmul.f32 %v9612_v25, %v2992_v60  ;;  %v3021_v30 = vmul.f32 0.5, %v3020_v27  ;;  %vm3004_vm13 = vweird.f32 %v9532_v24  ;;  %4888 = vrsqrt.f32 %v9730_v38 }
 0x6b5   : > { %v4262_v61 = vsel %vm274_vm0, %v3211_v63, %v4176_v8  ;;  %v3185_v63 = vmul.f32 %v9452_v5, %v3153_v45  ;;  %vm9756_vm14 = vmor %vm3004_vm13, %vm3005_vm10  ;;  %v3049_v40 = vmul.f32 %v9741_v55, %v9665_v57  ;;  %v2783_v54 = vmul.f32 %v10576_v41, %v5471_v26 }
 0x6b6   : > { %4556 = vst.msk [vmem:[%s6486_s6 + $0x98] sm:$0xff] %vm2310_vm11, %v4262_v61  ;;  %v9764_v49 = vadd.f32 1e-05, %v2784_v58  ;;  %v3213_v36 = vadd.f32 %v9464_v42, %v3181_v6  ;;  %vm2994_vm15 = vweird.f32 %v9556_v11  ;;  %v3007_v24 = vsel %vm9756_vm14, %v9600_v7, %v3003_v39  ;;  %v10585_v6 = vld [vmem:[#allocation7_spill] sm:$0xff] }
 0x6b7   : > { %v3032_v32 = vsub.f32 1.5, %v3031_v9  ;;  %v3060_v13 = vmul.f32 %v9715_v23, %v3059_v29  ;;  %vm9776_vm1 = vmor %vm2994_vm15, %vm2995_vm12  ;;  %v3184_v11 = vmul.f32 %v9452_v5, %v3152_v62  ;;  %v3022_v10 = vsub.f32 1.5, %v3021_v30  ;;  %v10586_v30 = vld [vmem:[#allocation87_spill] sm:$0xff] }
 0x6b8   : > { %v4174_v19 = vpop.permute.xlu0 %4173  ;;  %v4220_v1 = vpop.permute.xlu2 %4219  ;;  %v2997_v7 = vsel %vm9776_vm1, %v9612_v25, %v2993_v4  ;;  %v3217_v61 = vadd.f32 %v9464_v42, %v3185_v63  ;;  %v3156_v0 = vmul.f32 %v3007_v24, %v10579_v22  ;;  %v3050_v33 = vmul.f32 %v9741_v55, %v3049_v40 }
 0x6b9   : > { %v4261_v16 = vsel %vm274_vm0, %v3210_v44, %v4174_v19  ;;  %v4284_v2 = vsel %vm274_vm0, %v3233_v51, %v4220_v1  ;;  %v9772_v44 = vpop.eup %4886  ;;  %v9790_v14 = vadd.f32 1e-05, %v2783_v54  ;;  %4890 = vrsqrt.f32 %v9764_v49  ;;  %v10580_v19 = vld [vmem:[#allocation47_spill] sm:$0xff] }
 0x6ba   : > { %4555 = vst.msk [vmem:[%s6486_s6 + $0x90] sm:$0xff] %vm2310_vm11, %v4261_v16  ;;  %v9793_v3 = vpop.eup %4888  ;;  %v3033_v20 = vmul.f32 %v9658_v53, %v3032_v32  ;;  %vm3035_vm2 = vweird.f32 %v9658_v53  ;;  %v3061_v25 = vmul.f32 0.5, %v3060_v13  ;;  %v3089_v51 = vmul.f32 %v9772_v44, %v9709_v31 }
 0x6bb   : > { %4578 = vst.msk [vmem:[%s6486_s6 + $0x1f8] sm:$0xff] %vm2310_vm11, %v4284_v2  ;;  %v3216_v50 = vadd.f32 %v9464_v42, %v3184_v11  ;;  %v3155_v1 = vmul.f32 %v2997_v7, %v10580_v19  ;;  %v3023_v52 = vmul.f32 %v9670_v59, %v3022_v10  ;;  %vm3025_vm4 = vweird.f32 %v9670_v59  ;;  %v10587_v7 = vld [vmem:[#allocation110_spill] sm:$0xff] }
 0x6bc   : > { %vm3034_vm5 = vweird.f32 %v9593_v18  ;;  %v3051_v45 = vmul.f32 0.5, %v3050_v33  ;;  %v3079_v16 = vmul.f32 %v9793_v3, %v9730_v38  ;;  %4892 = vrsqrt.f32 %v9790_v14 }
 0x6bd   : > { %v4182_v37 = vpop.permute.xlu1 %4181  ;;  %vm9807_vm6 = vmor %vm3034_vm5, %vm3035_vm2  ;;  %v3188_v2 = vmul.f32 %v9452_v5, %v3156_v0  ;;  %vm3024_vm3 = vweird.f32 %v9603_v56  ;;  %v3062_v28 = vsub.f32 1.5, %v3061_v25  ;;  %v3090_v60 = vmul.f32 %v9772_v44, %v3089_v51 }
 0x6be   : > { %v4265_v17 = vsel %vm274_vm0, %v3214_v35, %v4182_v37  ;;  %v3037_v18 = vsel %vm9807_vm6, %v9658_v53, %v3033_v20  ;;  %vm9822_vm7 = vmor %vm3024_vm3, %vm3025_vm4  ;;  %v3187_v53 = vmul.f32 %v9452_v5, %v3155_v1  ;;  %v3052_v9 = vsub.f32 1.5, %v3051_v45 }
 0x6bf   : > { %4559 = vst.msk [vmem:[%s6486_s6 + $0xd0] sm:$0xff] %vm2310_vm11, %v4265_v17  ;;  %v9820_v48 = vpop.eup %4890  ;;  %v3027_v56 = vsel %vm9822_vm7, %v9670_v59, %v3023_v52  ;;  %v3159_v39 = vmul.f32 %v3037_v18, %v10585_v6  ;;  %v3080_v29 = vmul.f32 %v9793_v3, %v3079_v16  ;;  %v3220_v37 = vadd.f32 %v9464_v42, %v3188_v2 }
 0x6c0   : > { %v4180_v8 = vpop.permute.xlu0 %4179  ;;  %v3063_v47 = vmul.f32 %v9715_v23, %v3062_v28  ;;  %vm3065_vm8 = vweird.f32 %v9715_v23  ;;  %v3091_v62 = vmul.f32 0.5, %v3090_v60  ;;  %v3119_v59 = vmul.f32 %v9820_v48, %v9764_v49 }
 0x6c1   : > { %v4264_v15 = vsel %vm274_vm0, %v3213_v36, %v4180_v8  ;;  %v3158_v12 = vmul.f32 %v3027_v56, %v10586_v30  ;;  %vm3064_vm9 = vweird.f32 %v9645_v34  ;;  %v3219_v40 = vadd.f32 %v9464_v42, %v3187_v53 }
 0x6c2   : > { %4558 = vst.msk [vmem:[%s6486_s6 + $0xb8] sm:$0xff] %vm2310_vm11, %v4264_v15  ;;  %v9840_v63 = vpop.eup %4892  ;;  %v3053_v41 = vmul.f32 %v9741_v55, %v3052_v9  ;;  %vm3055_vm10 = vweird.f32 %v9741_v55  ;;  %v3081_v54 = vmul.f32 0.5, %v3080_v29  ;;  %vm3066_vm12 = vmor %vm3064_vm9, %vm3065_vm8  ;;  %v3191_v36 = vmul.f32 %v9452_v5, %v3159_v39  ;;  %v10591_v39 = vld [vmem:[#allocation35_spill] sm:$0xff] }
 0x6c3   : > { %v3067_v24 = vsel %vm3066_vm12, %v9715_v23, %v3063_v47  ;;  %v3092_v32 = vsub.f32 1.5, %v3091_v62  ;;  %v3109_v13 = vmul.f32 %v9840_v63, %v9790_v14  ;;  %v3120_v34 = vmul.f32 %v9820_v48, %v3119_v59 }
 0x6c4   : > { %vm3054_vm13 = vweird.f32 %v9665_v57  ;;  %v3190_v15 = vmul.f32 %v9452_v5, %v3158_v12  ;;  %v3082_v23 = vsub.f32 1.5, %v3081_v54  ;;  %v3162_v10 = vmul.f32 %v3067_v24, %v10587_v7 }
 0x6c5   : > { %v4188_v43 = vpop.permute.xlu1 %4187  ;;  %vm3056_vm14 = vmor %vm3054_vm13, %vm3055_vm10  ;;  %v3093_v22 = vmul.f32 %v9772_v44, %v3092_v32  ;;  %vm3095_vm15 = vweird.f32 %v9772_v44  ;;  %v3110_v57 = vmul.f32 %v9840_v63, %v3109_v13  ;;  %v3121_v0 = vmul.f32 0.5, %v3120_v34 }
 0x6c6   : > { %v4268_v21 = vsel %vm274_vm0, %v3217_v61, %v4188_v43  ;;  %v3057_v11 = vsel %vm3056_vm14, %v9741_v55, %v3053_v41  ;;  %v3223_v61 = vadd.f32 %v9464_v42, %v3191_v36  ;;  %vm3094_vm1 = vweird.f32 %v9709_v31  ;;  %v10588_v55 = vld [vmem:[#allocation63_spill] sm:$0xff] }
 0x6c7   : > { %4562 = vst.msk [vmem:[%s6486_s6 + $0xf8] sm:$0xff] %vm2310_vm11, %v4268_v21  ;;  %v3161_v25 = vmul.f32 %v3057_v11, %v10588_v55  ;;  %vm3085_vm2 = vweird.f32 %v9793_v3  ;;  %vm3096_vm4 = vmor %vm3094_vm1, %vm3095_vm15  ;;  %v3222_v51 = vadd.f32 %v9464_v42, %v3190_v15  ;;  %v3194_v43 = vmul.f32 %v9452_v5, %v3162_v10 }
 0x6c8   : > { %v4186_v27 = vpop.permute.xlu0 %4185  ;;  %v3083_v21 = vmul.f32 %v9793_v3, %v3082_v23  ;;  %v3111_v19 = vmul.f32 0.5, %v3110_v57  ;;  %v3122_v1 = vsub.f32 1.5, %v3121_v0  ;;  %vm3084_vm5 = vweird.f32 %v9730_v38 }
 0x6c9   : > { %v4267_v35 = vsel %vm274_vm0, %v3216_v50, %v4186_v27  ;;  %v3097_v50 = vsel %vm3096_vm4, %v9772_v44, %v3093_v22  ;;  %vm3086_vm6 = vmor %vm3084_vm5, %vm3085_vm2  ;;  %v3226_v16 = vadd.f32 %v9464_v42, %v3194_v43  ;;  %v3193_v2 = vmul.f32 %v9452_v5, %v3161_v25  ;;  %v10590_v27 = vld [vmem:[#allocation26_spill] sm:$0xff] }
 0x6ca   : > { %4561 = vst.msk [vmem:[%s6486_s6 + $0xf0] sm:$0xff] %vm2310_vm11, %v4267_v35  ;;  %v3165_v45 = vmul.f32 %v3097_v50, %v10589_v46  ;;  %v3087_v18 = vsel %vm3086_vm6, %v9793_v3, %v3083_v21  ;;  %v3112_v44 = vsub.f32 1.5, %v3111_v19  ;;  %v3123_v28 = vmul.f32 %v9820_v48, %v3122_v1 }
 0x6cb   : > { %vm3125_vm3 = vweird.f32 %v9820_v48  ;;  %vm3124_vm7 = vweird.f32 %v9764_v49  ;;  %v3164_v58 = vmul.f32 %v3087_v18, %v10590_v27  ;;  %v3225_v35 = vadd.f32 %v9464_v42, %v3193_v2 }
 0x6cc   : > { %vm3126_vm8 = vmor %vm3124_vm7, %vm3125_vm3  ;;  %v3197_v3 = vmul.f32 %v9452_v5, %v3165_v45  ;;  %v3113_v56 = vmul.f32 %v9840_v63, %v3112_v44  ;;  %vm3115_vm9 = vweird.f32 %v9840_v63  ;;  %vm3114_vm10 = vweird.f32 %v9790_v14  ;;  %v10592_v14 = vld [vmem:[#allocation13_spill] sm:$0xff] }
 0x6cd   : > { %v4194_v17 = vpop.permute.xlu1 %4193  ;;  %v3127_v53 = vsel %vm3126_vm8, %v9820_v48, %v3123_v28  ;;  %vm3116_vm12 = vmor %vm3114_vm10, %vm3115_vm9 }
 0x6ce   : > { %v4271_v4 = vsel %vm274_vm0, %v3220_v37, %v4194_v17  ;;  %v3168_v9 = vmul.f32 %v3127_v53, %v10591_v39  ;;  %v3229_v29 = vadd.f32 %v9464_v42, %v3197_v3  ;;  %v3196_v37 = vmul.f32 %v9452_v5, %v3164_v58 }
 0x6cf   : > { %4565 = vst.msk [vmem:[%s6486_s6 + $0x130] sm:$0xff] %vm2310_vm11, %v4271_v4  ;;  %v3117_v47 = vsel %vm3116_vm12, %v9840_v63, %v3113_v56 }
 0x6d0   : > { %v4192_v8 = vpop.permute.xlu0 %4191  ;;  %v3167_v59 = vmul.f32 %v3117_v47, %v10592_v14  ;;  %v3228_v17 = vadd.f32 %v9464_v42, %v3196_v37  ;;  %v3200_v4 = vmul.f32 %v9452_v5, %v3168_v9 }
 0x6d1   : > { %v4270_v26 = vsel %vm274_vm0, %v3219_v40, %v4192_v8 }
 0x6d2   : > { %4564 = vst.msk [vmem:[%s6486_s6 + $0x118] sm:$0xff] %vm2310_vm11, %v4270_v26  ;;  %v3232_v63 = vadd.f32 %v9464_v42, %v3200_v4  ;;  %v3199_v40 = vmul.f32 %v9452_v5, %v3167_v59 }
 0x6d4   : > { %v3231_v36 = vadd.f32 %v9464_v42, %v3199_v40 }
 0x6d6   : > { %v4200_v33 = vpop.permute.xlu1 %4199 }
 0x6d7   : > { %v4274_v20 = vsel %vm274_vm0, %v3223_v61, %v4200_v33 }
 0x6d8   : > { %4568 = vst.msk [vmem:[%s6486_s6 + $0x158] sm:$0xff] %vm2310_vm11, %v4274_v20  ;;  %v4198_v52 = vpop.permute.xlu0 %4197 }
 0x6d9   : > { %v4273_v31 = vsel %vm274_vm0, %v3222_v51, %v4198_v52 }
 0x6da   : > { %4567 = vst.msk [vmem:[%s6486_s6 + $0x150] sm:$0xff] %vm2310_vm11, %v4273_v31 }
 0x6de   : > { %v4206_v60 = vpop.permute.xlu1 %4205 }
 0x6df   : > { %v4277_v38 = vsel %vm274_vm0, %v3226_v16, %v4206_v60 }
 0x6e0   : > { %4571 = vst.msk [vmem:[%s6486_s6 + $0x190] sm:$0xff] %vm2310_vm11, %v4277_v38  ;;  %v4204_v6 = vpop.permute.xlu0 %4203 }
 0x6e1   : > { %v4276_v49 = vsel %vm274_vm0, %v3225_v35, %v4204_v6 }
 0x6e2   : > { %4570 = vst.msk [vmem:[%s6486_s6 + $0x178] sm:$0xff] %vm2310_vm11, %v4276_v49 }
 0x6e6   : > { %v4212_v62 = vpop.permute.xlu1 %4211 }
 0x6e7   : > { %v4280_v48 = vsel %vm274_vm0, %v3229_v29, %v4212_v62 }
 0x6e8   : > { %4574 = vst.msk [vmem:[%s6486_s6 + $0x1b8] sm:$0xff] %vm2310_vm11, %v4280_v48  ;;  %v4210_v30 = vpop.permute.xlu0 %4209 }
 0x6e9   : > { %v4279_v12 = vsel %vm274_vm0, %v3228_v17, %v4210_v30 }
 0x6ea   : > { %4573 = vst.msk [vmem:[%s6486_s6 + $0x1b0] sm:$0xff] %vm2310_vm11, %v4279_v12 }
 0x6ee   : > { %v4218_v41 = vpop.permute.xlu1 %4217 }
 0x6ef   : > { %v4283_v54 = vsel %vm274_vm0, %v3232_v63, %v4218_v41 }
 0x6f0   : > { %4577 = vst.msk [vmem:[%s6486_s6 + $0x1f0] sm:$0xff] %vm2310_vm11, %v4283_v54  ;;  %v4216_v24 = vpop.permute.xlu0 %4215 }
 0x6f1   : > { %v4282_v32 = vsel %vm274_vm0, %v3231_v36, %v4216_v24 }
 0x6f2   : > { %4576 = vst.msk [vmem:[%s6486_s6 + $0x1d8] sm:$0xff] %vm2310_vm11, %v4282_v32 }
 0x6f3   : > { %4967 = shalt.err (!%p4964_p3)
}
 0x6f4   : > { %s5006_s26 = smov 128   ;;  %s5007_s6 = smov 8  }
 0x6f5   : > { %4587 = dma.vmem_to_hbm [thread:$0]  (%p5076_p5), %s4333_s22, 8192, %s4335_s17, %s4319_s11, %s5006_s26, %s5006_s26, %s5007_s6  }
 0x6f6 PF: > { %p4593_p4 = scmp.ge.s32.totalorder %s5002_s21, 2  ;;  %s4349_s13 = sand.u32 1, %s4990_s18  }
 0x6f7   : > { %s4350_s23 = scalar_lea.sflag [#allocation3], %s4349_s13 }
 0x6f8   : > { %p4590_p7 = pnand %p4593_p4, %p5080_p6 }
 0x6fa   : > { %p4591_p8 = pneg %p4590_p7 }
 0x6fc   : > { %4985 = dma.done.wait (%p4591_p8), %s4350_s23, 8192  }
 0x6fd   : > { %4987 = vsyncadd (%p4591_p8), %s4350_s23, 4294959104  ;;  %p15_p9 = scmp.ge.s32.totalorder %s5063_s24, 4   ;;  %s10593_s18 = smov %s4994_s19 }
 0x6fe   : > { %s10594_s19 = smov %s4998_s20  ;;  %s10595_s20 = smov %s5074_s27 }
 0x6ff   : > { %s10596_s21 = smov %s5063_s24  ;;  %17 = sbr.rel (!%p15_p9) target bundleno = 3 (0x3), region = 82 }
 0x704   :  { %4356 = vsyncpa [#allocation3], 1 }
 0x705   :  { %4358 = vsyncpa [#allocation3 + $0x1], 1 }

</bundles_post_ra>
